<compile_context>
chip_gen: v6e
topology: v6e:2x2x1
jax: 0.10.0
libtpu: 0.0.40
codegen_flags: <defaults>
</compile_context>

<pallas_src>
import functools

import jax
import jax.numpy as jnp
from jax import lax
from jax.experimental import pallas as pl
from jax.experimental.pallas import tpu as pltpu

_MIN_VMEM_LIMIT = 32 * 1024 * 1024
_SQRT_2_OVER_PI = 0.7978845608028654
_INV_SQRT_2 = 0.7071067811865476


def _round_up(x, m):
    return ((x + m - 1) // m) * m


def _hw_info():
    """Best-effort trace-time hardware query with safe fallbacks."""
    vmem_cap = 128 * 1024 * 1024
    num_cores = 1
    kind = ""
    try:
        info = pltpu.get_tpu_info()
        cap = getattr(info, "vmem_capacity_bytes", None)
        if cap:
            vmem_cap = int(cap)
    except Exception:
        pass
    try:
        dev = jax.devices()[0]
        kind = str(getattr(dev, "device_kind", "")).lower()
        nc = getattr(dev, "num_cores", None)
        if isinstance(nc, int) and nc > 0:
            num_cores = nc
    except Exception:
        pass
    return vmem_cap, num_cores, kind


def _gelu_f32(h, approximate):
    # Always computed in f32 (v5e has no bf16 VPU/EUP).
    if approximate:
        # tanh form -> transcendental goes to the EUP slot (co-issues under MXU).
        c = jnp.float32(_SQRT_2_OVER_PI)
        return 0.5 * h * (1.0 + jnp.tanh(c * (h + jnp.float32(0.044715) * h * h * h)))
    # exact erf form, matching torch.nn.functional.gelu's default.
    return 0.5 * h * (1.0 + lax.erf(h * jnp.float32(_INV_SQRT_2)))


def _maybe_cast(a, dt):
    return a if dt is None or a.dtype == dt else a.astype(dt)


# --------------------------------------------------------------------------- #
# Kernels
# --------------------------------------------------------------------------- #
def _ffn_resident_kernel(x_ref, w1_ref, b1_ref, w2_ref, b2_ref, o_ref, *,
                         approximate_gelu, mxu_dtype):
    # x_ref : (tm, D)    w1_ref : (D, F)   b1_ref : (1, F)
    # w2_ref: (F, D)     b2_ref : (1, D)   o_ref  : (tm, D)
    # Weights/biases have constant index_maps -> DMA'd once, VMEM-resident.
    x = _maybe_cast(x_ref[...], mxu_dtype)
    w1 = _maybe_cast(w1_ref[...], mxu_dtype)
    h = jnp.dot(x, w1, preferred_element_type=jnp.float32)
    h = _gelu_f32(h + b1_ref[...].astype(jnp.float32), approximate_gelu)

    w2 = _maybe_cast(w2_ref[...], mxu_dtype)
    out = jnp.dot(h.astype(w2.dtype), w2, preferred_element_type=jnp.float32)
    o_ref[...] = (out + b2_ref[...].astype(jnp.float32)).astype(o_ref.dtype)


def _ffn_tiled_kernel(x_ref, w1_ref, b1_ref, w2_ref, b2_ref, o_ref, acc_ref, *,
                      approximate_gelu, mxu_dtype):
    # x_ref : (tm, D)    w1_ref : (D, tf)   b1_ref : (1, tf)
    # w2_ref: (tf, D)    b2_ref : (1, D)    o_ref  : (tm, D)
    # acc_ref: (tm, D) f32 scratch, persistent across the F (reduction) axis.
    f = pl.program_id(1)
    nf = pl.num_programs(1)

    @pl.when(f == 0)
    def _():
        acc_ref[...] = jnp.zeros_like(acc_ref)

    x = _maybe_cast(x_ref[...], mxu_dtype)
    w1 = _maybe_cast(w1_ref[...], mxu_dtype)
    h = jnp.dot(x, w1, preferred_element_type=jnp.float32)
    h = _gelu_f32(h + b1_ref[...].astype(jnp.float32), approximate_gelu)

    w2 = _maybe_cast(w2_ref[...], mxu_dtype)
    part = jnp.dot(h.astype(w2.dtype), w2, preferred_element_type=jnp.float32)

    @pl.when(f < nf - 1)
    def _():
        acc_ref[...] += part

    @pl.when(f == nf - 1)
    def _():
        # Final step: fold the last partial + bias directly into the output
        # (avoids an extra (tm, D) f32 store + reload of the accumulator).
        o_ref[...] = (acc_ref[...] + part + b2_ref[...].astype(jnp.float32)
                      ).astype(o_ref.dtype)


# --------------------------------------------------------------------------- #
# Wrapper
# --------------------------------------------------------------------------- #
@functools.partial(jax.jit, static_argnames=("tm", "tf", "approximate_gelu",
                                             "mxu_dtype", "residency"))
def feed_forward(x, w1, b1, w2, b2, *, tm=None, tf=None,
                 approximate_gelu=False, mxu_dtype=None, residency="auto"):
    """x: [batch, seq, d_model] -> [batch, seq, d_model].

    mxu_dtype: None -> matmuls run in the input dtype (bit-exact f32 path);
               "bfloat16" -> operands cast to bf16 in-kernel (f32 accumulate),
               recommended for performance on all TPU generations.
    residency: "auto" | "resident" | "tiled".
    """
    B, S, D = x.shape
    F = w1.shape[1]
    M = B * S

    mxu = jnp.dtype(mxu_dtype) if mxu_dtype is not None else None

    vmem_cap, num_cores, kind = _hw_info()
    # Leave headroom for Mosaic internal scratch / semaphores:
    # 128 MiB (v5e/v6e) -> 96 MiB budget; 64 MiB (v7x) -> 48 MiB budget.
    vmem_budget = max(min(int(vmem_cap * 0.75), vmem_cap - 16 * 1024 * 1024),
                      24 * 1024 * 1024)

    act_b = jnp.dtype(x.dtype).itemsize
    w_b = jnp.dtype(w1.dtype).itemsize
    # bf16 packs 16 sublanes per vreg -> round row tiles to 16 (fine for f32 too).
    row_align = 16

    # ------------------------------------------------------------------ #
    # Path selection: weights resident in VMEM vs. hidden-dim (F) tiling.
    # ------------------------------------------------------------------ #
    F_res = _round_up(F, 128)
    # x2: BlockSpec buffers are double-buffered (conservative accounting).
    weight_bytes = 2 * (D * F_res + F_res * D + F_res + D) * w_b

    def resident_footprint(tm_):
        return (weight_bytes
                + 2 * tm_ * D * act_b        # x tile (double buffered)
                + 2 * tm_ * D * act_b        # out tile (double buffered)
                + tm_ * F_res * 4            # f32 hidden intermediate
                + tm_ * D * 4)               # f32 output intermediate

    tm_res = min(_round_up(tm if tm else 512, row_align), _round_up(M, row_align))
    while resident_footprint(tm_res) > vmem_budget and tm_res > row_align:
        tm_res = max(row_align, _round_up(tm_res // 2, row_align))

    if residency == "resident":
        use_resident = True
    elif residency == "tiled":
        use_resident = False
    else:
        use_resident = resident_footprint(tm_res) <= vmem_budget

    b2_2d = b2.reshape(1, D)

    # ------------------------------------------------------------------ #
    # RESIDENT path: weights DMA'd once, 1-D grid over rows.
    # ------------------------------------------------------------------ #
    if use_resident:
        tm_eff = tm_res
        # Only multi-TC chips benefit from extra row tiles.
        if num_cores > 1:
            while (_round_up(M, tm_eff) // tm_eff < num_cores
                   and tm_eff >= 2 * row_align):
                tm_eff = max(row_align, _round_up(tm_eff // 2, row_align))
        M_pad = _round_up(M, tm_eff)
        F_pad = F_res

        x2d = x.reshape(M, D)
        if M_pad != M:
            x2d = jnp.pad(x2d, ((0, M_pad - M), (0, 0)))
        if F_pad != F:
            w1 = jnp.pad(w1, ((0, 0), (0, F_pad - F)))
            b1 = jnp.pad(b1, ((0, F_pad - F),))
            w2 = jnp.pad(w2, ((0, F_pad - F), (0, 0)))
        b1_2d = b1.reshape(1, F_pad)

        need = resident_footprint(tm_eff)
        vmem_limit = int(min(max(need * 5 // 4, _MIN_VMEM_LIMIT), vmem_budget))

        kernel = functools.partial(_ffn_resident_kernel,
                                   approximate_gelu=approximate_gelu,
                                   mxu_dtype=mxu)
        out2d = pl.pallas_call(
            kernel,
            out_shape=jax.ShapeDtypeStruct((M_pad, D), x.dtype),
            grid_spec=pltpu.PrefetchScalarGridSpec(
                num_scalar_prefetch=0,
                grid=(M_pad // tm_eff,),
                in_specs=[
                    pl.BlockSpec((tm_eff, D), lambda i: (i, 0)),   # x rows
                    pl.BlockSpec((D, F_pad), lambda i: (0, 0)),    # W1 (resident)
                    pl.BlockSpec((1, F_pad), lambda i: (0, 0)),    # b1 (resident)
                    pl.BlockSpec((F_pad, D), lambda i: (0, 0)),    # W2 (resident)
                    pl.BlockSpec((1, D), lambda i: (0, 0)),        # b2 (resident)
                ],
                out_specs=pl.BlockSpec((tm_eff, D), lambda i: (i, 0)),
            ),
            compiler_params=pltpu.CompilerParams(
                dimension_semantics=("parallel",),
                vmem_limit_bytes=vmem_limit,
            ),
        )(x2d, w1, b1_2d, w2, b2_2d)
        return out2d[:M].reshape(B, S, D)

    # ------------------------------------------------------------------ #
    # F-TILED path: weights too big to reside -> tile the hidden dim.
    # Generation-aware row tile pushes arithmetic intensity past the bf16
    # roofline crossover (v6e ~650 flops/B -> tm~1024; v5e ~240 / v7x ~310
    # -> tm~512), then shrink until the tile set fits the VMEM budget.
    # ------------------------------------------------------------------ #
    tm_pref = 1024 if "v6" in kind else 512
    tf_eff = min(_round_up(tf if tf else 512, 128), _round_up(F, 128))
    tm_eff = min(_round_up(tm if tm else tm_pref, row_align),
                 _round_up(M, row_align))

    def tiled_footprint(tm_, tf_):
        return (2 * tm_ * D * act_b               # x tile (double buffered)
                + 2 * tm_ * D * act_b             # out tile (double buffered)
                + 2 * (D * tf_ + tf_ * D) * w_b   # W1/W2 tiles (double buffered)
                + 2 * (tf_ + D) * w_b             # b1/b2 tiles
                + tm_ * D * 4                     # f32 accumulator scratch
                + tm_ * tf_ * 4)                  # f32 hidden intermediate

    while tiled_footprint(tm_eff, tf_eff) > vmem_budget and tm_eff > row_align:
        tm_eff = max(row_align, _round_up(tm_eff // 2, row_align))
    while tiled_footprint(tm_eff, tf_eff) > vmem_budget and tf_eff > 128:
        tf_eff = max(128, (tf_eff // 2) // 128 * 128)

    if num_cores > 1:
        while (_round_up(M, tm_eff) // tm_eff < num_cores
               and tm_eff >= 2 * row_align):
            tm_eff = max(row_align, _round_up(tm_eff // 2, row_align))

    M_pad = _round_up(M, tm_eff)
    F_pad = _round_up(F, tf_eff)

    x2d = x.reshape(M, D)
    if M_pad != M:
        x2d = jnp.pad(x2d, ((0, M_pad - M), (0, 0)))
    if F_pad != F:
        w1 = jnp.pad(w1, ((0, 0), (0, F_pad - F)))
        b1 = jnp.pad(b1, ((0, F_pad - F),))
        w2 = jnp.pad(w2, ((0, F_pad - F), (0, 0)))
    b1_2d = b1.reshape(1, F_pad)

    need = tiled_footprint(tm_eff, tf_eff)
    vmem_limit = int(min(max(need * 5 // 4, _MIN_VMEM_LIMIT), vmem_budget))

    kernel = functools.partial(_ffn_tiled_kernel,
                               approximate_gelu=approximate_gelu, mxu_dtype=mxu)
    out2d = pl.pallas_call(
        kernel,
        out_shape=jax.ShapeDtypeStruct((M_pad, D), x.dtype),
        grid_spec=pltpu.PrefetchScalarGridSpec(
            num_scalar_prefetch=0,
            grid=(M_pad // tm_eff, F_pad // tf_eff),
            in_specs=[
                pl.BlockSpec((tm_eff, D), lambda i, f: (i, 0)),   # x rows
                pl.BlockSpec((D, tf_eff), lambda i, f: (0, f)),   # W1 F-tile
                pl.BlockSpec((1, tf_eff), lambda i, f: (0, f)),   # b1 F-tile
                pl.BlockSpec((tf_eff, D), lambda i, f: (f, 0)),   # W2 F-tile
                pl.BlockSpec((1, D), lambda i, f: (0, 0)),        # b2
            ],
            out_specs=pl.BlockSpec((tm_eff, D), lambda i, f: (i, 0)),
            scratch_shapes=[pltpu.VMEM((tm_eff, D), jnp.float32)],
        ),
        compiler_params=pltpu.CompilerParams(
            dimension_semantics=("parallel", "arbitrary"),
            vmem_limit_bytes=vmem_limit,
        ),
    )(x2d, w1, b1_2d, w2, b2_2d)
    return out2d[:M].reshape(B, S, D)


def _reference(x, w1, b1, w2, b2):
    h = jnp.dot(x, w1) + b1
    h = 0.5 * h * (1.0 + lax.erf(h * jnp.float32(_INV_SQRT_2)))
    return jnp.dot(h, w2) + b2


if __name__ == "__main__":
    # Small config consistent with TransformerConfig: d_model=512, dff=2048.
    batch, seq, d_model, dff = 2, 8, 512, 2048

    key = jax.random.PRNGKey(0)
    kx, kw1, kb1, kw2, kb2 = jax.random.split(key, 5)

    x = jax.random.normal(kx, (batch, seq, d_model), dtype=jnp.float32)
    w1 = jax.random.normal(kw1, (d_model, dff), dtype=jnp.float32) * 0.02
    b1 = jax.random.normal(kb1, (dff,), dtype=jnp.float32) * 0.02
    w2 = jax.random.normal(kw2, (dff, d_model), dtype=jnp.float32) * 0.02
    b2 = jax.random.normal(kb2, (d_model,), dtype=jnp.float32) * 0.02

    ref = _reference(x, w1, b1, w2, b2)

    # 1) f32 exact path (auto -> weight-resident kernel), tight tolerance.
    out = jax.block_until_ready(feed_forward(x, w1, b1, w2, b2))
    assert out.shape == (batch, seq, d_model)
    assert jnp.allclose(out, ref, atol=1e-3, rtol=1e-3)

    # 2) Forced F-tiled path (exercises the reduction-grid kernel), f32 exact.
    out_t = jax.block_until_ready(
        feed_forward(x, w1, b1, w2, b2, tf=512, residency="tiled"))
    assert jnp.allclose(out_t, ref, atol=1e-3, rtol=1e-3)

    # 3) bf16-operand path (f32 accumulation / GELU inside), looser tolerance.
    out_bf = jax.block_until_ready(
        feed_forward(x.astype(jnp.bfloat16),
                     w1.astype(jnp.bfloat16), b1.astype(jnp.bfloat16),
                     w2.astype(jnp.bfloat16), b2.astype(jnp.bfloat16)))
    assert out_bf.shape == (batch, seq, d_model)
    assert jnp.allclose(out_bf.astype(jnp.float32), ref, atol=5e-2, rtol=5e-2)

    # 4) Perf-recommended path: f32 inputs, bf16 MXU operands (in-kernel cast).
    out_mx = jax.block_until_ready(
        feed_forward(x, w1, b1, w2, b2, mxu_dtype="bfloat16"))
    assert jnp.allclose(out_mx, ref, atol=5e-2, rtol=5e-2)

    print("KERNEL_OK")
</pallas_src>

<mosaic_0001>
module attributes {stable_mosaic.version = 11 : i64} {
  func.func @_ffn_resident_kernel(%arg0: i32, %arg1: memref<16x512xf32, #tpu.memory_space<vmem>>, %arg2: memref<512x2048xf32, #tpu.memory_space<vmem>>, %arg3: memref<1x2048xf32, #tpu.memory_space<vmem>>, %arg4: memref<2048x512xf32, #tpu.memory_space<vmem>>, %arg5: memref<1x512xf32, #tpu.memory_space<vmem>>, %arg6: memref<16x512xf32, #tpu.memory_space<vmem>>) attributes {dimension_semantics = [#tpu.dimension_semantics<parallel>], iteration_bounds = array<i64: 1>, scalar_prefetch = 0 : i64, scratch_operands = 0 : i64, tpu.core_type = #tpu.core_type<tc>, window_params = [{transform_indices = @transform_0, window_bounds = array<i64: 16, 512>}, {pipeline_mode = #tpu.pipeline_mode<synchronous>, transform_indices = @transform_1, window_bounds = array<i64: 512, 2048>}, {pipeline_mode = #tpu.pipeline_mode<synchronous>, transform_indices = @transform_2, window_bounds = array<i64: 1, 2048>}, {pipeline_mode = #tpu.pipeline_mode<synchronous>, transform_indices = @transform_3, window_bounds = array<i64: 2048, 512>}, {pipeline_mode = #tpu.pipeline_mode<synchronous>, transform_indices = @transform_4, window_bounds = array<i64: 1, 512>}, {transform_indices = @transform_5, window_bounds = array<i64: 16, 512>}]} {
    %c0 = arith.constant 0 : index
    %c0_0 = arith.constant 0 : index
    %0 = vector.load %arg1[%c0, %c0_0] : memref<16x512xf32, #tpu.memory_space<vmem>>, vector<16x512xf32>
    %c0_1 = arith.constant 0 : index
    %c0_2 = arith.constant 0 : index
    %1 = vector.load %arg2[%c0_1, %c0_2] : memref<512x2048xf32, #tpu.memory_space<vmem>>, vector<512x2048xf32>
    %cst = arith.constant dense<0.000000e+00> : vector<16x2048xf32>
    %2 = tpu.matmul %0, %1, %cst {dimension_numbers = #tpu.dot_dimension_numbers<[1], [0], [0], [1], [0, 0, 1, 1], [], []>} : vector<16x512xf32>, vector<512x2048xf32>, vector<16x2048xf32> -> vector<16x2048xf32>
    %c0_3 = arith.constant 0 : index
    %c0_4 = arith.constant 0 : index
    %3 = vector.load %arg3[%c0_3, %c0_4] : memref<1x2048xf32, #tpu.memory_space<vmem>>, vector<1x2048xf32>
    %4 = vector.broadcast %3 : vector<1x2048xf32> to vector<16x2048xf32>
    %5 = arith.addf %2, %4 : vector<16x2048xf32>
    %cst_5 = arith.constant 5.000000e-01 : f32
    %6 = vector.broadcast %cst_5 : f32 to vector<16x2048xf32>
    %7 = arith.mulf %6, %5 : vector<16x2048xf32>
    %cst_6 = arith.constant 0.707106769 : f32
    %8 = vector.broadcast %cst_6 : f32 to vector<16x2048xf32>
    %9 = arith.mulf %5, %8 : vector<16x2048xf32>
    %10 = math.erf %9 : vector<16x2048xf32>
    %cst_7 = arith.constant 1.000000e+00 : f32
    %11 = vector.broadcast %cst_7 : f32 to vector<16x2048xf32>
    %12 = arith.addf %11, %10 : vector<16x2048xf32>
    %13 = arith.mulf %7, %12 : vector<16x2048xf32>
    %c0_8 = arith.constant 0 : index
    %c0_9 = arith.constant 0 : index
    %14 = vector.load %arg4[%c0_8, %c0_9] : memref<2048x512xf32, #tpu.memory_space<vmem>>, vector<2048x512xf32>
    %cst_10 = arith.constant dense<0.000000e+00> : vector<16x512xf32>
    %15 = tpu.matmul %13, %14, %cst_10 {dimension_numbers = #tpu.dot_dimension_numbers<[1], [0], [0], [1], [0, 0, 1, 1], [], []>} : vector<16x2048xf32>, vector<2048x512xf32>, vector<16x512xf32> -> vector<16x512xf32>
    %c0_11 = arith.constant 0 : index
    %c0_12 = arith.constant 0 : index
    %16 = vector.load %arg5[%c0_11, %c0_12] : memref<1x512xf32, #tpu.memory_space<vmem>>, vector<1x512xf32>
    %17 = vector.broadcast %16 : vector<1x512xf32> to vector<16x512xf32>
    %18 = arith.addf %15, %17 : vector<16x512xf32>
    %c0_13 = arith.constant 0 : index
    %c0_14 = arith.constant 0 : index
    %19 = vector.load %arg6[%c0_13, %c0_14] : memref<16x512xf32, #tpu.memory_space<vmem>>, vector<16x512xf32>
    tpu.vector_store %arg6[%c0_13, %c0_14], %18 {strides = array<i32>} : memref<16x512xf32, #tpu.memory_space<vmem>>, vector<16x512xf32>,
    return
  }
  func.func @transform_0(%arg0: i32) -> (i32, i32) {
    %c0_i32 = arith.constant 0 : i32
    %c0_i32_0 = arith.constant 0 : i32
    return %arg0, %c0_i32 : i32, i32
  }
  func.func @transform_1(%arg0: i32) -> (i32, i32) {
    %c0_i32 = arith.constant 0 : i32
    %c0_i32_0 = arith.constant 0 : i32
    %c0_i32_1 = arith.constant 0 : i32
    return %c0_i32, %c0_i32_0 : i32, i32
  }
  func.func @transform_2(%arg0: i32) -> (i32, i32) {
    %c0_i32 = arith.constant 0 : i32
    %c0_i32_0 = arith.constant 0 : i32
    %c0_i32_1 = arith.constant 0 : i32
    return %c0_i32, %c0_i32_0 : i32, i32
  }
  func.func @transform_3(%arg0: i32) -> (i32, i32) {
    %c0_i32 = arith.constant 0 : i32
    %c0_i32_0 = arith.constant 0 : i32
    %c0_i32_1 = arith.constant 0 : i32
    return %c0_i32, %c0_i32_0 : i32, i32
  }
  func.func @transform_4(%arg0: i32) -> (i32, i32) {
    %c0_i32 = arith.constant 0 : i32
    %c0_i32_0 = arith.constant 0 : i32
    %c0_i32_1 = arith.constant 0 : i32
    return %c0_i32, %c0_i32_0 : i32, i32
  }
  func.func @transform_5(%arg0: i32) -> (i32, i32) {
    %c0_i32 = arith.constant 0 : i32
    %c0_i32_0 = arith.constant 0 : i32
    return %arg0, %c0_i32 : i32, i32
  }
}

</mosaic_0001>

<bundles_post_ra>
// kernel: feed_forward.1
= control target key start
LH: loop header
LB: loop body
LE: loop exit
PB: predicated region body
PF: predicated region fallthrough
CT: control target
= control target key end

     0   :  { %10 = vsyncpa [#allocation3], 0  ;;  %s5852_s0 = inlined_call_operand.hbm [shape: f32[16,512], index: 0, kind: input, shape index: {}]   ;;  %s5853_s1 = inlined_call_operand.hbm [shape: f32[512,2048], index: 1, kind: input, shape index: {}]   ;;  %s5854_s2 = inlined_call_operand.hbm [shape: f32[1,2048], index: 2, kind: input, shape index: {}]   ;;  %s5855_s3 = inlined_call_operand.hbm [shape: f32[2048,512], index: 3, kind: input, shape index: {}]   ;;  %s5856_s4 = inlined_call_operand.hbm [shape: f32[1,512], index: 4, kind: input, shape index: {}]   ;;  %s5857_s5 = inlined_call_operand.hbm [shape: f32[16,512], index: 5, kind: output, shape index: {}]  }
   0x1   :  { %11 = vsyncpa [#allocation6], 0 }
   0x2   :  { %12 = vsyncpa [#allocation9], 0 }
   0x3   :  { %13 = vsyncpa [#allocation4], 0  ;;  %s5128_s18 = smov [#allocation5]  }
   0x4   :  { %s31_s19 = sshll.u32 %s5128_s18, 4  ;;  %s32_s19 = int_to_ptr.vmem [resolvable:$true] %s31_s19 }
   0x5   :  { %s5008_s20 = scalar_lea.vmem %s32_s19, 131072  ;;  %p5013_p1 = scmp.lt.s32.totalorder %s32_s19, %s32_s19 }
   0x6   :  { %p5009_p0 = scmp.ne.s32.totalorder %s32_s19, %s5008_s20  ;;  %p5014_p2 = scmp.lt.s32.totalorder %s5008_s20, %s5008_s20 }
   0x8   :  { %p5015_p3 = por %p5014_p2, %p5013_p1 }
   0xa   :  { %p5016_p4 = pnand %p5015_p3, %p5009_p0 }
   0xc   :  { %5019 = shalt.err (!%p5016_p4)
}
   0xd   :  { %s5129_s21 = smov 2048   ;;  %s5130_s22 = smov 128  }
   0xe   :  { %37 = dma.hbm_to_vmem [thread:$0]  %s5853_s1, 131072, %s32_s19, [#allocation6], %s5129_s21, %s5129_s21, %s5130_s22  }
   0xf   :  { %s5131_s25 = smov [#allocation8]   ;;  %s5132_s27 = smov [#allocation2]  }
  0x10   :  { %s53_s26 = sshll.u32 %s5131_s25, 4  ;;  %s19_s28 = sshll.u32 %s5132_s27, 4  ;;  %s54_s26 = int_to_ptr.vmem [resolvable:$true] %s53_s26  ;;  %s20_s28 = int_to_ptr.vmem [resolvable:$true] %s19_s28 }
  0x11   :  { %s5028_s29 = scalar_lea.vmem %s54_s26, 131072  ;;  %p5033_p6 = scmp.lt.s32.totalorder %s54_s26, %s54_s26 }
  0x12   :  { %p5029_p5 = scmp.ne.s32.totalorder %s54_s26, %s5028_s29  ;;  %p5034_p7 = scmp.lt.s32.totalorder %s5028_s29, %s5028_s29 }
  0x14   :  { %p5035_p8 = por %p5034_p7, %p5033_p6 }
  0x16   :  { %p5036_p9 = pnand %p5035_p8, %p5029_p5 }
  0x18   :  { %5039 = shalt.err (!%p5036_p9)
}
  0x19   :  { %s5133_s30 = smov 512   ;;  %s5134_s6 = smov 32  }
  0x1a   :  { %59 = dma.hbm_to_vmem [thread:$0]  %s5855_s3, 131072, %s54_s26, [#allocation9], %s5133_s30, %s5133_s30, %s5134_s6  }
  0x1b   :  { %s5048_s1 = scalar_lea.vmem %s20_s28, 1024  ;;  %p5053_p11 = scmp.lt.s32.totalorder %s20_s28, %s20_s28 }
  0x1c   :  { %p5049_p10 = scmp.ne.s32.totalorder %s20_s28, %s5048_s1  ;;  %p5054_p12 = scmp.lt.s32.totalorder %s5048_s1, %s5048_s1 }
  0x1e   :  { %p5055_p13 = por %p5054_p12, %p5053_p11 }
  0x20   :  { %p5056_p0 = pnand %p5055_p13, %p5049_p10 }
  0x22   :  { %5059 = shalt.err (!%p5056_p0)
}
  0x23   :  { %25 = dma.hbm_to_vmem [thread:$0]  %s5852_s0, 1024, %s20_s28, [#allocation3], %s5133_s30, %s5133_s30, %s5134_s6  }
  0x24   :  { %s5135_s11 = smov [#allocation7]   ;;  %s5136_s13 = smov [#allocation10]  }
  0x25   :  { %s44_s12 = sshll.u32 %s5135_s11, 4  ;;  %s66_s3 = sshll.u32 %s5136_s13, 4  ;;  %s45_s12 = int_to_ptr.vmem [resolvable:$true] %s44_s12  ;;  %s67_s3 = int_to_ptr.vmem [resolvable:$true] %s66_s3 }
  0x26   :  { %s5068_s14 = scalar_lea.vmem %s45_s12, 256  ;;  %p5073_p2 = scmp.lt.s32.totalorder %s45_s12, %s45_s12 }
  0x27   :  { %p5069_p1 = scmp.ne.s32.totalorder %s45_s12, %s5068_s14  ;;  %p5074_p3 = scmp.lt.s32.totalorder %s5068_s14, %s5068_s14 }
  0x29   :  { %p5075_p4 = por %p5074_p3, %p5073_p2 }
  0x2b   :  { %p5076_p5 = pnand %p5075_p4, %p5069_p1 }
  0x2d   :  { %5079 = shalt.err (!%p5076_p5)
}
  0x2e   :  { %47 = dma.hbm_to_vmem [thread:$0]  %s5854_s2, 256, %s45_s12, [#allocation6]  }
  0x2f   :  { %s5088_s17 = scalar_lea.vmem %s67_s3, 64  ;;  %p5093_p7 = scmp.lt.s32.totalorder %s67_s3, %s67_s3 }
  0x30   :  { %p5089_p6 = scmp.ne.s32.totalorder %s67_s3, %s5088_s17  ;;  %p5094_p8 = scmp.lt.s32.totalorder %s5088_s17, %s5088_s17 }
  0x32   :  { %p5095_p9 = por %p5094_p8, %p5093_p7 }
  0x34   :  { %p5096_p10 = pnand %p5095_p9, %p5089_p6 }
  0x36   :  { %5099 = shalt.err (!%p5096_p10)
}
  0x37   :  { %69 = dma.hbm_to_vmem [thread:$0]  %s5856_s4, 64, %s67_s3, [#allocation9]  }
  0x38   :  { %5120 = dma.done.wait [#allocation3], 1024  }
  0x39   :  { %5121 = vsyncadd [#allocation3], 4294966272 }
  0x3a   :  { %5122 = dma.done.wait [#allocation6], 131328  }
  0x3b   :  { %5123 = vsyncadd [#allocation6], 4294835968 }
  0x3c   :  { %5124 = dma.done.wait [#allocation9], 131136  }
  0x3d   :  { %5125 = vsyncadd [#allocation9], 4294836160  ;;  %v334_v0 = vld [vmem:[#allocation5 + $0x788] sm:$0xff]  ;;  %v333_v2 = vld [vmem:[#allocation5 + $0x780] sm:$0xff]  ;;  %s5137_s2 = smov [#allocation11]  }
  0x3e   :  { %v846_v1 = vld [vmem:[#allocation5 + $0x1788] sm:$0xff]  ;;  %1201 = vmatprep.subr.mxu0 %v334_v0  ;;  %v845_v3 = vld [vmem:[#allocation5 + $0x1780] sm:$0xff]  ;;  %s4884_s4 = sshll.u32 %s5137_s2, 4  ;;  %s4885_s4 = int_to_ptr.vmem [resolvable:$true] %s4884_s4 }
  0x3f   :  { %1278 = vmatprep.subr.mxu1 %v846_v1  ;;  %v318_v4 = vld [vmem:[#allocation5 + $0x708] sm:$0xff]  ;;  %1202 = vmatpush1.msra.mxu0 %v333_v2  ;;  %v317_v6 = vld [vmem:[#allocation5 + $0x700] sm:$0xff]  ;;  %s5100_s19 = scalar_lea.vmem %s4885_s4, 1024  ;;  %p5105_p12 = scmp.lt.s32.totalorder %s4885_s4, %s4885_s4 }
  0x40   :  { %v830_v5 = vld [vmem:[#allocation5 + $0x1708] sm:$0xff]  ;;  %1279 = vmatpush1.msra.mxu1 %v845_v3  ;;  %v829_v7 = vld [vmem:[#allocation5 + $0x1700] sm:$0xff]  ;;  %1203 = vmatprep.subr.mxu0 %v318_v4  ;;  %p5101_p11 = scmp.ne.s32.totalorder %s4885_s4, %s5100_s19  ;;  %p5106_p13 = scmp.lt.s32.totalorder %s5100_s19, %s5100_s19 }
  0x41   :  { %v302_v8 = vld [vmem:[#allocation5 + $0x688] sm:$0xff]  ;;  %1280 = vmatprep.subr.mxu1 %v830_v5  ;;  %v301_v10 = vld [vmem:[#allocation5 + $0x680] sm:$0xff]  ;;  %1204 = vmatpush1.msra.mxu0 %v317_v6 }
  0x42   :  { %v814_v9 = vld [vmem:[#allocation5 + $0x1688] sm:$0xff]  ;;  %v813_v11 = vld [vmem:[#allocation5 + $0x1680] sm:$0xff]  ;;  %1281 = vmatpush1.msra.mxu1 %v829_v7  ;;  %1205 = vmatprep.subr.mxu0 %v302_v8  ;;  %p5107_p0 = por %p5106_p13, %p5105_p12 }
  0x43   :  { %v286_v12 = vld [vmem:[#allocation5 + $0x608] sm:$0xff]  ;;  %1282 = vmatprep.subr.mxu1 %v814_v9  ;;  %v285_v14 = vld [vmem:[#allocation5 + $0x600] sm:$0xff]  ;;  %1206 = vmatpush1.msra.mxu0 %v301_v10 }
  0x44   :  { %v798_v13 = vld [vmem:[#allocation5 + $0x1608] sm:$0xff]  ;;  %v797_v15 = vld [vmem:[#allocation5 + $0x1600] sm:$0xff]  ;;  %1283 = vmatpush1.msra.mxu1 %v813_v11  ;;  %1207 = vmatprep.subr.mxu0 %v286_v12  ;;  %p5108_p1 = pnand %p5107_p0, %p5101_p11 }
  0x45   :  { %v270_v16 = vld [vmem:[#allocation5 + $0x588] sm:$0xff]  ;;  %1284 = vmatprep.subr.mxu1 %v798_v13  ;;  %v269_v18 = vld [vmem:[#allocation5 + $0x580] sm:$0xff]  ;;  %1208 = vmatpush1.msra.mxu0 %v285_v14 }
  0x46   :  { %v782_v17 = vld [vmem:[#allocation5 + $0x1588] sm:$0xff]  ;;  %v781_v19 = vld [vmem:[#allocation5 + $0x1580] sm:$0xff]  ;;  %1285 = vmatpush1.msra.mxu1 %v797_v15  ;;  %1209 = vmatprep.subr.mxu0 %v270_v16 }
  0x47   :  { %v254_v20 = vld [vmem:[#allocation5 + $0x508] sm:$0xff]  ;;  %1286 = vmatprep.subr.mxu1 %v782_v17  ;;  %v253_v22 = vld [vmem:[#allocation5 + $0x500] sm:$0xff]  ;;  %1210 = vmatpush1.msra.mxu0 %v269_v18 }
  0x48   :  { %v766_v21 = vld [vmem:[#allocation5 + $0x1508] sm:$0xff]  ;;  %v765_v23 = vld [vmem:[#allocation5 + $0x1500] sm:$0xff]  ;;  %1287 = vmatpush1.msra.mxu1 %v781_v19  ;;  %1211 = vmatprep.subr.mxu0 %v254_v20 }
  0x49   :  { %v238_v24 = vld [vmem:[#allocation5 + $0x488] sm:$0xff]  ;;  %1288 = vmatprep.subr.mxu1 %v766_v21  ;;  %v237_v26 = vld [vmem:[#allocation5 + $0x480] sm:$0xff]  ;;  %1212 = vmatpush1.msra.mxu0 %v253_v22 }
  0x4a   :  { %v750_v25 = vld [vmem:[#allocation5 + $0x1488] sm:$0xff]  ;;  %v749_v27 = vld [vmem:[#allocation5 + $0x1480] sm:$0xff]  ;;  %1289 = vmatpush1.msra.mxu1 %v765_v23  ;;  %1213 = vmatprep.subr.mxu0 %v238_v24 }
  0x4b   :  { %v222_v28 = vld [vmem:[#allocation5 + $0x408] sm:$0xff]  ;;  %1290 = vmatprep.subr.mxu1 %v750_v25  ;;  %v221_v30 = vld [vmem:[#allocation5 + $0x400] sm:$0xff]  ;;  %1214 = vmatpush1.msra.mxu0 %v237_v26 }
  0x4c   :  { %v734_v29 = vld [vmem:[#allocation5 + $0x1408] sm:$0xff]  ;;  %v733_v31 = vld [vmem:[#allocation5 + $0x1400] sm:$0xff]  ;;  %1291 = vmatpush1.msra.mxu1 %v749_v27  ;;  %1215 = vmatprep.subr.mxu0 %v222_v28 }
  0x4d   :  { %v206_v32 = vld [vmem:[#allocation5 + $0x388] sm:$0xff]  ;;  %1292 = vmatprep.subr.mxu1 %v734_v29  ;;  %v205_v34 = vld [vmem:[#allocation5 + $0x380] sm:$0xff]  ;;  %1216 = vmatpush1.msra.mxu0 %v221_v30 }
  0x4e   :  { %v718_v33 = vld [vmem:[#allocation5 + $0x1388] sm:$0xff]  ;;  %v717_v35 = vld [vmem:[#allocation5 + $0x1380] sm:$0xff]  ;;  %1293 = vmatpush1.msra.mxu1 %v733_v31  ;;  %1217 = vmatprep.subr.mxu0 %v206_v32 }
  0x4f   :  { %v190_v36 = vld [vmem:[#allocation5 + $0x308] sm:$0xff]  ;;  %1294 = vmatprep.subr.mxu1 %v718_v33  ;;  %v189_v38 = vld [vmem:[#allocation5 + $0x300] sm:$0xff]  ;;  %1218 = vmatpush1.msra.mxu0 %v205_v34 }
  0x50   :  { %v702_v37 = vld [vmem:[#allocation5 + $0x1308] sm:$0xff]  ;;  %v701_v39 = vld [vmem:[#allocation5 + $0x1300] sm:$0xff]  ;;  %1295 = vmatpush1.msra.mxu1 %v717_v35  ;;  %1219 = vmatprep.subr.mxu0 %v190_v36 }
  0x51   :  { %v174_v40 = vld [vmem:[#allocation5 + $0x288] sm:$0xff]  ;;  %1296 = vmatprep.subr.mxu1 %v702_v37  ;;  %v173_v42 = vld [vmem:[#allocation5 + $0x280] sm:$0xff]  ;;  %1220 = vmatpush1.msra.mxu0 %v189_v38 }
  0x52   :  { %v686_v41 = vld [vmem:[#allocation5 + $0x1288] sm:$0xff]  ;;  %v685_v43 = vld [vmem:[#allocation5 + $0x1280] sm:$0xff]  ;;  %1297 = vmatpush1.msra.mxu1 %v701_v39  ;;  %1221 = vmatprep.subr.mxu0 %v174_v40 }
  0x53   :  { %v158_v44 = vld [vmem:[#allocation5 + $0x208] sm:$0xff]  ;;  %1298 = vmatprep.subr.mxu1 %v686_v41  ;;  %v157_v46 = vld [vmem:[#allocation5 + $0x200] sm:$0xff]  ;;  %1222 = vmatpush1.msra.mxu0 %v173_v42 }
  0x54   :  { %v670_v45 = vld [vmem:[#allocation5 + $0x1208] sm:$0xff]  ;;  %v669_v47 = vld [vmem:[#allocation5 + $0x1200] sm:$0xff]  ;;  %1299 = vmatpush1.msra.mxu1 %v685_v43  ;;  %1223 = vmatprep.subr.mxu0 %v158_v44 }
  0x55   :  { %v142_v48 = vld [vmem:[#allocation5 + $0x188] sm:$0xff]  ;;  %1300 = vmatprep.subr.mxu1 %v670_v45  ;;  %v141_v50 = vld [vmem:[#allocation5 + $0x180] sm:$0xff]  ;;  %1224 = vmatpush1.msra.mxu0 %v157_v46 }
  0x56   :  { %v654_v49 = vld [vmem:[#allocation5 + $0x1188] sm:$0xff]  ;;  %v653_v51 = vld [vmem:[#allocation5 + $0x1180] sm:$0xff]  ;;  %1301 = vmatpush1.msra.mxu1 %v669_v47  ;;  %1225 = vmatprep.subr.mxu0 %v142_v48 }
  0x57   :  { %v126_v52 = vld [vmem:[#allocation5 + $0x108] sm:$0xff]  ;;  %1302 = vmatprep.subr.mxu1 %v654_v49  ;;  %v125_v54 = vld [vmem:[#allocation5 + $0x100] sm:$0xff]  ;;  %1226 = vmatpush1.msra.mxu0 %v141_v50 }
  0x58   :  { %v638_v53 = vld [vmem:[#allocation5 + $0x1108] sm:$0xff]  ;;  %v637_v55 = vld [vmem:[#allocation5 + $0x1100] sm:$0xff]  ;;  %1303 = vmatpush1.msra.mxu1 %v653_v51  ;;  %1227 = vmatprep.subr.mxu0 %v126_v52 }
  0x59   :  { %v110_v56 = vld [vmem:[#allocation5 + $0x88] sm:$0xff]  ;;  %1304 = vmatprep.subr.mxu1 %v638_v53  ;;  %v109_v58 = vld [vmem:[#allocation5 + $0x80] sm:$0xff]  ;;  %1228 = vmatpush1.msra.mxu0 %v125_v54 }
  0x5a   :  { %v622_v57 = vld [vmem:[#allocation5 + $0x1088] sm:$0xff]  ;;  %v621_v59 = vld [vmem:[#allocation5 + $0x1080] sm:$0xff]  ;;  %1305 = vmatpush1.msra.mxu1 %v637_v55  ;;  %1229 = vmatprep.subr.mxu0 %v110_v56 }
  0x5b   :  { %v94_v60 = vld [vmem:[#allocation5 + $0x8] sm:$0xff]  ;;  %1306 = vmatprep.subr.mxu1 %v622_v57  ;;  %v93_v62 = vld [vmem:[#allocation5] sm:$0xff]  ;;  %1230 = vmatpush1.msra.mxu0 %v109_v58 }
  0x5c   :  { %v606_v61 = vld [vmem:[#allocation5 + $0x1008] sm:$0xff]  ;;  %v605_v63 = vld [vmem:[#allocation5 + $0x1000] sm:$0xff]  ;;  %1307 = vmatpush1.msra.mxu1 %v621_v59  ;;  %1231 = vmatprep.subr.mxu0 %v94_v60 }
  0x5d   :  { %v590_v0 = vld [vmem:[#allocation5 + $0xf88] sm:$0xff]  ;;  %1308 = vmatprep.subr.mxu1 %v606_v61  ;;  %v589_v2 = vld [vmem:[#allocation5 + $0xf80] sm:$0xff]  ;;  %1232 = vmatpush1.msra.mxu0 %v93_v62 }
  0x5e   :  { %v1102_v1 = vld [vmem:[#allocation5 + $0x1f88] sm:$0xff]  ;;  %v1101_v3 = vld [vmem:[#allocation5 + $0x1f80] sm:$0xff]  ;;  %1309 = vmatpush1.msra.mxu1 %v605_v63  ;;  %1233 = vmatprep.subr.mxu0 %v590_v0 }
  0x5f   :  { %v574_v4 = vld [vmem:[#allocation5 + $0xf08] sm:$0xff]  ;;  %1310 = vmatprep.subr.mxu1 %v1102_v1  ;;  %v573_v6 = vld [vmem:[#allocation5 + $0xf00] sm:$0xff]  ;;  %1234 = vmatpush2.msra.mxu0 %v589_v2  ;;  %v5193_v2 = vld [vmem:[#allocation2 + $0x18] sm:$0xff] }
  0x60   :  { %v1086_v5 = vld [vmem:[#allocation5 + $0x1f08] sm:$0xff]  ;;  %v1085_v7 = vld [vmem:[#allocation5 + $0x1f00] sm:$0xff]  ;;  %1311 = vmatpush2.msra.mxu1 %v1101_v3  ;;  %1235 = vmatprep.subr.mxu0 %v574_v4  ;;  %v336_v3 = vld [vmem:[#allocation5 + $0x798] sm:$0xff] }
  0x61   :  { %v558_v8 = vld [vmem:[#allocation5 + $0xe88] sm:$0xff]  ;;  %1312 = vmatprep.subr.mxu1 %v1086_v5  ;;  %v557_v10 = vld [vmem:[#allocation5 + $0xe80] sm:$0xff]  ;;  %1236 = vmatpush2.msra.mxu0 %v573_v6  ;;  %v848_v4 = vld [vmem:[#allocation5 + $0x1798] sm:$0xff] }
  0x62   :  { %v1070_v9 = vld [vmem:[#allocation5 + $0x1e88] sm:$0xff]  ;;  %v1069_v11 = vld [vmem:[#allocation5 + $0x1e80] sm:$0xff]  ;;  %1313 = vmatpush2.msra.mxu1 %v1085_v7  ;;  %1237 = vmatprep.subr.mxu0 %v558_v8  ;;  %v5196_v5 = vld [vmem:[#allocation2 + $0x10] sm:$0xff] }
  0x63   :  { %v542_v12 = vld [vmem:[#allocation5 + $0xe08] sm:$0xff]  ;;  %1314 = vmatprep.subr.mxu1 %v1070_v9  ;;  %v541_v14 = vld [vmem:[#allocation5 + $0xe00] sm:$0xff]  ;;  %1238 = vmatpush2.msra.mxu0 %v557_v10  ;;  %v335_v6 = vld [vmem:[#allocation5 + $0x790] sm:$0xff] }
  0x64   :  { %v1054_v13 = vld [vmem:[#allocation5 + $0x1e08] sm:$0xff]  ;;  %v1053_v15 = vld [vmem:[#allocation5 + $0x1e00] sm:$0xff]  ;;  %1315 = vmatpush2.msra.mxu1 %v1069_v11  ;;  %1239 = vmatprep.subr.mxu0 %v542_v12  ;;  %v847_v7 = vld [vmem:[#allocation5 + $0x1790] sm:$0xff] }
  0x65   :  { %v526_v16 = vld [vmem:[#allocation5 + $0xd88] sm:$0xff]  ;;  %1316 = vmatprep.subr.mxu1 %v1054_v13  ;;  %v525_v18 = vld [vmem:[#allocation5 + $0xd80] sm:$0xff]  ;;  %1240 = vmatpush2.msra.mxu0 %v541_v14  ;;  %v320_v8 = vld [vmem:[#allocation5 + $0x718] sm:$0xff] }
  0x66   :  { %v1038_v17 = vld [vmem:[#allocation5 + $0x1d88] sm:$0xff]  ;;  %v1037_v19 = vld [vmem:[#allocation5 + $0x1d80] sm:$0xff]  ;;  %1317 = vmatpush2.msra.mxu1 %v1053_v15  ;;  %1241 = vmatprep.subr.mxu0 %v526_v16  ;;  %v832_v9 = vld [vmem:[#allocation5 + $0x1718] sm:$0xff] }
  0x67   :  { %v510_v20 = vld [vmem:[#allocation5 + $0xd08] sm:$0xff]  ;;  %1318 = vmatprep.subr.mxu1 %v1038_v17  ;;  %v509_v22 = vld [vmem:[#allocation5 + $0xd00] sm:$0xff]  ;;  %1242 = vmatpush2.msra.mxu0 %v525_v18  ;;  %v319_v10 = vld [vmem:[#allocation5 + $0x710] sm:$0xff] }
  0x68   :  { %v1022_v21 = vld [vmem:[#allocation5 + $0x1d08] sm:$0xff]  ;;  %v1021_v23 = vld [vmem:[#allocation5 + $0x1d00] sm:$0xff]  ;;  %1319 = vmatpush2.msra.mxu1 %v1037_v19  ;;  %1243 = vmatprep.subr.mxu0 %v510_v20  ;;  %v831_v11 = vld [vmem:[#allocation5 + $0x1710] sm:$0xff] }
  0x69   :  { %v494_v24 = vld [vmem:[#allocation5 + $0xc88] sm:$0xff]  ;;  %1320 = vmatprep.subr.mxu1 %v1022_v21  ;;  %v493_v26 = vld [vmem:[#allocation5 + $0xc80] sm:$0xff]  ;;  %1244 = vmatpush2.msra.mxu0 %v509_v22  ;;  %v304_v12 = vld [vmem:[#allocation5 + $0x698] sm:$0xff] }
  0x6a   :  { %v1006_v25 = vld [vmem:[#allocation5 + $0x1c88] sm:$0xff]  ;;  %v1005_v27 = vld [vmem:[#allocation5 + $0x1c80] sm:$0xff]  ;;  %1321 = vmatpush2.msra.mxu1 %v1021_v23  ;;  %1245 = vmatprep.subr.mxu0 %v494_v24  ;;  %v816_v13 = vld [vmem:[#allocation5 + $0x1698] sm:$0xff] }
  0x6b   :  { %v478_v28 = vld [vmem:[#allocation5 + $0xc08] sm:$0xff]  ;;  %1322 = vmatprep.subr.mxu1 %v1006_v25  ;;  %v477_v30 = vld [vmem:[#allocation5 + $0xc00] sm:$0xff]  ;;  %1246 = vmatpush2.msra.mxu0 %v493_v26  ;;  %v303_v14 = vld [vmem:[#allocation5 + $0x690] sm:$0xff] }
  0x6c   :  { %v990_v29 = vld [vmem:[#allocation5 + $0x1c08] sm:$0xff]  ;;  %v989_v31 = vld [vmem:[#allocation5 + $0x1c00] sm:$0xff]  ;;  %1323 = vmatpush2.msra.mxu1 %v1005_v27  ;;  %1247 = vmatprep.subr.mxu0 %v478_v28  ;;  %v815_v15 = vld [vmem:[#allocation5 + $0x1690] sm:$0xff] }
  0x6d   :  { %v462_v32 = vld [vmem:[#allocation5 + $0xb88] sm:$0xff]  ;;  %1324 = vmatprep.subr.mxu1 %v990_v29  ;;  %v461_v34 = vld [vmem:[#allocation5 + $0xb80] sm:$0xff]  ;;  %1248 = vmatpush2.msra.mxu0 %v477_v30  ;;  %v288_v16 = vld [vmem:[#allocation5 + $0x618] sm:$0xff] }
  0x6e   :  { %v974_v33 = vld [vmem:[#allocation5 + $0x1b88] sm:$0xff]  ;;  %v973_v35 = vld [vmem:[#allocation5 + $0x1b80] sm:$0xff]  ;;  %1325 = vmatpush2.msra.mxu1 %v989_v31  ;;  %1249 = vmatprep.subr.mxu0 %v462_v32  ;;  %v800_v17 = vld [vmem:[#allocation5 + $0x1618] sm:$0xff] }
  0x6f   :  { %v446_v36 = vld [vmem:[#allocation5 + $0xb08] sm:$0xff]  ;;  %1326 = vmatprep.subr.mxu1 %v974_v33  ;;  %v445_v38 = vld [vmem:[#allocation5 + $0xb00] sm:$0xff]  ;;  %1250 = vmatpush2.msra.mxu0 %v461_v34  ;;  %v287_v18 = vld [vmem:[#allocation5 + $0x610] sm:$0xff] }
  0x70   :  { %v958_v37 = vld [vmem:[#allocation5 + $0x1b08] sm:$0xff]  ;;  %v957_v39 = vld [vmem:[#allocation5 + $0x1b00] sm:$0xff]  ;;  %1327 = vmatpush2.msra.mxu1 %v973_v35  ;;  %1251 = vmatprep.subr.mxu0 %v446_v36  ;;  %v799_v19 = vld [vmem:[#allocation5 + $0x1610] sm:$0xff] }
  0x71   :  { %v430_v40 = vld [vmem:[#allocation5 + $0xa88] sm:$0xff]  ;;  %1328 = vmatprep.subr.mxu1 %v958_v37  ;;  %v429_v42 = vld [vmem:[#allocation5 + $0xa80] sm:$0xff]  ;;  %1252 = vmatpush2.msra.mxu0 %v445_v38  ;;  %v272_v20 = vld [vmem:[#allocation5 + $0x598] sm:$0xff] }
  0x72   :  { %v942_v41 = vld [vmem:[#allocation5 + $0x1a88] sm:$0xff]  ;;  %v941_v43 = vld [vmem:[#allocation5 + $0x1a80] sm:$0xff]  ;;  %1329 = vmatpush2.msra.mxu1 %v957_v39  ;;  %1253 = vmatprep.subr.mxu0 %v430_v40  ;;  %v784_v21 = vld [vmem:[#allocation5 + $0x1598] sm:$0xff] }
  0x73   :  { %v414_v44 = vld [vmem:[#allocation5 + $0xa08] sm:$0xff]  ;;  %1330 = vmatprep.subr.mxu1 %v942_v41  ;;  %v413_v46 = vld [vmem:[#allocation5 + $0xa00] sm:$0xff]  ;;  %1254 = vmatpush2.msra.mxu0 %v429_v42  ;;  %v271_v22 = vld [vmem:[#allocation5 + $0x590] sm:$0xff] }
  0x74   :  { %v926_v45 = vld [vmem:[#allocation5 + $0x1a08] sm:$0xff]  ;;  %v925_v47 = vld [vmem:[#allocation5 + $0x1a00] sm:$0xff]  ;;  %1331 = vmatpush2.msra.mxu1 %v941_v43  ;;  %1255 = vmatprep.subr.mxu0 %v414_v44  ;;  %v783_v23 = vld [vmem:[#allocation5 + $0x1590] sm:$0xff] }
  0x75   :  { %v398_v48 = vld [vmem:[#allocation5 + $0x988] sm:$0xff]  ;;  %1332 = vmatprep.subr.mxu1 %v926_v45  ;;  %v397_v50 = vld [vmem:[#allocation5 + $0x980] sm:$0xff]  ;;  %1256 = vmatpush2.msra.mxu0 %v413_v46  ;;  %v256_v24 = vld [vmem:[#allocation5 + $0x518] sm:$0xff] }
  0x76   :  { %v910_v49 = vld [vmem:[#allocation5 + $0x1988] sm:$0xff]  ;;  %v909_v51 = vld [vmem:[#allocation5 + $0x1980] sm:$0xff]  ;;  %1333 = vmatpush2.msra.mxu1 %v925_v47  ;;  %1257 = vmatprep.subr.mxu0 %v398_v48  ;;  %v768_v25 = vld [vmem:[#allocation5 + $0x1518] sm:$0xff] }
  0x77   :  { %v382_v52 = vld [vmem:[#allocation5 + $0x908] sm:$0xff]  ;;  %1334 = vmatprep.subr.mxu1 %v910_v49  ;;  %v381_v54 = vld [vmem:[#allocation5 + $0x900] sm:$0xff]  ;;  %1258 = vmatpush2.msra.mxu0 %v397_v50  ;;  %v255_v26 = vld [vmem:[#allocation5 + $0x510] sm:$0xff] }
  0x78   :  { %v894_v53 = vld [vmem:[#allocation5 + $0x1908] sm:$0xff]  ;;  %v893_v55 = vld [vmem:[#allocation5 + $0x1900] sm:$0xff]  ;;  %1335 = vmatpush2.msra.mxu1 %v909_v51  ;;  %1259 = vmatprep.subr.mxu0 %v382_v52  ;;  %v767_v27 = vld [vmem:[#allocation5 + $0x1510] sm:$0xff] }
  0x79   :  { %v366_v56 = vld [vmem:[#allocation5 + $0x888] sm:$0xff]  ;;  %1336 = vmatprep.subr.mxu1 %v894_v53  ;;  %v365_v58 = vld [vmem:[#allocation5 + $0x880] sm:$0xff]  ;;  %1260 = vmatpush2.msra.mxu0 %v381_v54  ;;  %v240_v28 = vld [vmem:[#allocation5 + $0x498] sm:$0xff] }
  0x7a   :  { %v878_v57 = vld [vmem:[#allocation5 + $0x1888] sm:$0xff]  ;;  %v877_v59 = vld [vmem:[#allocation5 + $0x1880] sm:$0xff]  ;;  %1337 = vmatpush2.msra.mxu1 %v893_v55  ;;  %1261 = vmatprep.subr.mxu0 %v366_v56  ;;  %v752_v29 = vld [vmem:[#allocation5 + $0x1498] sm:$0xff] }
  0x7b   :  { %v350_v60 = vld [vmem:[#allocation5 + $0x808] sm:$0xff]  ;;  %1338 = vmatprep.subr.mxu1 %v878_v57  ;;  %v349_v62 = vld [vmem:[#allocation5 + $0x800] sm:$0xff]  ;;  %1262 = vmatpush2.msra.mxu0 %v365_v58  ;;  %v239_v30 = vld [vmem:[#allocation5 + $0x490] sm:$0xff] }
  0x7c   :  { %v862_v61 = vld [vmem:[#allocation5 + $0x1808] sm:$0xff]  ;;  %1339 = vmatpush2.msra.mxu1 %v877_v59  ;;  %v861_v0 = vld [vmem:[#allocation5 + $0x1800] sm:$0xff]  ;;  %1263 = vmatprep.subr.mxu0 %v350_v60  ;;  %v751_v31 = vld [vmem:[#allocation5 + $0x1490] sm:$0xff] }
  0x7d   :  { %v5189_v63 = vld [vmem:[#allocation2 + $0x8] sm:$0xff]  ;;  %v5191_v1 = vld [vmem:[#allocation2] sm:$0xff]  ;;  %1340 = vmatprep.subr.mxu1 %v862_v61  ;;  %1264 = vmatpush2.msra.mxu0 %v349_v62  ;;  %v224_v32 = vld [vmem:[#allocation5 + $0x418] sm:$0xff] }
  0x7e   :  { %1265 = vmatprep.mubr.f32.mxu0 %v5189_v63  ;;  %1341 = vmatpush2.msra.mxu1 %v861_v0  ;;  %v736_v33 = vld [vmem:[#allocation5 + $0x1418] sm:$0xff]  ;;  %v223_v34 = vld [vmem:[#allocation5 + $0x410] sm:$0xff] }
  0x7f   :  { %1266 = vmatmul.mubr.f32.vlgmr.msra.gmra.mxu0 %v5191_v1  ;;  %1342 = vmatprep.mubr.f32.mxu1 %v5193_v2  ;;  %v735_v35 = vld [vmem:[#allocation5 + $0x1410] sm:$0xff]  ;;  %v208_v36 = vld [vmem:[#allocation5 + $0x398] sm:$0xff] }
  0x80   :  { %1355 = vmatprep.subr.mxu0 %v336_v3  ;;  %1432 = vmatprep.subr.mxu1 %v848_v4  ;;  %v720_v37 = vld [vmem:[#allocation5 + $0x1398] sm:$0xff]  ;;  %v207_v38 = vld [vmem:[#allocation5 + $0x390] sm:$0xff] }
  0x81   :  { %1343 = vmatmul.mubr.f32.vlgmr.msra.gmra.mxu1 %v5196_v5  ;;  %1356 = vmatpush1.msra.mxu0 %v335_v6  ;;  %v719_v39 = vld [vmem:[#allocation5 + $0x1390] sm:$0xff]  ;;  %v192_v40 = vld [vmem:[#allocation5 + $0x318] sm:$0xff] }
  0x82   :  { %1433 = vmatpush1.msra.mxu1 %v847_v7  ;;  %1357 = vmatprep.subr.mxu0 %v320_v8  ;;  %v704_v41 = vld [vmem:[#allocation5 + $0x1318] sm:$0xff]  ;;  %v191_v42 = vld [vmem:[#allocation5 + $0x310] sm:$0xff] }
  0x83   :  { %1434 = vmatprep.subr.mxu1 %v832_v9  ;;  %1358 = vmatpush1.msra.mxu0 %v319_v10  ;;  %v703_v43 = vld [vmem:[#allocation5 + $0x1310] sm:$0xff]  ;;  %v176_v44 = vld [vmem:[#allocation5 + $0x298] sm:$0xff] }
  0x84   :  { %1435 = vmatpush1.msra.mxu1 %v831_v11  ;;  %1359 = vmatprep.subr.mxu0 %v304_v12  ;;  %v688_v45 = vld [vmem:[#allocation5 + $0x1298] sm:$0xff]  ;;  %v175_v46 = vld [vmem:[#allocation5 + $0x290] sm:$0xff] }
  0x85   :  { %1436 = vmatprep.subr.mxu1 %v816_v13  ;;  %1360 = vmatpush1.msra.mxu0 %v303_v14  ;;  %v687_v47 = vld [vmem:[#allocation5 + $0x1290] sm:$0xff]  ;;  %v160_v48 = vld [vmem:[#allocation5 + $0x218] sm:$0xff] }
  0x86   :  { %1437 = vmatpush1.msra.mxu1 %v815_v15  ;;  %1361 = vmatprep.subr.mxu0 %v288_v16  ;;  %v672_v49 = vld [vmem:[#allocation5 + $0x1218] sm:$0xff]  ;;  %v159_v50 = vld [vmem:[#allocation5 + $0x210] sm:$0xff] }
  0x87   :  { %1438 = vmatprep.subr.mxu1 %v800_v17  ;;  %1362 = vmatpush1.msra.mxu0 %v287_v18  ;;  %v671_v51 = vld [vmem:[#allocation5 + $0x1210] sm:$0xff]  ;;  %v144_v52 = vld [vmem:[#allocation5 + $0x198] sm:$0xff] }
  0x88   :  { %1439 = vmatpush1.msra.mxu1 %v799_v19  ;;  %1363 = vmatprep.subr.mxu0 %v272_v20  ;;  %v656_v53 = vld [vmem:[#allocation5 + $0x1198] sm:$0xff]  ;;  %v143_v54 = vld [vmem:[#allocation5 + $0x190] sm:$0xff] }
  0x89   :  { %1440 = vmatprep.subr.mxu1 %v784_v21  ;;  %1364 = vmatpush1.msra.mxu0 %v271_v22  ;;  %v655_v55 = vld [vmem:[#allocation5 + $0x1190] sm:$0xff]  ;;  %v128_v56 = vld [vmem:[#allocation5 + $0x118] sm:$0xff] }
  0x8a   :  { %1441 = vmatpush1.msra.mxu1 %v783_v23  ;;  %1365 = vmatprep.subr.mxu0 %v256_v24  ;;  %v640_v57 = vld [vmem:[#allocation5 + $0x1118] sm:$0xff]  ;;  %v127_v58 = vld [vmem:[#allocation5 + $0x110] sm:$0xff] }
  0x8b   :  { %1442 = vmatprep.subr.mxu1 %v768_v25  ;;  %1366 = vmatpush1.msra.mxu0 %v255_v26  ;;  %v639_v59 = vld [vmem:[#allocation5 + $0x1110] sm:$0xff]  ;;  %v112_v60 = vld [vmem:[#allocation5 + $0x98] sm:$0xff] }
  0x8c   :  { %1443 = vmatpush1.msra.mxu1 %v767_v27  ;;  %1367 = vmatprep.subr.mxu0 %v240_v28  ;;  %v624_v61 = vld [vmem:[#allocation5 + $0x1098] sm:$0xff]  ;;  %v111_v62 = vld [vmem:[#allocation5 + $0x90] sm:$0xff]  ;;  %v5201_v28 = vld [vmem:[#allocation2 + $0x28] sm:$0xff] }
  0x8d   :  { %1444 = vmatprep.subr.mxu1 %v752_v29  ;;  %1368 = vmatpush1.msra.mxu0 %v239_v30  ;;  %v623_v0 = vld [vmem:[#allocation5 + $0x1090] sm:$0xff]  ;;  %v96_v3 = vld [vmem:[#allocation5 + $0x18] sm:$0xff] }
  0x8e   :  { %1445 = vmatpush1.msra.mxu1 %v751_v31  ;;  %1369 = vmatprep.subr.mxu0 %v224_v32  ;;  %v608_v4 = vld [vmem:[#allocation5 + $0x1018] sm:$0xff]  ;;  %v95_v6 = vld [vmem:[#allocation5 + $0x10] sm:$0xff]  ;;  %v5203_v31 = vld [vmem:[#allocation2 + $0x20] sm:$0xff] }
  0x8f   :  { %1446 = vmatprep.subr.mxu1 %v736_v33  ;;  %1370 = vmatpush1.msra.mxu0 %v223_v34  ;;  %v607_v7 = vld [vmem:[#allocation5 + $0x1010] sm:$0xff]  ;;  %v592_v8 = vld [vmem:[#allocation5 + $0xf98] sm:$0xff] }
  0x90   :  { %1447 = vmatpush1.msra.mxu1 %v735_v35  ;;  %1371 = vmatprep.subr.mxu0 %v208_v36  ;;  %v1104_v9 = vld [vmem:[#allocation5 + $0x1f98] sm:$0xff]  ;;  %v591_v10 = vld [vmem:[#allocation5 + $0xf90] sm:$0xff] }
  0x91   :  { %1448 = vmatprep.subr.mxu1 %v720_v37  ;;  %1372 = vmatpush1.msra.mxu0 %v207_v38  ;;  %v1103_v11 = vld [vmem:[#allocation5 + $0x1f90] sm:$0xff]  ;;  %v576_v12 = vld [vmem:[#allocation5 + $0xf18] sm:$0xff] }
  0x92   :  { %1449 = vmatpush1.msra.mxu1 %v719_v39  ;;  %1373 = vmatprep.subr.mxu0 %v192_v40  ;;  %v1088_v13 = vld [vmem:[#allocation5 + $0x1f18] sm:$0xff]  ;;  %v575_v14 = vld [vmem:[#allocation5 + $0xf10] sm:$0xff] }
  0x93   :  { %1450 = vmatprep.subr.mxu1 %v704_v41  ;;  %1374 = vmatpush1.msra.mxu0 %v191_v42  ;;  %v1087_v15 = vld [vmem:[#allocation5 + $0x1f10] sm:$0xff]  ;;  %v560_v16 = vld [vmem:[#allocation5 + $0xe98] sm:$0xff] }
  0x94   :  { %1451 = vmatpush1.msra.mxu1 %v703_v43  ;;  %1375 = vmatprep.subr.mxu0 %v176_v44  ;;  %v1072_v17 = vld [vmem:[#allocation5 + $0x1e98] sm:$0xff]  ;;  %v559_v18 = vld [vmem:[#allocation5 + $0xe90] sm:$0xff] }
  0x95   :  { %1452 = vmatprep.subr.mxu1 %v688_v45  ;;  %1376 = vmatpush1.msra.mxu0 %v175_v46  ;;  %v1071_v19 = vld [vmem:[#allocation5 + $0x1e90] sm:$0xff]  ;;  %v544_v20 = vld [vmem:[#allocation5 + $0xe18] sm:$0xff] }
  0x96   :  { %1453 = vmatpush1.msra.mxu1 %v687_v47  ;;  %1377 = vmatprep.subr.mxu0 %v160_v48  ;;  %v1056_v21 = vld [vmem:[#allocation5 + $0x1e18] sm:$0xff]  ;;  %v543_v22 = vld [vmem:[#allocation5 + $0xe10] sm:$0xff] }
  0x97   :  { %1454 = vmatprep.subr.mxu1 %v672_v49  ;;  %1378 = vmatpush1.msra.mxu0 %v159_v50  ;;  %v1055_v23 = vld [vmem:[#allocation5 + $0x1e10] sm:$0xff]  ;;  %v528_v24 = vld [vmem:[#allocation5 + $0xd98] sm:$0xff] }
  0x98   :  { %1455 = vmatpush1.msra.mxu1 %v671_v51  ;;  %1379 = vmatprep.subr.mxu0 %v144_v52  ;;  %v1040_v25 = vld [vmem:[#allocation5 + $0x1d98] sm:$0xff]  ;;  %v527_v26 = vld [vmem:[#allocation5 + $0xd90] sm:$0xff] }
  0x99   :  { %1456 = vmatprep.subr.mxu1 %v656_v53  ;;  %1380 = vmatpush1.msra.mxu0 %v143_v54  ;;  %v1039_v27 = vld [vmem:[#allocation5 + $0x1d90] sm:$0xff]  ;;  %v512_v29 = vld [vmem:[#allocation5 + $0xd18] sm:$0xff] }
  0x9a   :  { %1457 = vmatpush1.msra.mxu1 %v655_v55  ;;  %1381 = vmatprep.subr.mxu0 %v128_v56  ;;  %v1024_v30 = vld [vmem:[#allocation5 + $0x1d18] sm:$0xff]  ;;  %v511_v32 = vld [vmem:[#allocation5 + $0xd10] sm:$0xff] }
  0x9b   :  { %1458 = vmatprep.subr.mxu1 %v640_v57  ;;  %1382 = vmatpush1.msra.mxu0 %v127_v58  ;;  %v1023_v33 = vld [vmem:[#allocation5 + $0x1d10] sm:$0xff]  ;;  %v5206_v34 = vld [vmem:[#allocation2 + $0x38] sm:$0xff] }
  0x9c   :  { %1459 = vmatpush1.msra.mxu1 %v639_v59  ;;  %1383 = vmatprep.subr.mxu0 %v112_v60  ;;  %v496_v35 = vld [vmem:[#allocation5 + $0xc98] sm:$0xff]  ;;  %v5209_v37 = vld [vmem:[#allocation2 + $0x30] sm:$0xff] }
  0x9d   :  { %1460 = vmatprep.subr.mxu1 %v624_v61  ;;  %1384 = vmatpush1.msra.mxu0 %v111_v62  ;;  %v1008_v36 = vld [vmem:[#allocation5 + $0x1c98] sm:$0xff]  ;;  %v495_v38 = vld [vmem:[#allocation5 + $0xc90] sm:$0xff] }
  0x9e   :  { %1461 = vmatpush1.msra.mxu1 %v623_v0  ;;  %1385 = vmatprep.subr.mxu0 %v96_v3  ;;  %v1007_v39 = vld [vmem:[#allocation5 + $0x1c90] sm:$0xff]  ;;  %v480_v40 = vld [vmem:[#allocation5 + $0xc18] sm:$0xff] }
  0x9f   :  { %1462 = vmatprep.subr.mxu1 %v608_v4  ;;  %1386 = vmatpush1.msra.mxu0 %v95_v6  ;;  %v992_v41 = vld [vmem:[#allocation5 + $0x1c18] sm:$0xff]  ;;  %v479_v42 = vld [vmem:[#allocation5 + $0xc10] sm:$0xff] }
  0xa0   :  { %1463 = vmatpush1.msra.mxu1 %v607_v7  ;;  %1387 = vmatprep.subr.mxu0 %v592_v8  ;;  %v991_v43 = vld [vmem:[#allocation5 + $0x1c10] sm:$0xff]  ;;  %v464_v44 = vld [vmem:[#allocation5 + $0xb98] sm:$0xff] }
  0xa1   :  { %1464 = vmatprep.subr.mxu1 %v1104_v9  ;;  %1388 = vmatpush2.msra.mxu0 %v591_v10  ;;  %v976_v45 = vld [vmem:[#allocation5 + $0x1b98] sm:$0xff]  ;;  %v463_v46 = vld [vmem:[#allocation5 + $0xb90] sm:$0xff] }
  0xa2   :  { %1465 = vmatpush2.msra.mxu1 %v1103_v11  ;;  %1389 = vmatprep.subr.mxu0 %v576_v12  ;;  %v975_v47 = vld [vmem:[#allocation5 + $0x1b90] sm:$0xff]  ;;  %v448_v48 = vld [vmem:[#allocation5 + $0xb18] sm:$0xff] }
  0xa3   :  { %1466 = vmatprep.subr.mxu1 %v1088_v13  ;;  %1390 = vmatpush2.msra.mxu0 %v575_v14  ;;  %v960_v49 = vld [vmem:[#allocation5 + $0x1b18] sm:$0xff]  ;;  %v447_v50 = vld [vmem:[#allocation5 + $0xb10] sm:$0xff] }
  0xa4   :  { %1467 = vmatpush2.msra.mxu1 %v1087_v15  ;;  %1391 = vmatprep.subr.mxu0 %v560_v16  ;;  %v959_v51 = vld [vmem:[#allocation5 + $0x1b10] sm:$0xff]  ;;  %v432_v52 = vld [vmem:[#allocation5 + $0xa98] sm:$0xff]  ;;  %v338_v16 = vld [vmem:[#allocation5 + $0x7a8] sm:$0xff] }
  0xa5   :  { %1468 = vmatprep.subr.mxu1 %v1072_v17  ;;  %1392 = vmatpush2.msra.mxu0 %v559_v18  ;;  %v944_v53 = vld [vmem:[#allocation5 + $0x1a98] sm:$0xff]  ;;  %v431_v54 = vld [vmem:[#allocation5 + $0xa90] sm:$0xff]  ;;  %v850_v17 = vld [vmem:[#allocation5 + $0x17a8] sm:$0xff] }
  0xa6   :  { %1469 = vmatpush2.msra.mxu1 %v1071_v19  ;;  %1393 = vmatprep.subr.mxu0 %v544_v20  ;;  %v943_v55 = vld [vmem:[#allocation5 + $0x1a90] sm:$0xff]  ;;  %v416_v56 = vld [vmem:[#allocation5 + $0xa18] sm:$0xff]  ;;  %v337_v18 = vld [vmem:[#allocation5 + $0x7a0] sm:$0xff] }
  0xa7   :  { %1470 = vmatprep.subr.mxu1 %v1056_v21  ;;  %1394 = vmatpush2.msra.mxu0 %v543_v22  ;;  %v928_v57 = vld [vmem:[#allocation5 + $0x1a18] sm:$0xff]  ;;  %v415_v58 = vld [vmem:[#allocation5 + $0xa10] sm:$0xff]  ;;  %v849_v19 = vld [vmem:[#allocation5 + $0x17a0] sm:$0xff] }
  0xa8   :  { %1471 = vmatpush2.msra.mxu1 %v1055_v23  ;;  %1395 = vmatprep.subr.mxu0 %v528_v24  ;;  %v927_v59 = vld [vmem:[#allocation5 + $0x1a10] sm:$0xff]  ;;  %v400_v60 = vld [vmem:[#allocation5 + $0x998] sm:$0xff]  ;;  %v322_v20 = vld [vmem:[#allocation5 + $0x728] sm:$0xff] }
  0xa9   :  { %1472 = vmatprep.subr.mxu1 %v1040_v25  ;;  %1396 = vmatpush2.msra.mxu0 %v527_v26  ;;  %v912_v61 = vld [vmem:[#allocation5 + $0x1998] sm:$0xff]  ;;  %v399_v62 = vld [vmem:[#allocation5 + $0x990] sm:$0xff]  ;;  %v834_v21 = vld [vmem:[#allocation5 + $0x1728] sm:$0xff] }
  0xaa   :  { %1473 = vmatpush2.msra.mxu1 %v1039_v27  ;;  %1271 = vmatprep.mubr.f32.mxu0 %v5201_v28  ;;  %v911_v0 = vld [vmem:[#allocation5 + $0x1990] sm:$0xff]  ;;  %v384_v3 = vld [vmem:[#allocation5 + $0x918] sm:$0xff]  ;;  %v321_v22 = vld [vmem:[#allocation5 + $0x720] sm:$0xff] }
  0xab   :  { %1397 = vmatprep.subr.mxu0 %v512_v29  ;;  %1474 = vmatprep.subr.mxu1 %v1024_v30  ;;  %v896_v4 = vld [vmem:[#allocation5 + $0x1918] sm:$0xff]  ;;  %v383_v6 = vld [vmem:[#allocation5 + $0x910] sm:$0xff]  ;;  %v833_v23 = vld [vmem:[#allocation5 + $0x1720] sm:$0xff] }
  0xac   :  { %1272 = vmatmul.mubr.f32.gmra.mxu0 %v5203_v31  ;;  %1475 = vmatpush2.msra.mxu1 %v1023_v33  ;;  %v895_v7 = vld [vmem:[#allocation5 + $0x1910] sm:$0xff]  ;;  %v368_v8 = vld [vmem:[#allocation5 + $0x898] sm:$0xff]  ;;  %v306_v24 = vld [vmem:[#allocation5 + $0x6a8] sm:$0xff] }
  0xad   :  { %1398 = vmatpush2.msra.mxu0 %v511_v32  ;;  %1348 = vmatprep.mubr.f32.mxu1 %v5206_v34  ;;  %v880_v9 = vld [vmem:[#allocation5 + $0x1898] sm:$0xff]  ;;  %v367_v10 = vld [vmem:[#allocation5 + $0x890] sm:$0xff]  ;;  %v305_v25 = vld [vmem:[#allocation5 + $0x6a0] sm:$0xff] }
  0xae   :  { %1399 = vmatprep.subr.mxu0 %v496_v35  ;;  %1476 = vmatprep.subr.mxu1 %v1008_v36  ;;  %v879_v11 = vld [vmem:[#allocation5 + $0x1890] sm:$0xff]  ;;  %v352_v12 = vld [vmem:[#allocation5 + $0x818] sm:$0xff]  ;;  %v290_v26 = vld [vmem:[#allocation5 + $0x628] sm:$0xff] }
  0xaf   :  { %1349 = vmatmul.mubr.f32.gmra.mxu1 %v5209_v37  ;;  %1400 = vmatpush2.msra.mxu0 %v495_v38  ;;  %v864_v13 = vld [vmem:[#allocation5 + $0x1818] sm:$0xff]  ;;  %v351_v14 = vld [vmem:[#allocation5 + $0x810] sm:$0xff]  ;;  %v289_v27 = vld [vmem:[#allocation5 + $0x620] sm:$0xff] }
  0xb0   :  { %1477 = vmatpush2.msra.mxu1 %v1007_v39  ;;  %1401 = vmatprep.subr.mxu0 %v480_v40  ;;  %v863_v15 = vld [vmem:[#allocation5 + $0x1810] sm:$0xff]  ;;  %v801_v29 = vld [vmem:[#allocation5 + $0x1620] sm:$0xff]  ;;  %v786_v30 = vld [vmem:[#allocation5 + $0x15a8] sm:$0xff] }
  0xb1   :  { %1478 = vmatprep.subr.mxu1 %v992_v41  ;;  %1402 = vmatpush2.msra.mxu0 %v479_v42  ;;  %v273_v32 = vld [vmem:[#allocation5 + $0x5a0] sm:$0xff]  ;;  %v258_v35 = vld [vmem:[#allocation5 + $0x528] sm:$0xff] }
  0xb2   :  { %1479 = vmatpush2.msra.mxu1 %v991_v43  ;;  %1403 = vmatprep.subr.mxu0 %v464_v44  ;;  %v785_v33 = vld [vmem:[#allocation5 + $0x15a0] sm:$0xff]  ;;  %v770_v36 = vld [vmem:[#allocation5 + $0x1528] sm:$0xff] }
  0xb3   :  { %1480 = vmatprep.subr.mxu1 %v976_v45  ;;  %1404 = vmatpush2.msra.mxu0 %v463_v46  ;;  %v257_v38 = vld [vmem:[#allocation5 + $0x520] sm:$0xff]  ;;  %v242_v40 = vld [vmem:[#allocation5 + $0x4a8] sm:$0xff] }
  0xb4   :  { %1481 = vmatpush2.msra.mxu1 %v975_v47  ;;  %1405 = vmatprep.subr.mxu0 %v448_v48  ;;  %v769_v39 = vld [vmem:[#allocation5 + $0x1520] sm:$0xff]  ;;  %v754_v41 = vld [vmem:[#allocation5 + $0x14a8] sm:$0xff] }
  0xb5   :  { %1482 = vmatprep.subr.mxu1 %v960_v49  ;;  %1406 = vmatpush2.msra.mxu0 %v447_v50  ;;  %v241_v42 = vld [vmem:[#allocation5 + $0x4a0] sm:$0xff]  ;;  %v226_v44 = vld [vmem:[#allocation5 + $0x428] sm:$0xff] }
  0xb6   :  { %1483 = vmatpush2.msra.mxu1 %v959_v51  ;;  %1407 = vmatprep.subr.mxu0 %v432_v52  ;;  %v753_v43 = vld [vmem:[#allocation5 + $0x14a0] sm:$0xff]  ;;  %v738_v45 = vld [vmem:[#allocation5 + $0x1428] sm:$0xff] }
  0xb7   :  { %1484 = vmatprep.subr.mxu1 %v944_v53  ;;  %1408 = vmatpush2.msra.mxu0 %v431_v54  ;;  %v225_v46 = vld [vmem:[#allocation5 + $0x420] sm:$0xff]  ;;  %v210_v48 = vld [vmem:[#allocation5 + $0x3a8] sm:$0xff] }
  0xb8   :  { %1485 = vmatpush2.msra.mxu1 %v943_v55  ;;  %1409 = vmatprep.subr.mxu0 %v416_v56  ;;  %v737_v47 = vld [vmem:[#allocation5 + $0x1420] sm:$0xff]  ;;  %v722_v49 = vld [vmem:[#allocation5 + $0x13a8] sm:$0xff] }
  0xb9   :  { %1486 = vmatprep.subr.mxu1 %v928_v57  ;;  %1410 = vmatpush2.msra.mxu0 %v415_v58  ;;  %v209_v50 = vld [vmem:[#allocation5 + $0x3a0] sm:$0xff]  ;;  %v194_v52 = vld [vmem:[#allocation5 + $0x328] sm:$0xff] }
  0xba   :  { %1487 = vmatpush2.msra.mxu1 %v927_v59  ;;  %1411 = vmatprep.subr.mxu0 %v400_v60  ;;  %v721_v51 = vld [vmem:[#allocation5 + $0x13a0] sm:$0xff]  ;;  %v706_v53 = vld [vmem:[#allocation5 + $0x1328] sm:$0xff] }
  0xbb   :  { %1488 = vmatprep.subr.mxu1 %v912_v61  ;;  %1412 = vmatpush2.msra.mxu0 %v399_v62  ;;  %v193_v54 = vld [vmem:[#allocation5 + $0x320] sm:$0xff]  ;;  %v178_v56 = vld [vmem:[#allocation5 + $0x2a8] sm:$0xff] }
  0xbc   :  { %1489 = vmatpush2.msra.mxu1 %v911_v0  ;;  %1413 = vmatprep.subr.mxu0 %v384_v3  ;;  %v705_v55 = vld [vmem:[#allocation5 + $0x1320] sm:$0xff]  ;;  %v690_v57 = vld [vmem:[#allocation5 + $0x12a8] sm:$0xff] }
  0xbd   :  { %1490 = vmatprep.subr.mxu1 %v896_v4  ;;  %1414 = vmatpush2.msra.mxu0 %v383_v6  ;;  %v177_v58 = vld [vmem:[#allocation5 + $0x2a0] sm:$0xff]  ;;  %v162_v60 = vld [vmem:[#allocation5 + $0x228] sm:$0xff] }
  0xbe   :  { %1491 = vmatpush2.msra.mxu1 %v895_v7  ;;  %1415 = vmatprep.subr.mxu0 %v368_v8  ;;  %v689_v59 = vld [vmem:[#allocation5 + $0x12a0] sm:$0xff]  ;;  %v674_v61 = vld [vmem:[#allocation5 + $0x1228] sm:$0xff] }
  0xbf   :  { %1492 = vmatprep.subr.mxu1 %v880_v9  ;;  %1416 = vmatpush2.msra.mxu0 %v367_v10  ;;  %v161_v62 = vld [vmem:[#allocation5 + $0x220] sm:$0xff]  ;;  %v146_v3 = vld [vmem:[#allocation5 + $0x1a8] sm:$0xff] }
  0xc0   :  { %1493 = vmatpush2.msra.mxu1 %v879_v11  ;;  %1417 = vmatprep.subr.mxu0 %v352_v12  ;;  %v673_v0 = vld [vmem:[#allocation5 + $0x1220] sm:$0xff]  ;;  %v658_v4 = vld [vmem:[#allocation5 + $0x11a8] sm:$0xff] }
  0xc1   :  { %1494 = vmatprep.subr.mxu1 %v864_v13  ;;  %1418 = vmatpush2.msra.mxu0 %v351_v14  ;;  %v145_v6 = vld [vmem:[#allocation5 + $0x1a0] sm:$0xff]  ;;  %v130_v8 = vld [vmem:[#allocation5 + $0x128] sm:$0xff] }
  0xc2   :  { %1419 = vmatprep.mubr.f32.mxu0 %v5189_v63  ;;  %1495 = vmatpush2.msra.mxu1 %v863_v15  ;;  %v818_v63 = vld [vmem:[#allocation5 + $0x16a8] sm:$0xff]  ;;  %v657_v7 = vld [vmem:[#allocation5 + $0x11a0] sm:$0xff] }
  0xc3   :  { %1420 = vmatmul.mubr.f32.vlgmr.msra.gmra.mxu0 %v5191_v1  ;;  %1496 = vmatprep.mubr.f32.mxu1 %v5193_v2  ;;  %v817_v1 = vld [vmem:[#allocation5 + $0x16a0] sm:$0xff]  ;;  %v802_v2 = vld [vmem:[#allocation5 + $0x1628] sm:$0xff] }
  0xc4   :  { %1509 = vmatprep.subr.mxu0 %v338_v16  ;;  %1586 = vmatprep.subr.mxu1 %v850_v17  ;;  %v642_v9 = vld [vmem:[#allocation5 + $0x1128] sm:$0xff]  ;;  %v129_v10 = vld [vmem:[#allocation5 + $0x120] sm:$0xff] }
  0xc5   :  { %1497 = vmatmul.mubr.f32.vlgmr.msra.gmra.mxu1 %v5196_v5  ;;  %1510 = vmatpush1.msra.mxu0 %v337_v18  ;;  %v274_v5 = vld [vmem:[#allocation5 + $0x5a8] sm:$0xff]  ;;  %v641_v11 = vld [vmem:[#allocation5 + $0x1120] sm:$0xff] }
  0xc6   :  { %1587 = vmatpush1.msra.mxu1 %v849_v19  ;;  %1511 = vmatprep.subr.mxu0 %v322_v20  ;;  %v114_v12 = vld [vmem:[#allocation5 + $0xa8] sm:$0xff]  ;;  %v113_v14 = vld [vmem:[#allocation5 + $0xa0] sm:$0xff] }
  0xc7   :  { %1588 = vmatprep.subr.mxu1 %v834_v21  ;;  %1512 = vmatpush1.msra.mxu0 %v321_v22  ;;  %v626_v13 = vld [vmem:[#allocation5 + $0x10a8] sm:$0xff]  ;;  %v625_v15 = vld [vmem:[#allocation5 + $0x10a0] sm:$0xff] }
  0xc8   :  { %1589 = vmatpush1.msra.mxu1 %v833_v23  ;;  %1513 = vmatprep.subr.mxu0 %v306_v24  ;;  %v98_v16 = vld [vmem:[#allocation5 + $0x28] sm:$0xff]  ;;  %v97_v18 = vld [vmem:[#allocation5 + $0x20] sm:$0xff] }
  0xc9   :  { %1590 = vmatprep.subr.mxu1 %v818_v63  ;;  %1514 = vmatpush1.msra.mxu0 %v305_v25  ;;  %v610_v17 = vld [vmem:[#allocation5 + $0x1028] sm:$0xff]  ;;  %v609_v19 = vld [vmem:[#allocation5 + $0x1020] sm:$0xff] }
  0xca   :  { %1591 = vmatpush1.msra.mxu1 %v817_v1  ;;  %1515 = vmatprep.subr.mxu0 %v290_v26  ;;  %v594_v20 = vld [vmem:[#allocation5 + $0xfa8] sm:$0xff]  ;;  %v593_v22 = vld [vmem:[#allocation5 + $0xfa0] sm:$0xff] }
  0xcb   :  { %1592 = vmatprep.subr.mxu1 %v802_v2  ;;  %1516 = vmatpush1.msra.mxu0 %v289_v27  ;;  %v1106_v21 = vld [vmem:[#allocation5 + $0x1fa8] sm:$0xff]  ;;  %v1105_v23 = vld [vmem:[#allocation5 + $0x1fa0] sm:$0xff] }
  0xcc   :  { %1593 = vmatpush1.msra.mxu1 %v801_v29  ;;  %1517 = vmatprep.subr.mxu0 %v274_v5  ;;  %v578_v24 = vld [vmem:[#allocation5 + $0xf28] sm:$0xff]  ;;  %v577_v25 = vld [vmem:[#allocation5 + $0xf20] sm:$0xff] }
  0xcd   :  { %1594 = vmatprep.subr.mxu1 %v786_v30  ;;  %1518 = vmatpush1.msra.mxu0 %v273_v32  ;;  %v1090_v63 = vld [vmem:[#allocation5 + $0x1f28] sm:$0xff]  ;;  %v1089_v1 = vld [vmem:[#allocation5 + $0x1f20] sm:$0xff] }
  0xce   :  { %1595 = vmatpush1.msra.mxu1 %v785_v33  ;;  %1519 = vmatprep.subr.mxu0 %v258_v35  ;;  %v562_v26 = vld [vmem:[#allocation5 + $0xea8] sm:$0xff]  ;;  %v561_v27 = vld [vmem:[#allocation5 + $0xea0] sm:$0xff] }
  0xcf   :  { %1596 = vmatprep.subr.mxu1 %v770_v36  ;;  %1520 = vmatpush1.msra.mxu0 %v257_v38  ;;  %v1074_v2 = vld [vmem:[#allocation5 + $0x1ea8] sm:$0xff]  ;;  %v1073_v29 = vld [vmem:[#allocation5 + $0x1ea0] sm:$0xff] }
  0xd0   :  { %1597 = vmatpush1.msra.mxu1 %v769_v39  ;;  %1521 = vmatprep.subr.mxu0 %v242_v40  ;;  %v546_v5 = vld [vmem:[#allocation5 + $0xe28] sm:$0xff]  ;;  %v545_v32 = vld [vmem:[#allocation5 + $0xe20] sm:$0xff] }
  0xd1   :  { %1598 = vmatprep.subr.mxu1 %v754_v41  ;;  %1522 = vmatpush1.msra.mxu0 %v241_v42  ;;  %v1058_v30 = vld [vmem:[#allocation5 + $0x1e28] sm:$0xff]  ;;  %v1057_v33 = vld [vmem:[#allocation5 + $0x1e20] sm:$0xff] }
  0xd2   :  { %1599 = vmatpush1.msra.mxu1 %v753_v43  ;;  %1523 = vmatprep.subr.mxu0 %v226_v44  ;;  %v530_v35 = vld [vmem:[#allocation5 + $0xda8] sm:$0xff]  ;;  %v529_v38 = vld [vmem:[#allocation5 + $0xda0] sm:$0xff] }
  0xd3   :  { %1600 = vmatprep.subr.mxu1 %v738_v45  ;;  %1524 = vmatpush1.msra.mxu0 %v225_v46  ;;  %v1042_v36 = vld [vmem:[#allocation5 + $0x1da8] sm:$0xff]  ;;  %v1041_v39 = vld [vmem:[#allocation5 + $0x1da0] sm:$0xff] }
  0xd4   :  { %1601 = vmatpush1.msra.mxu1 %v737_v47  ;;  %1525 = vmatprep.subr.mxu0 %v210_v48  ;;  %v514_v40 = vld [vmem:[#allocation5 + $0xd28] sm:$0xff]  ;;  %v513_v42 = vld [vmem:[#allocation5 + $0xd20] sm:$0xff] }
  0xd5   :  { %1602 = vmatprep.subr.mxu1 %v722_v49  ;;  %1526 = vmatpush1.msra.mxu0 %v209_v50  ;;  %v1026_v41 = vld [vmem:[#allocation5 + $0x1d28] sm:$0xff]  ;;  %v1025_v43 = vld [vmem:[#allocation5 + $0x1d20] sm:$0xff] }
  0xd6   :  { %1603 = vmatpush1.msra.mxu1 %v721_v51  ;;  %1527 = vmatprep.subr.mxu0 %v194_v52  ;;  %v498_v44 = vld [vmem:[#allocation5 + $0xca8] sm:$0xff]  ;;  %v497_v46 = vld [vmem:[#allocation5 + $0xca0] sm:$0xff] }
  0xd7   :  { %1604 = vmatprep.subr.mxu1 %v706_v53  ;;  %1528 = vmatpush1.msra.mxu0 %v193_v54  ;;  %v1010_v45 = vld [vmem:[#allocation5 + $0x1ca8] sm:$0xff]  ;;  %v1009_v47 = vld [vmem:[#allocation5 + $0x1ca0] sm:$0xff] }
  0xd8   :  { %1605 = vmatpush1.msra.mxu1 %v705_v55  ;;  %1529 = vmatprep.subr.mxu0 %v178_v56  ;;  %v482_v48 = vld [vmem:[#allocation5 + $0xc28] sm:$0xff]  ;;  %v481_v50 = vld [vmem:[#allocation5 + $0xc20] sm:$0xff] }
  0xd9   :  { %1606 = vmatprep.subr.mxu1 %v690_v57  ;;  %1530 = vmatpush1.msra.mxu0 %v177_v58  ;;  %v994_v49 = vld [vmem:[#allocation5 + $0x1c28] sm:$0xff]  ;;  %v977_v53 = vld [vmem:[#allocation5 + $0x1ba0] sm:$0xff] }
  0xda   :  { %1607 = vmatpush1.msra.mxu1 %v689_v59  ;;  %1531 = vmatprep.subr.mxu0 %v162_v60  ;;  %v466_v51 = vld [vmem:[#allocation5 + $0xba8] sm:$0xff]  ;;  %v449_v55 = vld [vmem:[#allocation5 + $0xb20] sm:$0xff] }
  0xdb   :  { %1608 = vmatprep.subr.mxu1 %v674_v61  ;;  %1532 = vmatpush1.msra.mxu0 %v161_v62  ;;  %v978_v52 = vld [vmem:[#allocation5 + $0x1ba8] sm:$0xff]  ;;  %v961_v56 = vld [vmem:[#allocation5 + $0x1b20] sm:$0xff] }
  0xdc   :  { %1609 = vmatpush1.msra.mxu1 %v673_v0  ;;  %1533 = vmatprep.subr.mxu0 %v146_v3  ;;  %v450_v54 = vld [vmem:[#allocation5 + $0xb28] sm:$0xff]  ;;  %v433_v58 = vld [vmem:[#allocation5 + $0xaa0] sm:$0xff] }
  0xdd   :  { %1610 = vmatprep.subr.mxu1 %v658_v4  ;;  %1534 = vmatpush1.msra.mxu0 %v145_v6  ;;  %v946_v57 = vld [vmem:[#allocation5 + $0x1aa8] sm:$0xff]  ;;  %v945_v59 = vld [vmem:[#allocation5 + $0x1aa0] sm:$0xff] }
  0xde   :  { %1611 = vmatpush1.msra.mxu1 %v657_v7  ;;  %1535 = vmatprep.subr.mxu0 %v130_v8  ;;  %v418_v60 = vld [vmem:[#allocation5 + $0xa28] sm:$0xff]  ;;  %v417_v62 = vld [vmem:[#allocation5 + $0xa20] sm:$0xff] }
  0xdf   :  { %1612 = vmatprep.subr.mxu1 %v642_v9  ;;  %1536 = vmatpush1.msra.mxu0 %v129_v10  ;;  %v930_v61 = vld [vmem:[#allocation5 + $0x1a28] sm:$0xff]  ;;  %v929_v0 = vld [vmem:[#allocation5 + $0x1a20] sm:$0xff] }
  0xe0   :  { %1613 = vmatpush1.msra.mxu1 %v641_v11  ;;  %1537 = vmatprep.subr.mxu0 %v114_v12  ;;  %v402_v3 = vld [vmem:[#allocation5 + $0x9a8] sm:$0xff]  ;;  %v401_v6 = vld [vmem:[#allocation5 + $0x9a0] sm:$0xff] }
  0xe1   :  { %1614 = vmatprep.subr.mxu1 %v626_v13  ;;  %1538 = vmatpush1.msra.mxu0 %v113_v14  ;;  %v914_v4 = vld [vmem:[#allocation5 + $0x19a8] sm:$0xff]  ;;  %v913_v7 = vld [vmem:[#allocation5 + $0x19a0] sm:$0xff] }
  0xe2   :  { %1615 = vmatpush1.msra.mxu1 %v625_v15  ;;  %1539 = vmatprep.subr.mxu0 %v98_v16  ;;  %v386_v8 = vld [vmem:[#allocation5 + $0x928] sm:$0xff]  ;;  %v385_v10 = vld [vmem:[#allocation5 + $0x920] sm:$0xff] }
  0xe3   :  { %1616 = vmatprep.subr.mxu1 %v610_v17  ;;  %1540 = vmatpush1.msra.mxu0 %v97_v18  ;;  %v898_v9 = vld [vmem:[#allocation5 + $0x1928] sm:$0xff]  ;;  %v897_v11 = vld [vmem:[#allocation5 + $0x1920] sm:$0xff] }
  0xe4   :  { %1617 = vmatpush1.msra.mxu1 %v609_v19  ;;  %1541 = vmatprep.subr.mxu0 %v594_v20  ;;  %v370_v12 = vld [vmem:[#allocation5 + $0x8a8] sm:$0xff]  ;;  %v369_v14 = vld [vmem:[#allocation5 + $0x8a0] sm:$0xff]  ;;  %v340_v20 = vld [vmem:[#allocation5 + $0x7b8] sm:$0xff] }
  0xe5   :  { %1618 = vmatprep.subr.mxu1 %v1106_v21  ;;  %1542 = vmatpush2.msra.mxu0 %v593_v22  ;;  %v882_v13 = vld [vmem:[#allocation5 + $0x18a8] sm:$0xff]  ;;  %v881_v15 = vld [vmem:[#allocation5 + $0x18a0] sm:$0xff]  ;;  %v852_v22 = vld [vmem:[#allocation5 + $0x17b8] sm:$0xff] }
  0xe6   :  { %1619 = vmatpush2.msra.mxu1 %v1105_v23  ;;  %1543 = vmatprep.subr.mxu0 %v578_v24  ;;  %v354_v16 = vld [vmem:[#allocation5 + $0x828] sm:$0xff]  ;;  %v353_v18 = vld [vmem:[#allocation5 + $0x820] sm:$0xff]  ;;  %v339_v24 = vld [vmem:[#allocation5 + $0x7b0] sm:$0xff] }
  0xe7   :  { %1620 = vmatprep.subr.mxu1 %v1090_v63  ;;  %1544 = vmatpush2.msra.mxu0 %v577_v25  ;;  %v866_v17 = vld [vmem:[#allocation5 + $0x1828] sm:$0xff]  ;;  %v865_v19 = vld [vmem:[#allocation5 + $0x1820] sm:$0xff]  ;;  %v851_v63 = vld [vmem:[#allocation5 + $0x17b0] sm:$0xff] }
  0xe8   :  { %1621 = vmatpush2.msra.mxu1 %v1089_v1  ;;  %1545 = vmatprep.subr.mxu0 %v562_v26  ;;  %v5221_v21 = vld [vmem:[#allocation2 + $0x8] sm:$0xff]  ;;  %v5224_v23 = vld [vmem:[#allocation2] sm:$0xff]  ;;  %v5227_v25 = vld [vmem:[#allocation2 + $0x18] sm:$0xff] }
  0xe9   :  { %1622 = vmatprep.subr.mxu1 %v1074_v2  ;;  %1546 = vmatpush2.msra.mxu0 %v561_v27  ;;  %v324_v1 = vld [vmem:[#allocation5 + $0x738] sm:$0xff]  ;;  %v5230_v2 = vld [vmem:[#allocation2 + $0x10] sm:$0xff] }
  0xea   :  { %1623 = vmatpush2.msra.mxu1 %v1073_v29  ;;  %1547 = vmatprep.subr.mxu0 %v546_v5  ;;  %v836_v26 = vld [vmem:[#allocation5 + $0x1738] sm:$0xff]  ;;  %v323_v27 = vld [vmem:[#allocation5 + $0x730] sm:$0xff] }
  0xeb   :  { %1624 = vmatprep.subr.mxu1 %v1058_v30  ;;  %1548 = vmatpush2.msra.mxu0 %v545_v32  ;;  %v835_v29 = vld [vmem:[#allocation5 + $0x1730] sm:$0xff]  ;;  %v308_v5 = vld [vmem:[#allocation5 + $0x6b8] sm:$0xff] }
  0xec   :  { %1625 = vmatpush2.msra.mxu1 %v1057_v33  ;;  %1549 = vmatprep.subr.mxu0 %v530_v35  ;;  %v820_v30 = vld [vmem:[#allocation5 + $0x16b8] sm:$0xff]  ;;  %v307_v32 = vld [vmem:[#allocation5 + $0x6b0] sm:$0xff] }
  0xed   :  { %1626 = vmatprep.subr.mxu1 %v1042_v36  ;;  %1550 = vmatpush2.msra.mxu0 %v529_v38  ;;  %v819_v33 = vld [vmem:[#allocation5 + $0x16b0] sm:$0xff]  ;;  %v292_v35 = vld [vmem:[#allocation5 + $0x638] sm:$0xff] }
  0xee   :  { %1627 = vmatpush2.msra.mxu1 %v1041_v39  ;;  %1425 = vmatprep.mubr.f32.mxu0 %v5201_v28  ;;  %v993_v28 = vld [vmem:[#allocation5 + $0x1c20] sm:$0xff]  ;;  %v804_v36 = vld [vmem:[#allocation5 + $0x1638] sm:$0xff]  ;;  %v291_v38 = vld [vmem:[#allocation5 + $0x630] sm:$0xff] }
  0xef   :  { %1551 = vmatprep.subr.mxu0 %v514_v40  ;;  %1628 = vmatprep.subr.mxu1 %v1026_v41  ;;  %v803_v39 = vld [vmem:[#allocation5 + $0x1630] sm:$0xff]  ;;  %v276_v40 = vld [vmem:[#allocation5 + $0x5b8] sm:$0xff] }
  0xf0   :  { %1426 = vmatmul.mubr.f32.gmra.mxu0 %v5203_v31  ;;  %1629 = vmatpush2.msra.mxu1 %v1025_v43  ;;  %v465_v31 = vld [vmem:[#allocation5 + $0xba0] sm:$0xff]  ;;  %v788_v41 = vld [vmem:[#allocation5 + $0x15b8] sm:$0xff]  ;;  %v787_v43 = vld [vmem:[#allocation5 + $0x15b0] sm:$0xff] }
  0xf1   :  { %1552 = vmatpush2.msra.mxu0 %v513_v42  ;;  %1502 = vmatprep.mubr.f32.mxu1 %v5206_v34  ;;  %v962_v34 = vld [vmem:[#allocation5 + $0x1b28] sm:$0xff]  ;;  %v275_v42 = vld [vmem:[#allocation5 + $0x5b0] sm:$0xff] }
  0xf2   :  { %1553 = vmatprep.subr.mxu0 %v498_v44  ;;  %1630 = vmatprep.subr.mxu1 %v1010_v45  ;;  %v260_v44 = vld [vmem:[#allocation5 + $0x538] sm:$0xff] }
  0xf3   :  { %1503 = vmatmul.mubr.f32.gmra.mxu1 %v5209_v37  ;;  %1554 = vmatpush2.msra.mxu0 %v497_v46  ;;  %v434_v37 = vld [vmem:[#allocation5 + $0xaa8] sm:$0xff]  ;;  %v772_v45 = vld [vmem:[#allocation5 + $0x1538] sm:$0xff]  ;;  %v259_v46 = vld [vmem:[#allocation5 + $0x530] sm:$0xff] }
  0xf4   :  { %1631 = vmatpush2.msra.mxu1 %v1009_v47  ;;  %1555 = vmatprep.subr.mxu0 %v482_v48  ;;  %v771_v47 = vld [vmem:[#allocation5 + $0x1530] sm:$0xff]  ;;  %v244_v48 = vld [vmem:[#allocation5 + $0x4b8] sm:$0xff] }
  0xf5   :  { %1632 = vmatprep.subr.mxu1 %v994_v49  ;;  %1556 = vmatpush2.msra.mxu0 %v481_v50  ;;  %v756_v49 = vld [vmem:[#allocation5 + $0x14b8] sm:$0xff]  ;;  %v243_v50 = vld [vmem:[#allocation5 + $0x4b0] sm:$0xff] }
  0xf6   :  { %1633 = vmatpush2.msra.mxu1 %v993_v28  ;;  %1557 = vmatprep.subr.mxu0 %v466_v51  ;;  %v755_v28 = vld [vmem:[#allocation5 + $0x14b0] sm:$0xff]  ;;  %v228_v51 = vld [vmem:[#allocation5 + $0x438] sm:$0xff] }
  0xf7   :  { %1634 = vmatprep.subr.mxu1 %v978_v52  ;;  %1558 = vmatpush2.msra.mxu0 %v465_v31  ;;  %v740_v52 = vld [vmem:[#allocation5 + $0x1438] sm:$0xff]  ;;  %v227_v31 = vld [vmem:[#allocation5 + $0x430] sm:$0xff] }
  0xf8   :  { %1635 = vmatpush2.msra.mxu1 %v977_v53  ;;  %1559 = vmatprep.subr.mxu0 %v450_v54  ;;  %v739_v53 = vld [vmem:[#allocation5 + $0x1430] sm:$0xff]  ;;  %v212_v54 = vld [vmem:[#allocation5 + $0x3b8] sm:$0xff] }
  0xf9   :  { %1636 = vmatprep.subr.mxu1 %v962_v34  ;;  %1560 = vmatpush2.msra.mxu0 %v449_v55  ;;  %v724_v34 = vld [vmem:[#allocation5 + $0x13b8] sm:$0xff]  ;;  %v211_v55 = vld [vmem:[#allocation5 + $0x3b0] sm:$0xff] }
  0xfa   :  { %1637 = vmatpush2.msra.mxu1 %v961_v56  ;;  %1561 = vmatprep.subr.mxu0 %v434_v37  ;;  %v723_v56 = vld [vmem:[#allocation5 + $0x13b0] sm:$0xff]  ;;  %v196_v37 = vld [vmem:[#allocation5 + $0x338] sm:$0xff] }
  0xfb   :  { %1638 = vmatprep.subr.mxu1 %v946_v57  ;;  %1562 = vmatpush2.msra.mxu0 %v433_v58  ;;  %v708_v57 = vld [vmem:[#allocation5 + $0x1338] sm:$0xff]  ;;  %v195_v58 = vld [vmem:[#allocation5 + $0x330] sm:$0xff] }
  0xfc   :  { %1639 = vmatpush2.msra.mxu1 %v945_v59  ;;  %1563 = vmatprep.subr.mxu0 %v418_v60  ;;  %v707_v59 = vld [vmem:[#allocation5 + $0x1330] sm:$0xff]  ;;  %v180_v60 = vld [vmem:[#allocation5 + $0x2b8] sm:$0xff] }
  0xfd   :  { %1640 = vmatprep.subr.mxu1 %v930_v61  ;;  %1564 = vmatpush2.msra.mxu0 %v417_v62  ;;  %v692_v61 = vld [vmem:[#allocation5 + $0x12b8] sm:$0xff]  ;;  %v179_v62 = vld [vmem:[#allocation5 + $0x2b0] sm:$0xff] }
  0xfe   :  { %1641 = vmatpush2.msra.mxu1 %v929_v0  ;;  %1565 = vmatprep.subr.mxu0 %v402_v3  ;;  %v691_v0 = vld [vmem:[#allocation5 + $0x12b0] sm:$0xff]  ;;  %v164_v3 = vld [vmem:[#allocation5 + $0x238] sm:$0xff] }
  0xff   :  { %1642 = vmatprep.subr.mxu1 %v914_v4  ;;  %1566 = vmatpush2.msra.mxu0 %v401_v6  ;;  %v676_v4 = vld [vmem:[#allocation5 + $0x1238] sm:$0xff]  ;;  %v163_v6 = vld [vmem:[#allocation5 + $0x230] sm:$0xff] }
 0x100   :  { %1643 = vmatpush2.msra.mxu1 %v913_v7  ;;  %1567 = vmatprep.subr.mxu0 %v386_v8  ;;  %v675_v7 = vld [vmem:[#allocation5 + $0x1230] sm:$0xff]  ;;  %v148_v8 = vld [vmem:[#allocation5 + $0x1b8] sm:$0xff] }
 0x101   :  { %1644 = vmatprep.subr.mxu1 %v898_v9  ;;  %1568 = vmatpush2.msra.mxu0 %v385_v10  ;;  %v660_v9 = vld [vmem:[#allocation5 + $0x11b8] sm:$0xff]  ;;  %v147_v10 = vld [vmem:[#allocation5 + $0x1b0] sm:$0xff] }
 0x102   :  { %1645 = vmatpush2.msra.mxu1 %v897_v11  ;;  %1569 = vmatprep.subr.mxu0 %v370_v12  ;;  %v659_v11 = vld [vmem:[#allocation5 + $0x11b0] sm:$0xff]  ;;  %v132_v12 = vld [vmem:[#allocation5 + $0x138] sm:$0xff] }
 0x103   :  { %1646 = vmatprep.subr.mxu1 %v882_v13  ;;  %1570 = vmatpush2.msra.mxu0 %v369_v14  ;;  %v644_v13 = vld [vmem:[#allocation5 + $0x1138] sm:$0xff]  ;;  %v131_v14 = vld [vmem:[#allocation5 + $0x130] sm:$0xff] }
 0x104   :  { %1647 = vmatpush2.msra.mxu1 %v881_v15  ;;  %1571 = vmatprep.subr.mxu0 %v354_v16  ;;  %v643_v15 = vld [vmem:[#allocation5 + $0x1130] sm:$0xff]  ;;  %v116_v16 = vld [vmem:[#allocation5 + $0xb8] sm:$0xff] }
 0x105   :  { %1648 = vmatprep.subr.mxu1 %v866_v17  ;;  %1572 = vmatpush2.msra.mxu0 %v353_v18  ;;  %v628_v17 = vld [vmem:[#allocation5 + $0x10b8] sm:$0xff]  ;;  %v115_v18 = vld [vmem:[#allocation5 + $0xb0] sm:$0xff] }
 0x106   :  { %1573 = vmatprep.mubr.f32.mxu0 %v5221_v21  ;;  %1649 = vmatpush2.msra.mxu1 %v865_v19  ;;  %v627_v19 = vld [vmem:[#allocation5 + $0x10b0] sm:$0xff] }
 0x107   :  { %1574 = vmatmul.mubr.f32.vlgmr.msra.gmra.mxu0 %v5224_v23  ;;  %1650 = vmatprep.mubr.f32.mxu1 %v5227_v25 }
 0x108   :  { %1663 = vmatprep.subr.mxu0 %v340_v20  ;;  %1740 = vmatprep.subr.mxu1 %v852_v22  ;;  %v100_v20 = vld [vmem:[#allocation5 + $0x38] sm:$0xff] }
 0x109   :  { %1651 = vmatmul.mubr.f32.vlgmr.msra.gmra.mxu1 %v5230_v2  ;;  %1664 = vmatpush1.msra.mxu0 %v339_v24  ;;  %v612_v22 = vld [vmem:[#allocation5 + $0x1038] sm:$0xff]  ;;  %v99_v24 = vld [vmem:[#allocation5 + $0x30] sm:$0xff] }
 0x10a   :  { %1741 = vmatpush1.msra.mxu1 %v851_v63  ;;  %1665 = vmatprep.subr.mxu0 %v324_v1  ;;  %v611_v63 = vld [vmem:[#allocation5 + $0x1030] sm:$0xff]  ;;  %v596_v1 = vld [vmem:[#allocation5 + $0xfb8] sm:$0xff] }
 0x10b   :  { %1742 = vmatprep.subr.mxu1 %v836_v26  ;;  %1666 = vmatpush1.msra.mxu0 %v323_v27  ;;  %v1108_v26 = vld [vmem:[#allocation5 + $0x1fb8] sm:$0xff]  ;;  %v595_v27 = vld [vmem:[#allocation5 + $0xfb0] sm:$0xff] }
 0x10c   :  { %1743 = vmatpush1.msra.mxu1 %v835_v29  ;;  %1667 = vmatprep.subr.mxu0 %v308_v5  ;;  %v1107_v29 = vld [vmem:[#allocation5 + $0x1fb0] sm:$0xff]  ;;  %v580_v5 = vld [vmem:[#allocation5 + $0xf38] sm:$0xff] }
 0x10d   :  { %1744 = vmatprep.subr.mxu1 %v820_v30  ;;  %1668 = vmatpush1.msra.mxu0 %v307_v32  ;;  %v1092_v30 = vld [vmem:[#allocation5 + $0x1f38] sm:$0xff]  ;;  %v579_v32 = vld [vmem:[#allocation5 + $0xf30] sm:$0xff] }
 0x10e   :  { %1745 = vmatpush1.msra.mxu1 %v819_v33  ;;  %1669 = vmatprep.subr.mxu0 %v292_v35  ;;  %v1091_v33 = vld [vmem:[#allocation5 + $0x1f30] sm:$0xff]  ;;  %v564_v35 = vld [vmem:[#allocation5 + $0xeb8] sm:$0xff] }
 0x10f   :  { %1746 = vmatprep.subr.mxu1 %v804_v36  ;;  %1670 = vmatpush1.msra.mxu0 %v291_v38  ;;  %v1076_v36 = vld [vmem:[#allocation5 + $0x1eb8] sm:$0xff]  ;;  %v563_v38 = vld [vmem:[#allocation5 + $0xeb0] sm:$0xff] }
 0x110   :  { %1747 = vmatpush1.msra.mxu1 %v803_v39  ;;  %1671 = vmatprep.subr.mxu0 %v276_v40  ;;  %v1075_v39 = vld [vmem:[#allocation5 + $0x1eb0] sm:$0xff]  ;;  %v548_v40 = vld [vmem:[#allocation5 + $0xe38] sm:$0xff] }
 0x111   :  { %1748 = vmatprep.subr.mxu1 %v788_v41  ;;  %1672 = vmatpush1.msra.mxu0 %v275_v42  ;;  %v1060_v41 = vld [vmem:[#allocation5 + $0x1e38] sm:$0xff]  ;;  %v547_v42 = vld [vmem:[#allocation5 + $0xe30] sm:$0xff] }
 0x112   :  { %1749 = vmatpush1.msra.mxu1 %v787_v43  ;;  %1673 = vmatprep.subr.mxu0 %v260_v44  ;;  %v1059_v43 = vld [vmem:[#allocation5 + $0x1e30] sm:$0xff]  ;;  %v532_v44 = vld [vmem:[#allocation5 + $0xdb8] sm:$0xff] }
 0x113   :  { %1750 = vmatprep.subr.mxu1 %v772_v45  ;;  %1674 = vmatpush1.msra.mxu0 %v259_v46  ;;  %v1044_v45 = vld [vmem:[#allocation5 + $0x1db8] sm:$0xff]  ;;  %v531_v46 = vld [vmem:[#allocation5 + $0xdb0] sm:$0xff] }
 0x114   :  { %1751 = vmatpush1.msra.mxu1 %v771_v47  ;;  %1675 = vmatprep.subr.mxu0 %v244_v48  ;;  %v1043_v47 = vld [vmem:[#allocation5 + $0x1db0] sm:$0xff]  ;;  %v516_v48 = vld [vmem:[#allocation5 + $0xd38] sm:$0xff] }
 0x115   :  { %1752 = vmatprep.subr.mxu1 %v756_v49  ;;  %1676 = vmatpush1.msra.mxu0 %v243_v50  ;;  %v1121_v49 = vlaneseq  ;;  %v1028_v50 = vld [vmem:[#allocation5 + $0x1d38] sm:$0xff] }
 0x116   :  { %1753 = vmatpush1.msra.mxu1 %v755_v28  ;;  %1677 = vmatprep.subr.mxu0 %v228_v51  ;;  %v515_v28 = vld [vmem:[#allocation5 + $0xd30] sm:$0xff] }
 0x117   :  { %1754 = vmatprep.subr.mxu1 %v740_v52  ;;  %1678 = vmatpush1.msra.mxu0 %v227_v31  ;;  %v1027_v51 = vld [vmem:[#allocation5 + $0x1d30] sm:$0xff]  ;;  %v5233_v52 = vld [vmem:[#allocation2 + $0x28] sm:$0xff]  ;;  %v500_v31 = vld [vmem:[#allocation5 + $0xcb8] sm:$0xff] }
 0x118   :  { %1755 = vmatpush1.msra.mxu1 %v739_v53  ;;  %1679 = vmatprep.subr.mxu0 %v212_v54  ;;  %v5236_v53 = vld [vmem:[#allocation2 + $0x20] sm:$0xff]  ;;  %v1012_v54 = vld [vmem:[#allocation5 + $0x1cb8] sm:$0xff] }
 0x119   :  { %1756 = vmatprep.subr.mxu1 %v724_v34  ;;  %1680 = vmatpush1.msra.mxu0 %v211_v55  ;;  %v5239_v34 = vshrl.u32 %v1121_v49, 7  ;;  %v499_v55 = vld [vmem:[#allocation5 + $0xcb0] sm:$0xff]  ;;  %v326_v49 = vld [vmem:[#allocation5 + $0x748] sm:$0xff] }
 0x11a   :  { %1757 = vmatpush1.msra.mxu1 %v723_v56  ;;  %1681 = vmatprep.subr.mxu0 %v196_v37  ;;  %v1011_v56 = vld [vmem:[#allocation5 + $0x1cb0] sm:$0xff]  ;;  %v5241_v37 = vld [vmem:[#allocation2 + $0x38] sm:$0xff] }
 0x11b   :  { %1758 = vmatprep.subr.mxu1 %v708_v57  ;;  %1682 = vmatpush1.msra.mxu0 %v195_v58  ;;  %v484_v57 = vld [vmem:[#allocation5 + $0xc38] sm:$0xff] }
 0x11c   :  { %1759 = vmatpush1.msra.mxu1 %v707_v59  ;;  %1683 = vmatprep.subr.mxu0 %v180_v60  ;;  %v996_v58 = vld [vmem:[#allocation5 + $0x1c38] sm:$0xff]  ;;  %v5244_v59 = vld [vmem:[#allocation2 + $0x30] sm:$0xff] }
 0x11d   :  { %1760 = vmatprep.subr.mxu1 %v692_v61  ;;  %1684 = vmatpush1.msra.mxu0 %v179_v62  ;;  %v483_v60 = vld [vmem:[#allocation5 + $0xc30] sm:$0xff]  ;;  %v468_v62 = vld [vmem:[#allocation5 + $0xbb8] sm:$0xff] }
 0x11e   :  { %1761 = vmatpush1.msra.mxu1 %v691_v0  ;;  %1685 = vmatprep.subr.mxu0 %v164_v3  ;;  %v995_v61 = vld [vmem:[#allocation5 + $0x1c30] sm:$0xff]  ;;  %v980_v0 = vld [vmem:[#allocation5 + $0x1bb8] sm:$0xff]  ;;  %v5248_v3 = vsub.s32 0, %v5239_v34 }
 0x11f   :  { %1762 = vmatprep.subr.mxu1 %v676_v4  ;;  %1686 = vmatpush1.msra.mxu0 %v163_v6  ;;  %v467_v4 = vld [vmem:[#allocation5 + $0xbb0] sm:$0xff] }
 0x120   :  { %1763 = vmatpush1.msra.mxu1 %v675_v7  ;;  %1687 = vmatprep.subr.mxu0 %v148_v8  ;;  %v979_v6 = vld [vmem:[#allocation5 + $0x1bb0] sm:$0xff]  ;;  %v5250_v7 = vld [vmem:[#allocation7] sm:$0xff]  ;;  %v452_v8 = vld [vmem:[#allocation5 + $0xb38] sm:$0xff] }
 0x121   :  { %1764 = vmatprep.subr.mxu1 %v660_v9  ;;  %1688 = vmatpush1.msra.mxu0 %v147_v10  ;;  %v964_v9 = vld [vmem:[#allocation5 + $0x1b38] sm:$0xff]  ;;  %v451_v10 = vld [vmem:[#allocation5 + $0xb30] sm:$0xff] }
 0x122   :  { %1765 = vmatpush1.msra.mxu1 %v659_v11  ;;  %1689 = vmatprep.subr.mxu0 %v132_v12  ;;  %v963_v11 = vld [vmem:[#allocation5 + $0x1b30] sm:$0xff]  ;;  %v436_v12 = vld [vmem:[#allocation5 + $0xab8] sm:$0xff] }
 0x123   :  { %1766 = vmatprep.subr.mxu1 %v644_v13  ;;  %1690 = vmatpush1.msra.mxu0 %v131_v14  ;;  %v948_v13 = vld [vmem:[#allocation5 + $0x1ab8] sm:$0xff]  ;;  %v5254_v14 = vrot.slane %v5250_v7, %v5248_v3 }
 0x124   :  { %1767 = vmatpush1.msra.mxu1 %v643_v15  ;;  %1691 = vmatprep.subr.mxu0 %v116_v16  ;;  %v435_v15 = vld [vmem:[#allocation5 + $0xab0] sm:$0xff] }
 0x125   :  { %1768 = vmatprep.subr.mxu1 %v628_v17  ;;  %1692 = vmatpush1.msra.mxu0 %v115_v18  ;;  %v947_v16 = vld [vmem:[#allocation5 + $0x1ab0] sm:$0xff]  ;;  %v420_v17 = vld [vmem:[#allocation5 + $0xa38] sm:$0xff] }
 0x126   :  { %1769 = vmatpush1.msra.mxu1 %v627_v19  ;;  %1693 = vmatprep.subr.mxu0 %v100_v20  ;;  %v932_v18 = vld [vmem:[#allocation5 + $0x1a38] sm:$0xff]  ;;  %v419_v19 = vld [vmem:[#allocation5 + $0xa30] sm:$0xff] }
 0x127   :  { %1770 = vmatprep.subr.mxu1 %v612_v22  ;;  %1694 = vmatpush1.msra.mxu0 %v99_v24  ;;  %v931_v20 = vld [vmem:[#allocation5 + $0x1a30] sm:$0xff]  ;;  %v404_v24 = vld [vmem:[#allocation5 + $0x9b8] sm:$0xff] }
 0x128   :  { %1771 = vmatpush1.msra.mxu1 %v611_v63  ;;  %1695 = vmatprep.subr.mxu0 %v596_v1  ;;  %v916_v63 = vld [vmem:[#allocation5 + $0x19b8] sm:$0xff] }
 0x129   :  { %1772 = vmatprep.subr.mxu1 %v1108_v26  ;;  %1696 = vmatpush2.msra.mxu0 %v595_v27  ;;  %v403_v26 = vld [vmem:[#allocation5 + $0x9b0] sm:$0xff] }
 0x12a   :  { %1773 = vmatpush2.msra.mxu1 %v1107_v29  ;;  %1697 = vmatprep.subr.mxu0 %v580_v5  ;;  %v915_v27 = vld [vmem:[#allocation5 + $0x19b0] sm:$0xff]  ;;  %v388_v5 = vld [vmem:[#allocation5 + $0x938] sm:$0xff] }
 0x12b   :  { %1774 = vmatprep.subr.mxu1 %v1092_v30  ;;  %1698 = vmatpush2.msra.mxu0 %v579_v32  ;;  %v900_v30 = vld [vmem:[#allocation5 + $0x1938] sm:$0xff] }
 0x12c   :  { %1775 = vmatpush2.msra.mxu1 %v1091_v33  ;;  %1699 = vmatprep.subr.mxu0 %v564_v35  ;;  %v387_v33 = vld [vmem:[#allocation5 + $0x930] sm:$0xff] }
 0x12d   :  { %1776 = vmatprep.subr.mxu1 %v1076_v36  ;;  %1700 = vmatpush2.msra.mxu0 %v563_v38  ;;  %v899_v35 = vld [vmem:[#allocation5 + $0x1930] sm:$0xff]  ;;  %v372_v36 = vld [vmem:[#allocation5 + $0x8b8] sm:$0xff] }
 0x12e   :  { %1777 = vmatpush2.msra.mxu1 %v1075_v39  ;;  %1701 = vmatprep.subr.mxu0 %v548_v40  ;;  %v884_v38 = vld [vmem:[#allocation5 + $0x18b8] sm:$0xff]  ;;  %v371_v39 = vld [vmem:[#allocation5 + $0x8b0] sm:$0xff] }
 0x12f   :  { %1778 = vmatprep.subr.mxu1 %v1060_v41  ;;  %1702 = vmatpush2.msra.mxu0 %v547_v42  ;;  %v883_v40 = vld [vmem:[#allocation5 + $0x18b0] sm:$0xff]  ;;  %v356_v41 = vld [vmem:[#allocation5 + $0x838] sm:$0xff] }
 0x130   :  { %1779 = vmatpush2.msra.mxu1 %v1059_v43  ;;  %1703 = vmatprep.subr.mxu0 %v532_v44  ;;  %v868_v42 = vld [vmem:[#allocation5 + $0x1838] sm:$0xff]  ;;  %v355_v43 = vld [vmem:[#allocation5 + $0x830] sm:$0xff] }
 0x131   :  { %1780 = vmatprep.subr.mxu1 %v1044_v45  ;;  %1704 = vmatpush2.msra.mxu0 %v531_v46  ;;  %v867_v44 = vld [vmem:[#allocation5 + $0x1830] sm:$0xff]  ;;  %v342_v45 = vld [vmem:[#allocation5 + $0x7c8] sm:$0xff] }
 0x132   :  { %1781 = vmatpush2.msra.mxu1 %v1043_v47  ;;  %1579 = vmatprep.mubr.f32.mxu0 %v5233_v52  ;;  %v854_v46 = vld [vmem:[#allocation5 + $0x17c8] sm:$0xff]  ;;  %v341_v47 = vld [vmem:[#allocation5 + $0x7c0] sm:$0xff] }
 0x133   :  { %1705 = vmatprep.subr.mxu0 %v516_v48  ;;  %1782 = vmatprep.subr.mxu1 %v1028_v50  ;;  %v853_v48 = vld [vmem:[#allocation5 + $0x17c0] sm:$0xff]  ;;  %v838_v50 = vld [vmem:[#allocation5 + $0x1748] sm:$0xff] }
 0x134   :  { %1580 = vmatmul.mubr.f32.gmra.mxu0 %v5236_v53  ;;  %1783 = vmatpush2.msra.mxu1 %v1027_v51  ;;  %v837_v51 = vld [vmem:[#allocation5 + $0x1740] sm:$0xff] }
 0x135   :  { %1706 = vmatpush2.msra.mxu0 %v515_v28  ;;  %1656 = vmatprep.mubr.f32.mxu1 %v5241_v37  ;;  %v325_v28 = vld [vmem:[#allocation5 + $0x740] sm:$0xff] }
 0x136   :  { %1707 = vmatprep.subr.mxu0 %v500_v31  ;;  %1784 = vmatprep.subr.mxu1 %v1012_v54  ;;  %v310_v31 = vld [vmem:[#allocation5 + $0x6c8] sm:$0xff]  ;;  %v309_v54 = vld [vmem:[#allocation5 + $0x6c0] sm:$0xff] }
 0x137   :  { %1657 = vmatmul.mubr.f32.gmra.mxu1 %v5244_v59  ;;  %1708 = vmatpush2.msra.mxu0 %v499_v55  ;;  %v294_v55 = vld [vmem:[#allocation5 + $0x648] sm:$0xff] }
 0x138   :  { %1785 = vmatpush2.msra.mxu1 %v1011_v56  ;;  %1709 = vmatprep.subr.mxu0 %v484_v57  ;;  %v293_v56 = vld [vmem:[#allocation5 + $0x640] sm:$0xff] }
 0x139   :  { %1786 = vmatprep.subr.mxu1 %v996_v58  ;;  %1710 = vmatpush2.msra.mxu0 %v483_v60  ;;  %v805_v57 = vld [vmem:[#allocation5 + $0x1640] sm:$0xff]  ;;  %v790_v58 = vld [vmem:[#allocation5 + $0x15c8] sm:$0xff] }
 0x13a   :  { %1787 = vmatpush2.msra.mxu1 %v995_v61  ;;  %1711 = vmatprep.subr.mxu0 %v468_v62  ;;  %v277_v60 = vld [vmem:[#allocation5 + $0x5c0] sm:$0xff]  ;;  %v262_v62 = vld [vmem:[#allocation5 + $0x548] sm:$0xff] }
 0x13b   :  { %1788 = vmatprep.subr.mxu1 %v980_v0  ;;  %1712 = vmatpush2.msra.mxu0 %v467_v4  ;;  %v789_v61 = vld [vmem:[#allocation5 + $0x15c0] sm:$0xff]  ;;  %v774_v0 = vld [vmem:[#allocation5 + $0x1548] sm:$0xff] }
 0x13c   :  { %1789 = vmatpush2.msra.mxu1 %v979_v6  ;;  %1713 = vmatprep.subr.mxu0 %v452_v8  ;;  %v261_v4 = vld [vmem:[#allocation5 + $0x540] sm:$0xff]  ;;  %v246_v8 = vld [vmem:[#allocation5 + $0x4c8] sm:$0xff] }
 0x13d   :  { %1790 = vmatprep.subr.mxu1 %v964_v9  ;;  %1714 = vmatpush2.msra.mxu0 %v451_v10  ;;  %v773_v6 = vld [vmem:[#allocation5 + $0x1540] sm:$0xff]  ;;  %v758_v9 = vld [vmem:[#allocation5 + $0x14c8] sm:$0xff] }
 0x13e   :  { %1791 = vmatpush2.msra.mxu1 %v963_v11  ;;  %1715 = vmatprep.subr.mxu0 %v436_v12  ;;  %v245_v10 = vld [vmem:[#allocation5 + $0x4c0] sm:$0xff]  ;;  %v230_v12 = vld [vmem:[#allocation5 + $0x448] sm:$0xff] }
 0x13f   :  { %1792 = vmatprep.subr.mxu1 %v948_v13  ;;  %v1267_v22 = vpop.f32.mrf.mxu0  ;;  %1716 = vmatpush2.msra.mxu0 %v435_v15  ;;  %v757_v11 = vld [vmem:[#allocation5 + $0x14c0] sm:$0xff]  ;;  %v742_v13 = vld [vmem:[#allocation5 + $0x1448] sm:$0xff] }
 0x140   :  { %1793 = vmatpush2.msra.mxu1 %v947_v16  ;;  %v1268_v1 = vadd.f32 %v1267_v22, %v5254_v14  ;;  %1717 = vmatprep.subr.mxu0 %v420_v17  ;;  %v229_v15 = vld [vmem:[#allocation5 + $0x440] sm:$0xff]  ;;  %v214_v17 = vld [vmem:[#allocation5 + $0x3c8] sm:$0xff] }
 0x141   :  { %1794 = vmatprep.subr.mxu1 %v932_v18  ;;  %v1344_v29 = vpop.f32.mrf.mxu1  ;;  %1718 = vmatpush2.msra.mxu0 %v419_v19  ;;  %v741_v16 = vld [vmem:[#allocation5 + $0x1440] sm:$0xff]  ;;  %v726_v18 = vld [vmem:[#allocation5 + $0x13c8] sm:$0xff] }
 0x142   :  { %1795 = vmatpush2.msra.mxu1 %v931_v20  ;;  %v5257_v32 = vadd.f32 %v1344_v29, %v1268_v1  ;;  %1719 = vmatprep.subr.mxu0 %v404_v24  ;;  %v213_v19 = vld [vmem:[#allocation5 + $0x3c0] sm:$0xff]  ;;  %v198_v22 = vld [vmem:[#allocation5 + $0x348] sm:$0xff] }
 0x143   :  { %1796 = vmatprep.subr.mxu1 %v916_v63  ;;  %1720 = vmatpush2.msra.mxu0 %v403_v26  ;;  %v725_v20 = vld [vmem:[#allocation5 + $0x13c0] sm:$0xff]  ;;  %v710_v24 = vld [vmem:[#allocation5 + $0x1348] sm:$0xff] }
 0x144   :  { %1797 = vmatpush2.msra.mxu1 %v915_v27  ;;  %1721 = vmatprep.subr.mxu0 %v388_v5  ;;  %v197_v63 = vld [vmem:[#allocation5 + $0x340] sm:$0xff]  ;;  %v182_v26 = vld [vmem:[#allocation5 + $0x2c8] sm:$0xff] }
 0x145   :  { %1798 = vmatprep.subr.mxu1 %v900_v30  ;;  %1722 = vmatpush2.msra.mxu0 %v387_v33  ;;  %v709_v1 = vld [vmem:[#allocation5 + $0x1340] sm:$0xff]  ;;  %v694_v27 = vld [vmem:[#allocation5 + $0x12c8] sm:$0xff] }
 0x146   :  { %1799 = vmatpush2.msra.mxu1 %v899_v35  ;;  %1723 = vmatprep.subr.mxu0 %v372_v36  ;;  %v181_v29 = vld [vmem:[#allocation5 + $0x2c0] sm:$0xff]  ;;  %v166_v30 = vld [vmem:[#allocation5 + $0x248] sm:$0xff] }
 0x147   :  { %1800 = vmatprep.subr.mxu1 %v884_v38  ;;  %1724 = vmatpush2.msra.mxu0 %v371_v39  ;;  %v693_v5 = vld [vmem:[#allocation5 + $0x12c0] sm:$0xff]  ;;  %v678_v33 = vld [vmem:[#allocation5 + $0x1248] sm:$0xff] }
 0x148   :  { %1801 = vmatpush2.msra.mxu1 %v883_v40  ;;  %1725 = vmatprep.subr.mxu0 %v356_v41  ;;  %v165_v35 = vld [vmem:[#allocation5 + $0x240] sm:$0xff]  ;;  %v150_v38 = vld [vmem:[#allocation5 + $0x1c8] sm:$0xff] }
 0x149   :  { %1802 = vmatprep.subr.mxu1 %v868_v42  ;;  %1726 = vmatpush2.msra.mxu0 %v355_v43  ;;  %v677_v36 = vld [vmem:[#allocation5 + $0x1240] sm:$0xff]  ;;  %v662_v39 = vld [vmem:[#allocation5 + $0x11c8] sm:$0xff] }
 0x14a   :  { %1727 = vmatprep.mubr.f32.mxu0 %v5221_v21  ;;  %1803 = vmatpush2.msra.mxu1 %v867_v44  ;;  %v822_v21 = vld [vmem:[#allocation5 + $0x16c8] sm:$0xff]  ;;  %v149_v40 = vld [vmem:[#allocation5 + $0x1c0] sm:$0xff] }
 0x14b   :  { %1728 = vmatmul.mubr.f32.vlgmr.msra.gmra.mxu0 %v5224_v23  ;;  %1804 = vmatprep.mubr.f32.mxu1 %v5227_v25  ;;  %v821_v23 = vld [vmem:[#allocation5 + $0x16c0] sm:$0xff]  ;;  %v806_v25 = vld [vmem:[#allocation5 + $0x1648] sm:$0xff] }
 0x14c   :  { %1817 = vmatprep.subr.mxu0 %v342_v45  ;;  %1894 = vmatprep.subr.mxu1 %v854_v46  ;;  %v661_v41 = vld [vmem:[#allocation5 + $0x11c0] sm:$0xff]  ;;  %v134_v42 = vld [vmem:[#allocation5 + $0x148] sm:$0xff] }
 0x14d   :  { %1805 = vmatmul.mubr.f32.vlgmr.msra.gmra.mxu1 %v5230_v2  ;;  %1818 = vmatpush1.msra.mxu0 %v341_v47  ;;  %v278_v2 = vld [vmem:[#allocation5 + $0x5c8] sm:$0xff]  ;;  %v133_v44 = vld [vmem:[#allocation5 + $0x140] sm:$0xff] }
 0x14e   :  { %1895 = vmatpush1.msra.mxu1 %v853_v48  ;;  %1819 = vmatprep.subr.mxu0 %v326_v49  ;;  %v646_v43 = vld [vmem:[#allocation5 + $0x1148] sm:$0xff]  ;;  %v645_v45 = vld [vmem:[#allocation5 + $0x1140] sm:$0xff] }
 0x14f   :  { %1896 = vmatprep.subr.mxu1 %v838_v50  ;;  %1820 = vmatpush1.msra.mxu0 %v325_v28  ;;  %v118_v46 = vld [vmem:[#allocation5 + $0xc8] sm:$0xff]  ;;  %v117_v48 = vld [vmem:[#allocation5 + $0xc0] sm:$0xff] }
 0x150   :  { %1897 = vmatpush1.msra.mxu1 %v837_v51  ;;  %1821 = vmatprep.subr.mxu0 %v310_v31  ;;  %v630_v47 = vld [vmem:[#allocation5 + $0x10c8] sm:$0xff]  ;;  %v629_v49 = vld [vmem:[#allocation5 + $0x10c0] sm:$0xff]  ;;  %v5264_v51 = vsub.s32 1, %v5239_v34 }
 0x151   :  { %1898 = vmatprep.subr.mxu1 %v822_v21  ;;  %1822 = vmatpush1.msra.mxu0 %v309_v54  ;;  %v102_v50 = vld [vmem:[#allocation5 + $0x48] sm:$0xff]  ;;  %v101_v31 = vld [vmem:[#allocation5 + $0x40] sm:$0xff]  ;;  %v5266_v54 = vpop.f32.mrf.mxu0 }
 0x152   :  { %1899 = vmatpush1.msra.mxu1 %v821_v23  ;;  %1823 = vmatprep.subr.mxu0 %v294_v55  ;;  %v614_v28 = vld [vmem:[#allocation5 + $0x1048] sm:$0xff]  ;;  %v613_v21 = vld [vmem:[#allocation5 + $0x1040] sm:$0xff] }
 0x153   :  { %1900 = vmatprep.subr.mxu1 %v806_v25  ;;  %1824 = vmatpush1.msra.mxu0 %v293_v56  ;;  %v598_v23 = vld [vmem:[#allocation5 + $0xfc8] sm:$0xff]  ;;  %v597_v25 = vld [vmem:[#allocation5 + $0xfc0] sm:$0xff] }
 0x154   :  { %1901 = vmatpush1.msra.mxu1 %v805_v57  ;;  %1825 = vmatprep.subr.mxu0 %v278_v2  ;;  %v1110_v55 = vld [vmem:[#allocation5 + $0x1fc8] sm:$0xff]  ;;  %v1109_v56 = vld [vmem:[#allocation5 + $0x1fc0] sm:$0xff] }
 0x155   :  { %1902 = vmatprep.subr.mxu1 %v790_v58  ;;  %1826 = vmatpush1.msra.mxu0 %v277_v60  ;;  %v582_v57 = vld [vmem:[#allocation5 + $0xf48] sm:$0xff]  ;;  %v5270_v60 = vrot.slane %v5250_v7, %v5264_v51 }
 0x156   :  { %1903 = vmatpush1.msra.mxu1 %v789_v61  ;;  %1827 = vmatprep.subr.mxu0 %v262_v62  ;;  %v1094_v2 = vld [vmem:[#allocation5 + $0x1f48] sm:$0xff]  ;;  %v5272_v61 = vpop.f32.mrf.mxu1  ;;  %v581_v62 = vld [vmem:[#allocation5 + $0xf40] sm:$0xff] }
 0x157   :  { %1904 = vmatprep.subr.mxu1 %v774_v0  ;;  %1828 = vmatpush1.msra.mxu0 %v261_v4  ;;  %v1093_v0 = vld [vmem:[#allocation5 + $0x1f40] sm:$0xff] }
 0x158   :  { %1905 = vmatpush1.msra.mxu1 %v773_v6  ;;  %1829 = vmatprep.subr.mxu0 %v246_v8  ;;  %v566_v6 = vld [vmem:[#allocation5 + $0xec8] sm:$0xff] }
 0x159   :  { %1906 = vmatprep.subr.mxu1 %v758_v9  ;;  %1830 = vmatpush1.msra.mxu0 %v245_v10  ;;  %v1078_v8 = vld [vmem:[#allocation5 + $0x1ec8] sm:$0xff]  ;;  %v565_v10 = vld [vmem:[#allocation5 + $0xec0] sm:$0xff] }
 0x15a   :  { %1907 = vmatpush1.msra.mxu1 %v757_v11  ;;  %1831 = vmatprep.subr.mxu0 %v230_v12  ;;  %v1077_v11 = vld [vmem:[#allocation5 + $0x1ec0] sm:$0xff] }
 0x15b   :  { %1908 = vmatprep.subr.mxu1 %v742_v13  ;;  %1832 = vmatpush1.msra.mxu0 %v229_v15  ;;  %v550_v13 = vld [vmem:[#allocation5 + $0xe48] sm:$0xff] }
 0x15c   :  { %1909 = vmatpush1.msra.mxu1 %v741_v16  ;;  %1833 = vmatprep.subr.mxu0 %v214_v17  ;;  %v1062_v15 = vld [vmem:[#allocation5 + $0x1e48] sm:$0xff]  ;;  %v1061_v17 = vld [vmem:[#allocation5 + $0x1e40] sm:$0xff] }
 0x15d   :  { %1910 = vmatprep.subr.mxu1 %v726_v18  ;;  %1834 = vmatpush1.msra.mxu0 %v213_v19  ;;  %v534_v19 = vld [vmem:[#allocation5 + $0xdc8] sm:$0xff] }
 0x15e   :  { %1911 = vmatpush1.msra.mxu1 %v725_v20  ;;  %1835 = vmatprep.subr.mxu0 %v198_v22  ;;  %v1046_v20 = vld [vmem:[#allocation5 + $0x1dc8] sm:$0xff] }
 0x15f   :  { %1912 = vmatprep.subr.mxu1 %v710_v24  ;;  %1836 = vmatpush1.msra.mxu0 %v197_v63  ;;  %v533_v24 = vld [vmem:[#allocation5 + $0xdc0] sm:$0xff] }
 0x160   :  { %1913 = vmatpush1.msra.mxu1 %v709_v1  ;;  %1837 = vmatprep.subr.mxu0 %v182_v26  ;;  %v1045_v63 = vld [vmem:[#allocation5 + $0x1dc0] sm:$0xff]  ;;  %v518_v1 = vld [vmem:[#allocation5 + $0xd48] sm:$0xff] }
 0x161   :  { %1914 = vmatprep.subr.mxu1 %v694_v27  ;;  %1838 = vmatpush1.msra.mxu0 %v181_v29  ;;  %v1030_v26 = vld [vmem:[#allocation5 + $0x1d48] sm:$0xff]  ;;  %v517_v27 = vld [vmem:[#allocation5 + $0xd40] sm:$0xff] }
 0x162   :  { %1915 = vmatpush1.msra.mxu1 %v693_v5  ;;  %1839 = vmatprep.subr.mxu0 %v166_v30  ;;  %v1029_v29 = vld [vmem:[#allocation5 + $0x1d40] sm:$0xff]  ;;  %v502_v5 = vld [vmem:[#allocation5 + $0xcc8] sm:$0xff] }
 0x163   :  { %1916 = vmatprep.subr.mxu1 %v678_v33  ;;  %1840 = vmatpush1.msra.mxu0 %v165_v35  ;;  %v1014_v30 = vld [vmem:[#allocation5 + $0x1cc8] sm:$0xff]  ;;  %v501_v33 = vld [vmem:[#allocation5 + $0xcc0] sm:$0xff] }
 0x164   :  { %1917 = vmatpush1.msra.mxu1 %v677_v36  ;;  %1841 = vmatprep.subr.mxu0 %v150_v38  ;;  %v1013_v35 = vld [vmem:[#allocation5 + $0x1cc0] sm:$0xff]  ;;  %v486_v36 = vld [vmem:[#allocation5 + $0xc48] sm:$0xff] }
 0x165   :  { %1918 = vmatprep.subr.mxu1 %v662_v39  ;;  %1842 = vmatpush1.msra.mxu0 %v149_v40  ;;  %v998_v38 = vld [vmem:[#allocation5 + $0x1c48] sm:$0xff]  ;;  %v485_v39 = vld [vmem:[#allocation5 + $0xc40] sm:$0xff] }
 0x166   :  { %1919 = vmatpush1.msra.mxu1 %v661_v41  ;;  %1843 = vmatprep.subr.mxu0 %v134_v42  ;;  %v470_v40 = vld [vmem:[#allocation5 + $0xbc8] sm:$0xff]  ;;  %v981_v42 = vld [vmem:[#allocation5 + $0x1bc0] sm:$0xff] }
 0x167   :  { %1920 = vmatprep.subr.mxu1 %v646_v43  ;;  %1844 = vmatpush1.msra.mxu0 %v133_v44  ;;  %v982_v41 = vld [vmem:[#allocation5 + $0x1bc8] sm:$0xff]  ;;  %v453_v44 = vld [vmem:[#allocation5 + $0xb40] sm:$0xff] }
 0x168   :  { %1921 = vmatpush1.msra.mxu1 %v645_v45  ;;  %1845 = vmatprep.subr.mxu0 %v118_v46  ;;  %v454_v43 = vld [vmem:[#allocation5 + $0xb48] sm:$0xff]  ;;  %v965_v45 = vld [vmem:[#allocation5 + $0x1b40] sm:$0xff] }
 0x169   :  { %1922 = vmatprep.subr.mxu1 %v630_v47  ;;  %1846 = vmatpush1.msra.mxu0 %v117_v48  ;;  %v950_v46 = vld [vmem:[#allocation5 + $0x1ac8] sm:$0xff]  ;;  %v437_v47 = vld [vmem:[#allocation5 + $0xac0] sm:$0xff] }
 0x16a   :  { %1923 = vmatpush1.msra.mxu1 %v629_v49  ;;  %1847 = vmatprep.subr.mxu0 %v102_v50  ;;  %v949_v48 = vld [vmem:[#allocation5 + $0x1ac0] sm:$0xff]  ;;  %v422_v49 = vld [vmem:[#allocation5 + $0xa48] sm:$0xff] }
 0x16b   :  { %1924 = vmatprep.subr.mxu1 %v614_v28  ;;  %1848 = vmatpush1.msra.mxu0 %v101_v31  ;;  %v934_v50 = vld [vmem:[#allocation5 + $0x1a48] sm:$0xff]  ;;  %v421_v28 = vld [vmem:[#allocation5 + $0xa40] sm:$0xff] }
 0x16c   :  { %1925 = vmatpush1.msra.mxu1 %v613_v21  ;;  %v1273_v58 = vpop.f32.mrf.mxu0  ;;  %1849 = vmatprep.subr.mxu0 %v598_v23  ;;  %v933_v31 = vld [vmem:[#allocation5 + $0x1a40] sm:$0xff]  ;;  %v406_v21 = vld [vmem:[#allocation5 + $0x9c8] sm:$0xff] }
 0x16d   :  { %1926 = vmatprep.subr.mxu1 %v1110_v55  ;;  %v1274_v4 = vadd.f32 %v1273_v58, %v5254_v14  ;;  %1850 = vmatpush2.msra.mxu0 %v597_v25  ;;  %v549_v14 = vld [vmem:[#allocation5 + $0xe40] sm:$0xff]  ;;  %v918_v23 = vld [vmem:[#allocation5 + $0x19c8] sm:$0xff] }
 0x16e   :  { %1927 = vmatpush2.msra.mxu1 %v1109_v56  ;;  %v1275_v9 = vpop.f32.mrf.mxu0  ;;  %1851 = vmatprep.subr.mxu0 %v582_v57  ;;  %v405_v55 = vld [vmem:[#allocation5 + $0x9c0] sm:$0xff]  ;;  %v390_v56 = vld [vmem:[#allocation5 + $0x948] sm:$0xff] }
 0x16f   :  { %1928 = vmatprep.subr.mxu1 %v1094_v2  ;;  %v1276_v7 = vadd.f32 %v1275_v9, %v5270_v60  ;;  %v1350_v12 = vpop.f32.mrf.mxu1  ;;  %1852 = vmatpush2.msra.mxu0 %v581_v62  ;;  %v917_v25 = vld [vmem:[#allocation5 + $0x19c0] sm:$0xff]  ;;  %v902_v57 = vld [vmem:[#allocation5 + $0x1948] sm:$0xff] }
 0x170   :  { %1929 = vmatpush2.msra.mxu1 %v1093_v0  ;;  %v5276_v16 = vadd.f32 %v1350_v12, %v1274_v4  ;;  %1853 = vmatprep.subr.mxu0 %v566_v6  ;;  %v389_v2 = vld [vmem:[#allocation5 + $0x940] sm:$0xff]  ;;  %v374_v62 = vld [vmem:[#allocation5 + $0x8c8] sm:$0xff] }
 0x171   :  { %1930 = vmatprep.subr.mxu1 %v1078_v8  ;;  %v1352_v18 = vpop.f32.mrf.mxu1  ;;  %1854 = vmatpush2.msra.mxu0 %v565_v10  ;;  %v901_v58 = vld [vmem:[#allocation5 + $0x1940] sm:$0xff]  ;;  %v886_v0 = vld [vmem:[#allocation5 + $0x18c8] sm:$0xff] }
 0x172   :  { %1931 = vmatpush2.msra.mxu1 %v1077_v11  ;;  %v5278_v22 = vadd.f32 %v1352_v18, %v1276_v7  ;;  %1855 = vmatprep.subr.mxu0 %v550_v13  ;;  %v373_v4 = vld [vmem:[#allocation5 + $0x8c0] sm:$0xff]  ;;  %v358_v8 = vld [vmem:[#allocation5 + $0x848] sm:$0xff]  ;;  %v344_v7 = vld [vmem:[#allocation5 + $0x7d8] sm:$0xff] }
 0x173   :  { %1932 = vmatprep.subr.mxu1 %v1062_v15  ;;  %1856 = vmatpush2.msra.mxu0 %v549_v14  ;;  %v885_v6 = vld [vmem:[#allocation5 + $0x18c0] sm:$0xff]  ;;  %v870_v9 = vld [vmem:[#allocation5 + $0x1848] sm:$0xff]  ;;  %v856_v13 = vld [vmem:[#allocation5 + $0x17d8] sm:$0xff] }
 0x174   :  { %1933 = vmatpush2.msra.mxu1 %v1061_v17  ;;  %1857 = vmatprep.subr.mxu0 %v534_v19  ;;  %v357_v10 = vld [vmem:[#allocation5 + $0x840] sm:$0xff]  ;;  %v5284_v12 = vld [vmem:[#allocation2 + $0x8] sm:$0xff]  ;;  %v343_v14 = vld [vmem:[#allocation5 + $0x7d0] sm:$0xff] }
 0x175   :  { %1934 = vmatprep.subr.mxu1 %v1046_v20  ;;  %1858 = vmatpush2.msra.mxu0 %v533_v24  ;;  %v869_v11 = vld [vmem:[#allocation5 + $0x1840] sm:$0xff]  ;;  %v855_v17 = vld [vmem:[#allocation5 + $0x17d0] sm:$0xff]  ;;  %v5290_v18 = vld [vmem:[#allocation2 + $0x18] sm:$0xff] }
 0x176   :  { %1935 = vmatpush2.msra.mxu1 %v1045_v63  ;;  %1733 = vmatprep.mubr.f32.mxu0 %v5233_v52  ;;  %v997_v52 = vld [vmem:[#allocation5 + $0x1c40] sm:$0xff]  ;;  %v328_v19 = vld [vmem:[#allocation5 + $0x758] sm:$0xff]  ;;  %v5293_v24 = vld [vmem:[#allocation2 + $0x10] sm:$0xff] }
 0x177   :  { %1859 = vmatprep.subr.mxu0 %v518_v1  ;;  %1936 = vmatprep.subr.mxu1 %v1030_v26  ;;  %v5287_v15 = vld [vmem:[#allocation2] sm:$0xff]  ;;  %v840_v20 = vld [vmem:[#allocation5 + $0x1758] sm:$0xff]  ;;  %v327_v63 = vld [vmem:[#allocation5 + $0x750] sm:$0xff] }
 0x178   :  { %1734 = vmatmul.mubr.f32.gmra.mxu0 %v5236_v53  ;;  %1937 = vmatpush2.msra.mxu1 %v1029_v29  ;;  %v469_v53 = vld [vmem:[#allocation5 + $0xbc0] sm:$0xff]  ;;  %v839_v1 = vld [vmem:[#allocation5 + $0x1750] sm:$0xff]  ;;  %v312_v26 = vld [vmem:[#allocation5 + $0x6d8] sm:$0xff] }
 0x179   :  { %1860 = vmatpush2.msra.mxu0 %v517_v27  ;;  %1810 = vmatprep.mubr.f32.mxu1 %v5241_v37  ;;  %v966_v37 = vld [vmem:[#allocation5 + $0x1b48] sm:$0xff]  ;;  %v824_v27 = vld [vmem:[#allocation5 + $0x16d8] sm:$0xff]  ;;  %v311_v29 = vld [vmem:[#allocation5 + $0x6d0] sm:$0xff] }
 0x17a   :  { %1861 = vmatprep.subr.mxu0 %v502_v5  ;;  %1938 = vmatprep.subr.mxu1 %v1014_v30  ;;  %v823_v5 = vld [vmem:[#allocation5 + $0x16d0] sm:$0xff]  ;;  %v296_v30 = vld [vmem:[#allocation5 + $0x658] sm:$0xff] }
 0x17b   :  { %1811 = vmatmul.mubr.f32.gmra.mxu1 %v5244_v59  ;;  %1862 = vmatpush2.msra.mxu0 %v501_v33  ;;  %v438_v59 = vld [vmem:[#allocation5 + $0xac8] sm:$0xff]  ;;  %v808_v33 = vld [vmem:[#allocation5 + $0x1658] sm:$0xff] }
 0x17c   :  { %1939 = vmatpush2.msra.mxu1 %v1013_v35  ;;  %1863 = vmatprep.subr.mxu0 %v486_v36  ;;  %v295_v35 = vld [vmem:[#allocation5 + $0x650] sm:$0xff] }
 0x17d   :  { %1940 = vmatprep.subr.mxu1 %v998_v38  ;;  %1864 = vmatpush2.msra.mxu0 %v485_v39  ;;  %v807_v36 = vld [vmem:[#allocation5 + $0x1650] sm:$0xff]  ;;  %v280_v38 = vld [vmem:[#allocation5 + $0x5d8] sm:$0xff] }
 0x17e   :  { %1941 = vmatpush2.msra.mxu1 %v997_v52  ;;  %1865 = vmatprep.subr.mxu0 %v470_v40  ;;  %v792_v39 = vld [vmem:[#allocation5 + $0x15d8] sm:$0xff]  ;;  %v279_v52 = vld [vmem:[#allocation5 + $0x5d0] sm:$0xff] }
 0x17f   :  { %1942 = vmatprep.subr.mxu1 %v982_v41  ;;  %1866 = vmatpush2.msra.mxu0 %v469_v53  ;;  %v791_v40 = vld [vmem:[#allocation5 + $0x15d0] sm:$0xff]  ;;  %v264_v41 = vld [vmem:[#allocation5 + $0x558] sm:$0xff] }
 0x180   :  { %1943 = vmatpush2.msra.mxu1 %v981_v42  ;;  %1867 = vmatprep.subr.mxu0 %v454_v43  ;;  %v776_v53 = vld [vmem:[#allocation5 + $0x1558] sm:$0xff]  ;;  %v263_v42 = vld [vmem:[#allocation5 + $0x550] sm:$0xff] }
 0x181   :  { %1944 = vmatprep.subr.mxu1 %v966_v37  ;;  %1868 = vmatpush2.msra.mxu0 %v453_v44  ;;  %v775_v43 = vld [vmem:[#allocation5 + $0x1550] sm:$0xff]  ;;  %v248_v37 = vld [vmem:[#allocation5 + $0x4d8] sm:$0xff] }
 0x182   :  { %1945 = vmatpush2.msra.mxu1 %v965_v45  ;;  %1869 = vmatprep.subr.mxu0 %v438_v59  ;;  %v760_v44 = vld [vmem:[#allocation5 + $0x14d8] sm:$0xff]  ;;  %v247_v45 = vld [vmem:[#allocation5 + $0x4d0] sm:$0xff] }
 0x183   :  { %1946 = vmatprep.subr.mxu1 %v950_v46  ;;  %1870 = vmatpush2.msra.mxu0 %v437_v47  ;;  %v759_v59 = vld [vmem:[#allocation5 + $0x14d0] sm:$0xff]  ;;  %v232_v46 = vld [vmem:[#allocation5 + $0x458] sm:$0xff] }
 0x184   :  { %1947 = vmatpush2.msra.mxu1 %v949_v48  ;;  %1871 = vmatprep.subr.mxu0 %v422_v49  ;;  %v744_v47 = vld [vmem:[#allocation5 + $0x1458] sm:$0xff]  ;;  %v231_v48 = vld [vmem:[#allocation5 + $0x450] sm:$0xff] }
 0x185   :  { %1948 = vmatprep.subr.mxu1 %v934_v50  ;;  %1872 = vmatpush2.msra.mxu0 %v421_v28  ;;  %v743_v49 = vld [vmem:[#allocation5 + $0x1450] sm:$0xff]  ;;  %v216_v50 = vld [vmem:[#allocation5 + $0x3d8] sm:$0xff] }
 0x186   :  { %1949 = vmatpush2.msra.mxu1 %v933_v31  ;;  %1873 = vmatprep.subr.mxu0 %v406_v21  ;;  %v728_v28 = vld [vmem:[#allocation5 + $0x13d8] sm:$0xff]  ;;  %v215_v31 = vld [vmem:[#allocation5 + $0x3d0] sm:$0xff] }
 0x187   :  { %1950 = vmatprep.subr.mxu1 %v918_v23  ;;  %1874 = vmatpush2.msra.mxu0 %v405_v55  ;;  %v727_v21 = vld [vmem:[#allocation5 + $0x13d0] sm:$0xff]  ;;  %v200_v23 = vld [vmem:[#allocation5 + $0x358] sm:$0xff] }
 0x188   :  { %1951 = vmatpush2.msra.mxu1 %v917_v25  ;;  %1875 = vmatprep.subr.mxu0 %v390_v56  ;;  %v712_v55 = vld [vmem:[#allocation5 + $0x1358] sm:$0xff]  ;;  %v199_v25 = vld [vmem:[#allocation5 + $0x350] sm:$0xff] }
 0x189   :  { %1952 = vmatprep.subr.mxu1 %v902_v57  ;;  %1876 = vmatpush2.msra.mxu0 %v389_v2  ;;  %v711_v56 = vld [vmem:[#allocation5 + $0x1350] sm:$0xff]  ;;  %v184_v57 = vld [vmem:[#allocation5 + $0x2d8] sm:$0xff] }
 0x18a   :  { %1953 = vmatpush2.msra.mxu1 %v901_v58  ;;  %1877 = vmatprep.subr.mxu0 %v374_v62  ;;  %v696_v2 = vld [vmem:[#allocation5 + $0x12d8] sm:$0xff]  ;;  %v183_v58 = vld [vmem:[#allocation5 + $0x2d0] sm:$0xff] }
 0x18b   :  { %1954 = vmatprep.subr.mxu1 %v886_v0  ;;  %1878 = vmatpush2.msra.mxu0 %v373_v4  ;;  %v695_v62 = vld [vmem:[#allocation5 + $0x12d0] sm:$0xff]  ;;  %v168_v0 = vld [vmem:[#allocation5 + $0x258] sm:$0xff] }
 0x18c   :  { %1955 = vmatpush2.msra.mxu1 %v885_v6  ;;  %1879 = vmatprep.subr.mxu0 %v358_v8  ;;  %v680_v4 = vld [vmem:[#allocation5 + $0x1258] sm:$0xff]  ;;  %v167_v6 = vld [vmem:[#allocation5 + $0x250] sm:$0xff] }
 0x18d   :  { %1956 = vmatprep.subr.mxu1 %v870_v9  ;;  %1880 = vmatpush2.msra.mxu0 %v357_v10  ;;  %v679_v8 = vld [vmem:[#allocation5 + $0x1250] sm:$0xff]  ;;  %v152_v9 = vld [vmem:[#allocation5 + $0x1d8] sm:$0xff] }
 0x18e   :  { %1881 = vmatprep.mubr.f32.mxu0 %v5284_v12  ;;  %1957 = vmatpush2.msra.mxu1 %v869_v11  ;;  %v664_v10 = vld [vmem:[#allocation5 + $0x11d8] sm:$0xff]  ;;  %v151_v11 = vld [vmem:[#allocation5 + $0x1d0] sm:$0xff] }
 0x18f   :  { %1882 = vmatmul.mubr.f32.vlgmr.msra.gmra.mxu0 %v5287_v15  ;;  %1958 = vmatprep.mubr.f32.mxu1 %v5290_v18 }
 0x190   :  { %1971 = vmatprep.subr.mxu0 %v344_v7  ;;  %2048 = vmatprep.subr.mxu1 %v856_v13  ;;  %v663_v7 = vld [vmem:[#allocation5 + $0x11d0] sm:$0xff]  ;;  %v136_v13 = vld [vmem:[#allocation5 + $0x158] sm:$0xff] }
 0x191   :  { %1959 = vmatmul.mubr.f32.vlgmr.msra.gmra.mxu1 %v5293_v24  ;;  %1972 = vmatpush1.msra.mxu0 %v343_v14  ;;  %v648_v14 = vld [vmem:[#allocation5 + $0x1158] sm:$0xff] }
 0x192   :  { %2049 = vmatpush1.msra.mxu1 %v855_v17  ;;  %1973 = vmatprep.subr.mxu0 %v328_v19  ;;  %v135_v17 = vld [vmem:[#allocation5 + $0x150] sm:$0xff] }
 0x193   :  { %2050 = vmatprep.subr.mxu1 %v840_v20  ;;  %1974 = vmatpush1.msra.mxu0 %v327_v63  ;;  %v647_v19 = vld [vmem:[#allocation5 + $0x1150] sm:$0xff]  ;;  %v120_v20 = vld [vmem:[#allocation5 + $0xd8] sm:$0xff] }
 0x194   :  { %2051 = vmatpush1.msra.mxu1 %v839_v1  ;;  %1975 = vmatprep.subr.mxu0 %v312_v26  ;;  %v632_v63 = vld [vmem:[#allocation5 + $0x10d8] sm:$0xff]  ;;  %v119_v1 = vld [vmem:[#allocation5 + $0xd0] sm:$0xff] }
 0x195   :  { %2052 = vmatprep.subr.mxu1 %v824_v27  ;;  %1976 = vmatpush1.msra.mxu0 %v311_v29  ;;  %v631_v26 = vld [vmem:[#allocation5 + $0x10d0] sm:$0xff]  ;;  %v104_v27 = vld [vmem:[#allocation5 + $0x58] sm:$0xff] }
 0x196   :  { %2053 = vmatpush1.msra.mxu1 %v823_v5  ;;  %1977 = vmatprep.subr.mxu0 %v296_v30  ;;  %v616_v29 = vld [vmem:[#allocation5 + $0x1058] sm:$0xff]  ;;  %v103_v5 = vld [vmem:[#allocation5 + $0x50] sm:$0xff] }
 0x197   :  { %2054 = vmatprep.subr.mxu1 %v808_v33  ;;  %1978 = vmatpush1.msra.mxu0 %v295_v35  ;;  %v615_v30 = vld [vmem:[#allocation5 + $0x1050] sm:$0xff]  ;;  %v600_v33 = vld [vmem:[#allocation5 + $0xfd8] sm:$0xff] }
 0x198   :  { %2055 = vmatpush1.msra.mxu1 %v807_v36  ;;  %1979 = vmatprep.subr.mxu0 %v280_v38  ;;  %v1112_v35 = vld [vmem:[#allocation5 + $0x1fd8] sm:$0xff]  ;;  %v599_v36 = vld [vmem:[#allocation5 + $0xfd0] sm:$0xff] }
 0x199   :  { %2056 = vmatprep.subr.mxu1 %v792_v39  ;;  %1980 = vmatpush1.msra.mxu0 %v279_v52  ;;  %v1111_v38 = vld [vmem:[#allocation5 + $0x1fd0] sm:$0xff]  ;;  %v584_v39 = vld [vmem:[#allocation5 + $0xf58] sm:$0xff] }
 0x19a   :  { %2057 = vmatpush1.msra.mxu1 %v791_v40  ;;  %1981 = vmatprep.subr.mxu0 %v264_v41  ;;  %v1096_v52 = vld [vmem:[#allocation5 + $0x1f58] sm:$0xff]  ;;  %v583_v40 = vld [vmem:[#allocation5 + $0xf50] sm:$0xff] }
 0x19b   :  { %2058 = vmatprep.subr.mxu1 %v776_v53  ;;  %1982 = vmatpush1.msra.mxu0 %v263_v42  ;;  %v1095_v41 = vld [vmem:[#allocation5 + $0x1f50] sm:$0xff]  ;;  %v568_v53 = vld [vmem:[#allocation5 + $0xed8] sm:$0xff] }
 0x19c   :  { %2059 = vmatpush1.msra.mxu1 %v775_v43  ;;  %1983 = vmatprep.subr.mxu0 %v248_v37  ;;  %v1080_v42 = vld [vmem:[#allocation5 + $0x1ed8] sm:$0xff]  ;;  %v567_v43 = vld [vmem:[#allocation5 + $0xed0] sm:$0xff] }
 0x19d   :  { %2060 = vmatprep.subr.mxu1 %v760_v44  ;;  %1984 = vmatpush1.msra.mxu0 %v247_v45  ;;  %v1079_v37 = vld [vmem:[#allocation5 + $0x1ed0] sm:$0xff]  ;;  %v552_v44 = vld [vmem:[#allocation5 + $0xe58] sm:$0xff] }
 0x19e   :  { %2061 = vmatpush1.msra.mxu1 %v759_v59  ;;  %1985 = vmatprep.subr.mxu0 %v232_v46  ;;  %v1064_v45 = vld [vmem:[#allocation5 + $0x1e58] sm:$0xff]  ;;  %v551_v59 = vld [vmem:[#allocation5 + $0xe50] sm:$0xff] }
 0x19f   :  { %2062 = vmatprep.subr.mxu1 %v744_v47  ;;  %1986 = vmatpush1.msra.mxu0 %v231_v48  ;;  %v1063_v46 = vld [vmem:[#allocation5 + $0x1e50] sm:$0xff]  ;;  %v536_v47 = vld [vmem:[#allocation5 + $0xdd8] sm:$0xff] }
 0x1a0   :  { %2063 = vmatpush1.msra.mxu1 %v743_v49  ;;  %1987 = vmatprep.subr.mxu0 %v216_v50  ;;  %v1048_v48 = vld [vmem:[#allocation5 + $0x1dd8] sm:$0xff]  ;;  %v535_v49 = vld [vmem:[#allocation5 + $0xdd0] sm:$0xff] }
 0x1a1   :  { %2064 = vmatprep.subr.mxu1 %v728_v28  ;;  %1988 = vmatpush1.msra.mxu0 %v215_v31  ;;  %v1047_v50 = vld [vmem:[#allocation5 + $0x1dd0] sm:$0xff]  ;;  %v520_v28 = vld [vmem:[#allocation5 + $0xd58] sm:$0xff] }
 0x1a2   :  { %2065 = vmatpush1.msra.mxu1 %v727_v21  ;;  %1989 = vmatprep.subr.mxu0 %v200_v23  ;;  %v1032_v31 = vld [vmem:[#allocation5 + $0x1d58] sm:$0xff]  ;;  %v519_v21 = vld [vmem:[#allocation5 + $0xd50] sm:$0xff] }
 0x1a3   :  { %2066 = vmatprep.subr.mxu1 %v712_v55  ;;  %1990 = vmatpush1.msra.mxu0 %v199_v25  ;;  %v1031_v23 = vld [vmem:[#allocation5 + $0x1d50] sm:$0xff]  ;;  %v5296_v55 = vpop.f32.mrf.mxu0  ;;  %v5298_v25 = vld [vmem:[#allocation2 + $0x28] sm:$0xff] }
 0x1a4   :  { %2067 = vmatpush1.msra.mxu1 %v711_v56  ;;  %1991 = vmatprep.subr.mxu0 %v184_v57  ;;  %v504_v56 = vld [vmem:[#allocation5 + $0xcd8] sm:$0xff]  ;;  %v5301_v57 = vld [vmem:[#allocation2 + $0x20] sm:$0xff] }
 0x1a5   :  { %2068 = vmatprep.subr.mxu1 %v696_v2  ;;  %1992 = vmatpush1.msra.mxu0 %v183_v58  ;;  %v1016_v2 = vld [vmem:[#allocation5 + $0x1cd8] sm:$0xff]  ;;  %v5304_v58 = vpop.f32.mrf.mxu1 }
 0x1a6   :  { %2069 = vmatpush1.msra.mxu1 %v695_v62  ;;  %1993 = vmatprep.subr.mxu0 %v168_v0  ;;  %v503_v62 = vld [vmem:[#allocation5 + $0xcd0] sm:$0xff] }
 0x1a7   :  { %2070 = vmatprep.subr.mxu1 %v680_v4  ;;  %1994 = vmatpush1.msra.mxu0 %v167_v6  ;;  %v1015_v0 = vld [vmem:[#allocation5 + $0x1cd0] sm:$0xff]  ;;  %v5306_v4 = vld [vmem:[#allocation2 + $0x38] sm:$0xff] }
 0x1a8   :  { %2071 = vmatpush1.msra.mxu1 %v679_v8  ;;  %1995 = vmatprep.subr.mxu0 %v152_v9  ;;  %v488_v6 = vld [vmem:[#allocation5 + $0xc58] sm:$0xff]  ;;  %v5309_v9 = vpop.f32.mrf.mxu0 }
 0x1a9   :  { %2072 = vmatprep.subr.mxu1 %v664_v10  ;;  %1996 = vmatpush1.msra.mxu0 %v151_v11  ;;  %v1000_v8 = vld [vmem:[#allocation5 + $0x1c58] sm:$0xff]  ;;  %v5311_v10 = vld [vmem:[#allocation2 + $0x30] sm:$0xff] }
 0x1aa   :  { %2073 = vmatpush1.msra.mxu1 %v663_v7  ;;  %1997 = vmatprep.subr.mxu0 %v136_v13  ;;  %v487_v11 = vld [vmem:[#allocation5 + $0xc50] sm:$0xff]  ;;  %v472_v13 = vld [vmem:[#allocation5 + $0xbd8] sm:$0xff] }
 0x1ab   :  { %2074 = vmatprep.subr.mxu1 %v648_v14  ;;  %1998 = vmatpush1.msra.mxu0 %v135_v17  ;;  %v999_v7 = vld [vmem:[#allocation5 + $0x1c50] sm:$0xff]  ;;  %v984_v14 = vld [vmem:[#allocation5 + $0x1bd8] sm:$0xff]  ;;  %v5859_v17 = vsub.s32 4, %v5239_v34 }
 0x1ac   :  { %2075 = vmatpush1.msra.mxu1 %v647_v19  ;;  %1999 = vmatprep.subr.mxu0 %v120_v20  ;;  %v5315_v19 = vpop.f32.mrf.mxu1 }
 0x1ad   :  { %2076 = vmatprep.subr.mxu1 %v632_v63  ;;  %2000 = vmatpush1.msra.mxu0 %v119_v1  ;;  %v471_v63 = vld [vmem:[#allocation5 + $0xbd0] sm:$0xff] }
 0x1ae   :  { %2077 = vmatpush1.msra.mxu1 %v631_v26  ;;  %2001 = vmatprep.subr.mxu0 %v104_v27  ;;  %v983_v1 = vld [vmem:[#allocation5 + $0x1bd0] sm:$0xff]  ;;  %v456_v26 = vld [vmem:[#allocation5 + $0xb58] sm:$0xff] }
 0x1af   :  { %2078 = vmatprep.subr.mxu1 %v616_v29  ;;  %2002 = vmatpush1.msra.mxu0 %v103_v5  ;;  %v968_v27 = vld [vmem:[#allocation5 + $0x1b58] sm:$0xff]  ;;  %v455_v5 = vld [vmem:[#allocation5 + $0xb50] sm:$0xff] }
 0x1b0   :  { %2079 = vmatpush1.msra.mxu1 %v615_v30  ;;  %2003 = vmatprep.subr.mxu0 %v600_v33  ;;  %v5317_v20 = vpop.f32.mrf.mxu0  ;;  %v967_v30 = vld [vmem:[#allocation5 + $0x1b50] sm:$0xff]  ;;  %v440_v33 = vld [vmem:[#allocation5 + $0xad8] sm:$0xff] }
 0x1b1   :  { %2080 = vmatprep.subr.mxu1 %v1112_v35  ;;  %2004 = vmatpush2.msra.mxu0 %v599_v36  ;;  %v952_v35 = vld [vmem:[#allocation5 + $0x1ad8] sm:$0xff]  ;;  %v5321_v36 = vld [vmem:[#allocation7] sm:$0xff] }
 0x1b2   :  { %2081 = vmatpush2.msra.mxu1 %v1111_v38  ;;  %2005 = vmatprep.subr.mxu0 %v584_v39  ;;  %v5326_v38 = vrot.slane %v5321_v36, %v5859_v17  ;;  %v5328_v39 = vpop.f32.mrf.mxu0 }
 0x1b3   :  { %2082 = vmatprep.subr.mxu1 %v1096_v52  ;;  %2006 = vmatpush2.msra.mxu0 %v583_v40  ;;  %v5319_v29 = vpop.f32.mrf.mxu1  ;;  %v439_v52 = vld [vmem:[#allocation5 + $0xad0] sm:$0xff] }
 0x1b4   :  { %2083 = vmatpush2.msra.mxu1 %v1095_v41  ;;  %2007 = vmatprep.subr.mxu0 %v568_v53  ;;  %v951_v40 = vld [vmem:[#allocation5 + $0x1ad0] sm:$0xff]  ;;  %v424_v41 = vld [vmem:[#allocation5 + $0xa58] sm:$0xff] }
 0x1b5   :  { %2084 = vmatprep.subr.mxu1 %v1080_v42  ;;  %2008 = vmatpush2.msra.mxu0 %v567_v43  ;;  %v936_v53 = vld [vmem:[#allocation5 + $0x1a58] sm:$0xff]  ;;  %v5330_v42 = vpop.f32.mrf.mxu1  ;;  %v423_v43 = vld [vmem:[#allocation5 + $0xa50] sm:$0xff] }
 0x1b6   :  { %2085 = vmatpush2.msra.mxu1 %v1079_v37  ;;  %2009 = vmatprep.subr.mxu0 %v552_v44  ;;  %v935_v37 = vld [vmem:[#allocation5 + $0x1a50] sm:$0xff] }
 0x1b7   :  { %2086 = vmatprep.subr.mxu1 %v1064_v45  ;;  %2010 = vmatpush2.msra.mxu0 %v551_v59  ;;  %v408_v45 = vld [vmem:[#allocation5 + $0x9d8] sm:$0xff] }
 0x1b8   :  { %2087 = vmatpush2.msra.mxu1 %v1063_v46  ;;  %2011 = vmatprep.subr.mxu0 %v536_v47  ;;  %v920_v59 = vld [vmem:[#allocation5 + $0x19d8] sm:$0xff]  ;;  %v407_v47 = vld [vmem:[#allocation5 + $0x9d0] sm:$0xff] }
 0x1b9   :  { %2088 = vmatprep.subr.mxu1 %v1048_v48  ;;  %2012 = vmatpush2.msra.mxu0 %v535_v49  ;;  %v919_v48 = vld [vmem:[#allocation5 + $0x19d0] sm:$0xff] }
 0x1ba   :  { %2089 = vmatpush2.msra.mxu1 %v1047_v50  ;;  %1887 = vmatprep.mubr.f32.mxu0 %v5298_v25  ;;  %v392_v50 = vld [vmem:[#allocation5 + $0x958] sm:$0xff] }
 0x1bb   :  { %2013 = vmatprep.subr.mxu0 %v520_v28  ;;  %2090 = vmatprep.subr.mxu1 %v1032_v31  ;;  %v904_v28 = vld [vmem:[#allocation5 + $0x1958] sm:$0xff] }
 0x1bc   :  { %1888 = vmatmul.mubr.f32.gmra.mxu0 %v5301_v57  ;;  %2091 = vmatpush2.msra.mxu1 %v1031_v23  ;;  %v903_v23 = vld [vmem:[#allocation5 + $0x1950] sm:$0xff] }
 0x1bd   :  { %2014 = vmatpush2.msra.mxu0 %v519_v21  ;;  %1964 = vmatprep.mubr.f32.mxu1 %v5306_v4  ;;  %v391_v21 = vld [vmem:[#allocation5 + $0x950] sm:$0xff] }
 0x1be   :  { %2015 = vmatprep.subr.mxu0 %v504_v56  ;;  %2092 = vmatprep.subr.mxu1 %v1016_v2  ;;  %v376_v56 = vld [vmem:[#allocation5 + $0x8d8] sm:$0xff] }
 0x1bf   :  { %1965 = vmatmul.mubr.f32.gmra.mxu1 %v5311_v10  ;;  %2016 = vmatpush2.msra.mxu0 %v503_v62  ;;  %v888_v2 = vld [vmem:[#allocation5 + $0x18d8] sm:$0xff]  ;;  %v375_v62 = vld [vmem:[#allocation5 + $0x8d0] sm:$0xff] }
 0x1c0   :  { %2093 = vmatpush2.msra.mxu1 %v1015_v0  ;;  %2017 = vmatprep.subr.mxu0 %v488_v6  ;;  %v887_v0 = vld [vmem:[#allocation5 + $0x18d0] sm:$0xff]  ;;  %v360_v6 = vld [vmem:[#allocation5 + $0x858] sm:$0xff] }
 0x1c1   :  { %2094 = vmatprep.subr.mxu1 %v1000_v8  ;;  %2018 = vmatpush2.msra.mxu0 %v487_v11  ;;  %v872_v8 = vld [vmem:[#allocation5 + $0x1858] sm:$0xff]  ;;  %v359_v11 = vld [vmem:[#allocation5 + $0x850] sm:$0xff] }
 0x1c2   :  { %2095 = vmatpush2.msra.mxu1 %v999_v7  ;;  %2019 = vmatprep.subr.mxu0 %v472_v13  ;;  %v871_v7 = vld [vmem:[#allocation5 + $0x1850] sm:$0xff]  ;;  %v346_v13 = vld [vmem:[#allocation5 + $0x7e8] sm:$0xff] }
 0x1c3   :  { %2096 = vmatprep.subr.mxu1 %v984_v14  ;;  %2020 = vmatpush2.msra.mxu0 %v471_v63  ;;  %v858_v14 = vld [vmem:[#allocation5 + $0x17e8] sm:$0xff]  ;;  %v345_v63 = vld [vmem:[#allocation5 + $0x7e0] sm:$0xff] }
 0x1c4   :  { %2097 = vmatpush2.msra.mxu1 %v983_v1  ;;  %2021 = vmatprep.subr.mxu0 %v456_v26  ;;  %v857_v1 = vld [vmem:[#allocation5 + $0x17e0] sm:$0xff]  ;;  %v330_v26 = vld [vmem:[#allocation5 + $0x768] sm:$0xff] }
 0x1c5   :  { %2098 = vmatprep.subr.mxu1 %v968_v27  ;;  %2022 = vmatpush2.msra.mxu0 %v455_v5  ;;  %v842_v27 = vld [vmem:[#allocation5 + $0x1768] sm:$0xff]  ;;  %v329_v5 = vld [vmem:[#allocation5 + $0x760] sm:$0xff] }
 0x1c6   :  { %2099 = vmatpush2.msra.mxu1 %v967_v30  ;;  %2023 = vmatprep.subr.mxu0 %v440_v33  ;;  %v841_v30 = vld [vmem:[#allocation5 + $0x1760] sm:$0xff]  ;;  %v314_v33 = vld [vmem:[#allocation5 + $0x6e8] sm:$0xff] }
 0x1c7   :  { %2100 = vmatprep.subr.mxu1 %v952_v35  ;;  %v1575_v44 = vpop.f32.mrf.mxu0  ;;  %2024 = vmatpush2.msra.mxu0 %v439_v52  ;;  %v313_v35 = vld [vmem:[#allocation5 + $0x6e0] sm:$0xff]  ;;  %v298_v52 = vld [vmem:[#allocation5 + $0x668] sm:$0xff] }
 0x1c8   :  { %2101 = vmatpush2.msra.mxu1 %v951_v40  ;;  %v1576_v46 = vadd.f32 %v1575_v44, %v5326_v38  ;;  %2025 = vmatprep.subr.mxu0 %v424_v41  ;;  %v297_v40 = vld [vmem:[#allocation5 + $0x660] sm:$0xff]  ;;  %v266_v44 = vld [vmem:[#allocation5 + $0x568] sm:$0xff] }
 0x1c9   :  { %2102 = vmatprep.subr.mxu1 %v936_v53  ;;  %v1652_v49 = vpop.f32.mrf.mxu1  ;;  %2026 = vmatpush2.msra.mxu0 %v423_v43  ;;  %v809_v41 = vld [vmem:[#allocation5 + $0x1660] sm:$0xff]  ;;  %v794_v53 = vld [vmem:[#allocation5 + $0x15e8] sm:$0xff] }
 0x1ca   :  { %2103 = vmatpush2.msra.mxu1 %v935_v37  ;;  %v5333_v31 = vadd.f32 %v1652_v49, %v1576_v46  ;;  %2027 = vmatprep.subr.mxu0 %v408_v45  ;;  %v281_v43 = vld [vmem:[#allocation5 + $0x5e0] sm:$0xff]  ;;  %v778_v45 = vld [vmem:[#allocation5 + $0x1568] sm:$0xff] }
 0x1cb   :  { %2104 = vmatprep.subr.mxu1 %v920_v59  ;;  %2028 = vmatpush2.msra.mxu0 %v407_v47  ;;  %v793_v37 = vld [vmem:[#allocation5 + $0x15e0] sm:$0xff]  ;;  %v250_v47 = vld [vmem:[#allocation5 + $0x4e8] sm:$0xff] }
 0x1cc   :  { %2105 = vmatpush2.msra.mxu1 %v919_v48  ;;  %2029 = vmatprep.subr.mxu0 %v392_v50  ;;  %v265_v59 = vld [vmem:[#allocation5 + $0x560] sm:$0xff]  ;;  %v762_v48 = vld [vmem:[#allocation5 + $0x14e8] sm:$0xff] }
 0x1cd   :  { %2106 = vmatprep.subr.mxu1 %v904_v28  ;;  %2030 = vmatpush2.msra.mxu0 %v391_v21  ;;  %v777_v46 = vld [vmem:[#allocation5 + $0x1560] sm:$0xff]  ;;  %v234_v28 = vld [vmem:[#allocation5 + $0x468] sm:$0xff] }
 0x1ce   :  { %2107 = vmatpush2.msra.mxu1 %v903_v23  ;;  %2031 = vmatprep.subr.mxu0 %v376_v56  ;;  %v249_v49 = vld [vmem:[#allocation5 + $0x4e0] sm:$0xff]  ;;  %v746_v21 = vld [vmem:[#allocation5 + $0x1468] sm:$0xff] }
 0x1cf   :  { %2108 = vmatprep.subr.mxu1 %v888_v2  ;;  %2032 = vmatpush2.msra.mxu0 %v375_v62  ;;  %v761_v50 = vld [vmem:[#allocation5 + $0x14e0] sm:$0xff]  ;;  %v218_v2 = vld [vmem:[#allocation5 + $0x3e8] sm:$0xff] }
 0x1d0   :  { %2109 = vmatpush2.msra.mxu1 %v887_v0  ;;  %2033 = vmatprep.subr.mxu0 %v360_v6  ;;  %v233_v23 = vld [vmem:[#allocation5 + $0x460] sm:$0xff]  ;;  %v730_v62 = vld [vmem:[#allocation5 + $0x13e8] sm:$0xff] }
 0x1d1   :  { %2110 = vmatprep.subr.mxu1 %v872_v8  ;;  %2034 = vmatpush2.msra.mxu0 %v359_v11  ;;  %v745_v56 = vld [vmem:[#allocation5 + $0x1460] sm:$0xff]  ;;  %v202_v8 = vld [vmem:[#allocation5 + $0x368] sm:$0xff] }
 0x1d2   :  { %2035 = vmatprep.mubr.f32.mxu0 %v5284_v12  ;;  %2111 = vmatpush2.msra.mxu1 %v871_v7  ;;  %v826_v12 = vld [vmem:[#allocation5 + $0x16e8] sm:$0xff]  ;;  %v217_v0 = vld [vmem:[#allocation5 + $0x3e0] sm:$0xff] }
 0x1d3   :  { %2036 = vmatmul.mubr.f32.vlgmr.msra.gmra.mxu0 %v5287_v15  ;;  %2112 = vmatprep.mubr.f32.mxu1 %v5290_v18  ;;  %v825_v15 = vld [vmem:[#allocation5 + $0x16e0] sm:$0xff]  ;;  %v810_v18 = vld [vmem:[#allocation5 + $0x1668] sm:$0xff] }
 0x1d4   :  { %2125 = vmatprep.subr.mxu0 %v346_v13  ;;  %2202 = vmatprep.subr.mxu1 %v858_v14  ;;  %v729_v6 = vld [vmem:[#allocation5 + $0x13e0] sm:$0xff]  ;;  %v714_v11 = vld [vmem:[#allocation5 + $0x1368] sm:$0xff] }
 0x1d5   :  { %2113 = vmatmul.mubr.f32.vlgmr.msra.gmra.mxu1 %v5293_v24  ;;  %2126 = vmatpush1.msra.mxu0 %v345_v63  ;;  %v282_v24 = vld [vmem:[#allocation5 + $0x5e8] sm:$0xff]  ;;  %v201_v7 = vld [vmem:[#allocation5 + $0x360] sm:$0xff] }
 0x1d6   :  { %2203 = vmatpush1.msra.mxu1 %v857_v1  ;;  %2127 = vmatprep.subr.mxu0 %v330_v26  ;;  %v713_v13 = vld [vmem:[#allocation5 + $0x1360] sm:$0xff]  ;;  %v186_v14 = vld [vmem:[#allocation5 + $0x2e8] sm:$0xff] }
 0x1d7   :  { %2204 = vmatprep.subr.mxu1 %v842_v27  ;;  %2128 = vmatpush1.msra.mxu0 %v329_v5  ;;  %v698_v63 = vld [vmem:[#allocation5 + $0x12e8] sm:$0xff]  ;;  %v185_v1 = vld [vmem:[#allocation5 + $0x2e0] sm:$0xff] }
 0x1d8   :  { %2205 = vmatpush1.msra.mxu1 %v841_v30  ;;  %2129 = vmatprep.subr.mxu0 %v314_v33  ;;  %v697_v26 = vld [vmem:[#allocation5 + $0x12e0] sm:$0xff]  ;;  %v170_v27 = vld [vmem:[#allocation5 + $0x268] sm:$0xff] }
 0x1d9   :  { %2206 = vmatprep.subr.mxu1 %v826_v12  ;;  %2130 = vmatpush1.msra.mxu0 %v313_v35  ;;  %v682_v5 = vld [vmem:[#allocation5 + $0x1268] sm:$0xff]  ;;  %v169_v30 = vld [vmem:[#allocation5 + $0x260] sm:$0xff] }
 0x1da   :  { %2207 = vmatpush1.msra.mxu1 %v825_v15  ;;  %2131 = vmatprep.subr.mxu0 %v298_v52  ;;  %v681_v33 = vld [vmem:[#allocation5 + $0x1260] sm:$0xff]  ;;  %v154_v12 = vld [vmem:[#allocation5 + $0x1e8] sm:$0xff] }
 0x1db   :  { %2208 = vmatprep.subr.mxu1 %v810_v18  ;;  %2132 = vmatpush1.msra.mxu0 %v297_v40  ;;  %v666_v35 = vld [vmem:[#allocation5 + $0x11e8] sm:$0xff]  ;;  %v153_v15 = vld [vmem:[#allocation5 + $0x1e0] sm:$0xff] }
 0x1dc   :  { %2209 = vmatpush1.msra.mxu1 %v809_v41  ;;  %2133 = vmatprep.subr.mxu0 %v282_v24  ;;  %v665_v52 = vld [vmem:[#allocation5 + $0x11e0] sm:$0xff]  ;;  %v138_v18 = vld [vmem:[#allocation5 + $0x168] sm:$0xff] }
 0x1dd   :  { %2210 = vmatprep.subr.mxu1 %v794_v53  ;;  %2134 = vmatpush1.msra.mxu0 %v281_v43  ;;  %v650_v40 = vld [vmem:[#allocation5 + $0x1168] sm:$0xff]  ;;  %v137_v41 = vld [vmem:[#allocation5 + $0x160] sm:$0xff] }
 0x1de   :  { %2211 = vmatpush1.msra.mxu1 %v793_v37  ;;  %2135 = vmatprep.subr.mxu0 %v266_v44  ;;  %v649_v24 = vld [vmem:[#allocation5 + $0x1160] sm:$0xff]  ;;  %v122_v53 = vld [vmem:[#allocation5 + $0xe8] sm:$0xff] }
 0x1df   :  { %2212 = vmatprep.subr.mxu1 %v778_v45  ;;  %2136 = vmatpush1.msra.mxu0 %v265_v59  ;;  %v634_v43 = vld [vmem:[#allocation5 + $0x10e8] sm:$0xff]  ;;  %v121_v37 = vld [vmem:[#allocation5 + $0xe0] sm:$0xff] }
 0x1e0   :  { %2213 = vmatpush1.msra.mxu1 %v777_v46  ;;  %2137 = vmatprep.subr.mxu0 %v250_v47  ;;  %v633_v44 = vld [vmem:[#allocation5 + $0x10e0] sm:$0xff]  ;;  %v106_v45 = vld [vmem:[#allocation5 + $0x68] sm:$0xff]  ;;  %v1143_v46 = vsub.s32 5, %v5239_v34 }
 0x1e1   :  { %2214 = vmatprep.subr.mxu1 %v762_v48  ;;  %2138 = vmatpush1.msra.mxu0 %v249_v49  ;;  %v618_v59 = vld [vmem:[#allocation5 + $0x1068] sm:$0xff]  ;;  %v105_v47 = vld [vmem:[#allocation5 + $0x60] sm:$0xff]  ;;  %v5340_v49 = vpop.f32.mrf.mxu0 }
 0x1e2   :  { %2215 = vmatpush1.msra.mxu1 %v761_v50  ;;  %2139 = vmatprep.subr.mxu0 %v234_v28  ;;  %v617_v48 = vld [vmem:[#allocation5 + $0x1060] sm:$0xff]  ;;  %v602_v50 = vld [vmem:[#allocation5 + $0xfe8] sm:$0xff] }
 0x1e3   :  { %2216 = vmatprep.subr.mxu1 %v746_v21  ;;  %2140 = vmatpush1.msra.mxu0 %v233_v23  ;;  %v1114_v28 = vld [vmem:[#allocation5 + $0x1fe8] sm:$0xff]  ;;  %v601_v21 = vld [vmem:[#allocation5 + $0xfe0] sm:$0xff] }
 0x1e4   :  { %2217 = vmatpush1.msra.mxu1 %v745_v56  ;;  %2141 = vmatprep.subr.mxu0 %v218_v2  ;;  %v1113_v23 = vld [vmem:[#allocation5 + $0x1fe0] sm:$0xff]  ;;  %v586_v56 = vld [vmem:[#allocation5 + $0xf68] sm:$0xff] }
 0x1e5   :  { %2218 = vmatprep.subr.mxu1 %v730_v62  ;;  %2142 = vmatpush1.msra.mxu0 %v217_v0  ;;  %v1098_v2 = vld [vmem:[#allocation5 + $0x1f68] sm:$0xff]  ;;  %v5345_v0 = vrot.slane %v5321_v36, %v1143_v46 }
 0x1e6   :  { %2219 = vmatpush1.msra.mxu1 %v729_v6  ;;  %2143 = vmatprep.subr.mxu0 %v202_v8  ;;  %v5347_v6 = vpop.f32.mrf.mxu1  ;;  %v585_v8 = vld [vmem:[#allocation5 + $0xf60] sm:$0xff] }
 0x1e7   :  { %2220 = vmatprep.subr.mxu1 %v714_v11  ;;  %2144 = vmatpush1.msra.mxu0 %v201_v7  ;;  %v1097_v11 = vld [vmem:[#allocation5 + $0x1f60] sm:$0xff] }
 0x1e8   :  { %2221 = vmatpush1.msra.mxu1 %v713_v13  ;;  %2145 = vmatprep.subr.mxu0 %v186_v14  ;;  %v570_v13 = vld [vmem:[#allocation5 + $0xee8] sm:$0xff] }
 0x1e9   :  { %2222 = vmatprep.subr.mxu1 %v698_v63  ;;  %2146 = vmatpush1.msra.mxu0 %v185_v1  ;;  %v1082_v14 = vld [vmem:[#allocation5 + $0x1ee8] sm:$0xff]  ;;  %v569_v1 = vld [vmem:[#allocation5 + $0xee0] sm:$0xff] }
 0x1ea   :  { %2223 = vmatpush1.msra.mxu1 %v697_v26  ;;  %2147 = vmatprep.subr.mxu0 %v170_v27  ;;  %v1081_v26 = vld [vmem:[#allocation5 + $0x1ee0] sm:$0xff] }
 0x1eb   :  { %2224 = vmatprep.subr.mxu1 %v682_v5  ;;  %2148 = vmatpush1.msra.mxu0 %v169_v30  ;;  %v554_v30 = vld [vmem:[#allocation5 + $0xe68] sm:$0xff] }
 0x1ec   :  { %2225 = vmatpush1.msra.mxu1 %v681_v33  ;;  %2149 = vmatprep.subr.mxu0 %v154_v12  ;;  %v1066_v33 = vld [vmem:[#allocation5 + $0x1e68] sm:$0xff] }
 0x1ed   :  { %2226 = vmatprep.subr.mxu1 %v666_v35  ;;  %2150 = vmatpush1.msra.mxu0 %v153_v15  ;;  %v1065_v35 = vld [vmem:[#allocation5 + $0x1e60] sm:$0xff] }
 0x1ee   :  { %2227 = vmatpush1.msra.mxu1 %v665_v52  ;;  %2151 = vmatprep.subr.mxu0 %v138_v18  ;;  %v538_v52 = vld [vmem:[#allocation5 + $0xde8] sm:$0xff] }
 0x1ef   :  { %2228 = vmatprep.subr.mxu1 %v650_v40  ;;  %2152 = vmatpush1.msra.mxu0 %v137_v41  ;;  %v1050_v18 = vld [vmem:[#allocation5 + $0x1de8] sm:$0xff]  ;;  %v537_v41 = vld [vmem:[#allocation5 + $0xde0] sm:$0xff] }
 0x1f0   :  { %2229 = vmatpush1.msra.mxu1 %v649_v24  ;;  %2153 = vmatprep.subr.mxu0 %v122_v53  ;;  %v1049_v24 = vld [vmem:[#allocation5 + $0x1de0] sm:$0xff]  ;;  %v522_v53 = vld [vmem:[#allocation5 + $0xd68] sm:$0xff] }
 0x1f1   :  { %2230 = vmatprep.subr.mxu1 %v634_v43  ;;  %2154 = vmatpush1.msra.mxu0 %v121_v37  ;;  %v1034_v43 = vld [vmem:[#allocation5 + $0x1d68] sm:$0xff]  ;;  %v521_v37 = vld [vmem:[#allocation5 + $0xd60] sm:$0xff] }
 0x1f2   :  { %2231 = vmatpush1.msra.mxu1 %v633_v44  ;;  %2155 = vmatprep.subr.mxu0 %v106_v45  ;;  %v1033_v44 = vld [vmem:[#allocation5 + $0x1d60] sm:$0xff]  ;;  %v506_v45 = vld [vmem:[#allocation5 + $0xce8] sm:$0xff] }
 0x1f3   :  { %2232 = vmatprep.subr.mxu1 %v618_v59  ;;  %2156 = vmatpush1.msra.mxu0 %v105_v47  ;;  %v1018_v59 = vld [vmem:[#allocation5 + $0x1ce8] sm:$0xff]  ;;  %v505_v47 = vld [vmem:[#allocation5 + $0xce0] sm:$0xff] }
 0x1f4   :  { %2233 = vmatpush1.msra.mxu1 %v617_v48  ;;  %v1581_v62 = vpop.f32.mrf.mxu0  ;;  %2157 = vmatprep.subr.mxu0 %v602_v50  ;;  %v1017_v48 = vld [vmem:[#allocation5 + $0x1ce0] sm:$0xff]  ;;  %v490_v50 = vld [vmem:[#allocation5 + $0xc68] sm:$0xff] }
 0x1f5   :  { %2234 = vmatprep.subr.mxu1 %v1114_v28  ;;  %v1582_v7 = vadd.f32 %v1581_v62, %v5326_v38  ;;  %2158 = vmatpush2.msra.mxu0 %v601_v21  ;;  %v553_v38 = vld [vmem:[#allocation5 + $0xe60] sm:$0xff]  ;;  %v1002_v28 = vld [vmem:[#allocation5 + $0x1c68] sm:$0xff] }
 0x1f6   :  { %2235 = vmatpush2.msra.mxu1 %v1113_v23  ;;  %v1583_v63 = vpop.f32.mrf.mxu0  ;;  %2159 = vmatprep.subr.mxu0 %v586_v56  ;;  %v489_v21 = vld [vmem:[#allocation5 + $0xc60] sm:$0xff]  ;;  %v474_v23 = vld [vmem:[#allocation5 + $0xbe8] sm:$0xff] }
 0x1f7   :  { %2236 = vmatprep.subr.mxu1 %v1098_v2  ;;  %v1584_v27 = vadd.f32 %v1583_v63, %v5345_v0  ;;  %v1658_v5 = vpop.f32.mrf.mxu1  ;;  %2160 = vmatpush2.msra.mxu0 %v585_v8  ;;  %v986_v56 = vld [vmem:[#allocation5 + $0x1be8] sm:$0xff]  ;;  %v985_v2 = vld [vmem:[#allocation5 + $0x1be0] sm:$0xff] }
 0x1f8   :  { %2237 = vmatpush2.msra.mxu1 %v1097_v11  ;;  %v5351_v12 = vadd.f32 %v1658_v5, %v1582_v7  ;;  %2161 = vmatprep.subr.mxu0 %v570_v13  ;;  %v458_v62 = vld [vmem:[#allocation5 + $0xb68] sm:$0xff]  ;;  %v457_v8 = vld [vmem:[#allocation5 + $0xb60] sm:$0xff] }
 0x1f9   :  { %2238 = vmatprep.subr.mxu1 %v1082_v14  ;;  %v1660_v15 = vpop.f32.mrf.mxu1  ;;  %2162 = vmatpush2.msra.mxu0 %v569_v1  ;;  %v969_v11 = vld [vmem:[#allocation5 + $0x1b60] sm:$0xff]  ;;  %v954_v7 = vld [vmem:[#allocation5 + $0x1ae8] sm:$0xff] }
 0x1fa   :  { %2239 = vmatpush2.msra.mxu1 %v1081_v26  ;;  %v5353_v40 = vadd.f32 %v1660_v15, %v1584_v27  ;;  %2163 = vmatprep.subr.mxu0 %v554_v30  ;;  %v441_v13 = vld [vmem:[#allocation5 + $0xae0] sm:$0xff]  ;;  %v426_v63 = vld [vmem:[#allocation5 + $0xa68] sm:$0xff] }
 0x1fb   :  { %2240 = vmatprep.subr.mxu1 %v1066_v33  ;;  %2164 = vmatpush2.msra.mxu0 %v553_v38  ;;  %v953_v14 = vld [vmem:[#allocation5 + $0x1ae0] sm:$0xff]  ;;  %v938_v1 = vld [vmem:[#allocation5 + $0x1a68] sm:$0xff] }
 0x1fc   :  { %2241 = vmatpush2.msra.mxu1 %v1065_v35  ;;  %2165 = vmatprep.subr.mxu0 %v538_v52  ;;  %v425_v26 = vld [vmem:[#allocation5 + $0xa60] sm:$0xff]  ;;  %v410_v5 = vld [vmem:[#allocation5 + $0x9e8] sm:$0xff] }
 0x1fd   :  { %2242 = vmatprep.subr.mxu1 %v1050_v18  ;;  %2166 = vmatpush2.msra.mxu0 %v537_v41  ;;  %v937_v27 = vld [vmem:[#allocation5 + $0x1a60] sm:$0xff]  ;;  %v922_v30 = vld [vmem:[#allocation5 + $0x19e8] sm:$0xff] }
 0x1fe   :  { %2243 = vmatpush2.msra.mxu1 %v1049_v24  ;;  %2041 = vmatprep.mubr.f32.mxu0 %v5298_v25  ;;  %v1001_v25 = vld [vmem:[#allocation5 + $0x1c60] sm:$0xff]  ;;  %v394_v35 = vld [vmem:[#allocation5 + $0x968] sm:$0xff] }
 0x1ff   :  { %2167 = vmatprep.subr.mxu0 %v522_v53  ;;  %2244 = vmatprep.subr.mxu1 %v1034_v43  ;;  %v409_v33 = vld [vmem:[#allocation5 + $0x9e0] sm:$0xff]  ;;  %v906_v15 = vld [vmem:[#allocation5 + $0x1968] sm:$0xff] }
 0x200   :  { %2042 = vmatmul.mubr.f32.gmra.mxu0 %v5301_v57  ;;  %2245 = vmatpush2.msra.mxu1 %v1033_v44  ;;  %v473_v57 = vld [vmem:[#allocation5 + $0xbe0] sm:$0xff]  ;;  %v378_v41 = vld [vmem:[#allocation5 + $0x8e8] sm:$0xff] }
 0x201   :  { %2168 = vmatpush2.msra.mxu0 %v521_v37  ;;  %2118 = vmatprep.mubr.f32.mxu1 %v5306_v4  ;;  %v970_v4 = vld [vmem:[#allocation5 + $0x1b68] sm:$0xff]  ;;  %v921_v38 = vld [vmem:[#allocation5 + $0x19e0] sm:$0xff] }
 0x202   :  { %2169 = vmatprep.subr.mxu0 %v506_v45  ;;  %2246 = vmatprep.subr.mxu1 %v1018_v59  ;;  %v393_v52 = vld [vmem:[#allocation5 + $0x960] sm:$0xff]  ;;  %v890_v24 = vld [vmem:[#allocation5 + $0x18e8] sm:$0xff] }
 0x203   :  { %2119 = vmatmul.mubr.f32.gmra.mxu1 %v5311_v10  ;;  %2170 = vmatpush2.msra.mxu0 %v505_v47  ;;  %v442_v10 = vld [vmem:[#allocation5 + $0xae8] sm:$0xff]  ;;  %v905_v18 = vld [vmem:[#allocation5 + $0x1960] sm:$0xff]  ;;  %v348_v47 = vld [vmem:[#allocation5 + $0x7f8] sm:$0xff] }
 0x204   :  { %2247 = vmatpush2.msra.mxu1 %v1017_v48  ;;  %2171 = vmatprep.subr.mxu0 %v490_v50  ;;  %v377_v53 = vld [vmem:[#allocation5 + $0x8e0] sm:$0xff]  ;;  %v362_v37 = vld [vmem:[#allocation5 + $0x868] sm:$0xff]  ;;  %v860_v50 = vld [vmem:[#allocation5 + $0x17f8] sm:$0xff] }
 0x205   :  { %2248 = vmatprep.subr.mxu1 %v1002_v28  ;;  %2172 = vmatpush2.msra.mxu0 %v489_v21  ;;  %v889_v43 = vld [vmem:[#allocation5 + $0x18e0] sm:$0xff]  ;;  %v874_v44 = vld [vmem:[#allocation5 + $0x1868] sm:$0xff]  ;;  %v347_v21 = vld [vmem:[#allocation5 + $0x7f0] sm:$0xff] }
 0x206   :  { %2249 = vmatpush2.msra.mxu1 %v1001_v25  ;;  %2173 = vmatprep.subr.mxu0 %v474_v23  ;;  %v361_v45 = vld [vmem:[#allocation5 + $0x860] sm:$0xff]  ;;  %v5359_v48 = vld [vmem:[#allocation2 + $0x8] sm:$0xff]  ;;  %v859_v25 = vld [vmem:[#allocation5 + $0x17f0] sm:$0xff] }
 0x207   :  { %2250 = vmatprep.subr.mxu1 %v986_v56  ;;  %2174 = vmatpush2.msra.mxu0 %v473_v57  ;;  %v873_v59 = vld [vmem:[#allocation5 + $0x1860] sm:$0xff]  ;;  %v5365_v23 = vld [vmem:[#allocation2 + $0x18] sm:$0xff] }
 0x208   :  { %2251 = vmatpush2.msra.mxu1 %v985_v2  ;;  %2175 = vmatprep.subr.mxu0 %v458_v62  ;;  %v5362_v28 = vld [vmem:[#allocation2] sm:$0xff]  ;;  %v332_v56 = vld [vmem:[#allocation5 + $0x778] sm:$0xff]  ;;  %v5368_v2 = vld [vmem:[#allocation2 + $0x10] sm:$0xff] }
 0x209   :  { %2252 = vmatprep.subr.mxu1 %v970_v4  ;;  %2176 = vmatpush2.msra.mxu0 %v457_v8  ;;  %v844_v57 = vld [vmem:[#allocation5 + $0x1778] sm:$0xff]  ;;  %v331_v62 = vld [vmem:[#allocation5 + $0x770] sm:$0xff] }
 0x20a   :  { %2253 = vmatpush2.msra.mxu1 %v969_v11  ;;  %2177 = vmatprep.subr.mxu0 %v442_v10  ;;  %v843_v4 = vld [vmem:[#allocation5 + $0x1770] sm:$0xff]  ;;  %v316_v8 = vld [vmem:[#allocation5 + $0x6f8] sm:$0xff] }
 0x20b   :  { %2254 = vmatprep.subr.mxu1 %v954_v7  ;;  %2178 = vmatpush2.msra.mxu0 %v441_v13  ;;  %v828_v11 = vld [vmem:[#allocation5 + $0x16f8] sm:$0xff]  ;;  %v315_v10 = vld [vmem:[#allocation5 + $0x6f0] sm:$0xff] }
 0x20c   :  { %2255 = vmatpush2.msra.mxu1 %v953_v14  ;;  %2179 = vmatprep.subr.mxu0 %v426_v63  ;;  %v827_v7 = vld [vmem:[#allocation5 + $0x16f0] sm:$0xff]  ;;  %v300_v13 = vld [vmem:[#allocation5 + $0x678] sm:$0xff] }
 0x20d   :  { %2256 = vmatprep.subr.mxu1 %v938_v1  ;;  %2180 = vmatpush2.msra.mxu0 %v425_v26  ;;  %v812_v14 = vld [vmem:[#allocation5 + $0x1678] sm:$0xff]  ;;  %v299_v63 = vld [vmem:[#allocation5 + $0x670] sm:$0xff] }
 0x20e   :  { %2257 = vmatpush2.msra.mxu1 %v937_v27  ;;  %2181 = vmatprep.subr.mxu0 %v410_v5  ;;  %v811_v1 = vld [vmem:[#allocation5 + $0x1670] sm:$0xff]  ;;  %v284_v26 = vld [vmem:[#allocation5 + $0x5f8] sm:$0xff] }
 0x20f   :  { %2258 = vmatprep.subr.mxu1 %v922_v30  ;;  %2182 = vmatpush2.msra.mxu0 %v409_v33  ;;  %v796_v27 = vld [vmem:[#allocation5 + $0x15f8] sm:$0xff]  ;;  %v283_v5 = vld [vmem:[#allocation5 + $0x5f0] sm:$0xff] }
 0x210   :  { %2259 = vmatpush2.msra.mxu1 %v921_v38  ;;  %2183 = vmatprep.subr.mxu0 %v394_v35  ;;  %v795_v30 = vld [vmem:[#allocation5 + $0x15f0] sm:$0xff]  ;;  %v268_v33 = vld [vmem:[#allocation5 + $0x578] sm:$0xff] }
 0x211   :  { %2260 = vmatprep.subr.mxu1 %v906_v15  ;;  %2184 = vmatpush2.msra.mxu0 %v393_v52  ;;  %v780_v38 = vld [vmem:[#allocation5 + $0x1578] sm:$0xff]  ;;  %v267_v35 = vld [vmem:[#allocation5 + $0x570] sm:$0xff] }
 0x212   :  { %2261 = vmatpush2.msra.mxu1 %v905_v18  ;;  %2185 = vmatprep.subr.mxu0 %v378_v41  ;;  %v779_v15 = vld [vmem:[#allocation5 + $0x1570] sm:$0xff]  ;;  %v252_v52 = vld [vmem:[#allocation5 + $0x4f8] sm:$0xff] }
 0x213   :  { %2262 = vmatprep.subr.mxu1 %v890_v24  ;;  %2186 = vmatpush2.msra.mxu0 %v377_v53  ;;  %v764_v18 = vld [vmem:[#allocation5 + $0x14f8] sm:$0xff]  ;;  %v251_v41 = vld [vmem:[#allocation5 + $0x4f0] sm:$0xff] }
 0x214   :  { %2263 = vmatpush2.msra.mxu1 %v889_v43  ;;  %2187 = vmatprep.subr.mxu0 %v362_v37  ;;  %v763_v24 = vld [vmem:[#allocation5 + $0x14f0] sm:$0xff]  ;;  %v236_v53 = vld [vmem:[#allocation5 + $0x478] sm:$0xff] }
 0x215   :  { %2264 = vmatprep.subr.mxu1 %v874_v44  ;;  %2188 = vmatpush2.msra.mxu0 %v361_v45  ;;  %v748_v43 = vld [vmem:[#allocation5 + $0x1478] sm:$0xff]  ;;  %v235_v37 = vld [vmem:[#allocation5 + $0x470] sm:$0xff] }
 0x216   :  { %2189 = vmatprep.mubr.f32.mxu0 %v5359_v48  ;;  %2265 = vmatpush2.msra.mxu1 %v873_v59  ;;  %v747_v44 = vld [vmem:[#allocation5 + $0x1470] sm:$0xff]  ;;  %v220_v45 = vld [vmem:[#allocation5 + $0x3f8] sm:$0xff] }
 0x217   :  { %2190 = vmatmul.mubr.f32.vlgmr.msra.gmra.mxu0 %v5362_v28  ;;  %2266 = vmatprep.mubr.f32.mxu1 %v5365_v23  ;;  %v732_v59 = vld [vmem:[#allocation5 + $0x13f8] sm:$0xff] }
 0x218   :  { %2279 = vmatprep.subr.mxu0 %v348_v47  ;;  %2356 = vmatprep.subr.mxu1 %v860_v50  ;;  %v219_v47 = vld [vmem:[#allocation5 + $0x3f0] sm:$0xff] }
 0x219   :  { %2267 = vmatmul.mubr.f32.vlgmr.msra.gmra.mxu1 %v5368_v2  ;;  %2280 = vmatpush1.msra.mxu0 %v347_v21  ;;  %v731_v50 = vld [vmem:[#allocation5 + $0x13f0] sm:$0xff]  ;;  %v204_v21 = vld [vmem:[#allocation5 + $0x378] sm:$0xff] }
 0x21a   :  { %2357 = vmatpush1.msra.mxu1 %v859_v25  ;;  %2281 = vmatprep.subr.mxu0 %v332_v56  ;;  %v716_v25 = vld [vmem:[#allocation5 + $0x1378] sm:$0xff]  ;;  %v203_v56 = vld [vmem:[#allocation5 + $0x370] sm:$0xff] }
 0x21b   :  { %2358 = vmatprep.subr.mxu1 %v844_v57  ;;  %2282 = vmatpush1.msra.mxu0 %v331_v62  ;;  %v715_v57 = vld [vmem:[#allocation5 + $0x1370] sm:$0xff]  ;;  %v188_v62 = vld [vmem:[#allocation5 + $0x2f8] sm:$0xff] }
 0x21c   :  { %2359 = vmatpush1.msra.mxu1 %v843_v4  ;;  %2283 = vmatprep.subr.mxu0 %v316_v8  ;;  %v700_v4 = vld [vmem:[#allocation5 + $0x12f8] sm:$0xff]  ;;  %v187_v8 = vld [vmem:[#allocation5 + $0x2f0] sm:$0xff] }
 0x21d   :  { %2360 = vmatprep.subr.mxu1 %v828_v11  ;;  %2284 = vmatpush1.msra.mxu0 %v315_v10  ;;  %v699_v11 = vld [vmem:[#allocation5 + $0x12f0] sm:$0xff]  ;;  %v172_v10 = vld [vmem:[#allocation5 + $0x278] sm:$0xff] }
 0x21e   :  { %2361 = vmatpush1.msra.mxu1 %v827_v7  ;;  %2285 = vmatprep.subr.mxu0 %v300_v13  ;;  %v684_v7 = vld [vmem:[#allocation5 + $0x1278] sm:$0xff]  ;;  %v171_v13 = vld [vmem:[#allocation5 + $0x270] sm:$0xff] }
 0x21f   :  { %2362 = vmatprep.subr.mxu1 %v812_v14  ;;  %2286 = vmatpush1.msra.mxu0 %v299_v63  ;;  %v683_v14 = vld [vmem:[#allocation5 + $0x1270] sm:$0xff]  ;;  %v156_v63 = vld [vmem:[#allocation5 + $0x1f8] sm:$0xff] }
 0x220   :  { %2363 = vmatpush1.msra.mxu1 %v811_v1  ;;  %2287 = vmatprep.subr.mxu0 %v284_v26  ;;  %v668_v1 = vld [vmem:[#allocation5 + $0x11f8] sm:$0xff]  ;;  %v155_v26 = vld [vmem:[#allocation5 + $0x1f0] sm:$0xff] }
 0x221   :  { %2364 = vmatprep.subr.mxu1 %v796_v27  ;;  %2288 = vmatpush1.msra.mxu0 %v283_v5  ;;  %v667_v27 = vld [vmem:[#allocation5 + $0x11f0] sm:$0xff]  ;;  %v140_v5 = vld [vmem:[#allocation5 + $0x178] sm:$0xff] }
 0x222   :  { %2365 = vmatpush1.msra.mxu1 %v795_v30  ;;  %2289 = vmatprep.subr.mxu0 %v268_v33  ;;  %v652_v30 = vld [vmem:[#allocation5 + $0x1178] sm:$0xff]  ;;  %v139_v33 = vld [vmem:[#allocation5 + $0x170] sm:$0xff] }
 0x223   :  { %2366 = vmatprep.subr.mxu1 %v780_v38  ;;  %2290 = vmatpush1.msra.mxu0 %v267_v35  ;;  %v651_v38 = vld [vmem:[#allocation5 + $0x1170] sm:$0xff]  ;;  %v124_v35 = vld [vmem:[#allocation5 + $0xf8] sm:$0xff] }
 0x224   :  { %2367 = vmatpush1.msra.mxu1 %v779_v15  ;;  %2291 = vmatprep.subr.mxu0 %v252_v52  ;;  %v636_v15 = vld [vmem:[#allocation5 + $0x10f8] sm:$0xff]  ;;  %v123_v52 = vld [vmem:[#allocation5 + $0xf0] sm:$0xff] }
 0x225   :  { %2368 = vmatprep.subr.mxu1 %v764_v18  ;;  %2292 = vmatpush1.msra.mxu0 %v251_v41  ;;  %v635_v18 = vld [vmem:[#allocation5 + $0x10f0] sm:$0xff]  ;;  %v108_v41 = vld [vmem:[#allocation5 + $0x78] sm:$0xff] }
 0x226   :  { %2369 = vmatpush1.msra.mxu1 %v763_v24  ;;  %2293 = vmatprep.subr.mxu0 %v236_v53  ;;  %v620_v24 = vld [vmem:[#allocation5 + $0x1078] sm:$0xff]  ;;  %v107_v53 = vld [vmem:[#allocation5 + $0x70] sm:$0xff] }
 0x227   :  { %2370 = vmatprep.subr.mxu1 %v748_v43  ;;  %2294 = vmatpush1.msra.mxu0 %v235_v37  ;;  %v619_v43 = vld [vmem:[#allocation5 + $0x1070] sm:$0xff]  ;;  %v604_v37 = vld [vmem:[#allocation5 + $0xff8] sm:$0xff] }
 0x228   :  { %2371 = vmatpush1.msra.mxu1 %v747_v44  ;;  %2295 = vmatprep.subr.mxu0 %v220_v45  ;;  %v1116_v44 = vld [vmem:[#allocation5 + $0x1ff8] sm:$0xff]  ;;  %v603_v45 = vld [vmem:[#allocation5 + $0xff0] sm:$0xff] }
 0x229   :  { %2372 = vmatprep.subr.mxu1 %v732_v59  ;;  %2296 = vmatpush1.msra.mxu0 %v219_v47  ;;  %v1115_v59 = vld [vmem:[#allocation5 + $0x1ff0] sm:$0xff]  ;;  %v588_v47 = vld [vmem:[#allocation5 + $0xf78] sm:$0xff] }
 0x22a   :  { %2373 = vmatpush1.msra.mxu1 %v731_v50  ;;  %2297 = vmatprep.subr.mxu0 %v204_v21  ;;  %v1100_v50 = vld [vmem:[#allocation5 + $0x1f78] sm:$0xff]  ;;  %v587_v21 = vld [vmem:[#allocation5 + $0xf70] sm:$0xff] }
 0x22b   :  { %2374 = vmatprep.subr.mxu1 %v716_v25  ;;  %2298 = vmatpush1.msra.mxu0 %v203_v56  ;;  %v1099_v25 = vld [vmem:[#allocation5 + $0x1f70] sm:$0xff]  ;;  %v572_v56 = vld [vmem:[#allocation5 + $0xef8] sm:$0xff] }
 0x22c   :  { %2375 = vmatpush1.msra.mxu1 %v715_v57  ;;  %2299 = vmatprep.subr.mxu0 %v188_v62  ;;  %v1084_v57 = vld [vmem:[#allocation5 + $0x1ef8] sm:$0xff]  ;;  %v5372_v62 = vsub.s32 3, %v5239_v34 }
 0x22d   :  { %2376 = vmatprep.subr.mxu1 %v700_v4  ;;  %2300 = vmatpush1.msra.mxu0 %v187_v8  ;;  %v571_v4 = vld [vmem:[#allocation5 + $0xef0] sm:$0xff] }
 0x22e   :  { %2377 = vmatpush1.msra.mxu1 %v699_v11  ;;  %2301 = vmatprep.subr.mxu0 %v172_v10  ;;  %v1083_v8 = vld [vmem:[#allocation5 + $0x1ef0] sm:$0xff]  ;;  %v556_v11 = vld [vmem:[#allocation5 + $0xe78] sm:$0xff] }
 0x22f   :  { %2378 = vmatprep.subr.mxu1 %v684_v7  ;;  %2302 = vmatpush1.msra.mxu0 %v171_v13  ;;  %v1068_v10 = vld [vmem:[#allocation5 + $0x1e78] sm:$0xff]  ;;  %v555_v7 = vld [vmem:[#allocation5 + $0xe70] sm:$0xff] }
 0x230   :  { %2379 = vmatpush1.msra.mxu1 %v683_v14  ;;  %2303 = vmatprep.subr.mxu0 %v156_v63  ;;  %v1067_v13 = vld [vmem:[#allocation5 + $0x1e70] sm:$0xff]  ;;  %v540_v14 = vld [vmem:[#allocation5 + $0xdf8] sm:$0xff] }
 0x231   :  { %2380 = vmatprep.subr.mxu1 %v668_v1  ;;  %2304 = vmatpush1.msra.mxu0 %v155_v26  ;;  %v1052_v63 = vld [vmem:[#allocation5 + $0x1df8] sm:$0xff]  ;;  %v5376_v1 = vrot.slane %v5321_v36, %v5372_v62  ;;  %v539_v26 = vld [vmem:[#allocation5 + $0xdf0] sm:$0xff] }
 0x232   :  { %2381 = vmatpush1.msra.mxu1 %v667_v27  ;;  %2305 = vmatprep.subr.mxu0 %v140_v5  ;;  %v1051_v27 = vld [vmem:[#allocation5 + $0x1df0] sm:$0xff]  ;;  %v524_v5 = vld [vmem:[#allocation5 + $0xd78] sm:$0xff] }
 0x233   :  { %2382 = vmatprep.subr.mxu1 %v652_v30  ;;  %2306 = vmatpush1.msra.mxu0 %v139_v33  ;;  %v1036_v30 = vld [vmem:[#allocation5 + $0x1d78] sm:$0xff]  ;;  %v1270_v33 = vadd.f32 %v5266_v54, %v5270_v60  ;;  %v1424_v36 = vadd.f32 %v5309_v9, %v5376_v1  ;;  %v5390_v60 = vpop.f32.mrf.mxu1  ;;  %v1019_v9 = vld [vmem:[#allocation5 + $0x1cf0] sm:$0xff] }
 0x234   :  { %2383 = vmatpush1.msra.mxu1 %v651_v38  ;;  %2307 = vmatprep.subr.mxu0 %v124_v35  ;;  %v523_v38 = vld [vmem:[#allocation5 + $0xd70] sm:$0xff]  ;;  %v1020_v54 = vld [vmem:[#allocation5 + $0x1cf8] sm:$0xff] }
 0x235   :  { %2384 = vmatprep.subr.mxu1 %v636_v15  ;;  %2308 = vmatpush1.msra.mxu0 %v123_v52  ;;  %v1035_v35 = vld [vmem:[#allocation5 + $0x1d70] sm:$0xff]  ;;  %v5382_v15 = vpop.f32.mrf.mxu0  ;;  %v5384_v52 = vld [vmem:[#allocation2 + $0x28] sm:$0xff] }
 0x236   :  { %2385 = vmatpush1.msra.mxu1 %v635_v18  ;;  %2309 = vmatprep.subr.mxu0 %v108_v41  ;;  %v508_v18 = vld [vmem:[#allocation5 + $0xcf8] sm:$0xff]  ;;  %v5387_v41 = vld [vmem:[#allocation2 + $0x20] sm:$0xff] }
 0x237   :  { %2386 = vmatprep.subr.mxu1 %v620_v24  ;;  %2310 = vmatpush1.msra.mxu0 %v107_v53  ;;  %v507_v24 = vld [vmem:[#allocation5 + $0xcf0] sm:$0xff]  ;;  %v5393_v53 = vadd.f32 %v5272_v61, %v1270_v33 }
 0x238   :  { %2387 = vmatpush1.msra.mxu1 %v619_v43  ;;  %2311 = vmatprep.subr.mxu0 %v604_v37  ;;  %v5395_v43 = vld [vmem:[#allocation2 + $0x38] sm:$0xff]  ;;  %v1003_v61 = vld [vmem:[#allocation5 + $0x1c70] sm:$0xff] }
 0x239   :  { %2388 = vmatprep.subr.mxu1 %v1116_v44  ;;  %2312 = vmatpush2.msra.mxu0 %v603_v45  ;;  %v492_v37 = vld [vmem:[#allocation5 + $0xc78] sm:$0xff]  ;;  %v5399_v45 = vadd.f32 %v5315_v19, %v1424_v36  ;;  %v475_v19 = vld [vmem:[#allocation5 + $0xbf0] sm:$0xff] }
 0x23a   :  { %2389 = vmatpush2.msra.mxu1 %v1115_v59  ;;  %2313 = vmatprep.subr.mxu0 %v588_v47  ;;  %v1004_v44 = vld [vmem:[#allocation5 + $0x1c78] sm:$0xff]  ;;  %v5401_v59 = vpop.f32.mrf.mxu0  ;;  %v5403_v47 = vld [vmem:[#allocation2 + $0x30] sm:$0xff] }
 0x23b   :  { %2390 = vmatprep.subr.mxu1 %v1100_v50  ;;  %2314 = vmatpush2.msra.mxu0 %v587_v21  ;;  %v491_v50 = vld [vmem:[#allocation5 + $0xc70] sm:$0xff]  ;;  %v476_v21 = vld [vmem:[#allocation5 + $0xbf8] sm:$0xff] }
 0x23c   :  { %2391 = vmatpush2.msra.mxu1 %v1099_v25  ;;  %2315 = vmatprep.subr.mxu0 %v572_v56  ;;  %v988_v25 = vld [vmem:[#allocation5 + $0x1bf8] sm:$0xff]  ;;  %v5406_v56 = vpop.f32.mrf.mxu1 }
 0x23d   :  { %2392 = vmatprep.subr.mxu1 %v1084_v57  ;;  %2316 = vmatpush2.msra.mxu0 %v571_v4  ;;  %v5408_v57 = vpop.f32.mrf.mxu0  ;;  %v987_v4 = vld [vmem:[#allocation5 + $0x1bf0] sm:$0xff]  ;;  %v428_v36 = vld [vmem:[#allocation5 + $0xa78] sm:$0xff] }
 0x23e   :  { %2393 = vmatpush2.msra.mxu1 %v1083_v8  ;;  %2317 = vmatprep.subr.mxu0 %v556_v11  ;;  %v5410_v8 = vld [vmem:[#allocation7 + $0x8] sm:$0xff]  ;;  %v2466_v11 = vmul.f32 0.70710677, %v5393_v53 }
 0x23f   :  { %2394 = vmatprep.subr.mxu1 %v1068_v10  ;;  %2318 = vmatpush2.msra.mxu0 %v555_v7  ;;  %v460_v10 = vld [vmem:[#allocation5 + $0xb78] sm:$0xff]  ;;  %v5420_v33 = vpop.f32.mrf.mxu0 }
 0x240   :  { %2395 = vmatpush2.msra.mxu1 %v1067_v13  ;;  %2319 = vmatprep.subr.mxu0 %v540_v14  ;;  %v972_v7 = vld [vmem:[#allocation5 + $0x1b78] sm:$0xff]  ;;  %v2468_v13 = vmul.f32 0.70710677, %v5399_v45  ;;  %v5414_v14 = vpop.f32.mrf.mxu1  ;;  %4908 = verf.f32 %v2466_v11 }
 0x241   :  { %2396 = vmatprep.subr.mxu1 %v1052_v63  ;;  %2320 = vmatpush2.msra.mxu0 %v539_v26  ;;  %v459_v63 = vld [vmem:[#allocation5 + $0xb70] sm:$0xff]  ;;  %v908_v11 = vld [vmem:[#allocation5 + $0x1978] sm:$0xff] }
 0x242   :  { %2397 = vmatpush2.msra.mxu1 %v1051_v27  ;;  %2195 = vmatprep.mubr.f32.mxu0 %v5384_v52  ;;  %v971_v26 = vld [vmem:[#allocation5 + $0x1b70] sm:$0xff]  ;;  %v444_v27 = vld [vmem:[#allocation5 + $0xaf8] sm:$0xff]  ;;  %4910 = verf.f32 %v2468_v13 }
 0x243   :  { %2321 = vmatprep.subr.mxu0 %v524_v5  ;;  %2398 = vmatprep.subr.mxu1 %v1036_v30  ;;  %v956_v5 = vld [vmem:[#allocation5 + $0x1af8] sm:$0xff]  ;;  %v5418_v30 = vrot.slane %v5410_v8, %v5248_v3  ;;  %v907_v13 = vld [vmem:[#allocation5 + $0x1970] sm:$0xff] }
 0x244   :  { %2196 = vmatmul.mubr.f32.gmra.mxu0 %v5387_v41  ;;  %2399 = vmatpush2.msra.mxu1 %v1035_v35  ;;  %v955_v35 = vld [vmem:[#allocation5 + $0x1af0] sm:$0xff] }
 0x245   :  { %2322 = vmatpush2.msra.mxu0 %v523_v38  ;;  %2272 = vmatprep.mubr.f32.mxu1 %v5395_v43  ;;  %v443_v38 = vld [vmem:[#allocation5 + $0xaf0] sm:$0xff] }
 0x246   :  { %2323 = vmatprep.subr.mxu0 %v508_v18  ;;  %2400 = vmatprep.subr.mxu1 %v1020_v54  ;;  %v940_v18 = vld [vmem:[#allocation5 + $0x1a78] sm:$0xff]  ;;  %v5422_v54 = vpop.f32.mrf.mxu1 }
 0x247   :  { %2273 = vmatmul.mubr.f32.gmra.mxu1 %v5403_v47  ;;  %2324 = vmatpush2.msra.mxu0 %v507_v24  ;;  %v427_v24 = vld [vmem:[#allocation5 + $0xa70] sm:$0xff] }
 0x248   :  { %2401 = vmatpush2.msra.mxu1 %v1019_v9  ;;  %2325 = vmatprep.subr.mxu0 %v492_v37  ;;  %v939_v9 = vld [vmem:[#allocation5 + $0x1a70] sm:$0xff] }
 0x249   :  { %2402 = vmatprep.subr.mxu1 %v1004_v44  ;;  %2326 = vmatpush2.msra.mxu0 %v491_v50  ;;  %v412_v44 = vld [vmem:[#allocation5 + $0x9f8] sm:$0xff] }
 0x24a   :  { %2403 = vmatpush2.msra.mxu1 %v1003_v61  ;;  %2327 = vmatprep.subr.mxu0 %v476_v21  ;;  %v924_v50 = vld [vmem:[#allocation5 + $0x19f8] sm:$0xff]  ;;  %v411_v21 = vld [vmem:[#allocation5 + $0x9f0] sm:$0xff] }
 0x24b   :  { %2404 = vmatprep.subr.mxu1 %v988_v25  ;;  %2328 = vmatpush2.msra.mxu0 %v475_v19  ;;  %v923_v25 = vld [vmem:[#allocation5 + $0x19f0] sm:$0xff] }
 0x24c   :  { %2405 = vmatpush2.msra.mxu1 %v987_v4  ;;  %2329 = vmatprep.subr.mxu0 %v460_v10  ;;  %v396_v4 = vld [vmem:[#allocation5 + $0x978] sm:$0xff] }
 0x24d   :  { %2406 = vmatprep.subr.mxu1 %v972_v7  ;;  %2330 = vmatpush2.msra.mxu0 %v459_v63  ;;  %v395_v7 = vld [vmem:[#allocation5 + $0x970] sm:$0xff]  ;;  %v380_v63 = vld [vmem:[#allocation5 + $0x8f8] sm:$0xff] }
 0x24e   :  { %2407 = vmatpush2.msra.mxu1 %v971_v26  ;;  %2331 = vmatprep.subr.mxu0 %v444_v27  ;;  %v892_v26 = vld [vmem:[#allocation5 + $0x18f8] sm:$0xff]  ;;  %v379_v27 = vld [vmem:[#allocation5 + $0x8f0] sm:$0xff] }
 0x24f   :  { %2408 = vmatprep.subr.mxu1 %v956_v5  ;;  %v1883_v37 = vpop.f32.mrf.mxu0  ;;  %2332 = vmatpush2.msra.mxu0 %v443_v38  ;;  %v891_v5 = vld [vmem:[#allocation5 + $0x18f0] sm:$0xff]  ;;  %v364_v38 = vld [vmem:[#allocation5 + $0x878] sm:$0xff] }
 0x250   :  { %2409 = vmatpush2.msra.mxu1 %v955_v35  ;;  %v1884_v61 = vadd.f32 %v1883_v37, %v5418_v30  ;;  %2333 = vmatprep.subr.mxu0 %v428_v36  ;;  %v876_v35 = vld [vmem:[#allocation5 + $0x1878] sm:$0xff]  ;;  %v363_v36 = vld [vmem:[#allocation5 + $0x870] sm:$0xff]  ;;  %v4909_v37 = vpop.eup %4908 }
 0x251   :  { %2410 = vmatprep.subr.mxu1 %v940_v18  ;;  %v1960_v19 = vpop.f32.mrf.mxu1  ;;  %2334 = vmatpush2.msra.mxu0 %v427_v24  ;;  %v875_v18 = vld [vmem:[#allocation5 + $0x1870] sm:$0xff]  ;;  %v2654_v24 = vld [vmem:[#allocation8 + $0x1e8] sm:$0xff] }
 0x252   :  { %2411 = vmatpush2.msra.mxu1 %v939_v9  ;;  %v5425_v10 = vadd.f32 %v1960_v19, %v1884_v61  ;;  %2335 = vmatprep.subr.mxu0 %v412_v44  ;;  %v2782_v9 = vld [vmem:[#allocation8 + $0x5e8] sm:$0xff]  ;;  %v2653_v44 = vld [vmem:[#allocation8 + $0x1e0] sm:$0xff]  ;;  %v4911_v61 = vpop.eup %4910 }
 0x253   :  { %2412 = vmatprep.subr.mxu1 %v924_v50  ;;  %2336 = vmatpush2.msra.mxu0 %v411_v21  ;;  %v2781_v50 = vld [vmem:[#allocation8 + $0x5e0] sm:$0xff]  ;;  %v2650_v21 = vld [vmem:[#allocation8 + $0x1c8] sm:$0xff] }
 0x254   :  { %2413 = vmatpush2.msra.mxu1 %v923_v25  ;;  %2337 = vmatprep.subr.mxu0 %v396_v4  ;;  %v2778_v25 = vld [vmem:[#allocation8 + $0x5c8] sm:$0xff]  ;;  %v2777_v19 = vld [vmem:[#allocation8 + $0x5c0] sm:$0xff]  ;;  %v2530_v4 = vadd.f32 1.0, %v4909_v37 }
 0x255   :  { %2414 = vmatprep.subr.mxu1 %v908_v11  ;;  %2338 = vmatpush2.msra.mxu0 %v395_v7  ;;  %v2532_v11 = vadd.f32 1.0, %v4911_v61  ;;  %v2436_v7 = vmul.f32 0.5, %v5399_v45  ;;  %v2641_v45 = vld [vmem:[#allocation8 + $0x180] sm:$0xff]  ;;  %v2758_v37 = vld [vmem:[#allocation8 + $0x528] sm:$0xff] }
 0x256   :  { %2415 = vmatpush2.msra.mxu1 %v907_v13  ;;  %2339 = vmatprep.subr.mxu0 %v380_v63  ;;  %v2645_v13 = vld [vmem:[#allocation8 + $0x1a0] sm:$0xff]  ;;  %v2626_v61 = vld [vmem:[#allocation8 + $0x108] sm:$0xff] }
 0x257   :  { %2416 = vmatprep.subr.mxu1 %v892_v26  ;;  %2340 = vmatpush2.msra.mxu0 %v379_v27  ;;  %v2773_v26 = vld [vmem:[#allocation8 + $0x5a0] sm:$0xff] }
 0x258   :  { %2417 = vmatpush2.msra.mxu1 %v891_v5  ;;  %2341 = vmatprep.subr.mxu0 %v364_v38  ;;  %v2769_v27 = vld [vmem:[#allocation8 + $0x580] sm:$0xff]  ;;  %v2766_v5 = vld [vmem:[#allocation8 + $0x568] sm:$0xff] }
 0x259   :  { %2418 = vmatprep.subr.mxu1 %v876_v35  ;;  %2342 = vmatpush2.msra.mxu0 %v363_v36  ;;  %v2765_v38 = vld [vmem:[#allocation8 + $0x560] sm:$0xff]  ;;  %v2634_v35 = vld [vmem:[#allocation8 + $0x148] sm:$0xff] }
 0x25a   :  { %2343 = vmatprep.mubr.f32.mxu0 %v5359_v48  ;;  %2419 = vmatpush2.msra.mxu1 %v875_v18  ;;  %v2649_v48 = vld [vmem:[#allocation8 + $0x1c0] sm:$0xff]  ;;  %v2762_v36 = vld [vmem:[#allocation8 + $0x548] sm:$0xff] }
 0x25b   :  { %2420 = vmatprep.mubr.f32.mxu1 %v5365_v23  ;;  %2344 = vmatmul.mubr.f32.vlgmr.msra.gmra.mxu0 %v5362_v28  ;;  %v2434_v23 = vmul.f32 0.5, %v5393_v53  ;;  %v2646_v28 = vld [vmem:[#allocation8 + $0x1a8] sm:$0xff]  ;;  %v5439_v53 = vmul.f32 %v2532_v11, %v2436_v7  ;;  %v2633_v18 = vld [vmem:[#allocation8 + $0x140] sm:$0xff] }
 0x25c   :  { %2421 = vmatmul.mubr.f32.vlgmr.msra.gmra.mxu1 %v5368_v2  ;;  %3639 = vmatprep.subr.mxu0 %v2654_v24  ;;  %v2774_v2 = vld [vmem:[#allocation8 + $0x5a8] sm:$0xff]  ;;  %v2761_v24 = vld [vmem:[#allocation8 + $0x540] sm:$0xff] }
 0x25d   :  { %3716 = vmatprep.subr.mxu1 %v2782_v9  ;;  %3640 = vmatpush1.msra.mxu0 %v2653_v44  ;;  %v5437_v63 = vmul.f32 %v2530_v4, %v2434_v23  ;;  %v2630_v9 = vld [vmem:[#allocation8 + $0x128] sm:$0xff]  ;;  %v2629_v44 = vld [vmem:[#allocation8 + $0x120] sm:$0xff] }
 0x25e   :  { %3717 = vmatpush1.msra.mxu1 %v2781_v50  ;;  %3641 = vmatprep.subr.mxu0 %v2650_v21  ;;  %v2757_v50 = vld [vmem:[#allocation8 + $0x520] sm:$0xff]  ;;  %v2754_v21 = vld [vmem:[#allocation8 + $0x508] sm:$0xff] }
 0x25f   :  { %3718 = vmatprep.subr.mxu1 %v2778_v25  ;;  %2349 = vmatprep.mubr.f32.mxu0 %v5384_v52  ;;  %v2642_v52 = vld [vmem:[#allocation8 + $0x188] sm:$0xff]  ;;  %v2625_v25 = vld [vmem:[#allocation8 + $0x100] sm:$0xff] }
 0x260   :  { %2426 = vmatprep.mubr.f32.mxu1 %v5395_v43  ;;  %3642 = vmatpush1.msra.mxu0 %v2649_v48  ;;  %v2770_v43 = vld [vmem:[#allocation8 + $0x588] sm:$0xff]  ;;  %v2753_v48 = vld [vmem:[#allocation8 + $0x500] sm:$0xff] }
 0x261   :  { %3719 = vmatpush1.msra.mxu1 %v2777_v19  ;;  %2350 = vmatmul.mubr.f32.gmra.mxu0 %v5387_v41  ;;  %v2638_v41 = vld [vmem:[#allocation8 + $0x168] sm:$0xff]  ;;  %v2621_v11 = vld [vmem:[#allocation8 + $0xe0] sm:$0xff] }
 0x262   :  { %2427 = vmatmul.mubr.f32.gmra.mxu1 %v5403_v47  ;;  %3643 = vmatprep.subr.mxu0 %v2646_v28  ;;  %v2637_v47 = vld [vmem:[#allocation8 + $0x160] sm:$0xff]  ;;  %v2622_v19 = vld [vmem:[#allocation8 + $0xe8] sm:$0xff] }
 0x263   :  { %3720 = vmatprep.subr.mxu1 %v2774_v2  ;;  %3644 = vmatpush1.msra.mxu0 %v2645_v13  ;;  %v2750_v4 = vld [vmem:[#allocation8 + $0x4e8] sm:$0xff]  ;;  %v2749_v23 = vld [vmem:[#allocation8 + $0x4e0] sm:$0xff] }
 0x264   :  { %3703 = vmatprep.mubr.f32.mxu0 %v5437_v63  ;;  %3721 = vmatpush1.msra.mxu1 %v2773_v26  ;;  %v2618_v28 = vld [vmem:[#allocation8 + $0xc8] sm:$0xff]  ;;  %v2617_v7 = vld [vmem:[#allocation8 + $0xc0] sm:$0xff] }
 0x265   :  { %3780 = vmatprep.mubr.f32.mxu1 %v5439_v53  ;;  %3645 = vmatprep.subr.mxu0 %v2642_v52  ;;  %v2746_v2 = vld [vmem:[#allocation8 + $0x4c8] sm:$0xff]  ;;  %v2745_v13 = vld [vmem:[#allocation8 + $0x4c0] sm:$0xff] }
 0x266   :  { %3722 = vmatprep.subr.mxu1 %v2770_v43  ;;  %3646 = vmatpush1.msra.mxu0 %v2641_v45  ;;  %v2614_v26 = vld [vmem:[#allocation8 + $0xa8] sm:$0xff]  ;;  %v2613_v43 = vld [vmem:[#allocation8 + $0xa0] sm:$0xff] }
 0x267   :  { %3723 = vmatpush1.msra.mxu1 %v2769_v27  ;;  %3647 = vmatprep.subr.mxu0 %v2638_v41  ;;  %v2742_v52 = vld [vmem:[#allocation8 + $0x4a8] sm:$0xff]  ;;  %v2741_v45 = vld [vmem:[#allocation8 + $0x4a0] sm:$0xff] }
 0x268   :  { %3724 = vmatprep.subr.mxu1 %v2766_v5  ;;  %3648 = vmatpush1.msra.mxu0 %v2637_v47  ;;  %v2610_v27 = vld [vmem:[#allocation8 + $0x88] sm:$0xff]  ;;  %v2609_v5 = vld [vmem:[#allocation8 + $0x80] sm:$0xff] }
 0x269   :  { %3725 = vmatpush1.msra.mxu1 %v2765_v38  ;;  %3649 = vmatprep.subr.mxu0 %v2634_v35  ;;  %v2738_v41 = vld [vmem:[#allocation8 + $0x488] sm:$0xff]  ;;  %v2737_v47 = vld [vmem:[#allocation8 + $0x480] sm:$0xff] }
 0x26a   :  { %3726 = vmatprep.subr.mxu1 %v2762_v36  ;;  %3650 = vmatpush1.msra.mxu0 %v2633_v18  ;;  %v2606_v38 = vld [vmem:[#allocation8 + $0x68] sm:$0xff]  ;;  %v5444_v36 = vsub.s32 2, %v5239_v34  ;;  %v2605_v18 = vld [vmem:[#allocation8 + $0x60] sm:$0xff] }
 0x26b   :  { %3727 = vmatpush1.msra.mxu1 %v2761_v24  ;;  %3651 = vmatprep.subr.mxu0 %v2630_v9  ;;  %v2734_v35 = vld [vmem:[#allocation8 + $0x468] sm:$0xff]  ;;  %v2733_v24 = vld [vmem:[#allocation8 + $0x460] sm:$0xff] }
 0x26c   :  { %3728 = vmatprep.subr.mxu1 %v2758_v37  ;;  %3652 = vmatpush1.msra.mxu0 %v2629_v44  ;;  %v2602_v9 = vld [vmem:[#allocation8 + $0x48] sm:$0xff]  ;;  %v2601_v44 = vld [vmem:[#allocation8 + $0x40] sm:$0xff] }
 0x26d   :  { %3729 = vmatpush1.msra.mxu1 %v2757_v50  ;;  %3653 = vmatprep.subr.mxu0 %v2626_v61  ;;  %v2730_v37 = vld [vmem:[#allocation8 + $0x448] sm:$0xff]  ;;  %v2729_v50 = vld [vmem:[#allocation8 + $0x440] sm:$0xff] }
 0x26e   :  { %3730 = vmatprep.subr.mxu1 %v2754_v21  ;;  %3654 = vmatpush1.msra.mxu0 %v2625_v25  ;;  %v2598_v61 = vld [vmem:[#allocation8 + $0x28] sm:$0xff]  ;;  %v5446_v25 = vld [vmem:[#allocation7] sm:$0xff] }
 0x26f   :  { %3731 = vmatpush1.msra.mxu1 %v2753_v48  ;;  %3655 = vmatprep.subr.mxu0 %v2622_v19  ;;  %v2726_v21 = vld [vmem:[#allocation8 + $0x428] sm:$0xff]  ;;  %v1132_v48 = vrot.slane %v5446_v25, %v5444_v36  ;;  %v5450_v19 = vpop.f32.mrf.mxu0 }
 0x270   :  { %3732 = vmatprep.subr.mxu1 %v2750_v4  ;;  %3656 = vmatpush1.msra.mxu0 %v2621_v11  ;;  %v2597_v4 = vld [vmem:[#allocation8 + $0x20] sm:$0xff] }
 0x271   :  { %3733 = vmatpush1.msra.mxu1 %v2749_v23  ;;  %3657 = vmatprep.subr.mxu0 %v2618_v28  ;;  %v2725_v11 = vld [vmem:[#allocation8 + $0x420] sm:$0xff]  ;;  %v2594_v23 = vld [vmem:[#allocation8 + $0x8] sm:$0xff] }
 0x272   :  { %3734 = vmatprep.subr.mxu1 %v2746_v2  ;;  %3658 = vmatpush1.msra.mxu0 %v2617_v7  ;;  %v2722_v28 = vld [vmem:[#allocation8 + $0x408] sm:$0xff]  ;;  %v2593_v2 = vld [vmem:[#allocation8] sm:$0xff] }
 0x273   :  { %3735 = vmatpush1.msra.mxu1 %v2745_v13  ;;  %3659 = vmatprep.subr.mxu0 %v2614_v26  ;;  %v2721_v7 = vld [vmem:[#allocation8 + $0x400] sm:$0xff]  ;;  %v5454_v26 = vrot.slane %v5410_v8, %v5264_v51  ;;  %v2714_v8 = vld [vmem:[#allocation8 + $0x3c8] sm:$0xff] }
 0x274   :  { %3736 = vmatprep.subr.mxu1 %v2742_v52  ;;  %3660 = vmatpush1.msra.mxu0 %v2613_v43  ;;  %v5456_v52 = vpop.f32.mrf.mxu1  ;;  %v2718_v43 = vld [vmem:[#allocation8 + $0x3e8] sm:$0xff] }
 0x275   :  { %3737 = vmatpush1.msra.mxu1 %v2741_v45  ;;  %3661 = vmatprep.subr.mxu0 %v2610_v27  ;;  %v2846_v45 = vld [vmem:[#allocation8 + $0x7e8] sm:$0xff] }
 0x276   :  { %3738 = vmatprep.subr.mxu1 %v2738_v41  ;;  %3662 = vmatpush1.msra.mxu0 %v2609_v5  ;;  %v1422_v41 = vadd.f32 %v5296_v55, %v1132_v48  ;;  %v2717_v5 = vld [vmem:[#allocation8 + $0x3e0] sm:$0xff] }
 0x277   :  { %3739 = vmatpush1.msra.mxu1 %v2737_v47  ;;  %3663 = vmatprep.subr.mxu0 %v2606_v38  ;;  %v2845_v47 = vld [vmem:[#allocation8 + $0x7e0] sm:$0xff] }
 0x278   :  { %3740 = vmatprep.subr.mxu1 %v2734_v35  ;;  %3664 = vmatpush1.msra.mxu0 %v2605_v18  ;;  %v1151_v35 = vsub.s32 7, %v5239_v34  ;;  %v2842_v18 = vld [vmem:[#allocation8 + $0x7c8] sm:$0xff]  ;;  %v2713_v55 = vld [vmem:[#allocation8 + $0x3c0] sm:$0xff] }
 0x279   :  { %3741 = vmatpush1.msra.mxu1 %v2733_v24  ;;  %3665 = vmatprep.subr.mxu0 %v2602_v9 }
 0x27a   :  { %3742 = vmatprep.subr.mxu1 %v2730_v37  ;;  %3666 = vmatpush1.msra.mxu0 %v2601_v44  ;;  %v1430_v37 = vadd.f32 %v5328_v39, %v5376_v1  ;;  %v5474_v39 = vrot.slane %v5446_v25, %v1151_v35  ;;  %v2706_v1 = vld [vmem:[#allocation8 + $0x388] sm:$0xff] }
 0x27b   :  { %3743 = vmatpush1.msra.mxu1 %v2729_v50  ;;  %3667 = vmatprep.subr.mxu0 %v2598_v61  ;;  %v2710_v50 = vld [vmem:[#allocation8 + $0x3a8] sm:$0xff] }
 0x27c   :  { %3744 = vmatprep.subr.mxu1 %v2726_v21  ;;  %v1889_v13 = vpop.f32.mrf.mxu0  ;;  %3668 = vmatpush1.msra.mxu0 %v2597_v4  ;;  %v2838_v61 = vld [vmem:[#allocation8 + $0x7a8] sm:$0xff]  ;;  %v5467_v4 = vadd.f32 %v5304_v58, %v1422_v41  ;;  %v5478_v58 = vadd.f32 %v5330_v42, %v1430_v37  ;;  %v2829_v42 = vld [vmem:[#allocation8 + $0x760] sm:$0xff] }
 0x27d   :  { %3745 = vmatpush1.msra.mxu1 %v2725_v11  ;;  %v1890_v27 = vadd.f32 %v1889_v13, %v5418_v30  ;;  %3669 = vmatprep.subr.mxu0 %v2594_v23  ;;  %v2841_v30 = vld [vmem:[#allocation8 + $0x7c0] sm:$0xff]  ;;  %v2830_v41 = vld [vmem:[#allocation8 + $0x768] sm:$0xff] }
 0x27e   :  { %3746 = vmatprep.subr.mxu1 %v2722_v28  ;;  %v1891_v38 = vpop.f32.mrf.mxu0  ;;  %3670 = vmatpush1.msra.mxu0 %v2593_v2  ;;  %v2709_v11 = vld [vmem:[#allocation8 + $0x3a0] sm:$0xff]  ;;  %v2834_v2 = vld [vmem:[#allocation8 + $0x788] sm:$0xff] }
 0x27f   :  { %3747 = vmatpush1.msra.mxu1 %v2721_v7  ;;  %v1892_v24 = vadd.f32 %v1891_v38, %v5454_v26  ;;  %v1966_v9 = vpop.f32.mrf.mxu1  ;;  %3671 = vmatprep.subr.mxu0 %v2718_v43  ;;  %v2837_v23 = vld [vmem:[#allocation8 + $0x7a0] sm:$0xff]  ;;  %v1428_v7 = vadd.f32 %v5317_v20, %v1132_v48  ;;  %v2482_v48 = vmul.f32 0.70710677, %v5278_v22  ;;  %v1732_v38 = vadd.f32 %v5401_v59, %v5474_v39  ;;  %v2694_v37 = vld [vmem:[#allocation8 + $0x328] sm:$0xff] }
 0x280   :  { %3748 = vmatprep.subr.mxu1 %v2846_v45  ;;  %v5464_v44 = vadd.f32 %v1966_v9, %v1890_v27  ;;  %3672 = vmatpush2.msra.mxu0 %v2717_v5  ;;  %v2705_v13 = vld [vmem:[#allocation8 + $0x380] sm:$0xff]  ;;  %v2465_v45 = vmul.f32 0.70710677, %v5257_v32  ;;  %v2702_v27 = vld [vmem:[#allocation8 + $0x368] sm:$0xff]  ;;  %v2467_v5 = vmul.f32 0.70710677, %v5467_v4 }
 0x281   :  { %3749 = vmatpush2.msra.mxu1 %v2845_v47  ;;  %v1968_v21 = vpop.f32.mrf.mxu1  ;;  %3673 = vmatprep.subr.mxu0 %v2714_v8  ;;  %v2833_v43 = vld [vmem:[#allocation8 + $0x780] sm:$0xff]  ;;  %v1578_v47 = vadd.f32 %v5340_v49, %v5345_v0  ;;  %v2698_v8 = vld [vmem:[#allocation8 + $0x348] sm:$0xff]  ;;  %v2484_v9 = vmul.f32 0.70710677, %v5478_v58 }
 0x282   :  { %3750 = vmatprep.subr.mxu1 %v2842_v18  ;;  %v5469_v28 = vadd.f32 %v1968_v21, %v1892_v24  ;;  %3674 = vmatpush2.msra.mxu0 %v2713_v55  ;;  %v2701_v20 = vld [vmem:[#allocation8 + $0x360] sm:$0xff]  ;;  %v2826_v18 = vld [vmem:[#allocation8 + $0x748] sm:$0xff]  ;;  %v5488_v24 = vadd.f32 %v5319_v29, %v1428_v7  ;;  %4912 = verf.f32 %v2465_v45 }
 0x283   :  { %3751 = vmatpush2.msra.mxu1 %v2841_v30  ;;  %3675 = vmatprep.subr.mxu0 %v2710_v50  ;;  %v2697_v49 = vld [vmem:[#allocation8 + $0x340] sm:$0xff]  ;;  %v2822_v55 = vld [vmem:[#allocation8 + $0x728] sm:$0xff]  ;;  %4914 = verf.f32 %v2467_v5  ;;  %v5492_v59 = vadd.f32 %v5347_v6, %v1578_v47  ;;  %v2481_v50 = vmul.f32 0.70710677, %v5276_v16 }
 0x284   :  { %3752 = vmatprep.subr.mxu1 %v2838_v61  ;;  %3676 = vmatpush2.msra.mxu0 %v2709_v11  ;;  %v2825_v0 = vld [vmem:[#allocation8 + $0x740] sm:$0xff]  ;;  %4916 = verf.f32 %v2482_v48  ;;  %v5496_v61 = vadd.f32 %v5406_v56, %v1732_v38  ;;  %v2690_v21 = vld [vmem:[#allocation8 + $0x308] sm:$0xff] }
 0x285   :  { %3753 = vmatpush2.msra.mxu1 %v2837_v23  ;;  %3677 = vmatprep.subr.mxu0 %v2706_v1  ;;  %v2693_v30 = vld [vmem:[#allocation8 + $0x320] sm:$0xff]  ;;  %v2818_v11 = vld [vmem:[#allocation8 + $0x708] sm:$0xff]  ;;  %v2483_v23 = vmul.f32 0.70710677, %v5488_v24  ;;  %4918 = verf.f32 %v2484_v9 }
 0x286   :  { %3754 = vmatprep.subr.mxu1 %v2834_v2  ;;  %3678 = vmatpush2.msra.mxu0 %v2705_v13  ;;  %v2821_v29 = vld [vmem:[#allocation8 + $0x720] sm:$0xff]  ;;  %v2686_v2 = vld [vmem:[#allocation8 + $0x2e8] sm:$0xff]  ;;  %v2470_v13 = vmul.f32 0.70710677, %v5492_v59  ;;  %4920 = verf.f32 %v2481_v50  ;;  %v2472_v45 = vmul.f32 0.70710677, %v5496_v61 }
 0x287   :  { %3755 = vmatpush2.msra.mxu1 %v2833_v43  ;;  %3679 = vmatprep.subr.mxu0 %v2702_v27  ;;  %v2689_v6 = vld [vmem:[#allocation8 + $0x300] sm:$0xff]  ;;  %v2814_v7 = vld [vmem:[#allocation8 + $0x6e8] sm:$0xff]  ;;  %4922 = verf.f32 %v2483_v23 }
 0x288   :  { %3756 = vmatprep.subr.mxu1 %v2830_v41  ;;  %3680 = vmatpush2.msra.mxu0 %v2701_v20  ;;  %v2817_v1 = vld [vmem:[#allocation8 + $0x700] sm:$0xff]  ;;  %v2682_v27 = vld [vmem:[#allocation8 + $0x2c8] sm:$0xff]  ;;  %4924 = verf.f32 %v2470_v13 }
 0x289   :  { %3757 = vmatpush2.msra.mxu1 %v2829_v42  ;;  %3681 = vmatprep.subr.mxu0 %v2698_v8  ;;  %v2685_v56 = vld [vmem:[#allocation8 + $0x2e0] sm:$0xff]  ;;  %v2810_v41 = vld [vmem:[#allocation8 + $0x6c8] sm:$0xff]  ;;  %4926 = verf.f32 %v2472_v45 }
 0x28a   :  { %3758 = vmatprep.subr.mxu1 %v2826_v18  ;;  %3682 = vmatpush2.msra.mxu0 %v2697_v49  ;;  %v2813_v43 = vld [vmem:[#allocation8 + $0x6e0] sm:$0xff]  ;;  %v2678_v20 = vld [vmem:[#allocation8 + $0x2a8] sm:$0xff] }
 0x28b   :  { %3759 = vmatpush2.msra.mxu1 %v2825_v0  ;;  %3683 = vmatprep.subr.mxu0 %v2694_v37  ;;  %v2681_v5 = vld [vmem:[#allocation8 + $0x2c0] sm:$0xff]  ;;  %v2806_v42 = vld [vmem:[#allocation8 + $0x6a8] sm:$0xff] }
 0x28c   :  { %3760 = vmatprep.subr.mxu1 %v2822_v55  ;;  %3684 = vmatpush2.msra.mxu0 %v2693_v30  ;;  %v2809_v47 = vld [vmem:[#allocation8 + $0x6c0] sm:$0xff]  ;;  %v2674_v8 = vld [vmem:[#allocation8 + $0x288] sm:$0xff] }
 0x28d   :  { %3761 = vmatpush2.msra.mxu1 %v2821_v29  ;;  %3685 = vmatprep.subr.mxu0 %v2690_v21  ;;  %v2677_v48 = vld [vmem:[#allocation8 + $0x2a0] sm:$0xff]  ;;  %v2802_v18 = vld [vmem:[#allocation8 + $0x688] sm:$0xff] }
 0x28e   :  { %3762 = vmatprep.subr.mxu1 %v2818_v11  ;;  %3686 = vmatpush2.msra.mxu0 %v2689_v6  ;;  %v2805_v38 = vld [vmem:[#allocation8 + $0x6a0] sm:$0xff]  ;;  %v2670_v0 = vld [vmem:[#allocation8 + $0x268] sm:$0xff] }
 0x28f   :  { %3763 = vmatpush2.msra.mxu1 %v2817_v1  ;;  %3687 = vmatprep.subr.mxu0 %v2686_v2  ;;  %v2673_v9 = vld [vmem:[#allocation8 + $0x280] sm:$0xff]  ;;  %v2798_v37 = vld [vmem:[#allocation8 + $0x668] sm:$0xff]  ;;  %v4913_v55 = vpop.eup %4912 }
 0x290   :  { %3764 = vmatprep.subr.mxu1 %v2814_v7  ;;  %3688 = vmatpush2.msra.mxu0 %v2685_v56  ;;  %v2801_v49 = vld [vmem:[#allocation8 + $0x680] sm:$0xff]  ;;  %v4915_v50 = vpop.eup %4914  ;;  %v2666_v21 = vld [vmem:[#allocation8 + $0x248] sm:$0xff]  ;;  %v2529_v56 = vadd.f32 1.0, %v4913_v55 }
 0x291   :  { %3765 = vmatpush2.msra.mxu1 %v2813_v43  ;;  %3689 = vmatprep.subr.mxu0 %v2682_v27  ;;  %v2669_v30 = vld [vmem:[#allocation8 + $0x260] sm:$0xff]  ;;  %v2794_v11 = vld [vmem:[#allocation8 + $0x648] sm:$0xff]  ;;  %v4917_v23 = vpop.eup %4916  ;;  %v2531_v43 = vadd.f32 1.0, %v4915_v50  ;;  %v2451_v50 = vmul.f32 0.5, %v5488_v24 }
 0x292   :  { %3766 = vmatprep.subr.mxu1 %v2810_v41  ;;  %3690 = vmatpush2.msra.mxu0 %v2681_v5  ;;  %v2797_v29 = vld [vmem:[#allocation8 + $0x660] sm:$0xff]  ;;  %v4919_v2 = vpop.eup %4918  ;;  %v2662_v7 = vld [vmem:[#allocation8 + $0x228] sm:$0xff]  ;;  %v2433_v41 = vmul.f32 0.5, %v5257_v32  ;;  %v2450_v5 = vmul.f32 0.5, %v5278_v22 }
 0x293   :  { %3767 = vmatpush2.msra.mxu1 %v2809_v47  ;;  %3691 = vmatprep.subr.mxu0 %v2678_v20  ;;  %v2665_v6 = vld [vmem:[#allocation8 + $0x240] sm:$0xff]  ;;  %v2790_v13 = vld [vmem:[#allocation8 + $0x628] sm:$0xff] }
 0x294   :  { %3768 = vmatprep.subr.mxu1 %v2806_v42  ;;  %3692 = vmatpush2.msra.mxu0 %v2677_v48  ;;  %v2793_v1 = vld [vmem:[#allocation8 + $0x640] sm:$0xff]  ;;  %v2658_v47 = vld [vmem:[#allocation8 + $0x208] sm:$0xff]  ;;  %v4921_v42 = vpop.eup %4920  ;;  %v2435_v48 = vmul.f32 0.5, %v5467_v4  ;;  %v5505_v32 = vmul.f32 %v2529_v56, %v2433_v41 }
 0x295   :  { %3769 = vmatpush2.msra.mxu1 %v2805_v38  ;;  %3693 = vmatprep.subr.mxu0 %v2674_v8  ;;  %v2661_v45 = vld [vmem:[#allocation8 + $0x220] sm:$0xff]  ;;  %v2786_v20 = vld [vmem:[#allocation8 + $0x608] sm:$0xff]  ;;  %v2452_v38 = vmul.f32 0.5, %v5478_v58  ;;  %v2449_v58 = vmul.f32 0.5, %v5276_v16 }
 0x296   :  { %3770 = vmatprep.subr.mxu1 %v2802_v18  ;;  %3694 = vmatpush2.msra.mxu0 %v2673_v9  ;;  %v2789_v27 = vld [vmem:[#allocation8 + $0x620] sm:$0xff]  ;;  %v2546_v9 = vadd.f32 1.0, %v4917_v23  ;;  %v5507_v22 = vmul.f32 %v2531_v43, %v2435_v48  ;;  %v3038_v55 = vld [vmem:[#allocation8 + $0xde8] sm:$0xff]  ;;  %v2438_v43 = vmul.f32 0.5, %v5492_v59 }
 0x297   :  { %3771 = vmatpush2.msra.mxu1 %v2801_v49  ;;  %3695 = vmatprep.subr.mxu0 %v2670_v0  ;;  %v2657_v8 = vld [vmem:[#allocation8 + $0x200] sm:$0xff]  ;;  %v2548_v49 = vadd.f32 1.0, %v4919_v2  ;;  %v4923_v0 = vpop.eup %4922  ;;  %v2906_v16 = vld [vmem:[#allocation8 + $0x9c8] sm:$0xff] }
 0x298   :  { %3772 = vmatprep.subr.mxu1 %v2798_v37  ;;  %3696 = vmatpush2.msra.mxu0 %v2669_v30  ;;  %v2785_v18 = vld [vmem:[#allocation8 + $0x600] sm:$0xff]  ;;  %v2910_v37 = vld [vmem:[#allocation8 + $0x9e8] sm:$0xff]  ;;  %v4925_v4 = vpop.eup %4924  ;;  %v2545_v30 = vadd.f32 1.0, %v4921_v42 }
 0x299   :  { %3773 = vmatpush2.msra.mxu1 %v2797_v29  ;;  %3697 = vmatprep.subr.mxu0 %v2666_v21  ;;  %v4927_v29 = vpop.eup %4926  ;;  %v5513_v21 = vmul.f32 %v2546_v9, %v2450_v5  ;;  %v2909_v23 = vld [vmem:[#allocation8 + $0x9e0] sm:$0xff]  ;;  %v3034_v2 = vld [vmem:[#allocation8 + $0xdc8] sm:$0xff] }
 0x29a   :  { %3774 = vmatprep.subr.mxu1 %v2794_v11  ;;  %3698 = vmatpush2.msra.mxu0 %v2665_v6  ;;  %v5515_v11 = vmul.f32 %v2548_v49, %v2452_v38  ;;  %v3037_v6 = vld [vmem:[#allocation8 + $0xde0] sm:$0xff]  ;;  %v2536_v56 = vadd.f32 1.0, %v4927_v29  ;;  %v2902_v41 = vld [vmem:[#allocation8 + $0x9a8] sm:$0xff] }
 0x29b   :  { %3775 = vmatpush2.msra.mxu1 %v2793_v1  ;;  %3699 = vmatprep.subr.mxu0 %v2662_v7  ;;  %v2547_v1 = vadd.f32 1.0, %v4923_v0  ;;  %v2905_v24 = vld [vmem:[#allocation8 + $0x9c0] sm:$0xff]  ;;  %v3030_v5 = vld [vmem:[#allocation8 + $0xda8] sm:$0xff] }
 0x29c   :  { %3776 = vmatprep.subr.mxu1 %v2790_v13  ;;  %3700 = vmatpush2.msra.mxu0 %v2661_v45  ;;  %v3033_v7 = vld [vmem:[#allocation8 + $0xdc0] sm:$0xff]  ;;  %v2534_v13 = vadd.f32 1.0, %v4925_v4  ;;  %v5520_v45 = vmul.f32 %v2545_v30, %v2449_v58  ;;  %v2898_v38 = vld [vmem:[#allocation8 + $0x988] sm:$0xff] }
 0x29d   :  { %3777 = vmatpush2.msra.mxu1 %v2789_v27  ;;  %3701 = vmatprep.subr.mxu0 %v2658_v47  ;;  %v5522_v27 = vmul.f32 %v2547_v1, %v2451_v50  ;;  %v2440_v47 = vmul.f32 0.5, %v5496_v61  ;;  %v3029_v59 = vld [vmem:[#allocation8 + $0xda0] sm:$0xff]  ;;  %v2894_v9 = vld [vmem:[#allocation8 + $0x968] sm:$0xff] }
 0x29e   :  { %3778 = vmatprep.subr.mxu1 %v2786_v20  ;;  %3702 = vmatpush2.msra.mxu0 %v2657_v8  ;;  %v2901_v20 = vld [vmem:[#allocation8 + $0x9a0] sm:$0xff]  ;;  %v5527_v42 = vmul.f32 %v2534_v13, %v2438_v43  ;;  %v3026_v8 = vld [vmem:[#allocation8 + $0xd88] sm:$0xff] }
 0x29f   :  { %3779 = vmatpush2.msra.mxu1 %v2785_v18  ;;  %3704 = vmatmul.mubr.f32.vlgmr.msra.gmra.mxu0 %v5505_v32  ;;  %v5529_v48 = vmul.f32 %v2536_v56, %v2440_v47  ;;  %v2897_v61 = vld [vmem:[#allocation8 + $0x980] sm:$0xff]  ;;  %v3022_v49 = vld [vmem:[#allocation8 + $0xd68] sm:$0xff] }
 0x2a0   :  { %3781 = vmatmul.mubr.f32.vlgmr.msra.gmra.mxu1 %v5507_v22  ;;  %3793 = vmatprep.subr.mxu0 %v2910_v37  ;;  %v3025_v18 = vld [vmem:[#allocation8 + $0xd80] sm:$0xff]  ;;  %v3018_v4 = vld [vmem:[#allocation8 + $0xd48] sm:$0xff] }
 0x2a1   :  { %3870 = vmatprep.subr.mxu1 %v3038_v55  ;;  %3709 = vmatprep.mubr.f32.mxu0 %v5513_v21  ;;  %v2893_v0 = vld [vmem:[#allocation8 + $0x960] sm:$0xff]  ;;  %v2890_v55 = vld [vmem:[#allocation8 + $0x948] sm:$0xff] }
 0x2a2   :  { %3786 = vmatprep.mubr.f32.mxu1 %v5515_v11  ;;  %3794 = vmatpush1.msra.mxu0 %v2909_v23  ;;  %v3021_v37 = vld [vmem:[#allocation8 + $0xd60] sm:$0xff]  ;;  %v2886_v29 = vld [vmem:[#allocation8 + $0x928] sm:$0xff] }
 0x2a3   :  { %3871 = vmatpush1.msra.mxu1 %v3037_v6  ;;  %3795 = vmatprep.subr.mxu0 %v2906_v16  ;;  %v2889_v58 = vld [vmem:[#allocation8 + $0x940] sm:$0xff]  ;;  %v3014_v50 = vld [vmem:[#allocation8 + $0xd28] sm:$0xff] }
 0x2a4   :  { %3872 = vmatprep.subr.mxu1 %v3034_v2  ;;  %3796 = vmatpush1.msra.mxu0 %v2905_v24  ;;  %v3017_v30 = vld [vmem:[#allocation8 + $0xd40] sm:$0xff]  ;;  %v2882_v1 = vld [vmem:[#allocation8 + $0x908] sm:$0xff] }
 0x2a5   :  { %3873 = vmatpush1.msra.mxu1 %v3033_v7  ;;  %3710 = vmatmul.mubr.f32.gmra.mxu0 %v5520_v45  ;;  %v2885_v23 = vld [vmem:[#allocation8 + $0x920] sm:$0xff]  ;;  %v3010_v16 = vld [vmem:[#allocation8 + $0xd08] sm:$0xff] }
 0x2a6   :  { %3787 = vmatmul.mubr.f32.gmra.mxu1 %v5522_v27  ;;  %3797 = vmatprep.subr.mxu0 %v2902_v41  ;;  %v3013_v6 = vld [vmem:[#allocation8 + $0xd20] sm:$0xff]  ;;  %v2878_v7 = vld [vmem:[#allocation8 + $0x8e8] sm:$0xff] }
 0x2a7   :  { %3874 = vmatprep.subr.mxu1 %v3030_v5  ;;  %3798 = vmatpush1.msra.mxu0 %v2901_v20  ;;  %v2881_v2 = vld [vmem:[#allocation8 + $0x900] sm:$0xff]  ;;  %v3006_v13 = vld [vmem:[#allocation8 + $0xce8] sm:$0xff] }
 0x2a8   :  { %3857 = vmatprep.mubr.f32.mxu0 %v5527_v42  ;;  %3875 = vmatpush1.msra.mxu1 %v3029_v59  ;;  %v3009_v24 = vld [vmem:[#allocation8 + $0xd00] sm:$0xff]  ;;  %v2874_v41 = vld [vmem:[#allocation8 + $0x8c8] sm:$0xff] }
 0x2a9   :  { %3934 = vmatprep.mubr.f32.mxu1 %v5529_v48  ;;  %3799 = vmatprep.subr.mxu0 %v2898_v38  ;;  %v2877_v56 = vld [vmem:[#allocation8 + $0x8e0] sm:$0xff]  ;;  %v3002_v5 = vld [vmem:[#allocation8 + $0xcc8] sm:$0xff] }
 0x2aa   :  { %3876 = vmatprep.subr.mxu1 %v3026_v8  ;;  %3800 = vmatpush1.msra.mxu0 %v2897_v61  ;;  %v3005_v43 = vld [vmem:[#allocation8 + $0xce0] sm:$0xff]  ;;  %v2870_v59 = vld [vmem:[#allocation8 + $0x8a8] sm:$0xff] }
 0x2ab   :  { %3877 = vmatpush1.msra.mxu1 %v3025_v18  ;;  %3801 = vmatprep.subr.mxu0 %v2894_v9  ;;  %v2873_v47 = vld [vmem:[#allocation8 + $0x8c0] sm:$0xff]  ;;  %v2998_v38 = vld [vmem:[#allocation8 + $0xca8] sm:$0xff] }
 0x2ac   :  { %3878 = vmatprep.subr.mxu1 %v3022_v49  ;;  %3802 = vmatpush1.msra.mxu0 %v2893_v0  ;;  %v3001_v20 = vld [vmem:[#allocation8 + $0xcc0] sm:$0xff]  ;;  %v2866_v18 = vld [vmem:[#allocation8 + $0x888] sm:$0xff] }
 0x2ad   :  { %3879 = vmatpush1.msra.mxu1 %v3021_v37  ;;  %3803 = vmatprep.subr.mxu0 %v2890_v55  ;;  %v2869_v8 = vld [vmem:[#allocation8 + $0x8a0] sm:$0xff]  ;;  %v2994_v9 = vld [vmem:[#allocation8 + $0xc88] sm:$0xff] }
 0x2ae   :  { %3880 = vmatprep.subr.mxu1 %v3018_v4  ;;  %3804 = vmatpush1.msra.mxu0 %v2889_v58  ;;  %v2997_v61 = vld [vmem:[#allocation8 + $0xca0] sm:$0xff]  ;;  %v2862_v37 = vld [vmem:[#allocation8 + $0x868] sm:$0xff]  ;;  %v5858_v4 = vsub.s32 6, %v5239_v34 }
 0x2af   :  { %3881 = vmatpush1.msra.mxu1 %v3017_v30  ;;  %3805 = vmatprep.subr.mxu0 %v2886_v29  ;;  %v2865_v49 = vld [vmem:[#allocation8 + $0x880] sm:$0xff]  ;;  %v2990_v55 = vld [vmem:[#allocation8 + $0xc68] sm:$0xff] }
 0x2b0   :  { %3882 = vmatprep.subr.mxu1 %v3014_v50  ;;  %3806 = vmatpush1.msra.mxu0 %v2885_v23  ;;  %v2993_v0 = vld [vmem:[#allocation8 + $0xc80] sm:$0xff]  ;;  %v2858_v29 = vld [vmem:[#allocation8 + $0x848] sm:$0xff] }
 0x2b1   :  { %3883 = vmatpush1.msra.mxu1 %v3013_v6  ;;  %3807 = vmatprep.subr.mxu0 %v2882_v1  ;;  %v2861_v58 = vld [vmem:[#allocation8 + $0x860] sm:$0xff]  ;;  %v2986_v50 = vld [vmem:[#allocation8 + $0xc48] sm:$0xff] }
 0x2b2   :  { %3884 = vmatprep.subr.mxu1 %v3010_v16  ;;  %3808 = vmatpush1.msra.mxu0 %v2881_v2  ;;  %v2989_v30 = vld [vmem:[#allocation8 + $0xc60] sm:$0xff]  ;;  %v2854_v1 = vld [vmem:[#allocation8 + $0x828] sm:$0xff]  ;;  %v1148_v2 = vrot.slane %v5446_v25, %v5858_v4 }
 0x2b3   :  { %3885 = vmatpush1.msra.mxu1 %v3009_v24  ;;  %3809 = vmatprep.subr.mxu0 %v2878_v7  ;;  %v2857_v23 = vld [vmem:[#allocation8 + $0x840] sm:$0xff]  ;;  %v2982_v16 = vld [vmem:[#allocation8 + $0xc28] sm:$0xff] }
 0x2b4   :  { %3886 = vmatprep.subr.mxu1 %v3006_v13  ;;  %3810 = vmatpush1.msra.mxu0 %v2877_v56  ;;  %v2985_v6 = vld [vmem:[#allocation8 + $0xc40] sm:$0xff]  ;;  %v2850_v13 = vld [vmem:[#allocation8 + $0x808] sm:$0xff] }
 0x2b5   :  { %3887 = vmatpush1.msra.mxu1 %v3005_v43  ;;  %3811 = vmatprep.subr.mxu0 %v2874_v41  ;;  %v2853_v24 = vld [vmem:[#allocation8 + $0x820] sm:$0xff]  ;;  %v2978_v56 = vld [vmem:[#allocation8 + $0xc08] sm:$0xff] }
 0x2b6   :  { %3888 = vmatprep.subr.mxu1 %v3002_v5  ;;  %3812 = vmatpush1.msra.mxu0 %v2873_v47  ;;  %v2981_v7 = vld [vmem:[#allocation8 + $0xc20] sm:$0xff]  ;;  %v2974_v5 = vld [vmem:[#allocation8 + $0xbe8] sm:$0xff] }
 0x2b7   :  { %3889 = vmatpush1.msra.mxu1 %v3001_v20  ;;  %3813 = vmatprep.subr.mxu0 %v2870_v59  ;;  %v2849_v43 = vld [vmem:[#allocation8 + $0x800] sm:$0xff]  ;;  %v3102_v47 = vld [vmem:[#allocation8 + $0xfe8] sm:$0xff]  ;;  %v1730_v20 = vadd.f32 %v5382_v15, %v1148_v2 }
 0x2b8   :  { %3890 = vmatprep.subr.mxu1 %v2998_v38  ;;  %3814 = vmatpush1.msra.mxu0 %v2869_v8  ;;  %v2977_v41 = vld [vmem:[#allocation8 + $0xc00] sm:$0xff]  ;;  %v2970_v38 = vld [vmem:[#allocation8 + $0xbc8] sm:$0xff] }
 0x2b9   :  { %3891 = vmatpush1.msra.mxu1 %v2997_v61  ;;  %3815 = vmatprep.subr.mxu0 %v2866_v18  ;;  %v2973_v25 = vld [vmem:[#allocation8 + $0xbe0] sm:$0xff]  ;;  %v3098_v8 = vld [vmem:[#allocation8 + $0xfc8] sm:$0xff]  ;;  %v1738_v61 = vadd.f32 %v5420_v33, %v5474_v39  ;;  %v5540_v18 = vpop.f32.mrf.mxu0 }
 0x2ba   :  { %3892 = vmatprep.subr.mxu1 %v2994_v9  ;;  %3816 = vmatpush1.msra.mxu0 %v2865_v49  ;;  %v3101_v59 = vld [vmem:[#allocation8 + $0xfe0] sm:$0xff]  ;;  %v2966_v15 = vld [vmem:[#allocation8 + $0xba8] sm:$0xff] }
 0x2bb   :  { %3893 = vmatpush1.msra.mxu1 %v2993_v0  ;;  %3817 = vmatprep.subr.mxu0 %v2862_v37  ;;  %v2969_v9 = vld [vmem:[#allocation8 + $0xbc0] sm:$0xff]  ;;  %v3094_v0 = vld [vmem:[#allocation8 + $0xfa8] sm:$0xff]  ;;  %v5543_v37 = vadd.f32 %v5390_v60, %v1730_v20  ;;  %v5555_v60 = vpop.f32.mrf.mxu1 }
 0x2bc   :  { %3894 = vmatprep.subr.mxu1 %v2990_v55  ;;  %3818 = vmatpush1.msra.mxu0 %v2861_v58  ;;  %v3097_v49 = vld [vmem:[#allocation8 + $0xfc0] sm:$0xff]  ;;  %v2962_v39 = vld [vmem:[#allocation8 + $0xb88] sm:$0xff] }
 0x2bd   :  { %3895 = vmatpush1.msra.mxu1 %v2989_v30  ;;  %3819 = vmatprep.subr.mxu0 %v2858_v29  ;;  %v2965_v55 = vld [vmem:[#allocation8 + $0xba0] sm:$0xff]  ;;  %v5545_v30 = vld [vmem:[#allocation7 + $0x8] sm:$0xff]  ;;  %v3090_v29 = vld [vmem:[#allocation8 + $0xf88] sm:$0xff] }
 0x2be   :  { %3896 = vmatprep.subr.mxu1 %v2986_v50  ;;  %3820 = vmatpush1.msra.mxu0 %v2857_v23  ;;  %v3093_v58 = vld [vmem:[#allocation8 + $0xfa0] sm:$0xff]  ;;  %v5549_v33 = vrot.slane %v5545_v30, %v5372_v62  ;;  %v1736_v50 = vadd.f32 %v5408_v57, %v1148_v2  ;;  %v5553_v23 = vadd.f32 %v5422_v54, %v1738_v61 }
 0x2bf   :  { %3897 = vmatpush1.msra.mxu1 %v2985_v6  ;;  %3821 = vmatprep.subr.mxu0 %v2854_v1  ;;  %v2039_v6 = vpop.f32.mrf.mxu0  ;;  %v2961_v1 = vld [vmem:[#allocation8 + $0xb80] sm:$0xff]  ;;  %v1886_v57 = vadd.f32 %v5450_v19, %v5454_v26 }
 0x2c0   :  { %3898 = vmatprep.subr.mxu1 %v2982_v16  ;;  %3822 = vmatpush1.msra.mxu0 %v2853_v24  ;;  %v3089_v16 = vld [vmem:[#allocation8 + $0xf80] sm:$0xff]  ;;  %v2469_v24 = vmul.f32 0.70710677, %v5333_v31  ;;  %v5564_v20 = vadd.f32 %v5414_v14, %v1736_v50  ;;  %v3070_v50 = vld [vmem:[#allocation8 + $0xee8] sm:$0xff] }
 0x2c1   :  { %3899 = vmatpush1.msra.mxu1 %v2981_v7  ;;  %3823 = vmatprep.subr.mxu0 %v2850_v13  ;;  %v2958_v7 = vld [vmem:[#allocation8 + $0xb68] sm:$0xff]  ;;  %v2957_v54 = vld [vmem:[#allocation8 + $0xb60] sm:$0xff]  ;;  %v5568_v61 = vadd.f32 %v5456_v52, %v1886_v57 }
 0x2c2   :  { %3900 = vmatprep.subr.mxu1 %v2978_v56  ;;  %3824 = vmatpush1.msra.mxu0 %v2849_v43  ;;  %v3086_v13 = vld [vmem:[#allocation8 + $0xf68] sm:$0xff]  ;;  %v2471_v56 = vmul.f32 0.70710677, %v5543_v37  ;;  %v3085_v2 = vld [vmem:[#allocation8 + $0xf60] sm:$0xff]  ;;  %v2486_v43 = vmul.f32 0.70710677, %v5353_v40  ;;  %4928 = verf.f32 %v2469_v24 }
 0x2c3   :  { %3901 = vmatpush1.msra.mxu1 %v2977_v41  ;;  %3825 = vmatprep.subr.mxu0 %v2974_v5  ;;  %v2040_v41 = vadd.f32 %v2039_v6, %v5549_v33  ;;  %v2954_v5 = vld [vmem:[#allocation8 + $0xb48] sm:$0xff]  ;;  %v2953_v19 = vld [vmem:[#allocation8 + $0xb40] sm:$0xff]  ;;  %v2474_v6 = vmul.f32 0.70710677, %v5568_v61 }
 0x2c4   :  { %3902 = vmatprep.subr.mxu1 %v3102_v47  ;;  %3826 = vmatpush2.msra.mxu0 %v2973_v25  ;;  %v3082_v47 = vld [vmem:[#allocation8 + $0xf48] sm:$0xff]  ;;  %v2488_v25 = vmul.f32 0.70710677, %v5553_v23  ;;  %v3081_v26 = vld [vmem:[#allocation8 + $0xf40] sm:$0xff]  ;;  %4930 = verf.f32 %v2471_v56 }
 0x2c5   :  { %3903 = vmatpush2.msra.mxu1 %v3101_v59  ;;  %3827 = vmatprep.subr.mxu0 %v2970_v38  ;;  %v2116_v59 = vpop.f32.mrf.mxu1  ;;  %v2950_v38 = vld [vmem:[#allocation8 + $0xb28] sm:$0xff]  ;;  %v2949_v14 = vld [vmem:[#allocation8 + $0xb20] sm:$0xff]  ;;  %4932 = verf.f32 %v2486_v43 }
 0x2c6   :  { %3904 = vmatprep.subr.mxu1 %v3098_v8  ;;  %3828 = vmatpush2.msra.mxu0 %v2969_v9  ;;  %v3078_v8 = vld [vmem:[#allocation8 + $0xf28] sm:$0xff]  ;;  %v3077_v9 = vld [vmem:[#allocation8 + $0xf20] sm:$0xff]  ;;  %4934 = verf.f32 %v2488_v25 }
 0x2c7   :  { %3905 = vmatpush2.msra.mxu1 %v3097_v49  ;;  %3829 = vmatprep.subr.mxu0 %v2966_v15  ;;  %v2485_v49 = vmul.f32 0.70710677, %v5351_v12  ;;  %v5571_v15 = vadd.f32 %v2116_v59, %v2040_v41  ;;  %v2945_v52 = vld [vmem:[#allocation8 + $0xb00] sm:$0xff] }
 0x2c8   :  { %3906 = vmatprep.subr.mxu1 %v3094_v0  ;;  %3830 = vmatpush2.msra.mxu0 %v2965_v55  ;;  %v2946_v0 = vld [vmem:[#allocation8 + $0xb08] sm:$0xff]  ;;  %v2937_v56 = vld [vmem:[#allocation8 + $0xac0] sm:$0xff] }
 0x2c9   :  { %3907 = vmatpush2.msra.mxu1 %v3093_v58  ;;  %3831 = vmatprep.subr.mxu0 %v2962_v39  ;;  %v3074_v55 = vld [vmem:[#allocation8 + $0xf08] sm:$0xff]  ;;  %v2487_v58 = vmul.f32 0.70710677, %v5564_v20  ;;  %v3073_v39 = vld [vmem:[#allocation8 + $0xf00] sm:$0xff]  ;;  %4936 = verf.f32 %v2485_v49  ;;  %v2476_v24 = vmul.f32 0.70710677, %v5571_v15 }
 0x2ca   :  { %3908 = vmatprep.subr.mxu1 %v3090_v29  ;;  %3832 = vmatpush2.msra.mxu0 %v2961_v1  ;;  %v2942_v29 = vld [vmem:[#allocation8 + $0xae8] sm:$0xff]  ;;  %v2941_v1 = vld [vmem:[#allocation8 + $0xae0] sm:$0xff] }
 0x2cb   :  { %3909 = vmatpush2.msra.mxu1 %v3089_v16  ;;  %3833 = vmatprep.subr.mxu0 %v2958_v7  ;;  %v3069_v16 = vld [vmem:[#allocation8 + $0xee0] sm:$0xff]  ;;  %v2938_v7 = vld [vmem:[#allocation8 + $0xac8] sm:$0xff]  ;;  %4938 = verf.f32 %v2487_v58 }
 0x2cc   :  { %3910 = vmatprep.subr.mxu1 %v3086_v13  ;;  %3834 = vmatpush2.msra.mxu0 %v2957_v54  ;;  %v3066_v13 = vld [vmem:[#allocation8 + $0xec8] sm:$0xff]  ;;  %v3065_v57 = vld [vmem:[#allocation8 + $0xec0] sm:$0xff]  ;;  %4940 = verf.f32 %v2474_v6 }
 0x2cd   :  { %3911 = vmatpush2.msra.mxu1 %v3085_v2  ;;  %3835 = vmatprep.subr.mxu0 %v2954_v5  ;;  %v2934_v54 = vld [vmem:[#allocation8 + $0xaa8] sm:$0xff]  ;;  %v2933_v43 = vld [vmem:[#allocation8 + $0xaa0] sm:$0xff]  ;;  %4942 = verf.f32 %v2476_v24 }
 0x2ce   :  { %3912 = vmatprep.subr.mxu1 %v3082_v47  ;;  %3836 = vmatpush2.msra.mxu0 %v2953_v19  ;;  %v3062_v2 = vld [vmem:[#allocation8 + $0xea8] sm:$0xff]  ;;  %v3061_v41 = vld [vmem:[#allocation8 + $0xea0] sm:$0xff] }
 0x2cf   :  { %3913 = vmatpush2.msra.mxu1 %v3081_v26  ;;  %3837 = vmatprep.subr.mxu0 %v2950_v38  ;;  %v2930_v5 = vld [vmem:[#allocation8 + $0xa88] sm:$0xff]  ;;  %v2929_v25 = vld [vmem:[#allocation8 + $0xa80] sm:$0xff]  ;;  %v4929_v38 = vpop.eup %4928 }
 0x2d0   :  { %3914 = vmatprep.subr.mxu1 %v3078_v8  ;;  %3838 = vmatpush2.msra.mxu0 %v2949_v14  ;;  %v3058_v47 = vld [vmem:[#allocation8 + $0xe88] sm:$0xff]  ;;  %v3057_v59 = vld [vmem:[#allocation8 + $0xe80] sm:$0xff]  ;;  %v2533_v6 = vadd.f32 1.0, %v4929_v38 }
 0x2d1   :  { %3915 = vmatpush2.msra.mxu1 %v3077_v9  ;;  %3839 = vmatprep.subr.mxu0 %v2946_v0  ;;  %v2926_v19 = vld [vmem:[#allocation8 + $0xa68] sm:$0xff]  ;;  %v2925_v8 = vld [vmem:[#allocation8 + $0xa60] sm:$0xff]  ;;  %v4931_v9 = vpop.eup %4930 }
 0x2d2   :  { %3916 = vmatprep.subr.mxu1 %v3074_v55  ;;  %3840 = vmatpush2.msra.mxu0 %v2945_v52  ;;  %v3054_v26 = vld [vmem:[#allocation8 + $0xe68] sm:$0xff]  ;;  %v3053_v14 = vld [vmem:[#allocation8 + $0xe60] sm:$0xff]  ;;  %v4933_v55 = vpop.eup %4932 }
 0x2d3   :  { %3917 = vmatpush2.msra.mxu1 %v3073_v39  ;;  %3841 = vmatprep.subr.mxu0 %v2942_v29  ;;  %v2922_v49 = vld [vmem:[#allocation8 + $0xa48] sm:$0xff]  ;;  %v2921_v58 = vld [vmem:[#allocation8 + $0xa40] sm:$0xff]  ;;  %v4935_v39 = vpop.eup %4934 }
 0x2d4   :  { %3918 = vmatprep.subr.mxu1 %v3070_v50  ;;  %3842 = vmatpush2.msra.mxu0 %v2941_v1  ;;  %v3050_v0 = vld [vmem:[#allocation8 + $0xe48] sm:$0xff]  ;;  %v3049_v52 = vld [vmem:[#allocation8 + $0xe40] sm:$0xff]  ;;  %v2535_v1 = vadd.f32 1.0, %v4931_v9 }
 0x2d5   :  { %3919 = vmatpush2.msra.mxu1 %v3069_v16  ;;  %3843 = vmatprep.subr.mxu0 %v2938_v7  ;;  %v2918_v29 = vld [vmem:[#allocation8 + $0xa28] sm:$0xff]  ;;  %v2917_v16 = vld [vmem:[#allocation8 + $0xa20] sm:$0xff]  ;;  %v2437_v7 = vmul.f32 0.5, %v5333_v31 }
 0x2d6   :  { %3920 = vmatprep.subr.mxu1 %v3066_v13  ;;  %3844 = vmatpush2.msra.mxu0 %v2937_v56  ;;  %v3046_v50 = vld [vmem:[#allocation8 + $0xe28] sm:$0xff]  ;;  %v3045_v24 = vld [vmem:[#allocation8 + $0xe20] sm:$0xff]  ;;  %v2454_v13 = vmul.f32 0.5, %v5353_v40 }
 0x2d7   :  { %3921 = vmatpush2.msra.mxu1 %v3065_v57  ;;  %3845 = vmatprep.subr.mxu0 %v2934_v54  ;;  %v2914_v56 = vld [vmem:[#allocation8 + $0xa08] sm:$0xff]  ;;  %v4937_v54 = vpop.eup %4936  ;;  %v5580_v31 = vmul.f32 %v2533_v6, %v2437_v7  ;;  %v2442_v6 = vmul.f32 0.5, %v5568_v61  ;;  %v3285_v61 = vld [vmem:[#allocation8 + $0x15a0] sm:$0xff] }
 0x2d8   :  { %3922 = vmatprep.subr.mxu1 %v3062_v2  ;;  %3846 = vmatpush2.msra.mxu0 %v2933_v43  ;;  %v3042_v57 = vld [vmem:[#allocation8 + $0xe08] sm:$0xff]  ;;  %v2439_v2 = vmul.f32 0.5, %v5543_v37  ;;  %v2456_v43 = vmul.f32 0.5, %v5553_v23  ;;  %v2453_v23 = vmul.f32 0.5, %v5351_v12  ;;  %v2549_v38 = vadd.f32 1.0, %v4937_v54 }
 0x2d9   :  { %3923 = vmatpush2.msra.mxu1 %v3061_v41  ;;  %3847 = vmatprep.subr.mxu0 %v2930_v5  ;;  %v2913_v41 = vld [vmem:[#allocation8 + $0xa00] sm:$0xff]  ;;  %v3162_v12 = vld [vmem:[#allocation8 + $0x11c8] sm:$0xff] }
 0x2da   :  { %3924 = vmatprep.subr.mxu1 %v3058_v47  ;;  %3848 = vmatpush2.msra.mxu0 %v2929_v25  ;;  %v3041_v5 = vld [vmem:[#allocation8 + $0xe00] sm:$0xff]  ;;  %v2550_v47 = vadd.f32 1.0, %v4933_v55  ;;  %v2552_v25 = vadd.f32 1.0, %v4935_v39  ;;  %v5582_v40 = vmul.f32 %v2535_v1, %v2439_v2  ;;  %v5595_v1 = vmul.f32 %v2549_v38, %v2453_v23  ;;  %v3286_v7 = vld [vmem:[#allocation8 + $0x15a8] sm:$0xff] }
 0x2db   :  { %3925 = vmatpush2.msra.mxu1 %v3057_v59  ;;  %3849 = vmatprep.subr.mxu0 %v2926_v19  ;;  %v4939_v59 = vpop.eup %4938  ;;  %v3166_v19 = vld [vmem:[#allocation8 + $0x11e8] sm:$0xff]  ;;  %v3293_v55 = vld [vmem:[#allocation8 + $0x15e0] sm:$0xff] }
 0x2dc   :  { %3926 = vmatprep.subr.mxu1 %v3054_v26  ;;  %3850 = vmatpush2.msra.mxu0 %v2925_v8  ;;  %v3294_v26 = vld [vmem:[#allocation8 + $0x15e8] sm:$0xff]  ;;  %v4941_v37 = vpop.eup %4940  ;;  %v5588_v9 = vmul.f32 %v2550_v47, %v2454_v13  ;;  %v3289_v39 = vld [vmem:[#allocation8 + $0x15c0] sm:$0xff]  ;;  %v2444_v13 = vmul.f32 0.5, %v5571_v15 }
 0x2dd   :  { %3927 = vmatpush2.msra.mxu1 %v3053_v14  ;;  %3851 = vmatprep.subr.mxu0 %v2922_v49  ;;  %v4943_v8 = vpop.eup %4942  ;;  %v2455_v14 = vmul.f32 0.5, %v5564_v20  ;;  %v5590_v49 = vmul.f32 %v2552_v25, %v2456_v43  ;;  %v3161_v20 = vld [vmem:[#allocation8 + $0x11c0] sm:$0xff]  ;;  %v3154_v2 = vld [vmem:[#allocation8 + $0x1188] sm:$0xff] }
 0x2de   :  { %3928 = vmatprep.subr.mxu1 %v3050_v0  ;;  %3852 = vmatpush2.msra.mxu0 %v2921_v58  ;;  %v3165_v0 = vld [vmem:[#allocation8 + $0x11e0] sm:$0xff]  ;;  %v2551_v58 = vadd.f32 1.0, %v4939_v59  ;;  %v3282_v43 = vld [vmem:[#allocation8 + $0x1588] sm:$0xff] }
 0x2df   :  { %3929 = vmatpush2.msra.mxu1 %v3049_v52  ;;  %3853 = vmatprep.subr.mxu0 %v2918_v29  ;;  %v3290_v52 = vld [vmem:[#allocation8 + $0x15c8] sm:$0xff]  ;;  %v2538_v29 = vadd.f32 1.0, %v4941_v37  ;;  %v3153_v15 = vld [vmem:[#allocation8 + $0x1180] sm:$0xff] }
 0x2e0   :  { %3930 = vmatprep.subr.mxu1 %v3046_v50  ;;  %3854 = vmatpush2.msra.mxu0 %v2917_v16  ;;  %v2540_v50 = vadd.f32 1.0, %v4943_v8  ;;  %v5597_v16 = vmul.f32 %v2551_v58, %v2455_v14  ;;  %v3278_v47 = vld [vmem:[#allocation8 + $0x1568] sm:$0xff]  ;;  %v3149_v25 = vld [vmem:[#allocation8 + $0x1160] sm:$0xff] }
 0x2e1   :  { %3931 = vmatpush2.msra.mxu1 %v3045_v24  ;;  %3855 = vmatprep.subr.mxu0 %v2914_v56  ;;  %v3158_v24 = vld [vmem:[#allocation8 + $0x11a8] sm:$0xff]  ;;  %v3157_v56 = vld [vmem:[#allocation8 + $0x11a0] sm:$0xff] }
 0x2e2   :  { %3932 = vmatprep.subr.mxu1 %v3042_v57  ;;  %3856 = vmatpush2.msra.mxu0 %v2913_v41  ;;  %v5602_v57 = vmul.f32 %v2538_v29, %v2442_v6  ;;  %v5604_v54 = vmul.f32 %v2540_v50, %v2444_v13  ;;  %v3281_v41 = vld [vmem:[#allocation8 + $0x1580] sm:$0xff]  ;;  %v3142_v38 = vld [vmem:[#allocation8 + $0x1128] sm:$0xff] }
 0x2e3   :  { %3933 = vmatpush2.msra.mxu1 %v3041_v5  ;;  %3858 = vmatmul.mubr.f32.vlgmr.msra.gmra.mxu0 %v5580_v31  ;;  %v3150_v5 = vld [vmem:[#allocation8 + $0x1168] sm:$0xff]  ;;  %v3277_v59 = vld [vmem:[#allocation8 + $0x1560] sm:$0xff] }
 0x2e4   :  { %3935 = vmatmul.mubr.f32.vlgmr.msra.gmra.mxu1 %v5582_v40  ;;  %3947 = vmatprep.subr.mxu0 %v3166_v19  ;;  %v3146_v19 = vld [vmem:[#allocation8 + $0x1148] sm:$0xff]  ;;  %v3145_v37 = vld [vmem:[#allocation8 + $0x1140] sm:$0xff] }
 0x2e5   :  { %4024 = vmatprep.subr.mxu1 %v3294_v26  ;;  %3863 = vmatprep.mubr.f32.mxu0 %v5588_v9  ;;  %v3274_v26 = vld [vmem:[#allocation8 + $0x1548] sm:$0xff]  ;;  %v3273_v23 = vld [vmem:[#allocation8 + $0x1540] sm:$0xff] }
 0x2e6   :  { %3940 = vmatprep.mubr.f32.mxu1 %v5590_v49  ;;  %3948 = vmatpush1.msra.mxu0 %v3165_v0  ;;  %v3270_v8 = vld [vmem:[#allocation8 + $0x1528] sm:$0xff]  ;;  %v3141_v14 = vld [vmem:[#allocation8 + $0x1120] sm:$0xff] }
 0x2e7   :  { %4025 = vmatpush1.msra.mxu1 %v3293_v55  ;;  %3949 = vmatprep.subr.mxu0 %v3162_v12  ;;  %v3269_v0 = vld [vmem:[#allocation8 + $0x1520] sm:$0xff]  ;;  %v3138_v55 = vld [vmem:[#allocation8 + $0x1108] sm:$0xff] }
 0x2e8   :  { %4026 = vmatprep.subr.mxu1 %v3290_v52  ;;  %3950 = vmatpush1.msra.mxu0 %v3161_v20  ;;  %v3266_v58 = vld [vmem:[#allocation8 + $0x1508] sm:$0xff]  ;;  %v3137_v12 = vld [vmem:[#allocation8 + $0x1100] sm:$0xff] }
 0x2e9   :  { %4027 = vmatpush1.msra.mxu1 %v3289_v39  ;;  %3864 = vmatmul.mubr.f32.gmra.mxu0 %v5595_v1  ;;  %v3265_v52 = vld [vmem:[#allocation8 + $0x1500] sm:$0xff]  ;;  %v3134_v20 = vld [vmem:[#allocation8 + $0x10e8] sm:$0xff] }
 0x2ea   :  { %3941 = vmatmul.mubr.f32.gmra.mxu1 %v5597_v16  ;;  %3951 = vmatprep.subr.mxu0 %v3158_v24  ;;  %v3262_v39 = vld [vmem:[#allocation8 + $0x14e8] sm:$0xff]  ;;  %v3133_v29 = vld [vmem:[#allocation8 + $0x10e0] sm:$0xff] }
 0x2eb   :  { %4028 = vmatprep.subr.mxu1 %v3286_v7  ;;  %3952 = vmatpush1.msra.mxu0 %v3157_v56  ;;  %v3261_v50 = vld [vmem:[#allocation8 + $0x14e0] sm:$0xff]  ;;  %v3130_v6 = vld [vmem:[#allocation8 + $0x10c8] sm:$0xff] }
 0x2ec   :  { %4011 = vmatprep.mubr.f32.mxu0 %v5602_v57  ;;  %4029 = vmatpush1.msra.mxu1 %v3285_v61  ;;  %v3258_v24 = vld [vmem:[#allocation8 + $0x14c8] sm:$0xff]  ;;  %v3129_v7 = vld [vmem:[#allocation8 + $0x10c0] sm:$0xff] }
 0x2ed   :  { %4088 = vmatprep.mubr.f32.mxu1 %v5604_v54  ;;  %3953 = vmatprep.subr.mxu0 %v3154_v2  ;;  %v3257_v13 = vld [vmem:[#allocation8 + $0x14c0] sm:$0xff]  ;;  %v3126_v56 = vld [vmem:[#allocation8 + $0x10a8] sm:$0xff] }
 0x2ee   :  { %4030 = vmatprep.subr.mxu1 %v3282_v43  ;;  %3954 = vmatpush1.msra.mxu0 %v3153_v15  ;;  %v3254_v61 = vld [vmem:[#allocation8 + $0x14a8] sm:$0xff]  ;;  %v3125_v2 = vld [vmem:[#allocation8 + $0x10a0] sm:$0xff] }
 0x2ef   :  { %4031 = vmatpush1.msra.mxu1 %v3281_v41  ;;  %3955 = vmatprep.subr.mxu0 %v3150_v5  ;;  %v3253_v43 = vld [vmem:[#allocation8 + $0x14a0] sm:$0xff]  ;;  %v3122_v15 = vld [vmem:[#allocation8 + $0x1088] sm:$0xff] }
 0x2f0   :  { %4032 = vmatprep.subr.mxu1 %v3278_v47  ;;  %3956 = vmatpush1.msra.mxu0 %v3149_v25  ;;  %v3250_v41 = vld [vmem:[#allocation8 + $0x1488] sm:$0xff]  ;;  %v3121_v5 = vld [vmem:[#allocation8 + $0x1080] sm:$0xff] }
 0x2f1   :  { %4033 = vmatpush1.msra.mxu1 %v3277_v59  ;;  %3957 = vmatprep.subr.mxu0 %v3146_v19  ;;  %v3249_v47 = vld [vmem:[#allocation8 + $0x1480] sm:$0xff]  ;;  %v3118_v25 = vld [vmem:[#allocation8 + $0x1068] sm:$0xff] }
 0x2f2   :  { %4034 = vmatprep.subr.mxu1 %v3274_v26  ;;  %3958 = vmatpush1.msra.mxu0 %v3145_v37  ;;  %v3246_v59 = vld [vmem:[#allocation8 + $0x1468] sm:$0xff]  ;;  %v3117_v19 = vld [vmem:[#allocation8 + $0x1060] sm:$0xff] }
 0x2f3   :  { %4035 = vmatpush1.msra.mxu1 %v3273_v23  ;;  %3959 = vmatprep.subr.mxu0 %v3142_v38  ;;  %v3245_v26 = vld [vmem:[#allocation8 + $0x1460] sm:$0xff]  ;;  %v3114_v37 = vld [vmem:[#allocation8 + $0x1048] sm:$0xff] }
 0x2f4   :  { %4036 = vmatprep.subr.mxu1 %v3270_v8  ;;  %3960 = vmatpush1.msra.mxu0 %v3141_v14  ;;  %v3242_v23 = vld [vmem:[#allocation8 + $0x1448] sm:$0xff]  ;;  %v3113_v38 = vld [vmem:[#allocation8 + $0x1040] sm:$0xff]  ;;  %v2043_v14 = vpop.f32.mrf.mxu0 }
 0x2f5   :  { %4037 = vmatpush1.msra.mxu1 %v3269_v0  ;;  %3961 = vmatprep.subr.mxu0 %v3138_v55  ;;  %v3241_v8 = vld [vmem:[#allocation8 + $0x1440] sm:$0xff]  ;;  %v3110_v0 = vld [vmem:[#allocation8 + $0x1028] sm:$0xff] }
 0x2f6   :  { %4038 = vmatprep.subr.mxu1 %v3266_v58  ;;  %3962 = vmatpush1.msra.mxu0 %v3137_v12  ;;  %v3238_v55 = vld [vmem:[#allocation8 + $0x1428] sm:$0xff]  ;;  %v1164_v58 = vrot.slane %v5545_v30, %v5444_v36  ;;  %v3109_v12 = vld [vmem:[#allocation8 + $0x1020] sm:$0xff] }
 0x2f7   :  { %4039 = vmatpush1.msra.mxu1 %v3265_v52  ;;  %3963 = vmatprep.subr.mxu0 %v3134_v20  ;;  %v3237_v52 = vld [vmem:[#allocation8 + $0x1420] sm:$0xff]  ;;  %v3106_v20 = vld [vmem:[#allocation8 + $0x1008] sm:$0xff] }
 0x2f8   :  { %4040 = vmatprep.subr.mxu1 %v3262_v39  ;;  %3964 = vmatpush1.msra.mxu0 %v3133_v29  ;;  %v3234_v39 = vld [vmem:[#allocation8 + $0x1408] sm:$0xff]  ;;  %v3105_v29 = vld [vmem:[#allocation8 + $0x1000] sm:$0xff] }
 0x2f9   :  { %4041 = vmatpush1.msra.mxu1 %v3261_v50  ;;  %3965 = vmatprep.subr.mxu0 %v3130_v6  ;;  %v3233_v50 = vld [vmem:[#allocation8 + $0x1400] sm:$0xff]  ;;  %v2045_v6 = vpop.f32.mrf.mxu0 }
 0x2fa   :  { %4042 = vmatprep.subr.mxu1 %v3258_v24  ;;  %3966 = vmatpush1.msra.mxu0 %v3129_v7  ;;  %v2120_v24 = vpop.f32.mrf.mxu1  ;;  %v3230_v7 = vld [vmem:[#allocation8 + $0x13e8] sm:$0xff] }
 0x2fb   :  { %4043 = vmatpush1.msra.mxu1 %v3257_v13  ;;  %3967 = vmatprep.subr.mxu0 %v3126_v56  ;;  %v3358_v13 = vld [vmem:[#allocation8 + $0x17e8] sm:$0xff]  ;;  %v2038_v56 = vadd.f32 %v5540_v18, %v1164_v58 }
 0x2fc   :  { %4044 = vmatprep.subr.mxu1 %v3254_v61  ;;  %3968 = vmatpush1.msra.mxu0 %v3125_v2  ;;  %v3229_v61 = vld [vmem:[#allocation8 + $0x13e0] sm:$0xff]  ;;  %v3222_v18 = vld [vmem:[#allocation8 + $0x13a8] sm:$0xff] }
 0x2fd   :  { %4045 = vmatpush1.msra.mxu1 %v3253_v43  ;;  %3969 = vmatprep.subr.mxu0 %v3122_v15  ;;  %v3357_v2 = vld [vmem:[#allocation8 + $0x17e0] sm:$0xff]  ;;  %v5611_v43 = vpop.f32.mrf.mxu0  ;;  %v3226_v15 = vld [vmem:[#allocation8 + $0x13c8] sm:$0xff] }
 0x2fe   :  { %4046 = vmatprep.subr.mxu1 %v3250_v41  ;;  %3970 = vmatpush1.msra.mxu0 %v3121_v5  ;;  %v3354_v41 = vld [vmem:[#allocation8 + $0x17c8] sm:$0xff]  ;;  %v2046_v5 = vadd.f32 %v2045_v6, %v5549_v33  ;;  %v3221_v33 = vld [vmem:[#allocation8 + $0x13a0] sm:$0xff] }
 0x2ff   :  { %4047 = vmatpush1.msra.mxu1 %v3249_v47  ;;  %3971 = vmatprep.subr.mxu0 %v3118_v25  ;;  %v3225_v47 = vld [vmem:[#allocation8 + $0x13c0] sm:$0xff] }
 0x300   :  { %4048 = vmatprep.subr.mxu1 %v3246_v59  ;;  %3972 = vmatpush1.msra.mxu0 %v3117_v19  ;;  %v3353_v25 = vld [vmem:[#allocation8 + $0x17c0] sm:$0xff]  ;;  %v2122_v59 = vpop.f32.mrf.mxu1  ;;  %v3350_v19 = vld [vmem:[#allocation8 + $0x17a8] sm:$0xff] }
 0x301   :  { %4049 = vmatpush1.msra.mxu1 %v3245_v26  ;;  %3973 = vmatprep.subr.mxu0 %v3114_v37  ;;  %v5615_v26 = vadd.f32 %v5555_v60, %v2038_v56  ;;  %v5620_v37 = vrot.slane %v5545_v30, %v1143_v46  ;;  %v3217_v60 = vld [vmem:[#allocation8 + $0x1380] sm:$0xff]  ;;  %v2473_v46 = vmul.f32 0.70710677, %v5425_v10  ;;  %v3210_v56 = vld [vmem:[#allocation8 + $0x1348] sm:$0xff] }
 0x302   :  { %4050 = vmatprep.subr.mxu1 %v3242_v23  ;;  %3974 = vmatpush1.msra.mxu0 %v3113_v38  ;;  %v3349_v23 = vld [vmem:[#allocation8 + $0x17a0] sm:$0xff]  ;;  %v5622_v38 = vpop.f32.mrf.mxu1 }
 0x303   :  { %4051 = vmatpush1.msra.mxu1 %v3241_v8  ;;  %3975 = vmatprep.subr.mxu0 %v3110_v0  ;;  %v2193_v8 = vpop.f32.mrf.mxu0  ;;  %v3218_v0 = vld [vmem:[#allocation8 + $0x1388] sm:$0xff]  ;;  %4944 = verf.f32 %v2473_v46 }
 0x304   :  { %4052 = vmatprep.subr.mxu1 %v3238_v55  ;;  %3976 = vmatpush1.msra.mxu0 %v3109_v12  ;;  %v3346_v55 = vld [vmem:[#allocation8 + $0x1788] sm:$0xff]  ;;  %v2044_v12 = vadd.f32 %v2043_v14, %v1164_v58  ;;  %v2194_v6 = vadd.f32 %v2193_v8, %v5620_v37  ;;  %v3341_v14 = vld [vmem:[#allocation8 + $0x1760] sm:$0xff]  ;;  %v2490_v58 = vmul.f32 0.70710677, %v5469_v28 }
 0x305   :  { %4053 = vmatpush1.msra.mxu1 %v3237_v52  ;;  %3977 = vmatprep.subr.mxu0 %v3106_v20  ;;  %v5624_v52 = vadd.f32 %v2122_v59, %v2046_v5  ;;  %v3345_v20 = vld [vmem:[#allocation8 + $0x1780] sm:$0xff]  ;;  %v5638_v46 = vpop.f32.mrf.mxu0 }
 0x306   :  { %4054 = vmatprep.subr.mxu1 %v3234_v39  ;;  %3978 = vmatpush1.msra.mxu0 %v3105_v29  ;;  %v3214_v39 = vld [vmem:[#allocation8 + $0x1368] sm:$0xff]  ;;  %v3337_v5 = vld [vmem:[#allocation8 + $0x1740] sm:$0xff] }
 0x307   :  { %4055 = vmatpush1.msra.mxu1 %v3233_v50  ;;  %3979 = vmatprep.subr.mxu0 %v3230_v7  ;;  %v3342_v29 = vld [vmem:[#allocation8 + $0x1768] sm:$0xff]  ;;  %v2475_v50 = vmul.f32 0.70710677, %v5615_v26  ;;  %v3213_v7 = vld [vmem:[#allocation8 + $0x1360] sm:$0xff] }
 0x308   :  { %4056 = vmatprep.subr.mxu1 %v3358_v13  ;;  %3980 = vmatpush2.msra.mxu0 %v3229_v61  ;;  %v2270_v13 = vpop.f32.mrf.mxu1  ;;  %v3338_v61 = vld [vmem:[#allocation8 + $0x1748] sm:$0xff] }
 0x309   :  { %4057 = vmatpush2.msra.mxu1 %v3357_v2  ;;  %3981 = vmatprep.subr.mxu0 %v3226_v15  ;;  %v5630_v2 = vadd.f32 %v2120_v24, %v2044_v12  ;;  %v2492_v15 = vmul.f32 0.70710677, %v5624_v52  ;;  %4946 = verf.f32 %v2475_v50  ;;  %v5633_v59 = vadd.f32 %v2270_v13, %v2194_v6  ;;  %v3198_v12 = vld [vmem:[#allocation8 + $0x12e8] sm:$0xff] }
 0x30a   :  { %4058 = vmatprep.subr.mxu1 %v3354_v41  ;;  %3982 = vmatpush2.msra.mxu0 %v3225_v47  ;;  %v3209_v41 = vld [vmem:[#allocation8 + $0x1340] sm:$0xff]  ;;  %v3206_v47 = vld [vmem:[#allocation8 + $0x1328] sm:$0xff]  ;;  %v2489_v24 = vmul.f32 0.70710677, %v5464_v44  ;;  %4948 = verf.f32 %v2490_v58 }
 0x30b   :  { %4059 = vmatpush2.msra.mxu1 %v3353_v25  ;;  %3983 = vmatprep.subr.mxu0 %v3222_v18  ;;  %v3334_v25 = vld [vmem:[#allocation8 + $0x1728] sm:$0xff]  ;;  %v3205_v18 = vld [vmem:[#allocation8 + $0x1320] sm:$0xff]  ;;  %v2491_v8 = vmul.f32 0.70710677, %v5630_v2  ;;  %4950 = verf.f32 %v2492_v15 }
 0x30c   :  { %4060 = vmatprep.subr.mxu1 %v3350_v19  ;;  %3984 = vmatpush2.msra.mxu0 %v3221_v33  ;;  %v3333_v19 = vld [vmem:[#allocation8 + $0x1720] sm:$0xff]  ;;  %v3202_v33 = vld [vmem:[#allocation8 + $0x1308] sm:$0xff]  ;;  %4952 = verf.f32 %v2489_v24 }
 0x30d   :  { %4061 = vmatpush2.msra.mxu1 %v3349_v23  ;;  %3985 = vmatprep.subr.mxu0 %v3218_v0  ;;  %v3330_v23 = vld [vmem:[#allocation8 + $0x1708] sm:$0xff]  ;;  %v3201_v0 = vld [vmem:[#allocation8 + $0x1300] sm:$0xff]  ;;  %4954 = verf.f32 %v2491_v8 }
 0x30e   :  { %4062 = vmatprep.subr.mxu1 %v3346_v55  ;;  %3986 = vmatpush2.msra.mxu0 %v3217_v60  ;;  %v3329_v55 = vld [vmem:[#allocation8 + $0x1700] sm:$0xff]  ;;  %v3326_v60 = vld [vmem:[#allocation8 + $0x16e8] sm:$0xff] }
 0x30f   :  { %4063 = vmatpush2.msra.mxu1 %v3345_v20  ;;  %3987 = vmatprep.subr.mxu0 %v3214_v39  ;;  %v2478_v20 = vmul.f32 0.70710677, %v5633_v59  ;;  %v3197_v39 = vld [vmem:[#allocation8 + $0x12e0] sm:$0xff]  ;;  %v3194_v50 = vld [vmem:[#allocation8 + $0x12c8] sm:$0xff] }
 0x310   :  { %4064 = vmatprep.subr.mxu1 %v3342_v29  ;;  %3988 = vmatpush2.msra.mxu0 %v3213_v7  ;;  %v3325_v29 = vld [vmem:[#allocation8 + $0x16e0] sm:$0xff]  ;;  %v3322_v6 = vld [vmem:[#allocation8 + $0x16c8] sm:$0xff] }
 0x311   :  { %4065 = vmatpush2.msra.mxu1 %v3341_v14  ;;  %3989 = vmatprep.subr.mxu0 %v3210_v56  ;;  %v3193_v7 = vld [vmem:[#allocation8 + $0x12c0] sm:$0xff]  ;;  %v3190_v58 = vld [vmem:[#allocation8 + $0x12a8] sm:$0xff]  ;;  %4956 = verf.f32 %v2478_v20  ;;  %v5640_v56 = vpop.f32.mrf.mxu0 }
 0x312   :  { %4066 = vmatprep.subr.mxu1 %v3338_v61  ;;  %3990 = vmatpush2.msra.mxu0 %v3209_v41  ;;  %v3321_v14 = vld [vmem:[#allocation8 + $0x16c0] sm:$0xff]  ;;  %v3318_v13 = vld [vmem:[#allocation8 + $0x16a8] sm:$0xff]  ;;  %v5642_v61 = vpop.f32.mrf.mxu1 }
 0x313   :  { %4067 = vmatpush2.msra.mxu1 %v3337_v5  ;;  %3991 = vmatprep.subr.mxu0 %v3206_v47  ;;  %v3189_v15 = vld [vmem:[#allocation8 + $0x12a0] sm:$0xff]  ;;  %v3186_v5 = vld [vmem:[#allocation8 + $0x1288] sm:$0xff] }
 0x314   :  { %4068 = vmatprep.subr.mxu1 %v3334_v25  ;;  %3992 = vmatpush2.msra.mxu0 %v3205_v18  ;;  %v3317_v41 = vld [vmem:[#allocation8 + $0x16a0] sm:$0xff]  ;;  %v3314_v47 = vld [vmem:[#allocation8 + $0x1688] sm:$0xff]  ;;  %v5646_v8 = vpop.f32.mrf.mxu1 }
 0x315   :  { %4069 = vmatpush2.msra.mxu1 %v3333_v19  ;;  %3993 = vmatprep.subr.mxu0 %v3202_v33  ;;  %v3185_v25 = vld [vmem:[#allocation8 + $0x1280] sm:$0xff]  ;;  %v3182_v24 = vld [vmem:[#allocation8 + $0x1268] sm:$0xff] }
 0x316   :  { %4070 = vmatprep.subr.mxu1 %v3330_v23  ;;  %3994 = vmatpush2.msra.mxu0 %v3201_v0  ;;  %v3313_v18 = vld [vmem:[#allocation8 + $0x1680] sm:$0xff]  ;;  %v3310_v33 = vld [vmem:[#allocation8 + $0x1668] sm:$0xff]  ;;  %v4945_v23 = vpop.eup %4944 }
 0x317   :  { %4071 = vmatpush2.msra.mxu1 %v3329_v55  ;;  %3995 = vmatprep.subr.mxu0 %v3198_v12  ;;  %v3181_v0 = vld [vmem:[#allocation8 + $0x1260] sm:$0xff]  ;;  %v4947_v12 = vpop.eup %4946  ;;  %v3306_v20 = vld [vmem:[#allocation8 + $0x1648] sm:$0xff] }
 0x318   :  { %4072 = vmatprep.subr.mxu1 %v3326_v60  ;;  %3996 = vmatpush2.msra.mxu0 %v3197_v39  ;;  %v3309_v55 = vld [vmem:[#allocation8 + $0x1660] sm:$0xff]  ;;  %v3178_v60 = vld [vmem:[#allocation8 + $0x1248] sm:$0xff]  ;;  %v5651_v39 = vrot.slane %v5545_v30, %v1151_v35  ;;  %v2441_v30 = vmul.f32 0.5, %v5425_v10 }
 0x319   :  { %4073 = vmatpush2.msra.mxu1 %v3325_v29  ;;  %3997 = vmatprep.subr.mxu0 %v3194_v50  ;;  %v4949_v29 = vpop.eup %4948  ;;  %v3177_v50 = vld [vmem:[#allocation8 + $0x1240] sm:$0xff] }
 0x31a   :  { %4074 = vmatprep.subr.mxu1 %v3322_v6  ;;  %3998 = vmatpush2.msra.mxu0 %v3193_v7  ;;  %v3305_v6 = vld [vmem:[#allocation8 + $0x1640] sm:$0xff] }
 0x31b   :  { %4075 = vmatpush2.msra.mxu1 %v3321_v14  ;;  %3999 = vmatprep.subr.mxu0 %v3190_v58  ;;  %v5644_v19 = vpop.f32.mrf.mxu0  ;;  %v4951_v58 = vpop.eup %4950  ;;  %v3301_v35 = vld [vmem:[#allocation8 + $0x1620] sm:$0xff] }
 0x31c   :  { %4076 = vmatprep.subr.mxu1 %v3318_v13  ;;  %4000 = vmatpush2.msra.mxu0 %v3189_v15  ;;  %v5653_v7 = vpop.f32.mrf.mxu1  ;;  %v3174_v13 = vld [vmem:[#allocation8 + $0x1228] sm:$0xff]  ;;  %v2556_v4 = vadd.f32 1.0, %v4951_v58  ;;  %v2459_v58 = vmul.f32 0.5, %v5630_v2  ;;  %v3417_v2 = vld [vmem:[#allocation8 + $0x19c0] sm:$0xff] }
 0x31d   :  { %4077 = vmatpush2.msra.mxu1 %v3317_v41  ;;  %4001 = vmatprep.subr.mxu0 %v3186_v5  ;;  %v2347_v14 = vpop.f32.mrf.mxu0  ;;  %v3302_v15 = vld [vmem:[#allocation8 + $0x1628] sm:$0xff]  ;;  %v2537_v41 = vadd.f32 1.0, %v4945_v23  ;;  %v2539_v5 = vadd.f32 1.0, %v4947_v12  ;;  %v2460_v23 = vmul.f32 0.5, %v5624_v52  ;;  %v3169_v12 = vld [vmem:[#allocation8 + $0x1200] sm:$0xff]  ;;  %v2457_v52 = vmul.f32 0.5, %v5464_v44 }
 0x31e   :  { %4078 = vmatprep.subr.mxu1 %v3314_v47  ;;  %4002 = vmatpush2.msra.mxu0 %v3185_v25  ;;  %v3173_v47 = vld [vmem:[#allocation8 + $0x1220] sm:$0xff]  ;;  %v2458_v25 = vmul.f32 0.5, %v5469_v28  ;;  %v2424_v10 = vpop.f32.mrf.mxu1  ;;  %v3418_v44 = vld [vmem:[#allocation8 + $0x19c8] sm:$0xff] }
 0x31f   :  { %4079 = vmatpush2.msra.mxu1 %v3313_v18  ;;  %4003 = vmatprep.subr.mxu0 %v3182_v24  ;;  %v3170_v18 = vld [vmem:[#allocation8 + $0x1208] sm:$0xff]  ;;  %v5660_v28 = vmul.f32 %v2537_v41, %v2441_v30  ;;  %v5672_v41 = vmul.f32 %v2556_v4, %v2460_v23  ;;  %v2446_v4 = vmul.f32 0.5, %v5633_v59  ;;  %v3413_v23 = vld [vmem:[#allocation8 + $0x19a0] sm:$0xff] }
 0x320   :  { %4080 = vmatprep.subr.mxu1 %v3310_v33  ;;  %4004 = vmatpush2.msra.mxu0 %v3181_v0  ;;  %v3298_v24 = vld [vmem:[#allocation8 + $0x1608] sm:$0xff]  ;;  %v2348_v33 = vadd.f32 %v2347_v14, %v5651_v39  ;;  %v4953_v0 = vpop.eup %4952 }
 0x321   :  { %4081 = vmatpush2.msra.mxu1 %v3309_v55  ;;  %4005 = vmatprep.subr.mxu0 %v3178_v60  ;;  %v2443_v55 = vmul.f32 0.5, %v5615_v26  ;;  %v3297_v60 = vld [vmem:[#allocation8 + $0x1600] sm:$0xff]  ;;  %v4955_v17 = vpop.eup %4954  ;;  %v3550_v26 = vld [vmem:[#allocation8 + $0x1de8] sm:$0xff] }
 0x322   :  { %4082 = vmatprep.subr.mxu1 %v3306_v20  ;;  %4006 = vmatpush2.msra.mxu0 %v3177_v50  ;;  %v2554_v20 = vadd.f32 1.0, %v4949_v29  ;;  %v4957_v14 = vpop.eup %4956  ;;  %v2553_v29 = vadd.f32 1.0, %v4953_v0  ;;  %v3546_v30 = vld [vmem:[#allocation8 + $0x1dc8] sm:$0xff] }
 0x323   :  { %4083 = vmatpush2.msra.mxu1 %v3305_v6  ;;  %4007 = vmatprep.subr.mxu0 %v3174_v13  ;;  %v5662_v50 = vmul.f32 %v2539_v5, %v2443_v55  ;;  %v3422_v6 = vld [vmem:[#allocation8 + $0x19e8] sm:$0xff]  ;;  %v5665_v13 = vadd.f32 %v2424_v10, %v2348_v33  ;;  %v3421_v5 = vld [vmem:[#allocation8 + $0x19e0] sm:$0xff] }
 0x324   :  { %4084 = vmatprep.subr.mxu1 %v3302_v15  ;;  %4008 = vmatpush2.msra.mxu0 %v3173_v47  ;;  %v5670_v15 = vmul.f32 %v2554_v20, %v2458_v25  ;;  %v3549_v47 = vld [vmem:[#allocation8 + $0x1de0] sm:$0xff]  ;;  %v3414_v0 = vld [vmem:[#allocation8 + $0x19a8] sm:$0xff] }
 0x325   :  { %4085 = vmatpush2.msra.mxu1 %v3301_v35  ;;  %4009 = vmatprep.subr.mxu0 %v3170_v18  ;;  %v2555_v35 = vadd.f32 1.0, %v4955_v17  ;;  %v3545_v18 = vld [vmem:[#allocation8 + $0x1dc0] sm:$0xff]  ;;  %v2480_v25 = vmul.f32 0.70710677, %v5665_v13  ;;  %v5678_v17 = vmul.f32 %v2553_v29, %v2457_v52  ;;  %v3542_v55 = vld [vmem:[#allocation8 + $0x1da8] sm:$0xff] }
 0x326   :  { %4086 = vmatprep.subr.mxu1 %v3298_v24  ;;  %4010 = vmatpush2.msra.mxu0 %v3169_v12  ;;  %v2542_v24 = vadd.f32 1.0, %v4957_v14  ;;  %v3410_v20 = vld [vmem:[#allocation8 + $0x1988] sm:$0xff]  ;;  %v3409_v10 = vld [vmem:[#allocation8 + $0x1980] sm:$0xff] }
 0x327   :  { %4087 = vmatpush2.msra.mxu1 %v3297_v60  ;;  %4012 = vmatmul.mubr.f32.vlgmr.msra.gmra.mxu0 %v5660_v28  ;;  %v5680_v33 = vmul.f32 %v2555_v35, %v2459_v58  ;;  %v3541_v60 = vld [vmem:[#allocation8 + $0x1da0] sm:$0xff]  ;;  %4958 = verf.f32 %v2480_v25  ;;  %v3538_v59 = vld [vmem:[#allocation8 + $0x1d88] sm:$0xff] }
 0x328   :  { %4089 = vmatmul.mubr.f32.vlgmr.msra.gmra.mxu1 %v5662_v50  ;;  %4101 = vmatprep.subr.mxu0 %v3422_v6  ;;  %v5684_v12 = vmul.f32 %v2542_v24, %v2446_v4  ;;  %v3537_v6 = vld [vmem:[#allocation8 + $0x1d80] sm:$0xff]  ;;  %v3534_v14 = vld [vmem:[#allocation8 + $0x1d68] sm:$0xff] }
 0x329   :  { %4178 = vmatprep.subr.mxu1 %v3550_v26  ;;  %4017 = vmatprep.mubr.f32.mxu0 %v5670_v15  ;;  %v3406_v26 = vld [vmem:[#allocation8 + $0x1968] sm:$0xff]  ;;  %v3405_v52 = vld [vmem:[#allocation8 + $0x1960] sm:$0xff] }
 0x32a   :  { %4094 = vmatprep.mubr.f32.mxu1 %v5672_v41  ;;  %4102 = vmatpush1.msra.mxu0 %v3421_v5  ;;  %v3533_v29 = vld [vmem:[#allocation8 + $0x1d60] sm:$0xff]  ;;  %v3402_v58 = vld [vmem:[#allocation8 + $0x1948] sm:$0xff] }
 0x32b   :  { %4179 = vmatpush1.msra.mxu1 %v3549_v47  ;;  %4103 = vmatprep.subr.mxu0 %v3418_v44  ;;  %v3530_v5 = vld [vmem:[#allocation8 + $0x1d48] sm:$0xff]  ;;  %v3401_v47 = vld [vmem:[#allocation8 + $0x1940] sm:$0xff] }
 0x32c   :  { %4180 = vmatprep.subr.mxu1 %v3546_v30  ;;  %4104 = vmatpush1.msra.mxu0 %v3417_v2  ;;  %v3529_v35 = vld [vmem:[#allocation8 + $0x1d40] sm:$0xff]  ;;  %v3398_v44 = vld [vmem:[#allocation8 + $0x1928] sm:$0xff] }
 0x32d   :  { %4181 = vmatpush1.msra.mxu1 %v3545_v18  ;;  %4018 = vmatmul.mubr.f32.gmra.mxu0 %v5678_v17  ;;  %v3526_v30 = vld [vmem:[#allocation8 + $0x1d28] sm:$0xff]  ;;  %v3397_v2 = vld [vmem:[#allocation8 + $0x1920] sm:$0xff] }
 0x32e   :  { %4095 = vmatmul.mubr.f32.gmra.mxu1 %v5680_v33  ;;  %4105 = vmatprep.subr.mxu0 %v3414_v0  ;;  %v3525_v18 = vld [vmem:[#allocation8 + $0x1d20] sm:$0xff]  ;;  %v3394_v24 = vld [vmem:[#allocation8 + $0x1908] sm:$0xff] }
 0x32f   :  { %4182 = vmatprep.subr.mxu1 %v3542_v55  ;;  %4106 = vmatpush1.msra.mxu0 %v3413_v23  ;;  %v3522_v25 = vld [vmem:[#allocation8 + $0x1d08] sm:$0xff]  ;;  %v3393_v4 = vld [vmem:[#allocation8 + $0x1900] sm:$0xff] }
 0x330   :  { %4165 = vmatprep.mubr.f32.mxu0 %v5684_v12  ;;  %4183 = vmatpush1.msra.mxu1 %v3541_v60  ;;  %v3521_v0 = vld [vmem:[#allocation8 + $0x1d00] sm:$0xff]  ;;  %v3390_v55 = vld [vmem:[#allocation8 + $0x18e8] sm:$0xff] }
 0x331   :  { %4107 = vmatprep.subr.mxu0 %v3410_v20  ;;  %4184 = vmatprep.subr.mxu1 %v3538_v59  ;;  %v3518_v23 = vld [vmem:[#allocation8 + $0x1ce8] sm:$0xff]  ;;  %v3389_v60 = vld [vmem:[#allocation8 + $0x18e0] sm:$0xff] }
 0x332   :  { %4108 = vmatpush1.msra.mxu0 %v3409_v10  ;;  %4185 = vmatpush1.msra.mxu1 %v3537_v6  ;;  %v3517_v20 = vld [vmem:[#allocation8 + $0x1ce0] sm:$0xff]  ;;  %v3386_v59 = vld [vmem:[#allocation8 + $0x18c8] sm:$0xff] }
 0x333   :  { %4109 = vmatprep.subr.mxu0 %v3406_v26  ;;  %4186 = vmatprep.subr.mxu1 %v3534_v14  ;;  %v3514_v10 = vld [vmem:[#allocation8 + $0x1cc8] sm:$0xff]  ;;  %v3385_v6 = vld [vmem:[#allocation8 + $0x18c0] sm:$0xff] }
 0x334   :  { %4110 = vmatpush1.msra.mxu0 %v3405_v52  ;;  %4187 = vmatpush1.msra.mxu1 %v3533_v29  ;;  %v4959_v26 = vpop.eup %4958  ;;  %v3513_v14 = vld [vmem:[#allocation8 + $0x1cc0] sm:$0xff]  ;;  %v3382_v52 = vld [vmem:[#allocation8 + $0x18a8] sm:$0xff] }
 0x335   :  { %4111 = vmatprep.subr.mxu0 %v3402_v58  ;;  %4188 = vmatprep.subr.mxu1 %v3530_v5  ;;  %v3510_v29 = vld [vmem:[#allocation8 + $0x1ca8] sm:$0xff]  ;;  %v3381_v58 = vld [vmem:[#allocation8 + $0x18a0] sm:$0xff] }
 0x336   :  { %4112 = vmatpush1.msra.mxu0 %v3401_v47  ;;  %4189 = vmatpush1.msra.mxu1 %v3529_v35  ;;  %v3509_v5 = vld [vmem:[#allocation8 + $0x1ca0] sm:$0xff]  ;;  %v3378_v47 = vld [vmem:[#allocation8 + $0x1888] sm:$0xff] }
 0x337   :  { %4113 = vmatprep.subr.mxu0 %v3398_v44  ;;  %4190 = vmatprep.subr.mxu1 %v3526_v30  ;;  %v3506_v35 = vld [vmem:[#allocation8 + $0x1c88] sm:$0xff]  ;;  %v3377_v44 = vld [vmem:[#allocation8 + $0x1880] sm:$0xff]  ;;  %v2544_v30 = vadd.f32 1.0, %v4959_v26 }
 0x338   :  { %4114 = vmatpush1.msra.mxu0 %v3397_v2  ;;  %4191 = vmatpush1.msra.mxu1 %v3525_v18  ;;  %v3505_v2 = vld [vmem:[#allocation8 + $0x1c80] sm:$0xff]  ;;  %v3374_v18 = vld [vmem:[#allocation8 + $0x1868] sm:$0xff] }
 0x339   :  { %4115 = vmatprep.subr.mxu0 %v3394_v24  ;;  %4192 = vmatprep.subr.mxu1 %v3522_v25  ;;  %v2448_v24 = vmul.f32 0.5, %v5665_v13  ;;  %v3502_v25 = vld [vmem:[#allocation8 + $0x1c68] sm:$0xff]  ;;  %v5860_v13 = vsub.s32 4, %v5239_v34 }
 0x33a   :  { %4116 = vmatpush1.msra.mxu0 %v3393_v4  ;;  %4193 = vmatpush1.msra.mxu1 %v3521_v0  ;;  %v3373_v4 = vld [vmem:[#allocation8 + $0x1860] sm:$0xff]  ;;  %v3366_v26 = vld [vmem:[#allocation8 + $0x1828] sm:$0xff] }
 0x33b   :  { %4117 = vmatprep.subr.mxu0 %v3390_v55  ;;  %4194 = vmatprep.subr.mxu1 %v3518_v23  ;;  %v3501_v0 = vld [vmem:[#allocation8 + $0x1c60] sm:$0xff]  ;;  %v3370_v55 = vld [vmem:[#allocation8 + $0x1848] sm:$0xff] }
 0x33c   :  { %4118 = vmatpush1.msra.mxu0 %v3389_v60  ;;  %4195 = vmatpush1.msra.mxu1 %v3517_v20  ;;  %v3498_v23 = vld [vmem:[#allocation8 + $0x1c48] sm:$0xff]  ;;  %v3369_v60 = vld [vmem:[#allocation8 + $0x1840] sm:$0xff]  ;;  %v5688_v20 = vmul.f32 %v2544_v30, %v2448_v24 }
 0x33d   :  { %4119 = vmatprep.subr.mxu0 %v3386_v59  ;;  %4196 = vmatprep.subr.mxu1 %v3514_v10  ;;  %v3497_v59 = vld [vmem:[#allocation8 + $0x1c40] sm:$0xff]  ;;  %v4999_v10 = vld [vmem:[#allocation7 + $0x8] sm:$0xff]  ;;  %v3486_v24 = vld [vmem:[#allocation8 + $0x1be8] sm:$0xff] }
 0x33e   :  { %4120 = vmatpush1.msra.mxu0 %v3385_v6  ;;  %4197 = vmatpush1.msra.mxu1 %v3513_v14  ;;  %v1172_v6 = vrot.slane %v4999_v10, %v5860_v13  ;;  %v3494_v14 = vld [vmem:[#allocation8 + $0x1c28] sm:$0xff]  ;;  %v3361_v30 = vld [vmem:[#allocation8 + $0x1800] sm:$0xff] }
 0x33f   :  { %4121 = vmatprep.subr.mxu0 %v3382_v52  ;;  %4198 = vmatprep.subr.mxu1 %v3510_v29  ;;  %v2351_v52 = vpop.f32.mrf.mxu0  ;;  %v5861_v29 = vsub.s32 6, %v5239_v34  ;;  %v3614_v34 = vld [vmem:[#allocation8 + $0x1fe8] sm:$0xff]  ;;  %v3609_v13 = vld [vmem:[#allocation8 + $0x1fc0] sm:$0xff] }
 0x340   :  { %4122 = vmatpush1.msra.mxu0 %v3381_v58  ;;  %4199 = vmatpush1.msra.mxu1 %v3509_v5  ;;  %v3365_v5 = vld [vmem:[#allocation8 + $0x1820] sm:$0xff] }
 0x341   :  { %4123 = vmatprep.subr.mxu0 %v3378_v47  ;;  %4200 = vmatprep.subr.mxu1 %v3506_v35  ;;  %v1180_v58 = vrot.slane %v4999_v10, %v5861_v29  ;;  %v3493_v47 = vld [vmem:[#allocation8 + $0x1c20] sm:$0xff]  ;;  %v3362_v35 = vld [vmem:[#allocation8 + $0x1808] sm:$0xff] }
 0x342   :  { %4124 = vmatpush1.msra.mxu0 %v3377_v44  ;;  %4201 = vmatpush1.msra.mxu1 %v3505_v2  ;;  %v3490_v44 = vld [vmem:[#allocation8 + $0x1c08] sm:$0xff]  ;;  %v3489_v2 = vld [vmem:[#allocation8 + $0x1c00] sm:$0xff] }
 0x343   :  { %4125 = vmatprep.subr.mxu0 %v3374_v18  ;;  %4202 = vmatprep.subr.mxu1 %v3502_v25  ;;  %v2192_v18 = vadd.f32 %v5611_v43, %v1172_v6  ;;  %v2353_v25 = vpop.f32.mrf.mxu0  ;;  %v3610_v10 = vld [vmem:[#allocation8 + $0x1fc8] sm:$0xff]  ;;  %v3481_v43 = vld [vmem:[#allocation8 + $0x1bc0] sm:$0xff] }
 0x344   :  { %4126 = vmatpush1.msra.mxu0 %v3373_v4  ;;  %4203 = vmatpush1.msra.mxu1 %v3501_v0  ;;  %v2428_v4 = vpop.f32.mrf.mxu1  ;;  %v2346_v0 = vadd.f32 %v5644_v19, %v1180_v58  ;;  %v3478_v19 = vld [vmem:[#allocation8 + $0x1ba8] sm:$0xff] }
 0x345   :  { %4127 = vmatprep.subr.mxu0 %v3370_v55  ;;  %4204 = vmatprep.subr.mxu1 %v3498_v23  ;;  %v3485_v55 = vld [vmem:[#allocation8 + $0x1be0] sm:$0xff]  ;;  %v3606_v29 = vld [vmem:[#allocation8 + $0x1fa8] sm:$0xff] }
 0x346   :  { %4128 = vmatpush1.msra.mxu0 %v3369_v60  ;;  %4205 = vmatpush1.msra.mxu1 %v3497_v59  ;;  %v3613_v23 = vld [vmem:[#allocation8 + $0x1fe0] sm:$0xff]  ;;  %v2200_v60 = vadd.f32 %v5640_v56, %v5620_v37  ;;  %v3482_v59 = vld [vmem:[#allocation8 + $0x1bc8] sm:$0xff]  ;;  %v5704_v37 = vadd.f32 %v5653_v7, %v2346_v0 }
 0x347   :  { %4242 = vmatprep.mubr.f32.mxu1 %v5688_v20  ;;  %4129 = vmatprep.subr.mxu0 %v3366_v26  ;;  %v2354_v26 = vadd.f32 %v2353_v25, %v5651_v39  ;;  %v3477_v56 = vld [vmem:[#allocation8 + $0x1ba0] sm:$0xff]  ;;  %v3602_v39 = vld [vmem:[#allocation8 + $0x1f88] sm:$0xff] }
 0x348   :  { %4206 = vmatprep.subr.mxu1 %v3494_v14  ;;  %4130 = vmatpush1.msra.mxu0 %v3365_v5  ;;  %v5701_v14 = vadd.f32 %v5622_v38, %v2192_v18  ;;  %v2430_v5 = vpop.f32.mrf.mxu1  ;;  %v3474_v38 = vld [vmem:[#allocation8 + $0x1b88] sm:$0xff]  ;;  %v3601_v18 = vld [vmem:[#allocation8 + $0x1f80] sm:$0xff] }
 0x349   :  { %4207 = vmatpush1.msra.mxu1 %v3493_v47  ;;  %4131 = vmatprep.subr.mxu0 %v3362_v35  ;;  %v3605_v47 = vld [vmem:[#allocation8 + $0x1fa0] sm:$0xff]  ;;  %v2352_v35 = vadd.f32 %v2351_v52, %v1180_v58  ;;  %v5710_v7 = vadd.f32 %v2430_v5, %v2354_v26  ;;  %v3470_v52 = vld [vmem:[#allocation8 + $0x1b68] sm:$0xff] }
 0x34a   :  { %4208 = vmatprep.subr.mxu1 %v3490_v44  ;;  %4132 = vmatpush1.msra.mxu0 %v3361_v30  ;;  %v5707_v44 = vadd.f32 %v5646_v8, %v2200_v60  ;;  %v2198_v30 = vadd.f32 %v5638_v46, %v1172_v6  ;;  %v3598_v58 = vld [vmem:[#allocation8 + $0x1f68] sm:$0xff]  ;;  %v2479_v8 = vmul.f32 0.70710677, %v5704_v37  ;;  %v3597_v25 = vld [vmem:[#allocation8 + $0x1f60] sm:$0xff] }
 0x34b   :  { %4209 = vmatpush1.msra.mxu1 %v3489_v2  ;;  %4133 = vmatprep.subr.mxu0 %v3486_v24  ;;  %v3473_v2 = vld [vmem:[#allocation8 + $0x1b80] sm:$0xff]  ;;  %v2477_v24 = vmul.f32 0.70710677, %v5701_v14  ;;  %v5714_v0 = vadd.f32 %v2428_v4, %v2352_v35  ;;  %v3466_v6 = vld [vmem:[#allocation8 + $0x1b48] sm:$0xff] }
 0x34c   :  { %4210 = vmatprep.subr.mxu1 %v3614_v34  ;;  %4134 = vmatpush2.msra.mxu0 %v3485_v55  ;;  %v3469_v34 = vld [vmem:[#allocation8 + $0x1b60] sm:$0xff]  ;;  %v2494_v46 = vmul.f32 0.70710677, %v5707_v44  ;;  %v3594_v55 = vld [vmem:[#allocation8 + $0x1f48] sm:$0xff] }
 0x34d   :  { %4211 = vmatpush2.msra.mxu1 %v3613_v23  ;;  %4135 = vmatprep.subr.mxu0 %v3482_v59  ;;  %v5718_v23 = vadd.f32 %v5642_v61, %v2198_v30  ;;  %v3465_v60 = vld [vmem:[#allocation8 + $0x1b40] sm:$0xff]  ;;  %4960 = verf.f32 %v2477_v24  ;;  %v3462_v4 = vld [vmem:[#allocation8 + $0x1b28] sm:$0xff] }
 0x34e   :  { %4212 = vmatprep.subr.mxu1 %v3610_v10  ;;  %4136 = vmatpush2.msra.mxu0 %v3481_v43  ;;  %v3593_v59 = vld [vmem:[#allocation8 + $0x1f40] sm:$0xff]  ;;  %v2496_v10 = vmul.f32 0.70710677, %v5710_v7  ;;  %v3590_v43 = vld [vmem:[#allocation8 + $0x1f28] sm:$0xff]  ;;  %4962 = verf.f32 %v2479_v8 }
 0x34f   :  { %4213 = vmatpush2.msra.mxu1 %v3609_v13  ;;  %4137 = vmatprep.subr.mxu0 %v3478_v19  ;;  %v2495_v13 = vmul.f32 0.70710677, %v5714_v0  ;;  %v3461_v26 = vld [vmem:[#allocation8 + $0x1b20] sm:$0xff]  ;;  %4964 = verf.f32 %v2494_v46  ;;  %v3458_v61 = vld [vmem:[#allocation8 + $0x1b08] sm:$0xff]  ;;  %v2493_v5 = vmul.f32 0.70710677, %v5718_v23 }
 0x350   :  { %4214 = vmatprep.subr.mxu1 %v3606_v29  ;;  %4138 = vmatpush2.msra.mxu0 %v3477_v56  ;;  %v3589_v19 = vld [vmem:[#allocation8 + $0x1f20] sm:$0xff]  ;;  %v3586_v29 = vld [vmem:[#allocation8 + $0x1f08] sm:$0xff]  ;;  %4966 = verf.f32 %v2496_v10 }
 0x351   :  { %4215 = vmatpush2.msra.mxu1 %v3605_v47  ;;  %4139 = vmatprep.subr.mxu0 %v3474_v38  ;;  %v3457_v56 = vld [vmem:[#allocation8 + $0x1b00] sm:$0xff]  ;;  %v3454_v35 = vld [vmem:[#allocation8 + $0x1ae8] sm:$0xff]  ;;  %4968 = verf.f32 %v2495_v13 }
 0x352   :  { %4216 = vmatprep.subr.mxu1 %v3602_v39  ;;  %4140 = vmatpush2.msra.mxu0 %v3473_v2  ;;  %v3585_v47 = vld [vmem:[#allocation8 + $0x1f00] sm:$0xff]  ;;  %v3582_v38 = vld [vmem:[#allocation8 + $0x1ee8] sm:$0xff]  ;;  %4970 = verf.f32 %v2493_v5 }
 0x353   :  { %4217 = vmatpush2.msra.mxu1 %v3601_v18  ;;  %4141 = vmatprep.subr.mxu0 %v3470_v52  ;;  %v3453_v39 = vld [vmem:[#allocation8 + $0x1ae0] sm:$0xff]  ;;  %v3450_v2 = vld [vmem:[#allocation8 + $0x1ac8] sm:$0xff] }
 0x354   :  { %4218 = vmatprep.subr.mxu1 %v3598_v58  ;;  %4142 = vmatpush2.msra.mxu0 %v3469_v34  ;;  %v3581_v30 = vld [vmem:[#allocation8 + $0x1ee0] sm:$0xff]  ;;  %v3578_v18 = vld [vmem:[#allocation8 + $0x1ec8] sm:$0xff] }
 0x355   :  { %4219 = vmatpush2.msra.mxu1 %v3597_v25  ;;  %4143 = vmatprep.subr.mxu0 %v3466_v6  ;;  %v3449_v24 = vld [vmem:[#allocation8 + $0x1ac0] sm:$0xff]  ;;  %v3446_v58 = vld [vmem:[#allocation8 + $0x1aa8] sm:$0xff] }
 0x356   :  { %4220 = vmatprep.subr.mxu1 %v3594_v55  ;;  %4144 = vmatpush2.msra.mxu0 %v3465_v60  ;;  %v3577_v52 = vld [vmem:[#allocation8 + $0x1ec0] sm:$0xff]  ;;  %v3574_v8 = vld [vmem:[#allocation8 + $0x1ea8] sm:$0xff] }
 0x357   :  { %4221 = vmatpush2.msra.mxu1 %v3593_v59  ;;  %4145 = vmatprep.subr.mxu0 %v3462_v4  ;;  %v3445_v34 = vld [vmem:[#allocation8 + $0x1aa0] sm:$0xff]  ;;  %v3442_v46 = vld [vmem:[#allocation8 + $0x1a88] sm:$0xff] }
 0x358   :  { %4222 = vmatprep.subr.mxu1 %v3590_v43  ;;  %4146 = vmatpush2.msra.mxu0 %v3461_v26  ;;  %v3573_v25 = vld [vmem:[#allocation8 + $0x1ea0] sm:$0xff]  ;;  %v3570_v6 = vld [vmem:[#allocation8 + $0x1e88] sm:$0xff] }
 0x359   :  { %4223 = vmatpush2.msra.mxu1 %v3589_v19  ;;  %4147 = vmatprep.subr.mxu0 %v3458_v61  ;;  %v3441_v55 = vld [vmem:[#allocation8 + $0x1a80] sm:$0xff]  ;;  %v3438_v59 = vld [vmem:[#allocation8 + $0x1a68] sm:$0xff] }
 0x35a   :  { %4224 = vmatprep.subr.mxu1 %v3586_v29  ;;  %4148 = vmatpush2.msra.mxu0 %v3457_v56  ;;  %v3569_v60 = vld [vmem:[#allocation8 + $0x1e80] sm:$0xff]  ;;  %v3566_v10 = vld [vmem:[#allocation8 + $0x1e68] sm:$0xff]  ;;  %v4961_v4 = vpop.eup %4960 }
 0x35b   :  { %4225 = vmatpush2.msra.mxu1 %v3585_v47  ;;  %4149 = vmatprep.subr.mxu0 %v3454_v35  ;;  %v3437_v43 = vld [vmem:[#allocation8 + $0x1a60] sm:$0xff]  ;;  %v4963_v26 = vpop.eup %4962  ;;  %v3434_v19 = vld [vmem:[#allocation8 + $0x1a48] sm:$0xff] }
 0x35c   :  { %4226 = vmatprep.subr.mxu1 %v3582_v38  ;;  %4150 = vmatpush2.msra.mxu0 %v3453_v39  ;;  %v3565_v13 = vld [vmem:[#allocation8 + $0x1e60] sm:$0xff]  ;;  %v3562_v61 = vld [vmem:[#allocation8 + $0x1e48] sm:$0xff]  ;;  %v4965_v29 = vpop.eup %4964  ;;  %v2541_v39 = vadd.f32 1.0, %v4961_v4  ;;  %v2463_v4 = vmul.f32 0.5, %v5714_v0 }
 0x35d   :  { %4227 = vmatpush2.msra.mxu1 %v3581_v30  ;;  %4151 = vmatprep.subr.mxu0 %v3450_v2  ;;  %v3433_v5 = vld [vmem:[#allocation8 + $0x1a40] sm:$0xff]  ;;  %v4967_v47 = vpop.eup %4966  ;;  %v3430_v35 = vld [vmem:[#allocation8 + $0x1a28] sm:$0xff]  ;;  %v2543_v30 = vadd.f32 1.0, %v4963_v26  ;;  %v2461_v26 = vmul.f32 0.5, %v5718_v23 }
 0x35e   :  { %4228 = vmatprep.subr.mxu1 %v3578_v18  ;;  %4152 = vmatpush2.msra.mxu0 %v3449_v24  ;;  %v3561_v56 = vld [vmem:[#allocation8 + $0x1e40] sm:$0xff]  ;;  %v3558_v38 = vld [vmem:[#allocation8 + $0x1e28] sm:$0xff]  ;;  %v4969_v24 = vpop.eup %4968 }
 0x35f   :  { %4229 = vmatpush2.msra.mxu1 %v3577_v52  ;;  %4153 = vmatprep.subr.mxu0 %v3446_v58  ;;  %v3429_v2 = vld [vmem:[#allocation8 + $0x1a20] sm:$0xff]  ;;  %v2445_v52 = vmul.f32 0.5, %v5701_v14  ;;  %v2462_v58 = vmul.f32 0.5, %v5707_v44 }
 0x360   :  { %4230 = vmatprep.subr.mxu1 %v3574_v8  ;;  %4154 = vmatpush2.msra.mxu0 %v3445_v34  ;;  %v3557_v18 = vld [vmem:[#allocation8 + $0x1e20] sm:$0xff]  ;;  %v3426_v8 = vld [vmem:[#allocation8 + $0x1a08] sm:$0xff] }
 0x361   :  { %4231 = vmatpush2.msra.mxu1 %v3573_v25  ;;  %4155 = vmatprep.subr.mxu0 %v3442_v46  ;;  %v3554_v34 = vld [vmem:[#allocation8 + $0x1e08] sm:$0xff]  ;;  %v2447_v25 = vmul.f32 0.5, %v5704_v37  ;;  %v2464_v46 = vmul.f32 0.5, %v5710_v7  ;;  %v5727_v14 = vmul.f32 %v2541_v39, %v2445_v52  ;;  %v2656_v37 = vld [vmem:[#allocation8 + $0x1f8] sm:$0xff]  ;;  %v2559_v7 = vadd.f32 1.0, %v4969_v24 }
 0x362   :  { %4232 = vmatprep.subr.mxu1 %v3570_v6  ;;  %4156 = vmatpush2.msra.mxu0 %v3441_v55  ;;  %v3425_v6 = vld [vmem:[#allocation8 + $0x1a00] sm:$0xff]  ;;  %v2648_v39 = vld [vmem:[#allocation8 + $0x1b8] sm:$0xff] }
 0x363   :  { %4233 = vmatpush2.msra.mxu1 %v3569_v60  ;;  %4157 = vmatprep.subr.mxu0 %v3438_v59  ;;  %v3553_v55 = vld [vmem:[#allocation8 + $0x1e00] sm:$0xff]  ;;  %v2558_v60 = vadd.f32 1.0, %v4965_v29  ;;  %v2560_v59 = vadd.f32 1.0, %v4967_v47  ;;  %v5729_v44 = vmul.f32 %v2543_v30, %v2447_v25  ;;  %v2652_v29 = vld [vmem:[#allocation8 + $0x1d8] sm:$0xff]  ;;  %v2651_v47 = vld [vmem:[#allocation8 + $0x1d0] sm:$0xff]  ;;  %v5740_v23 = vmul.f32 %v2559_v7, %v2463_v4 }
 0x364   :  { %4234 = vmatprep.subr.mxu1 %v3566_v10  ;;  %4158 = vmatpush2.msra.mxu0 %v3437_v43  ;;  %v4971_v10 = vpop.eup %4970  ;;  %v2784_v43 = vld [vmem:[#allocation8 + $0x5f8] sm:$0xff] }
 0x365   :  { %4235 = vmatpush2.msra.mxu1 %v3565_v13  ;;  %4159 = vmatprep.subr.mxu0 %v3434_v19  ;;  %v2655_v13 = vld [vmem:[#allocation8 + $0x1f0] sm:$0xff]  ;;  %v5735_v19 = vmul.f32 %v2558_v60, %v2462_v58  ;;  %v2557_v0 = vadd.f32 1.0, %v4971_v10  ;;  %v2776_v30 = vld [vmem:[#allocation8 + $0x5b8] sm:$0xff] }
 0x366   :  { %4236 = vmatprep.subr.mxu1 %v3562_v61  ;;  %4160 = vmatpush2.msra.mxu0 %v3433_v5  ;;  %v2783_v61 = vld [vmem:[#allocation8 + $0x5f0] sm:$0xff]  ;;  %v5737_v5 = vmul.f32 %v2560_v59, %v2464_v46  ;;  %v2644_v24 = vld [vmem:[#allocation8 + $0x198] sm:$0xff] }
 0x367   :  { %4237 = vmatpush2.msra.mxu1 %v3561_v56  ;;  %4161 = vmatprep.subr.mxu0 %v3430_v35  ;;  %v2780_v56 = vld [vmem:[#allocation8 + $0x5d8] sm:$0xff]  ;;  %v2779_v35 = vld [vmem:[#allocation8 + $0x5d0] sm:$0xff] }
 0x368   :  { %4238 = vmatprep.subr.mxu1 %v3558_v38  ;;  %4162 = vmatpush2.msra.mxu0 %v3429_v2  ;;  %v5743_v38 = vmul.f32 %v2557_v0, %v2461_v26  ;;  %v2647_v2 = vld [vmem:[#allocation8 + $0x1b0] sm:$0xff]  ;;  %v2772_v52 = vld [vmem:[#allocation8 + $0x598] sm:$0xff] }
 0x369   :  { %4239 = vmatpush2.msra.mxu1 %v3557_v18  ;;  %4163 = vmatprep.subr.mxu0 %v3426_v8  ;;  %v2775_v18 = vld [vmem:[#allocation8 + $0x5b0] sm:$0xff]  ;;  %v2768_v25 = vld [vmem:[#allocation8 + $0x578] sm:$0xff] }
 0x36a   :  { %4240 = vmatprep.subr.mxu1 %v3554_v34  ;;  %4164 = vmatpush2.msra.mxu0 %v3425_v6  ;;  %v2643_v58 = vld [vmem:[#allocation8 + $0x190] sm:$0xff]  ;;  %v2640_v34 = vld [vmem:[#allocation8 + $0x178] sm:$0xff] }
 0x36b   :  { %4241 = vmatpush2.msra.mxu1 %v3553_v55  ;;  %4166 = vmatmul.mubr.f32.vlgmr.msra.gmra.mxu0 %v5727_v14  ;;  %v2771_v8 = vld [vmem:[#allocation8 + $0x590] sm:$0xff]  ;;  %v2636_v55 = vld [vmem:[#allocation8 + $0x158] sm:$0xff] }
 0x36c   :  { %4243 = vmatmul.mubr.f32.vlgmr.msra.gmra.mxu1 %v5729_v44  ;;  %4255 = vmatprep.subr.mxu0 %v2656_v37  ;;  %v2639_v46 = vld [vmem:[#allocation8 + $0x170] sm:$0xff]  ;;  %v2764_v60 = vld [vmem:[#allocation8 + $0x558] sm:$0xff] }
 0x36d   :  { %4332 = vmatprep.subr.mxu1 %v2784_v43  ;;  %4171 = vmatprep.mubr.f32.mxu0 %v5735_v19  ;;  %v2767_v6 = vld [vmem:[#allocation8 + $0x570] sm:$0xff]  ;;  %v2760_v4 = vld [vmem:[#allocation8 + $0x538] sm:$0xff] }
 0x36e   :  { %4256 = vmatpush1.msra.mxu0 %v2655_v13  ;;  %4333 = vmatpush1.msra.mxu1 %v2783_v61  ;;  %v2635_v59 = vld [vmem:[#allocation8 + $0x150] sm:$0xff]  ;;  %v2628_v43 = vld [vmem:[#allocation8 + $0x118] sm:$0xff] }
 0x36f   :  { %4257 = vmatprep.subr.mxu0 %v2652_v29  ;;  %4334 = vmatprep.subr.mxu1 %v2780_v56  ;;  %v2763_v10 = vld [vmem:[#allocation8 + $0x550] sm:$0xff]  ;;  %v2756_v7 = vld [vmem:[#allocation8 + $0x518] sm:$0xff] }
 0x370   :  { %4248 = vmatprep.mubr.f32.mxu1 %v5737_v5  ;;  %4258 = vmatpush1.msra.mxu0 %v2651_v47  ;;  %v2759_v37 = vld [vmem:[#allocation8 + $0x530] sm:$0xff]  ;;  %v2624_v61 = vld [vmem:[#allocation8 + $0xf8] sm:$0xff] }
 0x371   :  { %4335 = vmatpush1.msra.mxu1 %v2779_v35  ;;  %4172 = vmatmul.mubr.f32.gmra.mxu0 %v5743_v38  ;;  %v2627_v13 = vld [vmem:[#allocation8 + $0x110] sm:$0xff]  ;;  %v2752_v29 = vld [vmem:[#allocation8 + $0x4f8] sm:$0xff] }
 0x372   :  { %4249 = vmatmul.mubr.f32.gmra.mxu1 %v5740_v23  ;;  %4259 = vmatprep.subr.mxu0 %v2648_v39  ;;  %v2755_v26 = vld [vmem:[#allocation8 + $0x510] sm:$0xff]  ;;  %v2620_v47 = vld [vmem:[#allocation8 + $0xd8] sm:$0xff] }
 0x373   :  { %4336 = vmatprep.subr.mxu1 %v2776_v30  ;;  %4260 = vmatpush1.msra.mxu0 %v2647_v2  ;;  %v2623_v0 = vld [vmem:[#allocation8 + $0xf0] sm:$0xff]  ;;  %v2748_v35 = vld [vmem:[#allocation8 + $0x4d8] sm:$0xff] }
 0x374   :  { %4319 = vmatprep.mubr.f32.mxu0 %v5437_v63  ;;  %4337 = vmatpush1.msra.mxu1 %v2775_v18  ;;  %v2632_v63 = vld [vmem:[#allocation8 + $0x138] sm:$0xff]  ;;  %v2751_v56 = vld [vmem:[#allocation8 + $0x4f0] sm:$0xff] }
 0x375   :  { %4396 = vmatprep.mubr.f32.mxu1 %v5439_v53  ;;  %4261 = vmatprep.subr.mxu0 %v2644_v24  ;;  %v2631_v53 = vld [vmem:[#allocation8 + $0x130] sm:$0xff]  ;;  %v2616_v2 = vld [vmem:[#allocation8 + $0xb8] sm:$0xff] }
 0x376   :  { %4338 = vmatprep.subr.mxu1 %v2772_v52  ;;  %4262 = vmatpush1.msra.mxu0 %v2643_v58  ;;  %v2619_v39 = vld [vmem:[#allocation8 + $0xd0] sm:$0xff]  ;;  %v2744_v18 = vld [vmem:[#allocation8 + $0x4b8] sm:$0xff] }
 0x377   :  { %4339 = vmatpush1.msra.mxu1 %v2771_v8  ;;  %4263 = vmatprep.subr.mxu0 %v2640_v34  ;;  %v2747_v30 = vld [vmem:[#allocation8 + $0x4d0] sm:$0xff]  ;;  %v2612_v58 = vld [vmem:[#allocation8 + $0x98] sm:$0xff] }
 0x378   :  { %4340 = vmatprep.subr.mxu1 %v2768_v25  ;;  %4264 = vmatpush1.msra.mxu0 %v2639_v46  ;;  %v2615_v24 = vld [vmem:[#allocation8 + $0xb0] sm:$0xff]  ;;  %v2740_v8 = vld [vmem:[#allocation8 + $0x498] sm:$0xff] }
 0x379   :  { %4341 = vmatpush1.msra.mxu1 %v2767_v6  ;;  %4265 = vmatprep.subr.mxu0 %v2636_v55  ;;  %v2743_v52 = vld [vmem:[#allocation8 + $0x4b0] sm:$0xff]  ;;  %v2608_v46 = vld [vmem:[#allocation8 + $0x78] sm:$0xff] }
 0x37a   :  { %4342 = vmatprep.subr.mxu1 %v2764_v60  ;;  %4266 = vmatpush1.msra.mxu0 %v2635_v59  ;;  %v2611_v34 = vld [vmem:[#allocation8 + $0x90] sm:$0xff]  ;;  %v2736_v6 = vld [vmem:[#allocation8 + $0x478] sm:$0xff] }
 0x37b   :  { %4343 = vmatpush1.msra.mxu1 %v2763_v10  ;;  %4267 = vmatprep.subr.mxu0 %v2632_v63  ;;  %v2739_v25 = vld [vmem:[#allocation8 + $0x490] sm:$0xff]  ;;  %v2604_v59 = vld [vmem:[#allocation8 + $0x58] sm:$0xff] }
 0x37c   :  { %4344 = vmatprep.subr.mxu1 %v2760_v4  ;;  %4268 = vmatpush1.msra.mxu0 %v2631_v53  ;;  %v2607_v55 = vld [vmem:[#allocation8 + $0x70] sm:$0xff]  ;;  %v2732_v10 = vld [vmem:[#allocation8 + $0x458] sm:$0xff] }
 0x37d   :  { %4345 = vmatpush1.msra.mxu1 %v2759_v37  ;;  %4269 = vmatprep.subr.mxu0 %v2628_v43  ;;  %v2735_v60 = vld [vmem:[#allocation8 + $0x470] sm:$0xff]  ;;  %v2600_v53 = vld [vmem:[#allocation8 + $0x38] sm:$0xff] }
 0x37e   :  { %4346 = vmatprep.subr.mxu1 %v2756_v7  ;;  %4270 = vmatpush1.msra.mxu0 %v2627_v13  ;;  %v2603_v63 = vld [vmem:[#allocation8 + $0x50] sm:$0xff]  ;;  %v2728_v37 = vld [vmem:[#allocation8 + $0x438] sm:$0xff] }
 0x37f   :  { %4347 = vmatpush1.msra.mxu1 %v2755_v26  ;;  %4271 = vmatprep.subr.mxu0 %v2624_v61  ;;  %v2731_v4 = vld [vmem:[#allocation8 + $0x450] sm:$0xff]  ;;  %v2596_v13 = vld [vmem:[#allocation8 + $0x18] sm:$0xff] }
 0x380   :  { %4348 = vmatprep.subr.mxu1 %v2752_v29  ;;  %4272 = vmatpush1.msra.mxu0 %v2623_v0  ;;  %v2599_v43 = vld [vmem:[#allocation8 + $0x30] sm:$0xff]  ;;  %v2724_v26 = vld [vmem:[#allocation8 + $0x418] sm:$0xff] }
 0x381   :  { %4349 = vmatpush1.msra.mxu1 %v2751_v56  ;;  %4273 = vmatprep.subr.mxu0 %v2620_v47  ;;  %v2727_v7 = vld [vmem:[#allocation8 + $0x430] sm:$0xff]  ;;  %v2720_v0 = vld [vmem:[#allocation8 + $0x3f8] sm:$0xff] }
 0x382   :  { %4350 = vmatprep.subr.mxu1 %v2748_v35  ;;  %4274 = vmatpush1.msra.mxu0 %v2619_v39  ;;  %v2595_v61 = vld [vmem:[#allocation8 + $0x10] sm:$0xff]  ;;  %v2848_v56 = vld [vmem:[#allocation8 + $0x7f8] sm:$0xff] }
 0x383   :  { %4351 = vmatpush1.msra.mxu1 %v2747_v30  ;;  %4275 = vmatprep.subr.mxu0 %v2616_v2  ;;  %v2723_v29 = vld [vmem:[#allocation8 + $0x410] sm:$0xff]  ;;  %v2716_v39 = vld [vmem:[#allocation8 + $0x3d8] sm:$0xff] }
 0x384   :  { %4352 = vmatprep.subr.mxu1 %v2744_v18  ;;  %4276 = vmatpush1.msra.mxu0 %v2615_v24  ;;  %v2719_v47 = vld [vmem:[#allocation8 + $0x3f0] sm:$0xff]  ;;  %v2844_v30 = vld [vmem:[#allocation8 + $0x7d8] sm:$0xff] }
 0x385   :  { %4353 = vmatpush1.msra.mxu1 %v2743_v52  ;;  %4277 = vmatprep.subr.mxu0 %v2612_v58  ;;  %v2847_v35 = vld [vmem:[#allocation8 + $0x7f0] sm:$0xff]  ;;  %v2712_v24 = vld [vmem:[#allocation8 + $0x3b8] sm:$0xff] }
 0x386   :  { %4354 = vmatprep.subr.mxu1 %v2740_v8  ;;  %4278 = vmatpush1.msra.mxu0 %v2611_v34  ;;  %v2715_v2 = vld [vmem:[#allocation8 + $0x3d0] sm:$0xff]  ;;  %v2840_v52 = vld [vmem:[#allocation8 + $0x7b8] sm:$0xff] }
 0x387   :  { %4355 = vmatpush1.msra.mxu1 %v2739_v25  ;;  %4279 = vmatprep.subr.mxu0 %v2608_v46  ;;  %v2843_v18 = vld [vmem:[#allocation8 + $0x7d0] sm:$0xff]  ;;  %v2708_v34 = vld [vmem:[#allocation8 + $0x398] sm:$0xff] }
 0x388   :  { %4356 = vmatprep.subr.mxu1 %v2736_v6  ;;  %4280 = vmatpush1.msra.mxu0 %v2607_v55  ;;  %v2711_v58 = vld [vmem:[#allocation8 + $0x3b0] sm:$0xff]  ;;  %v2836_v25 = vld [vmem:[#allocation8 + $0x798] sm:$0xff] }
 0x389   :  { %4357 = vmatpush1.msra.mxu1 %v2735_v60  ;;  %4281 = vmatprep.subr.mxu0 %v2604_v59  ;;  %v2839_v8 = vld [vmem:[#allocation8 + $0x7b0] sm:$0xff]  ;;  %v2704_v55 = vld [vmem:[#allocation8 + $0x378] sm:$0xff] }
 0x38a   :  { %4358 = vmatprep.subr.mxu1 %v2732_v10  ;;  %4282 = vmatpush1.msra.mxu0 %v2603_v63  ;;  %v2707_v46 = vld [vmem:[#allocation8 + $0x390] sm:$0xff]  ;;  %v2832_v60 = vld [vmem:[#allocation8 + $0x778] sm:$0xff] }
 0x38b   :  { %4359 = vmatpush1.msra.mxu1 %v2731_v4  ;;  %4283 = vmatprep.subr.mxu0 %v2600_v53  ;;  %v2835_v6 = vld [vmem:[#allocation8 + $0x790] sm:$0xff]  ;;  %v2700_v63 = vld [vmem:[#allocation8 + $0x358] sm:$0xff] }
 0x38c   :  { %4360 = vmatprep.subr.mxu1 %v2728_v37  ;;  %4284 = vmatpush1.msra.mxu0 %v2599_v43  ;;  %v2703_v59 = vld [vmem:[#allocation8 + $0x370] sm:$0xff]  ;;  %v2828_v4 = vld [vmem:[#allocation8 + $0x758] sm:$0xff] }
 0x38d   :  { %4361 = vmatpush1.msra.mxu1 %v2727_v7  ;;  %4285 = vmatprep.subr.mxu0 %v2596_v13  ;;  %v2831_v10 = vld [vmem:[#allocation8 + $0x770] sm:$0xff]  ;;  %v2696_v43 = vld [vmem:[#allocation8 + $0x338] sm:$0xff] }
 0x38e   :  { %4362 = vmatprep.subr.mxu1 %v2724_v26  ;;  %4286 = vmatpush1.msra.mxu0 %v2595_v61  ;;  %v2699_v53 = vld [vmem:[#allocation8 + $0x350] sm:$0xff]  ;;  %v2824_v7 = vld [vmem:[#allocation8 + $0x738] sm:$0xff] }
 0x38f   :  { %4363 = vmatpush1.msra.mxu1 %v2723_v29  ;;  %4287 = vmatprep.subr.mxu0 %v2720_v0  ;;  %v2827_v37 = vld [vmem:[#allocation8 + $0x750] sm:$0xff]  ;;  %v2692_v61 = vld [vmem:[#allocation8 + $0x318] sm:$0xff] }
 0x390   :  { %4364 = vmatprep.subr.mxu1 %v2848_v56  ;;  %4288 = vmatpush2.msra.mxu0 %v2719_v47  ;;  %v2695_v13 = vld [vmem:[#allocation8 + $0x330] sm:$0xff]  ;;  %v2820_v29 = vld [vmem:[#allocation8 + $0x718] sm:$0xff] }
 0x391   :  { %4365 = vmatpush2.msra.mxu1 %v2847_v35  ;;  %4289 = vmatprep.subr.mxu0 %v2716_v39  ;;  %v2823_v26 = vld [vmem:[#allocation8 + $0x730] sm:$0xff]  ;;  %v2688_v47 = vld [vmem:[#allocation8 + $0x2f8] sm:$0xff] }
 0x392   :  { %4366 = vmatprep.subr.mxu1 %v2844_v30  ;;  %4290 = vmatpush2.msra.mxu0 %v2715_v2  ;;  %v2691_v0 = vld [vmem:[#allocation8 + $0x310] sm:$0xff]  ;;  %v2816_v35 = vld [vmem:[#allocation8 + $0x6f8] sm:$0xff] }
 0x393   :  { %4367 = vmatpush2.msra.mxu1 %v2843_v18  ;;  %4291 = vmatprep.subr.mxu0 %v2712_v24  ;;  %v2819_v56 = vld [vmem:[#allocation8 + $0x710] sm:$0xff]  ;;  %v2684_v2 = vld [vmem:[#allocation8 + $0x2d8] sm:$0xff] }
 0x394   :  { %4368 = vmatprep.subr.mxu1 %v2840_v52  ;;  %4292 = vmatpush2.msra.mxu0 %v2711_v58  ;;  %v2687_v39 = vld [vmem:[#allocation8 + $0x2f0] sm:$0xff]  ;;  %v2812_v18 = vld [vmem:[#allocation8 + $0x6d8] sm:$0xff] }
 0x395   :  { %4369 = vmatpush2.msra.mxu1 %v2839_v8  ;;  %4293 = vmatprep.subr.mxu0 %v2708_v34  ;;  %v2815_v30 = vld [vmem:[#allocation8 + $0x6f0] sm:$0xff]  ;;  %v2680_v58 = vld [vmem:[#allocation8 + $0x2b8] sm:$0xff] }
 0x396   :  { %4370 = vmatprep.subr.mxu1 %v2836_v25  ;;  %4294 = vmatpush2.msra.mxu0 %v2707_v46  ;;  %v2683_v24 = vld [vmem:[#allocation8 + $0x2d0] sm:$0xff]  ;;  %v2808_v8 = vld [vmem:[#allocation8 + $0x6b8] sm:$0xff] }
 0x397   :  { %4371 = vmatpush2.msra.mxu1 %v2835_v6  ;;  %4295 = vmatprep.subr.mxu0 %v2704_v55  ;;  %v2811_v52 = vld [vmem:[#allocation8 + $0x6d0] sm:$0xff]  ;;  %v2676_v46 = vld [vmem:[#allocation8 + $0x298] sm:$0xff] }
 0x398   :  { %4372 = vmatprep.subr.mxu1 %v2832_v60  ;;  %4296 = vmatpush2.msra.mxu0 %v2703_v59  ;;  %v2679_v34 = vld [vmem:[#allocation8 + $0x2b0] sm:$0xff]  ;;  %v2804_v6 = vld [vmem:[#allocation8 + $0x698] sm:$0xff] }
 0x399   :  { %4373 = vmatpush2.msra.mxu1 %v2831_v10  ;;  %4297 = vmatprep.subr.mxu0 %v2700_v63  ;;  %v2807_v25 = vld [vmem:[#allocation8 + $0x6b0] sm:$0xff]  ;;  %v2672_v59 = vld [vmem:[#allocation8 + $0x278] sm:$0xff] }
 0x39a   :  { %4374 = vmatprep.subr.mxu1 %v2828_v4  ;;  %4298 = vmatpush2.msra.mxu0 %v2699_v53  ;;  %v2675_v55 = vld [vmem:[#allocation8 + $0x290] sm:$0xff]  ;;  %v2800_v10 = vld [vmem:[#allocation8 + $0x678] sm:$0xff] }
 0x39b   :  { %4375 = vmatpush2.msra.mxu1 %v2827_v37  ;;  %4299 = vmatprep.subr.mxu0 %v2696_v43  ;;  %v2803_v60 = vld [vmem:[#allocation8 + $0x690] sm:$0xff]  ;;  %v2668_v53 = vld [vmem:[#allocation8 + $0x258] sm:$0xff] }
 0x39c   :  { %4376 = vmatprep.subr.mxu1 %v2824_v7  ;;  %4300 = vmatpush2.msra.mxu0 %v2695_v13  ;;  %v2671_v63 = vld [vmem:[#allocation8 + $0x270] sm:$0xff]  ;;  %v2796_v37 = vld [vmem:[#allocation8 + $0x658] sm:$0xff] }
 0x39d   :  { %4377 = vmatpush2.msra.mxu1 %v2823_v26  ;;  %4301 = vmatprep.subr.mxu0 %v2692_v61  ;;  %v2799_v4 = vld [vmem:[#allocation8 + $0x670] sm:$0xff]  ;;  %v2664_v13 = vld [vmem:[#allocation8 + $0x238] sm:$0xff] }
 0x39e   :  { %4378 = vmatprep.subr.mxu1 %v2820_v29  ;;  %4302 = vmatpush2.msra.mxu0 %v2691_v0  ;;  %v2667_v43 = vld [vmem:[#allocation8 + $0x250] sm:$0xff]  ;;  %v2792_v26 = vld [vmem:[#allocation8 + $0x638] sm:$0xff] }
 0x39f   :  { %4379 = vmatpush2.msra.mxu1 %v2819_v56  ;;  %4303 = vmatprep.subr.mxu0 %v2688_v47  ;;  %v2795_v7 = vld [vmem:[#allocation8 + $0x650] sm:$0xff]  ;;  %v2660_v0 = vld [vmem:[#allocation8 + $0x218] sm:$0xff] }
 0x3a0   :  { %4380 = vmatprep.subr.mxu1 %v2816_v35  ;;  %4304 = vmatpush2.msra.mxu0 %v2687_v39  ;;  %v2663_v61 = vld [vmem:[#allocation8 + $0x230] sm:$0xff]  ;;  %v2788_v56 = vld [vmem:[#allocation8 + $0x618] sm:$0xff] }
 0x3a1   :  { %4381 = vmatpush2.msra.mxu1 %v2815_v30  ;;  %4305 = vmatprep.subr.mxu0 %v2684_v2  ;;  %v2791_v29 = vld [vmem:[#allocation8 + $0x630] sm:$0xff]  ;;  %v2912_v39 = vld [vmem:[#allocation8 + $0x9f8] sm:$0xff] }
 0x3a2   :  { %4382 = vmatprep.subr.mxu1 %v2812_v18  ;;  %4306 = vmatpush2.msra.mxu0 %v2683_v24  ;;  %v2659_v47 = vld [vmem:[#allocation8 + $0x210] sm:$0xff]  ;;  %v3040_v30 = vld [vmem:[#allocation8 + $0xdf8] sm:$0xff] }
 0x3a3   :  { %4383 = vmatpush2.msra.mxu1 %v2811_v52  ;;  %4307 = vmatprep.subr.mxu0 %v2680_v58  ;;  %v2787_v35 = vld [vmem:[#allocation8 + $0x610] sm:$0xff]  ;;  %v2908_v24 = vld [vmem:[#allocation8 + $0x9d8] sm:$0xff] }
 0x3a4   :  { %4384 = vmatprep.subr.mxu1 %v2808_v8  ;;  %4308 = vmatpush2.msra.mxu0 %v2679_v34  ;;  %v2911_v2 = vld [vmem:[#allocation8 + $0x9f0] sm:$0xff]  ;;  %v3036_v52 = vld [vmem:[#allocation8 + $0xdd8] sm:$0xff] }
 0x3a5   :  { %4385 = vmatpush2.msra.mxu1 %v2807_v25  ;;  %4309 = vmatprep.subr.mxu0 %v2676_v46  ;;  %v3039_v18 = vld [vmem:[#allocation8 + $0xdf0] sm:$0xff]  ;;  %v2904_v34 = vld [vmem:[#allocation8 + $0x9b8] sm:$0xff] }
 0x3a6   :  { %4386 = vmatprep.subr.mxu1 %v2804_v6  ;;  %4310 = vmatpush2.msra.mxu0 %v2675_v55  ;;  %v2907_v58 = vld [vmem:[#allocation8 + $0x9d0] sm:$0xff]  ;;  %v2896_v55 = vld [vmem:[#allocation8 + $0x978] sm:$0xff] }
 0x3a7   :  { %4387 = vmatpush2.msra.mxu1 %v2803_v60  ;;  %4311 = vmatprep.subr.mxu0 %v2672_v59  ;;  %v3035_v8 = vld [vmem:[#allocation8 + $0xdd0] sm:$0xff]  ;;  %v3024_v60 = vld [vmem:[#allocation8 + $0xd78] sm:$0xff] }
 0x3a8   :  { %4388 = vmatprep.subr.mxu1 %v2800_v10  ;;  %4312 = vmatpush2.msra.mxu0 %v2671_v63  ;;  %v3031_v25 = vld [vmem:[#allocation8 + $0xdb0] sm:$0xff]  ;;  %v3020_v10 = vld [vmem:[#allocation8 + $0xd58] sm:$0xff] }
 0x3a9   :  { %4389 = vmatpush2.msra.mxu1 %v2799_v4  ;;  %4313 = vmatprep.subr.mxu0 %v2668_v53  ;;  %v2899_v46 = vld [vmem:[#allocation8 + $0x990] sm:$0xff]  ;;  %v3016_v53 = vld [vmem:[#allocation8 + $0xd38] sm:$0xff] }
 0x3aa   :  { %4390 = vmatprep.subr.mxu1 %v2796_v37  ;;  %4314 = vmatpush2.msra.mxu0 %v2667_v43  ;;  %v3027_v6 = vld [vmem:[#allocation8 + $0xd90] sm:$0xff]  ;;  %v2884_v43 = vld [vmem:[#allocation8 + $0x918] sm:$0xff] }
 0x3ab   :  { %4391 = vmatpush2.msra.mxu1 %v2795_v7  ;;  %4315 = vmatprep.subr.mxu0 %v2664_v13  ;;  %v3023_v59 = vld [vmem:[#allocation8 + $0xd70] sm:$0xff]  ;;  %v3012_v7 = vld [vmem:[#allocation8 + $0xd18] sm:$0xff] }
 0x3ac   :  { %4392 = vmatprep.subr.mxu1 %v2792_v26  ;;  %4316 = vmatpush2.msra.mxu0 %v2663_v61  ;;  %v2891_v63 = vld [vmem:[#allocation8 + $0x950] sm:$0xff]  ;;  %v2880_v61 = vld [vmem:[#allocation8 + $0x8f8] sm:$0xff] }
 0x3ad   :  { %4393 = vmatpush2.msra.mxu1 %v2791_v29  ;;  %4317 = vmatprep.subr.mxu0 %v2660_v0  ;;  %v3019_v4 = vld [vmem:[#allocation8 + $0xd50] sm:$0xff]  ;;  %v3008_v29 = vld [vmem:[#allocation8 + $0xcf8] sm:$0xff] }
 0x3ae   :  { %4394 = vmatprep.subr.mxu1 %v2788_v56  ;;  %4318 = vmatpush2.msra.mxu0 %v2659_v47  ;;  %v3015_v37 = vld [vmem:[#allocation8 + $0xd30] sm:$0xff]  ;;  %v2876_v47 = vld [vmem:[#allocation8 + $0x8d8] sm:$0xff] }
 0x3af   :  { %4395 = vmatpush2.msra.mxu1 %v2787_v35  ;;  %4320 = vmatmul.mubr.f32.vlgmr.msra.gmra.mxu0 %v5505_v32  ;;  %v3032_v32 = vld [vmem:[#allocation8 + $0xdb8] sm:$0xff]  ;;  %v2883_v13 = vld [vmem:[#allocation8 + $0x910] sm:$0xff] }
 0x3b0   :  { %4397 = vmatmul.mubr.f32.vlgmr.msra.gmra.mxu1 %v5507_v22  ;;  %4409 = vmatprep.subr.mxu0 %v2912_v39  ;;  %v2903_v22 = vld [vmem:[#allocation8 + $0x9b0] sm:$0xff]  ;;  %v3004_v35 = vld [vmem:[#allocation8 + $0xcd8] sm:$0xff] }
 0x3b1   :  { %4486 = vmatprep.subr.mxu1 %v3040_v30  ;;  %4325 = vmatprep.mubr.f32.mxu0 %v5513_v21  ;;  %v2900_v21 = vld [vmem:[#allocation8 + $0x998] sm:$0xff]  ;;  %v3011_v26 = vld [vmem:[#allocation8 + $0xd10] sm:$0xff] }
 0x3b2   :  { %4402 = vmatprep.mubr.f32.mxu1 %v5515_v11  ;;  %4410 = vmatpush1.msra.mxu0 %v2911_v2  ;;  %v3028_v11 = vld [vmem:[#allocation8 + $0xd98] sm:$0xff]  ;;  %v2879_v0 = vld [vmem:[#allocation8 + $0x8f0] sm:$0xff] }
 0x3b3   :  { %4487 = vmatpush1.msra.mxu1 %v3039_v18  ;;  %4411 = vmatprep.subr.mxu0 %v2908_v24  ;;  %v3007_v56 = vld [vmem:[#allocation8 + $0xcf0] sm:$0xff]  ;;  %v2872_v2 = vld [vmem:[#allocation8 + $0x8b8] sm:$0xff] }
 0x3b4   :  { %4488 = vmatprep.subr.mxu1 %v3036_v52  ;;  %4412 = vmatpush1.msra.mxu0 %v2907_v58  ;;  %v2875_v39 = vld [vmem:[#allocation8 + $0x8d0] sm:$0xff]  ;;  %v3000_v18 = vld [vmem:[#allocation8 + $0xcb8] sm:$0xff] }
 0x3b5   :  { %4489 = vmatpush1.msra.mxu1 %v3035_v8  ;;  %4326 = vmatmul.mubr.f32.gmra.mxu0 %v5520_v45  ;;  %v2895_v45 = vld [vmem:[#allocation8 + $0x970] sm:$0xff]  ;;  %v2868_v58 = vld [vmem:[#allocation8 + $0x898] sm:$0xff] }
 0x3b6   :  { %4403 = vmatmul.mubr.f32.gmra.mxu1 %v5522_v27  ;;  %4413 = vmatprep.subr.mxu0 %v2904_v34  ;;  %v2892_v27 = vld [vmem:[#allocation8 + $0x958] sm:$0xff]  ;;  %v3003_v30 = vld [vmem:[#allocation8 + $0xcd0] sm:$0xff] }
 0x3b7   :  { %4490 = vmatprep.subr.mxu1 %v3032_v32  ;;  %4414 = vmatpush1.msra.mxu0 %v2903_v22  ;;  %v2871_v24 = vld [vmem:[#allocation8 + $0x8b0] sm:$0xff]  ;;  %v2996_v8 = vld [vmem:[#allocation8 + $0xc98] sm:$0xff] }
 0x3b8   :  { %4473 = vmatprep.mubr.f32.mxu0 %v5527_v42  ;;  %4491 = vmatpush1.msra.mxu1 %v3031_v25  ;;  %v2888_v42 = vld [vmem:[#allocation8 + $0x938] sm:$0xff]  ;;  %v2999_v52 = vld [vmem:[#allocation8 + $0xcb0] sm:$0xff] }
 0x3b9   :  { %4550 = vmatprep.mubr.f32.mxu1 %v5529_v48  ;;  %4415 = vmatprep.subr.mxu0 %v2900_v21  ;;  %v2887_v48 = vld [vmem:[#allocation8 + $0x930] sm:$0xff]  ;;  %v2864_v22 = vld [vmem:[#allocation8 + $0x878] sm:$0xff] }
 0x3ba   :  { %4492 = vmatprep.subr.mxu1 %v3028_v11  ;;  %4416 = vmatpush1.msra.mxu0 %v2899_v46  ;;  %v2867_v34 = vld [vmem:[#allocation8 + $0x890] sm:$0xff]  ;;  %v2992_v25 = vld [vmem:[#allocation8 + $0xc78] sm:$0xff] }
 0x3bb   :  { %4493 = vmatpush1.msra.mxu1 %v3027_v6  ;;  %4417 = vmatprep.subr.mxu0 %v2896_v55  ;;  %v2995_v32 = vld [vmem:[#allocation8 + $0xc90] sm:$0xff]  ;;  %v2860_v46 = vld [vmem:[#allocation8 + $0x858] sm:$0xff] }
 0x3bc   :  { %4494 = vmatprep.subr.mxu1 %v3024_v60  ;;  %4418 = vmatpush1.msra.mxu0 %v2895_v45  ;;  %v2863_v21 = vld [vmem:[#allocation8 + $0x870] sm:$0xff]  ;;  %v2988_v6 = vld [vmem:[#allocation8 + $0xc58] sm:$0xff] }
 0x3bd   :  { %4495 = vmatpush1.msra.mxu1 %v3023_v59  ;;  %4419 = vmatprep.subr.mxu0 %v2892_v27  ;;  %v2991_v11 = vld [vmem:[#allocation8 + $0xc70] sm:$0xff]  ;;  %v2856_v45 = vld [vmem:[#allocation8 + $0x838] sm:$0xff] }
 0x3be   :  { %4496 = vmatprep.subr.mxu1 %v3020_v10  ;;  %4420 = vmatpush1.msra.mxu0 %v2891_v63  ;;  %v2859_v55 = vld [vmem:[#allocation8 + $0x850] sm:$0xff]  ;;  %v2984_v59 = vld [vmem:[#allocation8 + $0xc38] sm:$0xff] }
 0x3bf   :  { %4497 = vmatpush1.msra.mxu1 %v3019_v4  ;;  %4421 = vmatprep.subr.mxu0 %v2888_v42  ;;  %v2987_v60 = vld [vmem:[#allocation8 + $0xc50] sm:$0xff]  ;;  %v2852_v63 = vld [vmem:[#allocation8 + $0x818] sm:$0xff] }
 0x3c0   :  { %4498 = vmatprep.subr.mxu1 %v3016_v53  ;;  %4422 = vmatpush1.msra.mxu0 %v2887_v48  ;;  %v2855_v27 = vld [vmem:[#allocation8 + $0x830] sm:$0xff]  ;;  %v2980_v4 = vld [vmem:[#allocation8 + $0xc18] sm:$0xff] }
 0x3c1   :  { %4499 = vmatpush1.msra.mxu1 %v3015_v37  ;;  %4423 = vmatprep.subr.mxu0 %v2884_v43  ;;  %v2983_v10 = vld [vmem:[#allocation8 + $0xc30] sm:$0xff]  ;;  %v2976_v48 = vld [vmem:[#allocation8 + $0xbf8] sm:$0xff] }
 0x3c2   :  { %4500 = vmatprep.subr.mxu1 %v3012_v7  ;;  %4424 = vmatpush1.msra.mxu0 %v2883_v13  ;;  %v2851_v42 = vld [vmem:[#allocation8 + $0x810] sm:$0xff]  ;;  %v3104_v37 = vld [vmem:[#allocation8 + $0xff8] sm:$0xff] }
 0x3c3   :  { %4501 = vmatpush1.msra.mxu1 %v3011_v26  ;;  %4425 = vmatprep.subr.mxu0 %v2880_v61  ;;  %v2979_v53 = vld [vmem:[#allocation8 + $0xc10] sm:$0xff]  ;;  %v2972_v13 = vld [vmem:[#allocation8 + $0xbd8] sm:$0xff] }
 0x3c4   :  { %4502 = vmatprep.subr.mxu1 %v3008_v29  ;;  %4426 = vmatpush1.msra.mxu0 %v2879_v0  ;;  %v2975_v43 = vld [vmem:[#allocation8 + $0xbf0] sm:$0xff]  ;;  %v3100_v26 = vld [vmem:[#allocation8 + $0xfd8] sm:$0xff] }
 0x3c5   :  { %4503 = vmatpush1.msra.mxu1 %v3007_v56  ;;  %4427 = vmatprep.subr.mxu0 %v2876_v47  ;;  %v3103_v7 = vld [vmem:[#allocation8 + $0xff0] sm:$0xff]  ;;  %v2968_v0 = vld [vmem:[#allocation8 + $0xbb8] sm:$0xff] }
 0x3c6   :  { %4504 = vmatprep.subr.mxu1 %v3004_v35  ;;  %4428 = vmatpush1.msra.mxu0 %v2875_v39  ;;  %v2971_v61 = vld [vmem:[#allocation8 + $0xbd0] sm:$0xff]  ;;  %v3096_v56 = vld [vmem:[#allocation8 + $0xfb8] sm:$0xff] }
 0x3c7   :  { %4505 = vmatpush1.msra.mxu1 %v3003_v30  ;;  %4429 = vmatprep.subr.mxu0 %v2872_v2  ;;  %v3099_v29 = vld [vmem:[#allocation8 + $0xfd0] sm:$0xff]  ;;  %v2964_v39 = vld [vmem:[#allocation8 + $0xb98] sm:$0xff] }
 0x3c8   :  { %4506 = vmatprep.subr.mxu1 %v3000_v18  ;;  %4430 = vmatpush1.msra.mxu0 %v2871_v24  ;;  %v2967_v47 = vld [vmem:[#allocation8 + $0xbb0] sm:$0xff]  ;;  %v3092_v30 = vld [vmem:[#allocation8 + $0xf98] sm:$0xff] }
 0x3c9   :  { %4507 = vmatpush1.msra.mxu1 %v2999_v52  ;;  %4431 = vmatprep.subr.mxu0 %v2868_v58  ;;  %v3095_v35 = vld [vmem:[#allocation8 + $0xfb0] sm:$0xff]  ;;  %v2960_v24 = vld [vmem:[#allocation8 + $0xb78] sm:$0xff] }
 0x3ca   :  { %4508 = vmatprep.subr.mxu1 %v2996_v8  ;;  %4432 = vmatpush1.msra.mxu0 %v2867_v34  ;;  %v2963_v2 = vld [vmem:[#allocation8 + $0xb90] sm:$0xff]  ;;  %v3088_v52 = vld [vmem:[#allocation8 + $0xf78] sm:$0xff] }
 0x3cb   :  { %4509 = vmatpush1.msra.mxu1 %v2995_v32  ;;  %4433 = vmatprep.subr.mxu0 %v2864_v22  ;;  %v3091_v18 = vld [vmem:[#allocation8 + $0xf90] sm:$0xff]  ;;  %v2956_v34 = vld [vmem:[#allocation8 + $0xb58] sm:$0xff] }
 0x3cc   :  { %4510 = vmatprep.subr.mxu1 %v2992_v25  ;;  %4434 = vmatpush1.msra.mxu0 %v2863_v21  ;;  %v2959_v58 = vld [vmem:[#allocation8 + $0xb70] sm:$0xff]  ;;  %v3084_v32 = vld [vmem:[#allocation8 + $0xf58] sm:$0xff] }
 0x3cd   :  { %4511 = vmatpush1.msra.mxu1 %v2991_v11  ;;  %4435 = vmatprep.subr.mxu0 %v2860_v46  ;;  %v3087_v8 = vld [vmem:[#allocation8 + $0xf70] sm:$0xff]  ;;  %v2952_v21 = vld [vmem:[#allocation8 + $0xb38] sm:$0xff] }
 0x3ce   :  { %4512 = vmatprep.subr.mxu1 %v2988_v6  ;;  %4436 = vmatpush1.msra.mxu0 %v2859_v55  ;;  %v2955_v22 = vld [vmem:[#allocation8 + $0xb50] sm:$0xff]  ;;  %v3080_v11 = vld [vmem:[#allocation8 + $0xf38] sm:$0xff] }
 0x3cf   :  { %4513 = vmatpush1.msra.mxu1 %v2987_v60  ;;  %4437 = vmatprep.subr.mxu0 %v2856_v45  ;;  %v3083_v25 = vld [vmem:[#allocation8 + $0xf50] sm:$0xff]  ;;  %v2948_v55 = vld [vmem:[#allocation8 + $0xb18] sm:$0xff] }
 0x3d0   :  { %4514 = vmatprep.subr.mxu1 %v2984_v59  ;;  %4438 = vmatpush1.msra.mxu0 %v2855_v27  ;;  %v2951_v46 = vld [vmem:[#allocation8 + $0xb30] sm:$0xff]  ;;  %v3076_v60 = vld [vmem:[#allocation8 + $0xf18] sm:$0xff] }
 0x3d1   :  { %4515 = vmatpush1.msra.mxu1 %v2983_v10  ;;  %4439 = vmatprep.subr.mxu0 %v2852_v63  ;;  %v3079_v6 = vld [vmem:[#allocation8 + $0xf30] sm:$0xff]  ;;  %v2944_v27 = vld [vmem:[#allocation8 + $0xaf8] sm:$0xff] }
 0x3d2   :  { %4516 = vmatprep.subr.mxu1 %v2980_v4  ;;  %4440 = vmatpush1.msra.mxu0 %v2851_v42  ;;  %v2947_v45 = vld [vmem:[#allocation8 + $0xb10] sm:$0xff]  ;;  %v3072_v10 = vld [vmem:[#allocation8 + $0xef8] sm:$0xff] }
 0x3d3   :  { %4517 = vmatpush1.msra.mxu1 %v2979_v53  ;;  %4441 = vmatprep.subr.mxu0 %v2976_v48  ;;  %v3075_v59 = vld [vmem:[#allocation8 + $0xf10] sm:$0xff]  ;;  %v2940_v42 = vld [vmem:[#allocation8 + $0xad8] sm:$0xff] }
 0x3d4   :  { %4518 = vmatprep.subr.mxu1 %v3104_v37  ;;  %4442 = vmatpush2.msra.mxu0 %v2975_v43  ;;  %v2943_v63 = vld [vmem:[#allocation8 + $0xaf0] sm:$0xff]  ;;  %v3068_v53 = vld [vmem:[#allocation8 + $0xed8] sm:$0xff] }
 0x3d5   :  { %4519 = vmatpush2.msra.mxu1 %v3103_v7  ;;  %4443 = vmatprep.subr.mxu0 %v2972_v13  ;;  %v3071_v4 = vld [vmem:[#allocation8 + $0xef0] sm:$0xff]  ;;  %v2936_v43 = vld [vmem:[#allocation8 + $0xab8] sm:$0xff] }
 0x3d6   :  { %4520 = vmatprep.subr.mxu1 %v3100_v26  ;;  %4444 = vmatpush2.msra.mxu0 %v2971_v61  ;;  %v2939_v48 = vld [vmem:[#allocation8 + $0xad0] sm:$0xff]  ;;  %v3064_v7 = vld [vmem:[#allocation8 + $0xeb8] sm:$0xff] }
 0x3d7   :  { %4521 = vmatpush2.msra.mxu1 %v3099_v29  ;;  %4445 = vmatprep.subr.mxu0 %v2968_v0  ;;  %v3067_v37 = vld [vmem:[#allocation8 + $0xed0] sm:$0xff]  ;;  %v2932_v61 = vld [vmem:[#allocation8 + $0xa98] sm:$0xff] }
 0x3d8   :  { %4522 = vmatprep.subr.mxu1 %v3096_v56  ;;  %4446 = vmatpush2.msra.mxu0 %v2967_v47  ;;  %v2935_v13 = vld [vmem:[#allocation8 + $0xab0] sm:$0xff]  ;;  %v3060_v29 = vld [vmem:[#allocation8 + $0xe98] sm:$0xff] }
 0x3d9   :  { %4523 = vmatpush2.msra.mxu1 %v3095_v35  ;;  %4447 = vmatprep.subr.mxu0 %v2964_v39  ;;  %v3063_v26 = vld [vmem:[#allocation8 + $0xeb0] sm:$0xff]  ;;  %v2928_v47 = vld [vmem:[#allocation8 + $0xa78] sm:$0xff] }
 0x3da   :  { %4524 = vmatprep.subr.mxu1 %v3092_v30  ;;  %4448 = vmatpush2.msra.mxu0 %v2963_v2  ;;  %v2931_v0 = vld [vmem:[#allocation8 + $0xa90] sm:$0xff]  ;;  %v3056_v35 = vld [vmem:[#allocation8 + $0xe78] sm:$0xff] }
 0x3db   :  { %4525 = vmatpush2.msra.mxu1 %v3091_v18  ;;  %4449 = vmatprep.subr.mxu0 %v2960_v24  ;;  %v3059_v56 = vld [vmem:[#allocation8 + $0xe90] sm:$0xff]  ;;  %v2924_v2 = vld [vmem:[#allocation8 + $0xa58] sm:$0xff] }
 0x3dc   :  { %4526 = vmatprep.subr.mxu1 %v3088_v52  ;;  %4450 = vmatpush2.msra.mxu0 %v2959_v58  ;;  %v2927_v39 = vld [vmem:[#allocation8 + $0xa70] sm:$0xff]  ;;  %v3052_v18 = vld [vmem:[#allocation8 + $0xe58] sm:$0xff] }
 0x3dd   :  { %4527 = vmatpush2.msra.mxu1 %v3087_v8  ;;  %4451 = vmatprep.subr.mxu0 %v2956_v34  ;;  %v3055_v30 = vld [vmem:[#allocation8 + $0xe70] sm:$0xff]  ;;  %v2920_v58 = vld [vmem:[#allocation8 + $0xa38] sm:$0xff] }
 0x3de   :  { %4528 = vmatprep.subr.mxu1 %v3084_v32  ;;  %4452 = vmatpush2.msra.mxu0 %v2955_v22  ;;  %v2923_v24 = vld [vmem:[#allocation8 + $0xa50] sm:$0xff]  ;;  %v3048_v8 = vld [vmem:[#allocation8 + $0xe38] sm:$0xff] }
 0x3df   :  { %4529 = vmatpush2.msra.mxu1 %v3083_v25  ;;  %4453 = vmatprep.subr.mxu0 %v2952_v21  ;;  %v3051_v52 = vld [vmem:[#allocation8 + $0xe50] sm:$0xff]  ;;  %v2916_v22 = vld [vmem:[#allocation8 + $0xa18] sm:$0xff] }
 0x3e0   :  { %4530 = vmatprep.subr.mxu1 %v3080_v11  ;;  %4454 = vmatpush2.msra.mxu0 %v2951_v46  ;;  %v2919_v34 = vld [vmem:[#allocation8 + $0xa30] sm:$0xff]  ;;  %v3044_v25 = vld [vmem:[#allocation8 + $0xe18] sm:$0xff] }
 0x3e1   :  { %4531 = vmatpush2.msra.mxu1 %v3079_v6  ;;  %4455 = vmatprep.subr.mxu0 %v2948_v55  ;;  %v3047_v32 = vld [vmem:[#allocation8 + $0xe30] sm:$0xff]  ;;  %v3168_v46 = vld [vmem:[#allocation8 + $0x11f8] sm:$0xff] }
 0x3e2   :  { %4532 = vmatprep.subr.mxu1 %v3076_v60  ;;  %4456 = vmatpush2.msra.mxu0 %v2947_v45  ;;  %v2915_v21 = vld [vmem:[#allocation8 + $0xa10] sm:$0xff]  ;;  %v3296_v6 = vld [vmem:[#allocation8 + $0x15f8] sm:$0xff] }
 0x3e3   :  { %4533 = vmatpush2.msra.mxu1 %v3075_v59  ;;  %4457 = vmatprep.subr.mxu0 %v2944_v27  ;;  %v3043_v11 = vld [vmem:[#allocation8 + $0xe10] sm:$0xff]  ;;  %v3164_v45 = vld [vmem:[#allocation8 + $0x11d8] sm:$0xff] }
 0x3e4   :  { %4534 = vmatprep.subr.mxu1 %v3072_v10  ;;  %4458 = vmatpush2.msra.mxu0 %v2943_v63  ;;  %v3167_v55 = vld [vmem:[#allocation8 + $0x11f0] sm:$0xff]  ;;  %v3292_v59 = vld [vmem:[#allocation8 + $0x15d8] sm:$0xff] }
 0x3e5   :  { %4535 = vmatpush2.msra.mxu1 %v3071_v4  ;;  %4459 = vmatprep.subr.mxu0 %v2940_v42  ;;  %v3295_v60 = vld [vmem:[#allocation8 + $0x15f0] sm:$0xff]  ;;  %v3160_v63 = vld [vmem:[#allocation8 + $0x11b8] sm:$0xff] }
 0x3e6   :  { %4536 = vmatprep.subr.mxu1 %v3068_v53  ;;  %4460 = vmatpush2.msra.mxu0 %v2939_v48  ;;  %v3163_v27 = vld [vmem:[#allocation8 + $0x11d0] sm:$0xff]  ;;  %v3152_v48 = vld [vmem:[#allocation8 + $0x1178] sm:$0xff] }
 0x3e7   :  { %4537 = vmatpush2.msra.mxu1 %v3067_v37  ;;  %4461 = vmatprep.subr.mxu0 %v2936_v43  ;;  %v3291_v10 = vld [vmem:[#allocation8 + $0x15d0] sm:$0xff]  ;;  %v3280_v37 = vld [vmem:[#allocation8 + $0x1578] sm:$0xff] }
 0x3e8   :  { %4538 = vmatprep.subr.mxu1 %v3064_v7  ;;  %4462 = vmatpush2.msra.mxu0 %v2935_v13  ;;  %v3287_v4 = vld [vmem:[#allocation8 + $0x15b0] sm:$0xff]  ;;  %v3276_v7 = vld [vmem:[#allocation8 + $0x1558] sm:$0xff] }
 0x3e9   :  { %4539 = vmatpush2.msra.mxu1 %v3063_v26  ;;  %4463 = vmatprep.subr.mxu0 %v2932_v61  ;;  %v3155_v42 = vld [vmem:[#allocation8 + $0x1190] sm:$0xff]  ;;  %v3272_v61 = vld [vmem:[#allocation8 + $0x1538] sm:$0xff] }
 0x3ea   :  { %4540 = vmatprep.subr.mxu1 %v3060_v29  ;;  %4464 = vmatpush2.msra.mxu0 %v2931_v0  ;;  %v3283_v53 = vld [vmem:[#allocation8 + $0x1590] sm:$0xff]  ;;  %v5765_v29 = vpop.f32.mrf.mxu0 }
 0x3eb   :  { %4541 = vmatpush2.msra.mxu1 %v3059_v56  ;;  %4465 = vmatprep.subr.mxu0 %v2928_v47  ;;  %v3279_v43 = vld [vmem:[#allocation8 + $0x1570] sm:$0xff]  ;;  %v3140_v47 = vld [vmem:[#allocation8 + $0x1118] sm:$0xff] }
 0x3ec   :  { %4542 = vmatprep.subr.mxu1 %v3056_v35  ;;  %4466 = vmatpush2.msra.mxu0 %v2927_v39  ;;  %v3147_v13 = vld [vmem:[#allocation8 + $0x1150] sm:$0xff]  ;;  %v3268_v35 = vld [vmem:[#allocation8 + $0x1518] sm:$0xff] }
 0x3ed   :  { %4543 = vmatpush2.msra.mxu1 %v3055_v30  ;;  %4467 = vmatprep.subr.mxu0 %v2924_v2  ;;  %v3275_v26 = vld [vmem:[#allocation8 + $0x1550] sm:$0xff]  ;;  %v3136_v2 = vld [vmem:[#allocation8 + $0x10f8] sm:$0xff] }
 0x3ee   :  { %4544 = vmatprep.subr.mxu1 %v3052_v18  ;;  %4468 = vmatpush2.msra.mxu0 %v2923_v24  ;;  %v3143_v0 = vld [vmem:[#allocation8 + $0x1130] sm:$0xff]  ;;  %v3264_v18 = vld [vmem:[#allocation8 + $0x14f8] sm:$0xff]  ;;  %v5769_v24 = vpop.f32.mrf.mxu0 }
 0x3ef   :  { %4545 = vmatpush2.msra.mxu1 %v3051_v52  ;;  %4469 = vmatprep.subr.mxu0 %v2920_v58  ;;  %v3271_v56 = vld [vmem:[#allocation8 + $0x1530] sm:$0xff] }
 0x3f0   :  { %4546 = vmatprep.subr.mxu1 %v3048_v8  ;;  %4470 = vmatpush2.msra.mxu0 %v2919_v34  ;;  %v3139_v39 = vld [vmem:[#allocation8 + $0x1110] sm:$0xff]  ;;  %v3132_v34 = vld [vmem:[#allocation8 + $0x10d8] sm:$0xff] }
 0x3f1   :  { %4547 = vmatpush2.msra.mxu1 %v3047_v32  ;;  %4471 = vmatprep.subr.mxu0 %v2916_v22  ;;  %v3267_v30 = vld [vmem:[#allocation8 + $0x1510] sm:$0xff]  ;;  %v3260_v32 = vld [vmem:[#allocation8 + $0x14d8] sm:$0xff] }
 0x3f2   :  { %4548 = vmatprep.subr.mxu1 %v3044_v25  ;;  %4472 = vmatpush2.msra.mxu0 %v2915_v21  ;;  %v3135_v58 = vld [vmem:[#allocation8 + $0x10f0] sm:$0xff]  ;;  %v3128_v21 = vld [vmem:[#allocation8 + $0x10b8] sm:$0xff] }
 0x3f3   :  { %4549 = vmatpush2.msra.mxu1 %v3043_v11  ;;  %4474 = vmatmul.mubr.f32.vlgmr.msra.gmra.mxu0 %v5580_v31  ;;  %v3288_v31 = vld [vmem:[#allocation8 + $0x15b8] sm:$0xff]  ;;  %v3263_v8 = vld [vmem:[#allocation8 + $0x14f0] sm:$0xff] }
 0x3f4   :  { %4551 = vmatmul.mubr.f32.vlgmr.msra.gmra.mxu1 %v5582_v40  ;;  %4563 = vmatprep.subr.mxu0 %v3168_v46  ;;  %v3159_v40 = vld [vmem:[#allocation8 + $0x11b0] sm:$0xff]  ;;  %v3256_v11 = vld [vmem:[#allocation8 + $0x14b8] sm:$0xff]  ;;  %v5773_v46 = vpop.f32.mrf.mxu0 }
 0x3f5   :  { %4640 = vmatprep.subr.mxu1 %v3296_v6  ;;  %4479 = vmatprep.mubr.f32.mxu0 %v5588_v9  ;;  %v3156_v9 = vld [vmem:[#allocation8 + $0x1198] sm:$0xff]  ;;  %v3131_v22 = vld [vmem:[#allocation8 + $0x10d0] sm:$0xff] }
 0x3f6   :  { %4556 = vmatprep.mubr.f32.mxu1 %v5590_v49  ;;  %4564 = vmatpush1.msra.mxu0 %v3167_v55  ;;  %v3284_v49 = vld [vmem:[#allocation8 + $0x1598] sm:$0xff]  ;;  %v3259_v25 = vld [vmem:[#allocation8 + $0x14d0] sm:$0xff] }
 0x3f7   :  { %4641 = vmatpush1.msra.mxu1 %v3295_v60  ;;  %4565 = vmatprep.subr.mxu0 %v3164_v45  ;;  %v3127_v55 = vld [vmem:[#allocation8 + $0x10b0] sm:$0xff]  ;;  %v3124_v45 = vld [vmem:[#allocation8 + $0x1098] sm:$0xff] }
 0x3f8   :  { %4642 = vmatprep.subr.mxu1 %v3292_v59  ;;  %4566 = vmatpush1.msra.mxu0 %v3163_v27  ;;  %v3255_v60 = vld [vmem:[#allocation8 + $0x14b0] sm:$0xff]  ;;  %v3252_v59 = vld [vmem:[#allocation8 + $0x1498] sm:$0xff] }
 0x3f9   :  { %4643 = vmatpush1.msra.mxu1 %v3291_v10  ;;  %4480 = vmatmul.mubr.f32.gmra.mxu0 %v5595_v1  ;;  %v3151_v1 = vld [vmem:[#allocation8 + $0x1170] sm:$0xff] }
 0x3fa   :  { %4557 = vmatmul.mubr.f32.gmra.mxu1 %v5597_v16  ;;  %4567 = vmatprep.subr.mxu0 %v3160_v63  ;;  %v3148_v16 = vld [vmem:[#allocation8 + $0x1158] sm:$0xff]  ;;  %v3123_v27 = vld [vmem:[#allocation8 + $0x1090] sm:$0xff] }
 0x3fb   :  { %4644 = vmatprep.subr.mxu1 %v3288_v31  ;;  %4568 = vmatpush1.msra.mxu0 %v3159_v40  ;;  %v3251_v10 = vld [vmem:[#allocation8 + $0x1490] sm:$0xff]  ;;  %v3120_v63 = vld [vmem:[#allocation8 + $0x1078] sm:$0xff]  ;;  %v5777_v40 = vpop.f32.mrf.mxu0 }
 0x3fc   :  { %4627 = vmatprep.mubr.f32.mxu0 %v5602_v57  ;;  %4645 = vmatpush1.msra.mxu1 %v3287_v4  ;;  %v3144_v57 = vld [vmem:[#allocation8 + $0x1138] sm:$0xff] }
 0x3fd   :  { %4704 = vmatprep.mubr.f32.mxu1 %v5604_v54  ;;  %4569 = vmatprep.subr.mxu0 %v3156_v9  ;;  %v5767_v54 = vpop.f32.mrf.mxu1  ;;  %v3248_v31 = vld [vmem:[#allocation8 + $0x1478] sm:$0xff]  ;;  %v3119_v9 = vld [vmem:[#allocation8 + $0x1070] sm:$0xff] }
 0x3fe   :  { %4646 = vmatprep.subr.mxu1 %v3284_v49  ;;  %4570 = vmatpush1.msra.mxu0 %v3155_v42  ;;  %v3247_v49 = vld [vmem:[#allocation8 + $0x1470] sm:$0xff]  ;;  %v3116_v42 = vld [vmem:[#allocation8 + $0x1058] sm:$0xff] }
 0x3ff   :  { %4647 = vmatpush1.msra.mxu1 %v3283_v53  ;;  %4571 = vmatprep.subr.mxu0 %v3152_v48  ;;  %v5771_v52 = vpop.f32.mrf.mxu1  ;;  %v3244_v53 = vld [vmem:[#allocation8 + $0x1458] sm:$0xff]  ;;  %v5781_v48 = vpop.f32.mrf.mxu0 }
 0x400   :  { %4648 = vmatprep.subr.mxu1 %v3280_v37  ;;  %4572 = vmatpush1.msra.mxu0 %v3151_v1  ;;  %v3115_v1 = vld [vmem:[#allocation8 + $0x1050] sm:$0xff] }
 0x401   :  { %4649 = vmatpush1.msra.mxu1 %v3279_v43  ;;  %4573 = vmatprep.subr.mxu0 %v3148_v16  ;;  %v5775_v6 = vpop.f32.mrf.mxu1  ;;  %v3243_v43 = vld [vmem:[#allocation8 + $0x1450] sm:$0xff]  ;;  %v3112_v16 = vld [vmem:[#allocation8 + $0x1038] sm:$0xff] }
 0x402   :  { %4650 = vmatprep.subr.mxu1 %v3276_v7  ;;  %4574 = vmatpush1.msra.mxu0 %v3147_v13  ;;  %v3240_v7 = vld [vmem:[#allocation8 + $0x1438] sm:$0xff]  ;;  %v3111_v13 = vld [vmem:[#allocation8 + $0x1030] sm:$0xff] }
 0x403   :  { %4651 = vmatpush1.msra.mxu1 %v3275_v26  ;;  %4575 = vmatprep.subr.mxu0 %v3144_v57  ;;  %v5779_v4 = vpop.f32.mrf.mxu1  ;;  %v3239_v26 = vld [vmem:[#allocation8 + $0x1430] sm:$0xff]  ;;  %v3108_v57 = vld [vmem:[#allocation8 + $0x1018] sm:$0xff] }
 0x404   :  { %4652 = vmatprep.subr.mxu1 %v3272_v61  ;;  %4576 = vmatpush1.msra.mxu0 %v3143_v0  ;;  %v3236_v61 = vld [vmem:[#allocation8 + $0x1418] sm:$0xff]  ;;  %v5785_v0 = vld [vmem:[#allocation10] sm:$0xf] }
 0x405   :  { %4653 = vmatpush1.msra.mxu1 %v3271_v56  ;;  %4577 = vmatprep.subr.mxu0 %v3140_v47  ;;  %v5783_v37 = vpop.f32.mrf.mxu1  ;;  %v5787_v56 = vpop.f32.mrf.mxu0 }
 0x406   :  { %4654 = vmatprep.subr.mxu1 %v3268_v35  ;;  %4578 = vmatpush1.msra.mxu0 %v3139_v39  ;;  %v3107_v35 = vld [vmem:[#allocation8 + $0x1010] sm:$0xff] }
 0x407   :  { %4655 = vmatpush1.msra.mxu1 %v3267_v30  ;;  %4579 = vmatprep.subr.mxu0 %v3136_v2  ;;  %v5789_v47 = vpop.f32.mrf.mxu1  ;;  %v3235_v39 = vld [vmem:[#allocation8 + $0x1410] sm:$0xff]  ;;  %v3232_v30 = vld [vmem:[#allocation8 + $0x13f8] sm:$0xff] }
 0x408   :  { %4656 = vmatprep.subr.mxu1 %v3264_v18  ;;  %4580 = vmatpush1.msra.mxu0 %v3135_v58  ;;  %v3360_v2 = vld [vmem:[#allocation8 + $0x17f8] sm:$0xff]  ;;  %v3231_v18 = vld [vmem:[#allocation8 + $0x13f0] sm:$0xff] }
 0x409   :  { %4657 = vmatpush1.msra.mxu1 %v3263_v8  ;;  %4581 = vmatprep.subr.mxu0 %v3132_v34  ;;  %v3359_v58 = vld [vmem:[#allocation8 + $0x17f0] sm:$0xff]  ;;  %v3622_v8 = vrot.slane %v5785_v0, %v5248_v3  ;;  %v3228_v34 = vld [vmem:[#allocation8 + $0x13d8] sm:$0xff] }
 0x40a   :  { %4658 = vmatprep.subr.mxu1 %v3260_v32  ;;  %4582 = vmatpush1.msra.mxu0 %v3131_v22  ;;  %v3356_v32 = vld [vmem:[#allocation8 + $0x17d8] sm:$0xff]  ;;  %v5793_v22 = vpop.f32.mrf.mxu0  ;;  %v3223_v3 = vld [vmem:[#allocation8 + $0x13b0] sm:$0xff] }
 0x40b   :  { %4659 = vmatpush1.msra.mxu1 %v3259_v25  ;;  %4583 = vmatprep.subr.mxu0 %v3128_v21  ;;  %v5795_v25 = vpop.f32.mrf.mxu1  ;;  %v3227_v21 = vld [vmem:[#allocation8 + $0x13d0] sm:$0xff] }
 0x40c   :  { %4660 = vmatprep.subr.mxu1 %v3256_v11  ;;  %4584 = vmatpush1.msra.mxu0 %v3127_v55  ;;  %v3355_v11 = vld [vmem:[#allocation8 + $0x17d0] sm:$0xff]  ;;  %v3626_v55 = vrot.slane %v5785_v0, %v5264_v51 }
 0x40d   :  { %4661 = vmatpush1.msra.mxu1 %v3255_v60  ;;  %4585 = vmatprep.subr.mxu0 %v3124_v45  ;;  %v3224_v60 = vld [vmem:[#allocation8 + $0x13b8] sm:$0xff]  ;;  %v3219_v51 = vld [vmem:[#allocation8 + $0x1390] sm:$0xff] }
 0x40e   :  { %4662 = vmatprep.subr.mxu1 %v3252_v59  ;;  %4586 = vmatpush1.msra.mxu0 %v3123_v27  ;;  %v3352_v45 = vld [vmem:[#allocation8 + $0x17b8] sm:$0xff]  ;;  %v3351_v59 = vld [vmem:[#allocation8 + $0x17b0] sm:$0xff]  ;;  %v3706_v27 = vadd.f32 %v5765_v29, %v3622_v8 }
 0x40f   :  { %4663 = vmatpush1.msra.mxu1 %v3251_v10  ;;  %4587 = vmatprep.subr.mxu0 %v3120_v63  ;;  %v3220_v10 = vld [vmem:[#allocation8 + $0x1398] sm:$0xff] }
 0x410   :  { %4664 = vmatprep.subr.mxu1 %v3248_v31  ;;  %4588 = vmatpush1.msra.mxu0 %v3119_v9  ;;  %v3348_v63 = vld [vmem:[#allocation8 + $0x1798] sm:$0xff]  ;;  %v5800_v31 = vpop.f32.mrf.mxu0  ;;  %v5802_v9 = vpop.f32.mrf.mxu1 }
 0x411   :  { %4665 = vmatpush1.msra.mxu1 %v3247_v49  ;;  %4589 = vmatprep.subr.mxu0 %v3116_v42  ;;  %v3347_v49 = vld [vmem:[#allocation8 + $0x1790] sm:$0xff]  ;;  %v3708_v42 = vadd.f32 %v5769_v24, %v3626_v55 }
 0x412   :  { %4666 = vmatprep.subr.mxu1 %v3244_v53  ;;  %4590 = vmatpush1.msra.mxu0 %v3115_v1  ;;  %v3216_v53 = vld [vmem:[#allocation8 + $0x1378] sm:$0xff]  ;;  %v5805_v29 = vpop.f32.mrf.mxu1  ;;  %v3211_v24 = vld [vmem:[#allocation8 + $0x1350] sm:$0xff] }
 0x413   :  { %4667 = vmatpush1.msra.mxu1 %v3243_v43  ;;  %4591 = vmatprep.subr.mxu0 %v3112_v16  ;;  %v3344_v1 = vld [vmem:[#allocation8 + $0x1778] sm:$0xff]  ;;  %v4013_v43 = vpop.f32.mrf.mxu0  ;;  %v3215_v16 = vld [vmem:[#allocation8 + $0x1370] sm:$0xff] }
 0x414   :  { %4668 = vmatprep.subr.mxu1 %v3240_v7  ;;  %4592 = vmatpush1.msra.mxu0 %v3111_v13  ;;  %v3343_v7 = vld [vmem:[#allocation8 + $0x1770] sm:$0xff]  ;;  %v3783_v13 = vadd.f32 %v5767_v54, %v3706_v27  ;;  %v3714_v54 = vadd.f32 %v5777_v40, %v3626_v55  ;;  %v3200_v55 = vld [vmem:[#allocation8 + $0x12f8] sm:$0xff] }
 0x415   :  { %4669 = vmatpush1.msra.mxu1 %v3239_v26  ;;  %4593 = vmatprep.subr.mxu0 %v3108_v57  ;;  %v3212_v26 = vld [vmem:[#allocation8 + $0x1358] sm:$0xff]  ;;  %v3199_v27 = vld [vmem:[#allocation8 + $0x12f0] sm:$0xff] }
 0x416   :  { %4670 = vmatprep.subr.mxu1 %v3236_v61  ;;  %4594 = vmatpush1.msra.mxu0 %v3107_v35  ;;  %v3340_v57 = vld [vmem:[#allocation8 + $0x1758] sm:$0xff]  ;;  %v3339_v61 = vld [vmem:[#allocation8 + $0x1750] sm:$0xff]  ;;  %v3785_v35 = vadd.f32 %v5771_v52, %v3708_v42 }
 0x417   :  { %4671 = vmatpush1.msra.mxu1 %v3235_v39  ;;  %4595 = vmatprep.subr.mxu0 %v3232_v30  ;;  %v3712_v39 = vadd.f32 %v5773_v46, %v3622_v8  ;;  %v3860_v30 = vadd.f32 %v5781_v48, %v3783_v13  ;;  %v3204_v52 = vld [vmem:[#allocation8 + $0x1318] sm:$0xff]  ;;  %v3203_v48 = vld [vmem:[#allocation8 + $0x1310] sm:$0xff] }
 0x418   :  { %4672 = vmatprep.subr.mxu1 %v3360_v2  ;;  %4596 = vmatpush2.msra.mxu0 %v3231_v18  ;;  %v3208_v2 = vld [vmem:[#allocation8 + $0x1338] sm:$0xff]  ;;  %v3331_v8 = vld [vmem:[#allocation8 + $0x1710] sm:$0xff] }
 0x419   :  { %4673 = vmatpush2.msra.mxu1 %v3359_v58  ;;  %4597 = vmatprep.subr.mxu0 %v3228_v34  ;;  %v3336_v18 = vld [vmem:[#allocation8 + $0x1738] sm:$0xff]  ;;  %v4015_v58 = vpop.f32.mrf.mxu0  ;;  %v5812_v34 = vpop.f32.mrf.mxu1  ;;  %v3937_v40 = vadd.f32 %v5783_v37, %v3860_v30 }
 0x41a   :  { %4674 = vmatprep.subr.mxu1 %v3356_v32  ;;  %4598 = vmatpush2.msra.mxu0 %v3227_v21  ;;  %v3207_v32 = vld [vmem:[#allocation8 + $0x1330] sm:$0xff]  ;;  %v3332_v46 = vld [vmem:[#allocation8 + $0x1718] sm:$0xff] }
 0x41b   :  { %4675 = vmatpush2.msra.mxu1 %v3355_v11  ;;  %4599 = vmatprep.subr.mxu0 %v3224_v60  ;;  %v3335_v21 = vld [vmem:[#allocation8 + $0x1730] sm:$0xff]  ;;  %v3862_v11 = vadd.f32 %v5787_v56, %v3785_v35  ;;  %v3789_v60 = vadd.f32 %v5775_v6, %v3712_v39  ;;  %v5818_v56 = vpop.f32.mrf.mxu1  ;;  %v4014_v6 = vadd.f32 %v4013_v43, %v3937_v40  ;;  %v3196_v37 = vld [vmem:[#allocation8 + $0x12d8] sm:$0xff] }
 0x41c   :  { %4676 = vmatprep.subr.mxu1 %v3352_v45  ;;  %4600 = vmatpush2.msra.mxu0 %v3223_v3  ;;  %v3328_v45 = vld [vmem:[#allocation8 + $0x16f8] sm:$0xff]  ;;  %v3791_v3 = vadd.f32 %v5779_v4, %v3714_v54  ;;  %v3195_v4 = vld [vmem:[#allocation8 + $0x12d0] sm:$0xff] }
 0x41d   :  { %4677 = vmatpush2.msra.mxu1 %v3351_v59  ;;  %4601 = vmatprep.subr.mxu0 %v3220_v10  ;;  %v4019_v59 = vpop.f32.mrf.mxu0  ;;  %v3327_v10 = vld [vmem:[#allocation8 + $0x16f0] sm:$0xff] }
 0x41e   :  { %4678 = vmatprep.subr.mxu1 %v3348_v63  ;;  %4602 = vmatpush2.msra.mxu0 %v3219_v51  ;;  %v3939_v63 = vadd.f32 %v5789_v47, %v3862_v11  ;;  %v3866_v51 = vadd.f32 %v5793_v22, %v3789_v60  ;;  %v3868_v42 = vadd.f32 %v5800_v31, %v3791_v3  ;;  %v4098_v47 = vpop.f32.mrf.mxu1  ;;  %v3191_v22 = vld [vmem:[#allocation8 + $0x12b0] sm:$0xff]  ;;  %v3188_v31 = vld [vmem:[#allocation8 + $0x1298] sm:$0xff] }
 0x41f   :  { %4679 = vmatpush2.msra.mxu1 %v3347_v49  ;;  %4603 = vmatprep.subr.mxu0 %v3216_v53  ;;  %v3324_v49 = vld [vmem:[#allocation8 + $0x16d8] sm:$0xff]  ;;  %v3323_v53 = vld [vmem:[#allocation8 + $0x16d0] sm:$0xff]  ;;  %v4021_v13 = vpop.f32.mrf.mxu0 }
 0x420   :  { %4680 = vmatprep.subr.mxu1 %v3344_v1  ;;  %4604 = vmatpush2.msra.mxu0 %v3215_v16  ;;  %v4016_v1 = vadd.f32 %v4015_v58, %v3939_v63  ;;  %v3192_v16 = vld [vmem:[#allocation8 + $0x12b8] sm:$0xff]  ;;  %v3319_v43 = vld [vmem:[#allocation8 + $0x16b0] sm:$0xff] }
 0x421   :  { %4681 = vmatpush2.msra.mxu1 %v3343_v7  ;;  %4605 = vmatprep.subr.mxu0 %v3212_v26  ;;  %v3320_v7 = vld [vmem:[#allocation8 + $0x16b8] sm:$0xff]  ;;  %v3943_v26 = vadd.f32 %v5795_v25, %v3866_v51  ;;  %v3187_v35 = vld [vmem:[#allocation8 + $0x1290] sm:$0xff] }
 0x422   :  { %4682 = vmatprep.subr.mxu1 %v3340_v57  ;;  %4606 = vmatpush2.msra.mxu0 %v3211_v24  ;;  %v4091_v57 = vadd.f32 %v5805_v29, %v4014_v6  ;;  %v3316_v24 = vld [vmem:[#allocation8 + $0x1698] sm:$0xff]  ;;  %v3315_v39 = vld [vmem:[#allocation8 + $0x1690] sm:$0xff] }
 0x423   :  { %4683 = vmatpush2.msra.mxu1 %v3339_v61  ;;  %4607 = vmatprep.subr.mxu0 %v3208_v2  ;;  %v3945_v61 = vadd.f32 %v5802_v9, %v3868_v42  ;;  %v4020_v54 = vadd.f32 %v4019_v59, %v3943_v26  ;;  %v3184_v25 = vld [vmem:[#allocation8 + $0x1278] sm:$0xff]  ;;  %v3307_v40 = vld [vmem:[#allocation8 + $0x1650] sm:$0xff] }
 0x424   :  { %4684 = vmatprep.subr.mxu1 %v3336_v18  ;;  %4608 = vmatpush2.msra.mxu0 %v3207_v32  ;;  %v4093_v18 = vadd.f32 %v5812_v34, %v4016_v1  ;;  %v3312_v58 = vld [vmem:[#allocation8 + $0x1678] sm:$0xff]  ;;  %v3183_v32 = vld [vmem:[#allocation8 + $0x1270] sm:$0xff] }
 0x425   :  { %4685 = vmatpush2.msra.mxu1 %v3335_v21  ;;  %4609 = vmatprep.subr.mxu0 %v3204_v52  ;;  %v3311_v21 = vld [vmem:[#allocation8 + $0x1670] sm:$0xff]  ;;  %v4022_v52 = vadd.f32 %v4021_v13, %v3945_v61  ;;  %v3304_v3 = vld [vmem:[#allocation8 + $0x1638] sm:$0xff] }
 0x426   :  { %4686 = vmatprep.subr.mxu1 %v3332_v46  ;;  %4610 = vmatpush2.msra.mxu0 %v3203_v48  ;;  %v3180_v46 = vld [vmem:[#allocation8 + $0x1258] sm:$0xff]  ;;  %v3179_v34 = vld [vmem:[#allocation8 + $0x1250] sm:$0xff] }
 0x427   :  { %4687 = vmatpush2.msra.mxu1 %v3331_v8  ;;  %4611 = vmatprep.subr.mxu0 %v3200_v55  ;;  %v3308_v48 = vld [vmem:[#allocation8 + $0x1658] sm:$0xff]  ;;  %v4097_v55 = vadd.f32 %v5818_v56, %v4020_v54  ;;  %v4099_v6 = vadd.f32 %v4098_v47, %v4022_v52  ;;  %v3171_v56 = vld [vmem:[#allocation8 + $0x1210] sm:$0xff] }
 0x428   :  { %4688 = vmatprep.subr.mxu1 %v3328_v45  ;;  %4612 = vmatpush2.msra.mxu0 %v3199_v27  ;;  %v3176_v45 = vld [vmem:[#allocation8 + $0x1238] sm:$0xff]  ;;  %v3175_v27 = vld [vmem:[#allocation8 + $0x1230] sm:$0xff] }
 0x429   :  { %4689 = vmatpush2.msra.mxu1 %v3327_v10  ;;  %4613 = vmatprep.subr.mxu0 %v3196_v37  ;;  %v3303_v10 = vld [vmem:[#allocation8 + $0x1630] sm:$0xff]  ;;  %v3172_v37 = vld [vmem:[#allocation8 + $0x1218] sm:$0xff] }
 0x42a   :  { %4690 = vmatprep.subr.mxu1 %v3324_v49  ;;  %4614 = vmatpush2.msra.mxu0 %v3195_v4  ;;  %v3300_v49 = vld [vmem:[#allocation8 + $0x1618] sm:$0xff]  ;;  %v3299_v4 = vld [vmem:[#allocation8 + $0x1610] sm:$0xff] }
 0x42b   :  { %4691 = vmatpush2.msra.mxu1 %v3323_v53  ;;  %4615 = vmatprep.subr.mxu0 %v3192_v16  ;;  %v4167_v30 = vpop.f32.mrf.mxu0  ;;  %v3552_v13 = vld [vmem:[#allocation8 + $0x1df8] sm:$0xff]  ;;  %v3551_v26 = vld [vmem:[#allocation8 + $0x1df0] sm:$0xff] }
 0x42c   :  { %4692 = vmatprep.subr.mxu1 %v3320_v7  ;;  %v4244_v2 = vpop.f32.mrf.mxu1  ;;  %4616 = vmatpush2.msra.mxu0 %v3191_v22  ;;  %v4168_v29 = vadd.f32 %v4167_v30, %v4091_v57  ;;  %v3424_v7 = vld [vmem:[#allocation8 + $0x19f8] sm:$0xff]  ;;  %v3547_v61 = vld [vmem:[#allocation8 + $0x1dd0] sm:$0xff] }
 0x42d   :  { %4693 = vmatpush2.msra.mxu1 %v3319_v43  ;;  %4617 = vmatprep.subr.mxu0 %v3188_v31  ;;  %v4169_v11 = vpop.f32.mrf.mxu0  ;;  %v3423_v43 = vld [vmem:[#allocation8 + $0x19f0] sm:$0xff]  ;;  %v3420_v57 = vld [vmem:[#allocation8 + $0x19d8] sm:$0xff] }
 0x42e   :  { %4694 = vmatprep.subr.mxu1 %v3316_v24  ;;  %v4246_v9 = vpop.f32.mrf.mxu1  ;;  %4618 = vmatpush2.msra.mxu0 %v3187_v35  ;;  %v4245_v8 = vadd.f32 %v4244_v2, %v4168_v29  ;;  %v4170_v60 = vadd.f32 %v4169_v11, %v4093_v18  ;;  %v3548_v31 = vld [vmem:[#allocation8 + $0x1dd8] sm:$0xff]  ;;  %v3419_v24 = vld [vmem:[#allocation8 + $0x19d0] sm:$0xff] }
 0x42f   :  { %4695 = vmatpush2.msra.mxu1 %v3315_v39  ;;  %4619 = vmatprep.subr.mxu0 %v3184_v25  ;;  %v3544_v35 = vld [vmem:[#allocation8 + $0x1db8] sm:$0xff]  ;;  %v3543_v39 = vld [vmem:[#allocation8 + $0x1db0] sm:$0xff] }
 0x430   :  { %4696 = vmatprep.subr.mxu1 %v3312_v58  ;;  %4620 = vmatpush2.msra.mxu0 %v3183_v32  ;;  %4871 = vst [vmem:[#allocation11] sm:$0xff] %v4245_v8  ;;  %v4247_v59 = vadd.f32 %v4246_v9, %v4170_v60  ;;  %v3411_v30 = vld [vmem:[#allocation8 + $0x1990] sm:$0xff]  ;;  %v3408_v18 = vld [vmem:[#allocation8 + $0x1978] sm:$0xff] }
 0x431   :  { %4697 = vmatpush2.msra.mxu1 %v3311_v21  ;;  %4621 = vmatprep.subr.mxu0 %v3180_v46  ;;  %v4173_v63 = vpop.f32.mrf.mxu0  ;;  %v3539_v2 = vld [vmem:[#allocation8 + $0x1d90] sm:$0xff]  ;;  %v3536_v54 = vld [vmem:[#allocation8 + $0x1d78] sm:$0xff] }
 0x432   :  { %4698 = vmatprep.subr.mxu1 %v3308_v48  ;;  %v4250_v51 = vpop.f32.mrf.mxu1  ;;  %4622 = vmatpush2.msra.mxu0 %v3179_v34  ;;  %4872 = vst [vmem:[#allocation11 + $0x8] sm:$0xff] %v4247_v59  ;;  %v4174_v42 = vadd.f32 %v4173_v63, %v4097_v55  ;;  %v3535_v25 = vld [vmem:[#allocation8 + $0x1d70] sm:$0xff]  ;;  %v3532_v58 = vld [vmem:[#allocation8 + $0x1d58] sm:$0xff] }
 0x433   :  { %4699 = vmatpush2.msra.mxu1 %v3307_v40  ;;  %4623 = vmatprep.subr.mxu0 %v3176_v45  ;;  %v4175_v53 = vpop.f32.mrf.mxu0  ;;  %v3403_v29 = vld [vmem:[#allocation8 + $0x1950] sm:$0xff]  ;;  %v3528_v21 = vld [vmem:[#allocation8 + $0x1d38] sm:$0xff] }
 0x434   :  { %4700 = vmatprep.subr.mxu1 %v3304_v3  ;;  %4624 = vmatpush2.msra.mxu0 %v3175_v27  ;;  %v4251_v1 = vadd.f32 %v4250_v51, %v4174_v42  ;;  %v4176_v16 = vadd.f32 %v4175_v53, %v4099_v6  ;;  %v4252_v47 = vpop.f32.mrf.mxu1  ;;  %v3531_v32 = vld [vmem:[#allocation8 + $0x1d50] sm:$0xff]  ;;  %v3396_v9 = vld [vmem:[#allocation8 + $0x1918] sm:$0xff] }
 0x435   :  { %4701 = vmatpush2.msra.mxu1 %v3303_v10  ;;  %4625 = vmatprep.subr.mxu0 %v3172_v37  ;;  %v3527_v11 = vld [vmem:[#allocation8 + $0x1d30] sm:$0xff]  ;;  %v3524_v52 = vld [vmem:[#allocation8 + $0x1d18] sm:$0xff] }
 0x436   :  { %4702 = vmatprep.subr.mxu1 %v3300_v49  ;;  %4626 = vmatpush2.msra.mxu0 %v3171_v56  ;;  %4875 = vst [vmem:[#allocation11 + $0x20] sm:$0xff] %v4251_v1  ;;  %v4253_v22 = vadd.f32 %v4252_v47, %v4176_v16  ;;  %v3395_v46 = vld [vmem:[#allocation8 + $0x1910] sm:$0xff]  ;;  %v3392_v8 = vld [vmem:[#allocation8 + $0x18f8] sm:$0xff] }
 0x437   :  { %4703 = vmatpush2.msra.mxu1 %v3299_v4  ;;  %4628 = vmatmul.mubr.f32.vlgmr.msra.gmra.mxu0 %v5660_v28  ;;  %v3416_v28 = vld [vmem:[#allocation8 + $0x19b8] sm:$0xff]  ;;  %v3523_v48 = vld [vmem:[#allocation8 + $0x1d10] sm:$0xff] }
 0x438   :  { %4705 = vmatmul.mubr.f32.vlgmr.msra.gmra.mxu1 %v5662_v50  ;;  %4717 = vmatprep.subr.mxu0 %v3424_v7  ;;  %4876 = vst [vmem:[#allocation11 + $0x28] sm:$0xff] %v4253_v22  ;;  %v3415_v50 = vld [vmem:[#allocation8 + $0x19b0] sm:$0xff]  ;;  %v3520_v60 = vld [vmem:[#allocation8 + $0x1cf8] sm:$0xff] }
 0x439   :  { %4794 = vmatprep.subr.mxu1 %v3552_v13  ;;  %4633 = vmatprep.mubr.f32.mxu0 %v5670_v15  ;;  %v3412_v15 = vld [vmem:[#allocation8 + $0x1998] sm:$0xff]  ;;  %v3391_v34 = vld [vmem:[#allocation8 + $0x18f0] sm:$0xff] }
 0x43a   :  { %4710 = vmatprep.mubr.f32.mxu1 %v5672_v41  ;;  %4718 = vmatpush1.msra.mxu0 %v3423_v43  ;;  %v3540_v41 = vld [vmem:[#allocation8 + $0x1d98] sm:$0xff]  ;;  %v3519_v40 = vld [vmem:[#allocation8 + $0x1cf0] sm:$0xff] }
 0x43b   :  { %4795 = vmatpush1.msra.mxu1 %v3551_v26  ;;  %4719 = vmatprep.subr.mxu0 %v3420_v57  ;;  %v3388_v55 = vld [vmem:[#allocation8 + $0x18d8] sm:$0xff]  ;;  %v3387_v3 = vld [vmem:[#allocation8 + $0x18d0] sm:$0xff] }
 0x43c   :  { %4796 = vmatprep.subr.mxu1 %v3548_v31  ;;  %4720 = vmatpush1.msra.mxu0 %v3419_v24  ;;  %v3516_v45 = vld [vmem:[#allocation8 + $0x1cd8] sm:$0xff]  ;;  %v3515_v59 = vld [vmem:[#allocation8 + $0x1cd0] sm:$0xff] }
 0x43d   :  { %4797 = vmatpush1.msra.mxu1 %v3547_v61  ;;  %4634 = vmatmul.mubr.f32.gmra.mxu0 %v5678_v17  ;;  %v3407_v17 = vld [vmem:[#allocation8 + $0x1970] sm:$0xff]  ;;  %v3384_v27 = vld [vmem:[#allocation8 + $0x18b8] sm:$0xff] }
 0x43e   :  { %4711 = vmatmul.mubr.f32.gmra.mxu1 %v5680_v33  ;;  %4721 = vmatprep.subr.mxu0 %v3416_v28  ;;  %v3404_v33 = vld [vmem:[#allocation8 + $0x1958] sm:$0xff]  ;;  %v3383_v63 = vld [vmem:[#allocation8 + $0x18b0] sm:$0xff] }
 0x43f   :  { %4798 = vmatprep.subr.mxu1 %v3544_v35  ;;  %4722 = vmatpush1.msra.mxu0 %v3415_v50  ;;  %v3512_v10 = vld [vmem:[#allocation8 + $0x1cb8] sm:$0xff]  ;;  %v3511_v51 = vld [vmem:[#allocation8 + $0x1cb0] sm:$0xff] }
 0x440   :  { %4781 = vmatprep.mubr.f32.mxu0 %v5684_v12  ;;  %4799 = vmatpush1.msra.mxu1 %v3543_v39  ;;  %v3400_v12 = vld [vmem:[#allocation8 + $0x1938] sm:$0xff]  ;;  %v3379_v49 = vld [vmem:[#allocation8 + $0x1890] sm:$0xff] }
 0x441   :  { %4858 = vmatprep.mubr.f32.mxu1 %v5688_v20  ;;  %4723 = vmatprep.subr.mxu0 %v3412_v15  ;;  %v3399_v20 = vld [vmem:[#allocation8 + $0x1930] sm:$0xff]  ;;  %v3380_v6 = vld [vmem:[#allocation8 + $0x1898] sm:$0xff] }
 0x442   :  { %4800 = vmatprep.subr.mxu1 %v3540_v41  ;;  %4724 = vmatpush1.msra.mxu0 %v3411_v30  ;;  %v3508_v37 = vld [vmem:[#allocation8 + $0x1c98] sm:$0xff]  ;;  %v3507_v42 = vld [vmem:[#allocation8 + $0x1c90] sm:$0xff] }
 0x443   :  { %4801 = vmatpush1.msra.mxu1 %v3539_v2  ;;  %4725 = vmatprep.subr.mxu0 %v3408_v18  ;;  %v3376_v56 = vld [vmem:[#allocation8 + $0x1878] sm:$0xff]  ;;  %v3375_v53 = vld [vmem:[#allocation8 + $0x1870] sm:$0xff] }
 0x444   :  { %4802 = vmatprep.subr.mxu1 %v3536_v54  ;;  %4726 = vmatpush1.msra.mxu0 %v3407_v17  ;;  %v3504_v4 = vld [vmem:[#allocation8 + $0x1c78] sm:$0xff]  ;;  %v3503_v1 = vld [vmem:[#allocation8 + $0x1c70] sm:$0xff] }
 0x445   :  { %4803 = vmatpush1.msra.mxu1 %v3535_v25  ;;  %4727 = vmatprep.subr.mxu0 %v3404_v33  ;;  %v3372_v16 = vld [vmem:[#allocation8 + $0x1858] sm:$0xff]  ;;  %v3371_v13 = vld [vmem:[#allocation8 + $0x1850] sm:$0xff] }
 0x446   :  { %4804 = vmatprep.subr.mxu1 %v3532_v58  ;;  %4728 = vmatpush1.msra.mxu0 %v3403_v29  ;;  %v3500_v7 = vld [vmem:[#allocation8 + $0x1c58] sm:$0xff]  ;;  %v3499_v47 = vld [vmem:[#allocation8 + $0x1c50] sm:$0xff] }
 0x447   :  { %4805 = vmatpush1.msra.mxu1 %v3531_v32  ;;  %4729 = vmatprep.subr.mxu0 %v3400_v12  ;;  %v3368_v22 = vld [vmem:[#allocation8 + $0x1838] sm:$0xff]  ;;  %v3367_v26 = vld [vmem:[#allocation8 + $0x1830] sm:$0xff] }
 0x448   :  { %4806 = vmatprep.subr.mxu1 %v3528_v21  ;;  %4730 = vmatpush1.msra.mxu0 %v3399_v20  ;;  %v3496_v43 = vld [vmem:[#allocation8 + $0x1c38] sm:$0xff]  ;;  %v3495_v57 = vld [vmem:[#allocation8 + $0x1c30] sm:$0xff] }
 0x449   :  { %4807 = vmatpush1.msra.mxu1 %v3527_v11  ;;  %4731 = vmatprep.subr.mxu0 %v3396_v9  ;;  %v3364_v31 = vld [vmem:[#allocation8 + $0x1818] sm:$0xff]  ;;  %v3363_v61 = vld [vmem:[#allocation8 + $0x1810] sm:$0xff] }
 0x44a   :  { %4808 = vmatprep.subr.mxu1 %v3524_v52  ;;  %4732 = vmatpush1.msra.mxu0 %v3395_v46  ;;  %v3492_v24 = vld [vmem:[#allocation8 + $0x1c18] sm:$0xff]  ;;  %v3491_v28 = vld [vmem:[#allocation8 + $0x1c10] sm:$0xff] }
 0x44b   :  { %4809 = vmatpush1.msra.mxu1 %v3523_v48  ;;  %4733 = vmatprep.subr.mxu0 %v3392_v8  ;;  %v3488_v35 = vld [vmem:[#allocation8 + $0x1bf8] sm:$0xff]  ;;  %v3487_v39 = vld [vmem:[#allocation8 + $0x1bf0] sm:$0xff] }
 0x44c   :  { %4810 = vmatprep.subr.mxu1 %v3520_v60  ;;  %4734 = vmatpush1.msra.mxu0 %v3391_v34  ;;  %v3616_v50 = vld [vmem:[#allocation8 + $0x1ff8] sm:$0xff]  ;;  %v3615_v15 = vld [vmem:[#allocation8 + $0x1ff0] sm:$0xff] }
 0x44d   :  { %4811 = vmatpush1.msra.mxu1 %v3519_v40  ;;  %4735 = vmatprep.subr.mxu0 %v3388_v55  ;;  %v3484_v41 = vld [vmem:[#allocation8 + $0x1bd8] sm:$0xff]  ;;  %v3483_v2 = vld [vmem:[#allocation8 + $0x1bd0] sm:$0xff] }
 0x44e   :  { %4812 = vmatprep.subr.mxu1 %v3516_v45  ;;  %4736 = vmatpush1.msra.mxu0 %v3387_v3  ;;  %v3612_v30 = vld [vmem:[#allocation8 + $0x1fd8] sm:$0xff]  ;;  %v3611_v18 = vld [vmem:[#allocation8 + $0x1fd0] sm:$0xff] }
 0x44f   :  { %4813 = vmatpush1.msra.mxu1 %v3515_v59  ;;  %4737 = vmatprep.subr.mxu0 %v3384_v27  ;;  %v3480_v54 = vld [vmem:[#allocation8 + $0x1bb8] sm:$0xff]  ;;  %v3479_v25 = vld [vmem:[#allocation8 + $0x1bb0] sm:$0xff] }
 0x450   :  { %4814 = vmatprep.subr.mxu1 %v3512_v10  ;;  %4738 = vmatpush1.msra.mxu0 %v3383_v63  ;;  %v3608_v17 = vld [vmem:[#allocation8 + $0x1fb8] sm:$0xff]  ;;  %v3607_v33 = vld [vmem:[#allocation8 + $0x1fb0] sm:$0xff] }
 0x451   :  { %4815 = vmatpush1.msra.mxu1 %v3511_v51  ;;  %4739 = vmatprep.subr.mxu0 %v3380_v6  ;;  %v3476_v58 = vld [vmem:[#allocation8 + $0x1b98] sm:$0xff]  ;;  %v3475_v32 = vld [vmem:[#allocation8 + $0x1b90] sm:$0xff] }
 0x452   :  { %4816 = vmatprep.subr.mxu1 %v3508_v37  ;;  %4740 = vmatpush1.msra.mxu0 %v3379_v49  ;;  %v3604_v29 = vld [vmem:[#allocation8 + $0x1f98] sm:$0xff]  ;;  %v3603_v12 = vld [vmem:[#allocation8 + $0x1f90] sm:$0xff] }
 0x453   :  { %4817 = vmatpush1.msra.mxu1 %v3507_v42  ;;  %4741 = vmatprep.subr.mxu0 %v3376_v56  ;;  %v3472_v21 = vld [vmem:[#allocation8 + $0x1b78] sm:$0xff]  ;;  %v3471_v11 = vld [vmem:[#allocation8 + $0x1b70] sm:$0xff] }
 0x454   :  { %4818 = vmatprep.subr.mxu1 %v3504_v4  ;;  %4742 = vmatpush1.msra.mxu0 %v3375_v53  ;;  %v3600_v20 = vld [vmem:[#allocation8 + $0x1f78] sm:$0xff]  ;;  %v3599_v9 = vld [vmem:[#allocation8 + $0x1f70] sm:$0xff] }
 0x455   :  { %4819 = vmatpush1.msra.mxu1 %v3503_v1  ;;  %4743 = vmatprep.subr.mxu0 %v3372_v16  ;;  %v3468_v52 = vld [vmem:[#allocation8 + $0x1b58] sm:$0xff]  ;;  %v3467_v48 = vld [vmem:[#allocation8 + $0x1b50] sm:$0xff] }
 0x456   :  { %4820 = vmatprep.subr.mxu1 %v3500_v7  ;;  %4744 = vmatpush1.msra.mxu0 %v3371_v13  ;;  %v3596_v46 = vld [vmem:[#allocation8 + $0x1f58] sm:$0xff]  ;;  %v3595_v8 = vld [vmem:[#allocation8 + $0x1f50] sm:$0xff] }
 0x457   :  { %4821 = vmatpush1.msra.mxu1 %v3499_v47  ;;  %4745 = vmatprep.subr.mxu0 %v3368_v22  ;;  %v3464_v60 = vld [vmem:[#allocation8 + $0x1b38] sm:$0xff]  ;;  %v3463_v40 = vld [vmem:[#allocation8 + $0x1b30] sm:$0xff] }
 0x458   :  { %4822 = vmatprep.subr.mxu1 %v3496_v43  ;;  %4746 = vmatpush1.msra.mxu0 %v3367_v26  ;;  %v3592_v34 = vld [vmem:[#allocation8 + $0x1f38] sm:$0xff]  ;;  %v3591_v55 = vld [vmem:[#allocation8 + $0x1f30] sm:$0xff] }
 0x459   :  { %4823 = vmatpush1.msra.mxu1 %v3495_v57  ;;  %4747 = vmatprep.subr.mxu0 %v3364_v31  ;;  %v3460_v45 = vld [vmem:[#allocation8 + $0x1b18] sm:$0xff]  ;;  %v3459_v59 = vld [vmem:[#allocation8 + $0x1b10] sm:$0xff] }
 0x45a   :  { %4824 = vmatprep.subr.mxu1 %v3492_v24  ;;  %4748 = vmatpush1.msra.mxu0 %v3363_v61  ;;  %v3588_v3 = vld [vmem:[#allocation8 + $0x1f18] sm:$0xff]  ;;  %v3587_v27 = vld [vmem:[#allocation8 + $0x1f10] sm:$0xff] }
 0x45b   :  { %4825 = vmatpush1.msra.mxu1 %v3491_v28  ;;  %4749 = vmatprep.subr.mxu0 %v3488_v35  ;;  %v3456_v10 = vld [vmem:[#allocation8 + $0x1af8] sm:$0xff]  ;;  %v3455_v51 = vld [vmem:[#allocation8 + $0x1af0] sm:$0xff] }
 0x45c   :  { %4826 = vmatprep.subr.mxu1 %v3616_v50  ;;  %4750 = vmatpush2.msra.mxu0 %v3487_v39  ;;  %v3584_v63 = vld [vmem:[#allocation8 + $0x1ef8] sm:$0xff]  ;;  %v3583_v6 = vld [vmem:[#allocation8 + $0x1ef0] sm:$0xff] }
 0x45d   :  { %4827 = vmatpush2.msra.mxu1 %v3615_v15  ;;  %4751 = vmatprep.subr.mxu0 %v3484_v41  ;;  %v3452_v37 = vld [vmem:[#allocation8 + $0x1ad8] sm:$0xff]  ;;  %v3451_v42 = vld [vmem:[#allocation8 + $0x1ad0] sm:$0xff] }
 0x45e   :  { %4828 = vmatprep.subr.mxu1 %v3612_v30  ;;  %4752 = vmatpush2.msra.mxu0 %v3483_v2  ;;  %v3580_v49 = vld [vmem:[#allocation8 + $0x1ed8] sm:$0xff]  ;;  %v3579_v56 = vld [vmem:[#allocation8 + $0x1ed0] sm:$0xff] }
 0x45f   :  { %4829 = vmatpush2.msra.mxu1 %v3611_v18  ;;  %4753 = vmatprep.subr.mxu0 %v3480_v54  ;;  %v3448_v4 = vld [vmem:[#allocation8 + $0x1ab8] sm:$0xff]  ;;  %v3447_v1 = vld [vmem:[#allocation8 + $0x1ab0] sm:$0xff] }
 0x460   :  { %4830 = vmatprep.subr.mxu1 %v3608_v17  ;;  %4754 = vmatpush2.msra.mxu0 %v3479_v25  ;;  %v3576_v53 = vld [vmem:[#allocation8 + $0x1eb8] sm:$0xff]  ;;  %v3575_v16 = vld [vmem:[#allocation8 + $0x1eb0] sm:$0xff] }
 0x461   :  { %4831 = vmatpush2.msra.mxu1 %v3607_v33  ;;  %4755 = vmatprep.subr.mxu0 %v3476_v58  ;;  %v3444_v7 = vld [vmem:[#allocation8 + $0x1a98] sm:$0xff]  ;;  %v3443_v47 = vld [vmem:[#allocation8 + $0x1a90] sm:$0xff] }
 0x462   :  { %4832 = vmatprep.subr.mxu1 %v3604_v29  ;;  %4756 = vmatpush2.msra.mxu0 %v3475_v32  ;;  %v3572_v13 = vld [vmem:[#allocation8 + $0x1e98] sm:$0xff]  ;;  %v3571_v22 = vld [vmem:[#allocation8 + $0x1e90] sm:$0xff] }
 0x463   :  { %4833 = vmatpush2.msra.mxu1 %v3603_v12  ;;  %4757 = vmatprep.subr.mxu0 %v3472_v21  ;;  %v3440_v43 = vld [vmem:[#allocation8 + $0x1a78] sm:$0xff]  ;;  %v3439_v57 = vld [vmem:[#allocation8 + $0x1a70] sm:$0xff] }
 0x464   :  { %4834 = vmatprep.subr.mxu1 %v3600_v20  ;;  %4758 = vmatpush2.msra.mxu0 %v3471_v11  ;;  %v3568_v26 = vld [vmem:[#allocation8 + $0x1e78] sm:$0xff]  ;;  %v3567_v31 = vld [vmem:[#allocation8 + $0x1e70] sm:$0xff] }
 0x465   :  { %4835 = vmatpush2.msra.mxu1 %v3599_v9  ;;  %4759 = vmatprep.subr.mxu0 %v3468_v52  ;;  %v3436_v24 = vld [vmem:[#allocation8 + $0x1a58] sm:$0xff]  ;;  %v3435_v28 = vld [vmem:[#allocation8 + $0x1a50] sm:$0xff] }
 0x466   :  { %4836 = vmatprep.subr.mxu1 %v3596_v46  ;;  %4760 = vmatpush2.msra.mxu0 %v3467_v48  ;;  %v3564_v61 = vld [vmem:[#allocation8 + $0x1e58] sm:$0xff]  ;;  %v3563_v35 = vld [vmem:[#allocation8 + $0x1e50] sm:$0xff] }
 0x467   :  { %4837 = vmatpush2.msra.mxu1 %v3595_v8  ;;  %4761 = vmatprep.subr.mxu0 %v3464_v60  ;;  %v3432_v50 = vld [vmem:[#allocation8 + $0x1a38] sm:$0xff]  ;;  %v3431_v15 = vld [vmem:[#allocation8 + $0x1a30] sm:$0xff] }
 0x468   :  { %4838 = vmatprep.subr.mxu1 %v3592_v34  ;;  %4762 = vmatpush2.msra.mxu0 %v3463_v40  ;;  %v3560_v39 = vld [vmem:[#allocation8 + $0x1e38] sm:$0xff]  ;;  %v3559_v41 = vld [vmem:[#allocation8 + $0x1e30] sm:$0xff] }
 0x469   :  { %4839 = vmatpush2.msra.mxu1 %v3591_v55  ;;  %4763 = vmatprep.subr.mxu0 %v3460_v45  ;;  %v3428_v30 = vld [vmem:[#allocation8 + $0x1a18] sm:$0xff]  ;;  %v3427_v18 = vld [vmem:[#allocation8 + $0x1a10] sm:$0xff] }
 0x46a   :  { %4840 = vmatprep.subr.mxu1 %v3588_v3  ;;  %4764 = vmatpush2.msra.mxu0 %v3459_v59  ;;  %v3556_v2 = vld [vmem:[#allocation8 + $0x1e18] sm:$0xff]  ;;  %v3555_v54 = vld [vmem:[#allocation8 + $0x1e10] sm:$0xff] }
 0x46b   :  { %4841 = vmatpush2.msra.mxu1 %v3587_v27  ;;  %4765 = vmatprep.subr.mxu0 %v3456_v10 }
 0x46c   :  { %4842 = vmatprep.subr.mxu1 %v3584_v63  ;;  %4766 = vmatpush2.msra.mxu0 %v3455_v51 }
 0x46d   :  { %4843 = vmatpush2.msra.mxu1 %v3583_v6  ;;  %4767 = vmatprep.subr.mxu0 %v3452_v37 }
 0x46e   :  { %4844 = vmatprep.subr.mxu1 %v3580_v49  ;;  %4768 = vmatpush2.msra.mxu0 %v3451_v42 }
 0x46f   :  { %4845 = vmatpush2.msra.mxu1 %v3579_v56  ;;  %4769 = vmatprep.subr.mxu0 %v3448_v4  ;;  %v4321_v17 = vpop.f32.mrf.mxu0 }
 0x470   :  { %4846 = vmatprep.subr.mxu1 %v3576_v53  ;;  %4770 = vmatpush2.msra.mxu0 %v3447_v1  ;;  %v4398_v25 = vpop.f32.mrf.mxu1 }
 0x471   :  { %4847 = vmatpush2.msra.mxu1 %v3575_v16  ;;  %4771 = vmatprep.subr.mxu0 %v3444_v7  ;;  %v4323_v33 = vpop.f32.mrf.mxu0 }
 0x472   :  { %4848 = vmatprep.subr.mxu1 %v3572_v13  ;;  %4772 = vmatpush2.msra.mxu0 %v3443_v47  ;;  %v4400_v58 = vpop.f32.mrf.mxu1 }
 0x473   :  { %4849 = vmatpush2.msra.mxu1 %v3571_v22  ;;  %4773 = vmatprep.subr.mxu0 %v3440_v43 }
 0x474   :  { %4850 = vmatprep.subr.mxu1 %v3568_v26  ;;  %4774 = vmatpush2.msra.mxu0 %v3439_v57 }
 0x475   :  { %4851 = vmatpush2.msra.mxu1 %v3567_v31  ;;  %4775 = vmatprep.subr.mxu0 %v3436_v24  ;;  %v4327_v29 = vpop.f32.mrf.mxu0 }
 0x476   :  { %4852 = vmatprep.subr.mxu1 %v3564_v61  ;;  %4776 = vmatpush2.msra.mxu0 %v3435_v28  ;;  %v4404_v32 = vpop.f32.mrf.mxu1 }
 0x477   :  { %4853 = vmatpush2.msra.mxu1 %v3563_v35  ;;  %4777 = vmatprep.subr.mxu0 %v3432_v50  ;;  %v4329_v12 = vpop.f32.mrf.mxu0 }
 0x478   :  { %4854 = vmatprep.subr.mxu1 %v3560_v39  ;;  %4778 = vmatpush2.msra.mxu0 %v3431_v15  ;;  %v4406_v21 = vpop.f32.mrf.mxu1 }
 0x479   :  { %4855 = vmatpush2.msra.mxu1 %v3559_v41  ;;  %4779 = vmatprep.subr.mxu0 %v3428_v30 }
 0x47a   :  { %4856 = vmatprep.subr.mxu1 %v3556_v2  ;;  %4780 = vmatpush2.msra.mxu0 %v3427_v18 }
 0x47b   :  { %4857 = vmatpush2.msra.mxu1 %v3555_v54  ;;  %4782 = vmatmul.mubr.f32.vlgmr.msra.gmra.mxu0 %v5727_v14 }
 0x47c   :  { %4859 = vmatmul.mubr.f32.vlgmr.msra.gmra.mxu1 %v5729_v44  ;;  %4787 = vmatprep.mubr.f32.mxu0 %v5735_v19  ;;  %v3630_v19 = vrot.slane %v5785_v0, %v5444_v36 }
 0x47d   :  { %4864 = vmatprep.mubr.f32.mxu1 %v5737_v5 }
 0x47e   :  { %v4328_v40 = vadd.f32 %v4327_v29, %v3630_v19 }
 0x47f   :  { %4788 = vmatmul.mubr.f32.gmra.mxu0 %v5743_v38  ;;  %v4322_v38 = vadd.f32 %v4321_v17, %v3630_v19 }
 0x480   :  { %4865 = vmatmul.mubr.f32.gmra.mxu1 %v5740_v23  ;;  %v3634_v23 = vrot.slane %v5785_v0, %v5372_v62  ;;  %v4405_v10 = vadd.f32 %v4404_v32, %v4328_v40 }
 0x481   :  { %v4399_v34 = vadd.f32 %v4398_v25, %v4322_v38 }
 0x482   :  { %v4324_v48 = vadd.f32 %v4323_v33, %v3634_v23  ;;  %v4330_v45 = vadd.f32 %v4329_v12, %v3634_v23 }
 0x484   :  { %v4401_v55 = vadd.f32 %v4400_v58, %v4324_v48  ;;  %v4407_v63 = vadd.f32 %v4406_v21, %v4330_v45 }
 0x4b3   :  { %v4475_v20 = vpop.f32.mrf.mxu0 }
 0x4b4   :  { %v4552_v14 = vpop.f32.mrf.mxu1  ;;  %v4476_v3 = vadd.f32 %v4475_v20, %v4399_v34 }
 0x4b5   :  { %v4477_v11 = vpop.f32.mrf.mxu0 }
 0x4b6   :  { %v4554_v44 = vpop.f32.mrf.mxu1  ;;  %v4478_v36 = vadd.f32 %v4477_v11, %v4401_v55  ;;  %v4553_v51 = vadd.f32 %v4552_v14, %v4476_v3 }
 0x4b8   :  { %v4555_v0 = vadd.f32 %v4554_v44, %v4478_v36 }
 0x4b9   :  { %v4481_v5 = vpop.f32.mrf.mxu0 }
 0x4ba   :  { %v4558_v9 = vpop.f32.mrf.mxu1  ;;  %v4482_v6 = vadd.f32 %v4481_v5, %v4405_v10 }
 0x4bb   :  { %v4483_v52 = vpop.f32.mrf.mxu0 }
 0x4bc   :  { %v4560_v46 = vpop.f32.mrf.mxu1  ;;  %v4484_v49 = vadd.f32 %v4483_v52, %v4407_v63  ;;  %v4559_v56 = vadd.f32 %v4558_v9, %v4482_v6 }
 0x4be   :  { %v4561_v16 = vadd.f32 %v4560_v46, %v4484_v49 }
 0x4f7   :  { %v4629_v8 = vpop.f32.mrf.mxu0 }
 0x4f8   :  { %v4706_v60 = vpop.f32.mrf.mxu1  ;;  %v4630_v42 = vadd.f32 %v4629_v8, %v4553_v51 }
 0x4f9   :  { %v4631_v59 = vpop.f32.mrf.mxu0 }
 0x4fa   :  { %v4708_v27 = vpop.f32.mrf.mxu1  ;;  %v4632_v4 = vadd.f32 %v4631_v59, %v4555_v0  ;;  %v4707_v7 = vadd.f32 %v4706_v60, %v4630_v42 }
 0x4fc   :  { %v4709_v43 = vadd.f32 %v4708_v27, %v4632_v4 }
 0x4fd   :  { %v4635_v37 = vpop.f32.mrf.mxu0 }
 0x4fe   :  { %v4712_v62 = vpop.f32.mrf.mxu1  ;;  %v4636_v13 = vadd.f32 %v4635_v37, %v4559_v56 }
 0x4ff   :  { %v4637_v53 = vpop.f32.mrf.mxu0 }
 0x500   :  { %v4714_v1 = vpop.f32.mrf.mxu1  ;;  %v4638_v26 = vadd.f32 %v4637_v53, %v4561_v16  ;;  %v4713_v61 = vadd.f32 %v4712_v62, %v4636_v13 }
 0x502   :  { %v4715_v15 = vadd.f32 %v4714_v1, %v4638_v26 }
 0x53b   :  { %v4783_v47 = vpop.f32.mrf.mxu0 }
 0x53c   :  { %v4860_v22 = vpop.f32.mrf.mxu1  ;;  %v4784_v57 = vadd.f32 %v4783_v47, %v4707_v7 }
 0x53d   :  { %v4785_v31 = vpop.f32.mrf.mxu0 }
 0x53e   :  { %v4862_v24 = vpop.f32.mrf.mxu1  ;;  %v4861_v28 = vadd.f32 %v4860_v22, %v4784_v57  ;;  %v4786_v35 = vadd.f32 %v4785_v31, %v4709_v43 }
 0x53f   :  { %v4789_v50 = vpop.f32.mrf.mxu0 }
 0x540   :  { %v4866_v39 = vpop.f32.mrf.mxu1  ;;  %4873 = vst [vmem:[#allocation11 + $0x10] sm:$0xff] %v4861_v28  ;;  %v4863_v41 = vadd.f32 %v4862_v24, %v4786_v35  ;;  %v4790_v30 = vadd.f32 %v4789_v50, %v4713_v61 }
 0x541   :  { %v4791_v2 = vpop.f32.mrf.mxu0 }
 0x542   :  { %4874 = vst [vmem:[#allocation11 + $0x18] sm:$0xff] %v4863_v41  ;;  %v4867_v18 = vadd.f32 %v4866_v39, %v4790_v30  ;;  %v4792_v54 = vadd.f32 %v4791_v2, %v4715_v15  ;;  %v4868_v17 = vpop.f32.mrf.mxu1 }
 0x544   :  { %4877 = vst [vmem:[#allocation11 + $0x30] sm:$0xff] %v4867_v18  ;;  %v4869_v25 = vadd.f32 %v4868_v17, %v4792_v54 }
 0x546   :  { %4878 = vst [vmem:[#allocation11 + $0x38] sm:$0xff] %v4869_v25 }
 0x547   :  { %5111 = shalt.err (!%p5108_p1)
}
 0x548   :  { %4890 = dma.vmem_to_hbm [thread:$0]  %s4885_s4, 1024, %s5857_s5, [#allocation4], %s5133_s30, %s5133_s30, %s5134_s6  }
 0x549   :  { %5126 = dma.done.wait [#allocation4], 1024  }
 0x54a   :  { %5127 = vsyncadd [#allocation4], 4294966272 }
 0x54b   :  { %4894 = vsyncpa [#allocation3], 1 }
 0x54c   :  { %4895 = vsyncpa [#allocation6], 1 }
 0x54d   :  { %4896 = vsyncpa [#allocation9], 1 }
 0x54e   :  { %4897 = vsyncpa [#allocation4], 1 }

</bundles_post_ra>
